<compile_context>
chip_gen: v5e
topology: v5e:2x2
jax: 0.10.0
libtpu: 0.0.40
codegen_flags: <defaults>
</compile_context>

<pallas_src>
import functools

import numpy as np
import jax
import jax.numpy as jnp
from jax import lax
from jax.experimental import pallas as pl
from jax.experimental.pallas import tpu as pltpu

NEG_SLOPE = 0.2
IN_EPS = 1e-5


# ----------------------------------------------------------------------------
# Pallas kernels
# ----------------------------------------------------------------------------
def _conv_mm_kernel(x_ref, w_ref, b_ref, o_ref, *, inorm):
    """(Cout,K) @ (K,S) conv-as-matmul + bias [+ InstanceNorm] + LeakyReLU.

    Channels live on sublanes, flattened spatial on lanes (multiple of 128),
    so the store is lane-dense and the f32 accumulator stays in-register.
    """
    acc = jnp.dot(w_ref[...], x_ref[0],
                  preferred_element_type=jnp.float32) + b_ref[...]
    if inorm:
        # InstanceNorm2d: per-sample, per-channel stats over spatial,
        # biased variance, eps=1e-5, no affine (training-mode statistics;
        # running-stat updates are not tracked in this forward-only port).
        mu = jnp.mean(acc, axis=1, keepdims=True)
        var = jnp.mean(jnp.square(acc - mu), axis=1, keepdims=True)
        acc = (acc - mu) * lax.rsqrt(var + IN_EPS)
    acc = jnp.where(acc >= 0.0, acc, NEG_SLOPE * acc)
    o_ref[...] = acc.reshape(o_ref.shape).astype(o_ref.dtype)


def conv_in_lrelu(x_im2col, w, b, *, inorm, s_chunk=None):
    """x_im2col: (N, K, S) bf16; w: (Cout, K) bf16; b: (Cout, 1) f32.

    Returns (N, Cout, S) bf16.  When inorm=False the spatial axis may be
    chunked on the grid (better pipelining, smaller live accumulators)."""
    n, k, s = x_im2col.shape
    cout = w.shape[0]
    kern = functools.partial(_conv_mm_kernel, inorm=inorm)
    if inorm or s_chunk is None or s_chunk >= s:
        grid = (n,)
        in_specs = [pl.BlockSpec((1, k, s), lambda i: (i, 0, 0)),
                    pl.BlockSpec((cout, k), lambda i: (0, 0)),
                    pl.BlockSpec((cout, 1), lambda i: (0, 0))]
        out_specs = pl.BlockSpec((1, cout, s), lambda i: (i, 0, 0))
        sem = ("parallel",)
    else:
        assert s % s_chunk == 0
        grid = (n, s // s_chunk)
        in_specs = [pl.BlockSpec((1, k, s_chunk), lambda i, j: (i, 0, j)),
                    pl.BlockSpec((cout, k), lambda i, j: (0, 0)),
                    pl.BlockSpec((cout, 1), lambda i, j: (0, 0))]
        out_specs = pl.BlockSpec((1, cout, s_chunk), lambda i, j: (i, 0, j))
        sem = ("parallel", "parallel")
    return pl.pallas_call(
        kern,
        out_shape=jax.ShapeDtypeStruct((n, cout, s), jnp.bfloat16),
        grid_spec=pltpu.PrefetchScalarGridSpec(
            num_scalar_prefetch=0, grid=grid,
            in_specs=in_specs, out_specs=out_specs),
        compiler_params=pltpu.CompilerParams(dimension_semantics=sem),
    )(x_im2col, w, b)


def _in_lrelu(acc):
    mu = jnp.mean(acc, axis=1, keepdims=True)
    var = jnp.mean(jnp.square(acc - mu), axis=1, keepdims=True)
    acc = (acc - mu) * lax.rsqrt(var + IN_EPS)
    return jnp.where(acc >= 0.0, acc, NEG_SLOPE * acc)


def _tap_conv(a_bf16, g_ref, w_ref):
    """4x4 / stride-2 / pad-1 conv as 16 gather-matmul taps (MXU only).

    a_bf16: (Cin, S_in); g_ref: (16, S_in, S_out) 0/1 selection matrices;
    w_ref: (16, Cout, Cin).  Returns (Cout, S_out) f32."""
    cout = w_ref.shape[1]
    s_out = g_ref.shape[2]
    acc = jnp.zeros((cout, s_out), jnp.float32)
    for tap in range(16):
        at = jnp.dot(a_bf16, g_ref[tap],
                     preferred_element_type=jnp.float32)        # (Cin, S_out)
        acc = acc + jnp.dot(w_ref[tap], at.astype(jnp.bfloat16),
                            preferred_element_type=jnp.float32)  # (Cout, S_out)
    return acc


def _tail_kernel(x3_ref, w3_ref, b3_ref, g4_ref, w4_ref, b4_ref,
                 g5_ref, w5_ref, b5_ref, w6_ref, b6_ref, logit_ref):
    """Fused layers 3-5 (conv + IN + LeakyReLU) + final 4x4 valid conv head."""
    # layer 3: single im2col matmul, K = 16*Cin, S = 16*16
    a = jnp.dot(w3_ref[...], x3_ref[0], preferred_element_type=jnp.float32)
    a = _in_lrelu(a + b3_ref[...]).astype(jnp.bfloat16)          # (32, 256)
    # layer 4: (32,16,16) -> (64,8,8)
    a = _in_lrelu(_tap_conv(a, g4_ref, w4_ref) + b4_ref[...])
    a = a.astype(jnp.bfloat16)                                   # (64, 64)
    # layer 5: (64,8,8) -> (128,4,4)
    a = _in_lrelu(_tap_conv(a, g5_ref, w5_ref) + b5_ref[...])    # (128, 16)
    # head: 4x4 valid conv -> one logit / sample (broadcast to a full tile
    # so the output store stays (8,128)-aligned).
    s = jnp.sum(a * w6_ref[...], axis=1, keepdims=True)          # (128, 1)
    logit = jnp.sum(s, axis=0, keepdims=True) + b6_ref[...]      # (1, 1)
    logit_ref[...] = jnp.broadcast_to(logit.reshape(1, 1, 1), logit_ref.shape)


def netD_tail(x3, p):
    n, k3, s3 = x3.shape
    in_specs = [
        pl.BlockSpec((1, k3, s3), lambda i: (i, 0, 0)),
        pl.BlockSpec(p["w3"].shape, lambda i: (0, 0)),
        pl.BlockSpec(p["b3"].shape, lambda i: (0, 0)),
        pl.BlockSpec(p["g4"].shape, lambda i: (0, 0, 0)),
        pl.BlockSpec(p["w4t"].shape, lambda i: (0, 0, 0)),
        pl.BlockSpec(p["b4"].shape, lambda i: (0, 0)),
        pl.BlockSpec(p["g5"].shape, lambda i: (0, 0, 0)),
        pl.BlockSpec(p["w5t"].shape, lambda i: (0, 0, 0)),
        pl.BlockSpec(p["b5"].shape, lambda i: (0, 0)),
        pl.BlockSpec(p["w6"].shape, lambda i: (0, 0)),
        pl.BlockSpec(p["b6"].shape, lambda i: (0, 0)),
    ]
    return pl.pallas_call(
        _tail_kernel,
        out_shape=jax.ShapeDtypeStruct((n, 8, 128), jnp.float32),
        grid_spec=pltpu.PrefetchScalarGridSpec(
            num_scalar_prefetch=0, grid=(n,),
            in_specs=in_specs,
            out_specs=pl.BlockSpec((1, 8, 128), lambda i: (i, 0, 0))),
        compiler_params=pltpu.CompilerParams(
            dimension_semantics=("parallel",)),
    )(x3, p["w3"], p["b3"], p["g4"], p["w4t"], p["b4"],
      p["g5"], p["w5t"], p["b5"], p["w6"], p["b6"])


def _loss_kernel(logits_ref, fake_ref, real_ref,
                 errd_real_ref, errd_fake_ref, errg_gan_ref,
                 d_x_ref, d_g_ref, l1_ref, *, half):
    lg = logits_ref[...]                       # (2B, 1024); lanes are copies
    real = lg[:half]                           # D(src, des)
    fake = lg[half:]                           # D(src, G(src))
    # TODO(synk): GANLoss is not defined in the source file; LSGAN
    #             (MSE against constant 1.0 / 0.0 targets) is assumed.
    errd_real_ref[...] = jnp.mean(jnp.square(real - 1.0), keepdims=True)
    errd_fake_ref[...] = jnp.mean(jnp.square(fake), keepdims=True)
    errg_gan_ref[...] = jnp.mean(jnp.square(fake - 1.0), keepdims=True)
    d_x_ref[...] = jnp.mean(real, keepdims=True)
    d_g_ref[...] = jnp.mean(fake, keepdims=True)
    l1_ref[...] = jnp.mean(jnp.abs(fake_ref[...] - real_ref[...]),
                           keepdims=True)


def losses(logits2d, fake_flat, real_flat, half):
    kern = functools.partial(_loss_kernel, half=half)
    vmem = pltpu.MemorySpace.VMEM
    outs = pl.pallas_call(
        kern,
        out_shape=tuple(jax.ShapeDtypeStruct((1, 1), jnp.float32)
                        for _ in range(6)),
        in_specs=[pl.BlockSpec(memory_space=vmem)] * 3,
        out_specs=tuple(pl.BlockSpec(memory_space=vmem) for _ in range(6)),
    )(logits2d, fake_flat, real_flat)
    return tuple(o[0, 0] for o in outs)


# ----------------------------------------------------------------------------
# XLA-side layout glue + one-time weight re-layout
# ----------------------------------------------------------------------------
def im2col_4x4_s2_p1(x_nchw):
    """4x4 / stride-2 / pad-1 im2col: (N,C,H,W) -> (N, C*16, (H/2)*(W/2)).

    K ordering is (c, ki, kj) so torch weights flatten with a plain reshape."""
    n, c, h, w = x_nchw.shape
    oh, ow = h // 2, w // 2
    xp = jnp.pad(x_nchw, ((0, 0), (0, 0), (1, 1), (1, 1)))
    cols = [xp[:, :, ki:ki + 2 * oh:2, kj:kj + 2 * ow:2]
            for ki in range(4) for kj in range(4)]
    x = jnp.stack(cols, axis=2)                      # (N, C, 16, oh, ow)
    return x.reshape(n, c * 16, oh * ow)


def _gather_mats(h_in):
    """0/1 selection matrices (16, h_in^2, h_out^2) turning a 4x4/s2/p1 conv
    into 16 MXU matmul taps on a channel-major (C, spatial) activation."""
    h_out = h_in // 2
    g = np.zeros((16, h_in * h_in, h_out * h_out), np.float32)
    for ki in range(4):
        for kj in range(4):
            for oi in range(h_out):
                ii = 2 * oi - 1 + ki
                if not 0 <= ii < h_in:
                    continue
                for oj in range(h_out):
                    jj = 2 * oj - 1 + kj
                    if not 0 <= jj < h_in:
                        continue
                    g[ki * 4 + kj, ii * h_in + jj, oi * h_out + oj] = 1.0
    return jnp.asarray(g, dtype=jnp.bfloat16)


def init_netD_params(key, nc, ndf):
    chans = [(nc * 2, ndf), (ndf, ndf * 2), (ndf * 2, ndf * 4),
             (ndf * 4, ndf * 8), (ndf * 8, ndf * 16), (ndf * 16, 1)]
    params = []
    for (ci, co) in chans:
        key, kw = jax.random.split(key)
        w = 0.02 * jax.random.normal(kw, (co, ci, 4, 4), dtype=jnp.float32)
        b = jnp.zeros((co,), dtype=jnp.float32)
        params.append((w, b))
    return params


def prepare_netD_params(params):
    """One-time re-layout of torch-style (Cout,Cin,4,4) weights."""
    p = {}
    for li, (w, b) in enumerate(params[:3], start=1):
        co = w.shape[0]
        p[f"w{li}"] = w.reshape(co, -1).astype(jnp.bfloat16)      # (Cout, 16*Cin)
        p[f"b{li}"] = b.reshape(co, 1).astype(jnp.float32)
    for li, (w, b) in zip((4, 5), params[3:5]):
        co, ci = w.shape[0], w.shape[1]
        p[f"w{li}t"] = jnp.transpose(w, (2, 3, 0, 1)).reshape(
            16, co, ci).astype(jnp.bfloat16)                       # (16, Cout, Cin)
        p[f"b{li}"] = b.reshape(co, 1).astype(jnp.float32)
    w6, b6 = params[5]                                             # (1, Cin, 4, 4)
    p["w6"] = w6.reshape(w6.shape[1], 16).astype(jnp.float32)      # (Cin, 16)
    p["b6"] = b6.reshape(1, 1).astype(jnp.float32)
    p["g4"] = _gather_mats(16)        # layer-4 spatial 16x16 -> 8x8
    p["g5"] = _gather_mats(8)         # layer-5 spatial  8x8 -> 4x4
    return p


# ----------------------------------------------------------------------------
# pix2pix forward (train=False semantics: no backward / optimizer steps)
# ----------------------------------------------------------------------------
def pix2pix_forward(prepD, batch, des_lowres_fake,
                    w_GANLoss=1.0, w_L1Loss=100.0):
    src_lr = batch["src_lowres"]
    des_lr = batch["des_lowres"]
    B = src_lr.shape[0]

    # Real + fake discriminator passes batched into one (rows [:B] are real).
    x = jnp.concatenate(
        [jnp.concatenate([src_lr, des_lr], axis=1),
         jnp.concatenate([src_lr, des_lowres_fake], axis=1)],
        axis=0).astype(jnp.bfloat16)                      # (2B, 6, 128, 128)

    # layer 1: conv(4,2,1) + LReLU          -> (2B, 8, 4096)
    a1 = conv_in_lrelu(im2col_4x4_s2_p1(x), prepD["w1"], prepD["b1"],
                       inorm=False, s_chunk=2048)
    # layer 2: conv(4,2,1) + IN + LReLU     -> (2B, 16, 1024)
    a2 = conv_in_lrelu(im2col_4x4_s2_p1(a1.reshape(2 * B, 8, 64, 64)),
                       prepD["w2"], prepD["b2"], inorm=True)
    # layers 3-5 + head fused               -> per-sample logit
    x3 = im2col_4x4_s2_p1(a2.reshape(2 * B, 16, 32, 32))  # (2B, 256, 256)
    logits = netD_tail(x3, prepD)                         # (2B, 8, 128)

    fake_flat = des_lowres_fake.reshape(-1, 128)
    real_flat = des_lr.reshape(-1, 128)
    logits2d = logits.reshape(2 * B, 8 * 128)
    (errD_real, errD_fake, errG_GAN,
     D_x, D_G_1, errG_L1) = losses(logits2d, fake_flat, real_flat, half=B)

    errD = (errD_real + errD_fake) * 0.5
    # The third netD pass (non-detached fake) is numerically identical; reuse.
    D_G_2 = D_G_1
    errG = w_GANLoss * errG_GAN + w_L1Loss * errG_L1

    out = {
        "errD": errD, "errG": errG, "errG_GAN": errG_GAN, "errG_L1": errG_L1,
        "D_x": D_x, "D_G_1": D_G_1, "D_G_2": D_G_2,
        "src": batch["src"],
        "des_lowres": batch["des_lowres"],
        "des_lowres_fake": des_lowres_fake,
    }
    # TODO(synk): calc_psnr / calc_ssim helpers are not defined in the source.
    return out


# ----------------------------------------------------------------------------
if __name__ == "__main__":
    key = jax.random.PRNGKey(0)

    # args: nc=3, ndf=8; the conv stack (five stride-2 convs + a final 4x4
    # valid conv) fixes the lowres spatial size at 128x128.
    nc, ndf, B = 3, 8, 2

    k_src, k_srclr, k_deslr, k_fake, k_par = jax.random.split(key, 5)
    batch = {
        "src": jax.random.normal(k_src, (B, nc, 256, 256), dtype=jnp.float32),
        "src_lowres": jax.random.normal(k_srclr, (B, nc, 128, 128),
                                        dtype=jnp.float32),
        "des_lowres": jax.random.normal(k_deslr, (B, nc, 128, 128),
                                        dtype=jnp.float32),
    }

    # TODO(synk): _netG relies on a pretrained torchvision resnet18 backbone;
    # a deterministic tanh-range stand-in is used for the generator output so
    # the discriminator + loss kernels can be exercised end-to-end.
    des_lowres_fake = jnp.tanh(
        jax.random.normal(k_fake, (B, nc, 128, 128), dtype=jnp.float32))

    paramsD = init_netD_params(k_par, nc, ndf)
    prepD = prepare_netD_params(paramsD)        # one-time weight re-layout

    fwd = jax.jit(pix2pix_forward)
    output = fwd(prepD, batch, des_lowres_fake)
    output = jax.tree_util.tree_map(jax.block_until_ready, output)

    scalars = ["errD", "errG", "errG_GAN", "errG_L1", "D_x", "D_G_1", "D_G_2"]
    assert all(bool(jnp.isfinite(output[k])) for k in scalars)
    assert output["des_lowres_fake"].shape == (B, nc, 128, 128)

    print("KERNEL_OK")
</pallas_src>

<mosaic_0001>
module attributes {stable_mosaic.version = 11 : i64} {
  func.func @_conv_mm_kernel(%arg0: i32, %arg1: i32, %arg2: memref<1x96x2048xbf16, #tpu.memory_space<vmem>>, %arg3: memref<8x96xbf16, #tpu.memory_space<vmem>>, %arg4: memref<8x1xf32, #tpu.memory_space<vmem>>, %arg5: memref<1x8x2048xbf16, #tpu.memory_space<vmem>>) attributes {dimension_semantics = [#tpu.dimension_semantics<parallel>, #tpu.dimension_semantics<parallel>], iteration_bounds = array<i64: 4, 2>, scalar_prefetch = 0 : i64, scratch_operands = 0 : i64, tpu.core_type = #tpu.core_type<tc>, window_params = [{transform_indices = @transform_0, window_bounds = array<i64: 1, 96, 2048>}, {pipeline_mode = #tpu.pipeline_mode<synchronous>, transform_indices = @transform_1, window_bounds = array<i64: 8, 96>}, {pipeline_mode = #tpu.pipeline_mode<synchronous>, transform_indices = @transform_2, window_bounds = array<i64: 8, 1>}, {transform_indices = @transform_3, window_bounds = array<i64: 1, 8, 2048>}]} {
    %c0 = arith.constant 0 : index
    %c0_0 = arith.constant 0 : index
    %0 = vector.load %arg3[%c0, %c0_0] : memref<8x96xbf16, #tpu.memory_space<vmem>>, vector<8x96xbf16>
    %c0_1 = arith.constant 0 : index
    %c0_2 = arith.constant 0 : index
    %c0_3 = arith.constant 0 : index
    %1 = vector.load %arg2[%c0_1, %c0_2, %c0_3] : memref<1x96x2048xbf16, #tpu.memory_space<vmem>>, vector<1x96x2048xbf16>
    %2 = vector.shape_cast %1 : vector<1x96x2048xbf16> to vector<96x2048xbf16>
    %cst = arith.constant dense<0.000000e+00> : vector<8x2048xf32>
    %3 = tpu.matmul %0, %2, %cst {dimension_numbers = #tpu.dot_dimension_numbers<[1], [0], [0], [1], [0, 0, 1, 1], [], []>} : vector<8x96xbf16>, vector<96x2048xbf16>, vector<8x2048xf32> -> vector<8x2048xf32>
    %c0_4 = arith.constant 0 : index
    %c0_5 = arith.constant 0 : index
    %4 = vector.load %arg4[%c0_4, %c0_5] : memref<8x1xf32, #tpu.memory_space<vmem>>, vector<8x1xf32>
    %5 = vector.broadcast %4 : vector<8x1xf32> to vector<8x2048xf32>
    %6 = arith.addf %3, %5 : vector<8x2048xf32>
    %cst_6 = arith.constant 0.000000e+00 : f32
    %7 = vector.broadcast %cst_6 : f32 to vector<8x2048xf32>
    %8 = arith.cmpf oge, %6, %7 : vector<8x2048xf32>
    %cst_7 = arith.constant 2.000000e-01 : f32
    %9 = vector.broadcast %cst_7 : f32 to vector<8x2048xf32>
    %10 = arith.mulf %9, %6 : vector<8x2048xf32>
    %11 = arith.select %8, %6, %10 : vector<8x2048xi1>, vector<8x2048xf32>
    %12 = vector.shape_cast %11 : vector<8x2048xf32> to vector<1x8x2048xf32>
    %13 = arith.truncf %12 : vector<1x8x2048xf32> to vector<1x8x2048xbf16>
    %c0_8 = arith.constant 0 : index
    %c0_9 = arith.constant 0 : index
    %c0_10 = arith.constant 0 : index
    %14 = vector.load %arg5[%c0_8, %c0_9, %c0_10] : memref<1x8x2048xbf16, #tpu.memory_space<vmem>>, vector<1x8x2048xbf16>
    tpu.vector_store %arg5[%c0_8, %c0_9, %c0_10], %13 {strides = array<i32>} : memref<1x8x2048xbf16, #tpu.memory_space<vmem>>, vector<1x8x2048xbf16>,
    return
  }
  func.func @transform_0(%arg0: i32, %arg1: i32) -> (i32, i32, i32) {
    %c0_i32 = arith.constant 0 : i32
    %c0_i32_0 = arith.constant 0 : i32
    return %arg0, %c0_i32, %arg1 : i32, i32, i32
  }
  func.func @transform_1(%arg0: i32, %arg1: i32) -> (i32, i32) {
    %c0_i32 = arith.constant 0 : i32
    %c0_i32_0 = arith.constant 0 : i32
    %c0_i32_1 = arith.constant 0 : i32
    return %c0_i32, %c0_i32_0 : i32, i32
  }
  func.func @transform_2(%arg0: i32, %arg1: i32) -> (i32, i32) {
    %c0_i32 = arith.constant 0 : i32
    %c0_i32_0 = arith.constant 0 : i32
    %c0_i32_1 = arith.constant 0 : i32
    return %c0_i32, %c0_i32_0 : i32, i32
  }
  func.func @transform_3(%arg0: i32, %arg1: i32) -> (i32, i32, i32) {
    %c0_i32 = arith.constant 0 : i32
    %c0_i32_0 = arith.constant 0 : i32
    return %arg0, %c0_i32, %arg1 : i32, i32, i32
  }
}

module attributes {stable_mosaic.version = 11 : i64} {
  func.func @_conv_mm_kernel(%arg0: i32, %arg1: memref<1x128x1024xbf16, #tpu.memory_space<vmem>>, %arg2: memref<16x128xbf16, #tpu.memory_space<vmem>>, %arg3: memref<16x1xf32, #tpu.memory_space<vmem>>, %arg4: memref<1x16x1024xbf16, #tpu.memory_space<vmem>>) attributes {dimension_semantics = [#tpu.dimension_semantics<parallel>], iteration_bounds = array<i64: 4>, scalar_prefetch = 0 : i64, scratch_operands = 0 : i64, tpu.core_type = #tpu.core_type<tc>, window_params = [{transform_indices = @transform_0, window_bounds = array<i64: 1, 128, 1024>}, {pipeline_mode = #tpu.pipeline_mode<synchronous>, transform_indices = @transform_1, window_bounds = array<i64: 16, 128>}, {pipeline_mode = #tpu.pipeline_mode<synchronous>, transform_indices = @transform_2, window_bounds = array<i64: 16, 1>}, {transform_indices = @transform_3, window_bounds = array<i64: 1, 16, 1024>}]} {
    %c0 = arith.constant 0 : index
    %c0_0 = arith.constant 0 : index
    %0 = vector.load %arg2[%c0, %c0_0] : memref<16x128xbf16, #tpu.memory_space<vmem>>, vector<16x128xbf16>
    %c0_1 = arith.constant 0 : index
    %c0_2 = arith.constant 0 : index
    %c0_3 = arith.constant 0 : index
    %1 = vector.load %arg1[%c0_1, %c0_2, %c0_3] : memref<1x128x1024xbf16, #tpu.memory_space<vmem>>, vector<1x128x1024xbf16>
    %2 = vector.shape_cast %1 : vector<1x128x1024xbf16> to vector<128x1024xbf16>
    %cst = arith.constant dense<0.000000e+00> : vector<16x1024xf32>
    %3 = tpu.matmul %0, %2, %cst {dimension_numbers = #tpu.dot_dimension_numbers<[1], [0], [0], [1], [0, 0, 1, 1], [], []>} : vector<16x128xbf16>, vector<128x1024xbf16>, vector<16x1024xf32> -> vector<16x1024xf32>
    %c0_4 = arith.constant 0 : index
    %c0_5 = arith.constant 0 : index
    %4 = vector.load %arg3[%c0_4, %c0_5] : memref<16x1xf32, #tpu.memory_space<vmem>>, vector<16x1xf32>
    %5 = vector.broadcast %4 : vector<16x1xf32> to vector<16x1024xf32>
    %6 = arith.addf %3, %5 : vector<16x1024xf32>
    %cst_6 = arith.constant dense<0.000000e+00> : vector<16xf32>
    %7 = vector.multi_reduction <add>, %6, %cst_6 [1] : vector<16x1024xf32> to vector<16xf32>
    %8 = vector.shape_cast %7 : vector<16xf32> to vector<16x1xf32>
    %cst_7 = arith.constant 1.024000e+03 : f32
    %9 = vector.broadcast %cst_7 : f32 to vector<16x1xf32>
    %10 = arith.divf %8, %9 : vector<16x1xf32>
    %11 = vector.broadcast %10 : vector<16x1xf32> to vector<16x1024xf32>
    %12 = arith.subf %6, %11 : vector<16x1024xf32>
    %13 = arith.mulf %12, %12 : vector<16x1024xf32>
    %cst_8 = arith.constant dense<0.000000e+00> : vector<16xf32>
    %14 = vector.multi_reduction <add>, %13, %cst_8 [1] : vector<16x1024xf32> to vector<16xf32>
    %15 = vector.shape_cast %14 : vector<16xf32> to vector<16x1xf32>
    %cst_9 = arith.constant 1.024000e+03 : f32
    %16 = vector.broadcast %cst_9 : f32 to vector<16x1xf32>
    %17 = arith.divf %15, %16 : vector<16x1xf32>
    %18 = vector.broadcast %10 : vector<16x1xf32> to vector<16x1024xf32>
    %19 = arith.subf %6, %18 : vector<16x1024xf32>
    %cst_10 = arith.constant 9.99999974E-6 : f32
    %20 = vector.broadcast %cst_10 : f32 to vector<16x1xf32>
    %21 = arith.addf %17, %20 : vector<16x1xf32>
    %22 = math.rsqrt %21 : vector<16x1xf32>
    %23 = vector.broadcast %22 : vector<16x1xf32> to vector<16x1024xf32>
    %24 = arith.mulf %19, %23 : vector<16x1024xf32>
    %cst_11 = arith.constant 0.000000e+00 : f32
    %25 = vector.broadcast %cst_11 : f32 to vector<16x1024xf32>
    %26 = arith.cmpf oge, %24, %25 : vector<16x1024xf32>
    %cst_12 = arith.constant 2.000000e-01 : f32
    %27 = vector.broadcast %cst_12 : f32 to vector<16x1024xf32>
    %28 = arith.mulf %27, %24 : vector<16x1024xf32>
    %29 = arith.select %26, %24, %28 : vector<16x1024xi1>, vector<16x1024xf32>
    %30 = vector.shape_cast %29 : vector<16x1024xf32> to vector<1x16x1024xf32>
    %31 = arith.truncf %30 : vector<1x16x1024xf32> to vector<1x16x1024xbf16>
    %c0_13 = arith.constant 0 : index
    %c0_14 = arith.constant 0 : index
    %c0_15 = arith.constant 0 : index
    %32 = vector.load %arg4[%c0_13, %c0_14, %c0_15] : memref<1x16x1024xbf16, #tpu.memory_space<vmem>>, vector<1x16x1024xbf16>
    tpu.vector_store %arg4[%c0_13, %c0_14, %c0_15], %31 {strides = array<i32>} : memref<1x16x1024xbf16, #tpu.memory_space<vmem>>, vector<1x16x1024xbf16>,
    return
  }
  func.func @transform_0(%arg0: i32) -> (i32, i32, i32) {
    %c0_i32 = arith.constant 0 : i32
    %c0_i32_0 = arith.constant 0 : i32
    %c0_i32_1 = arith.constant 0 : i32
    return %arg0, %c0_i32, %c0_i32_0 : i32, i32, i32
  }
  func.func @transform_1(%arg0: i32) -> (i32, i32) {
    %c0_i32 = arith.constant 0 : i32
    %c0_i32_0 = arith.constant 0 : i32
    %c0_i32_1 = arith.constant 0 : i32
    return %c0_i32, %c0_i32_0 : i32, i32
  }
  func.func @transform_2(%arg0: i32) -> (i32, i32) {
    %c0_i32 = arith.constant 0 : i32
    %c0_i32_0 = arith.constant 0 : i32
    %c0_i32_1 = arith.constant 0 : i32
    return %c0_i32, %c0_i32_0 : i32, i32
  }
  func.func @transform_3(%arg0: i32) -> (i32, i32, i32) {
    %c0_i32 = arith.constant 0 : i32
    %c0_i32_0 = arith.constant 0 : i32
    %c0_i32_1 = arith.constant 0 : i32
    return %arg0, %c0_i32, %c0_i32_0 : i32, i32, i32
  }
}

module attributes {stable_mosaic.version = 11 : i64} {
  func.func @_loss_kernel(%arg0: memref<4x1024xf32, #tpu.memory_space<vmem>>, %arg1: memref<768x128xf32, #tpu.memory_space<vmem>>, %arg2: memref<768x128xf32, #tpu.memory_space<vmem>>, %arg3: memref<1x1xf32, #tpu.memory_space<vmem>>, %arg4: memref<1x1xf32, #tpu.memory_space<vmem>>, %arg5: memref<1x1xf32, #tpu.memory_space<vmem>>, %arg6: memref<1x1xf32, #tpu.memory_space<vmem>>, %arg7: memref<1x1xf32, #tpu.memory_space<vmem>>, %arg8: memref<1x1xf32, #tpu.memory_space<vmem>>) attributes {dimension_semantics = [], scalar_prefetch = 0 : i64, scratch_operands = 0 : i64, tpu.core_type = #tpu.core_type<tc>} {
    %c0 = arith.constant 0 : index
    %c0_0 = arith.constant 0 : index
    %0 = vector.load %arg0[%c0, %c0_0] : memref<4x1024xf32, #tpu.memory_space<vmem>>, vector<4x1024xf32>
    %1 = vector.extract_strided_slice %0 {offsets = [0, 0], sizes = [2, 1024], strides = [1, 1]} : vector<4x1024xf32> to vector<2x1024xf32>
    %2 = vector.extract_strided_slice %0 {offsets = [2, 0], sizes = [2, 1024], strides = [1, 1]} : vector<4x1024xf32> to vector<2x1024xf32>
    %cst = arith.constant 1.000000e+00 : f32
    %3 = vector.broadcast %cst : f32 to vector<2x1024xf32>
    %4 = arith.subf %1, %3 : vector<2x1024xf32>
    %5 = arith.mulf %4, %4 : vector<2x1024xf32>
    %6 = vector.shape_cast %5 : vector<2x1024xf32> to vector<1x2x1024xf32>
    %cst_1 = arith.constant dense<0.000000e+00> : vector<1xf32>
    %7 = vector.multi_reduction <add>, %6, %cst_1 [1, 2] : vector<1x2x1024xf32> to vector<1xf32>
    %8 = vector.shape_cast %7 : vector<1xf32> to vector<1x1x1xf32>
    %9 = vector.extract %8[0, 0, 0] : f32 from vector<1x1x1xf32>
    %10 = vector.broadcast %9 : f32 to vector<1x1xf32>
    %cst_2 = arith.constant 2.048000e+03 : f32
    %11 = vector.broadcast %cst_2 : f32 to vector<1x1xf32>
    %12 = arith.divf %10, %11 : vector<1x1xf32>
    %c0_3 = arith.constant 0 : index
    %c0_4 = arith.constant 0 : index
    %13 = vector.load %arg3[%c0_3, %c0_4] : memref<1x1xf32, #tpu.memory_space<vmem>>, vector<1x1xf32>
    tpu.vector_store %arg3[%c0_3, %c0_4], %12 {strides = array<i32>} : memref<1x1xf32, #tpu.memory_space<vmem>>, vector<1x1xf32>,
    %14 = arith.mulf %2, %2 : vector<2x1024xf32>
    %15 = vector.shape_cast %14 : vector<2x1024xf32> to vector<1x2x1024xf32>
    %cst_5 = arith.constant dense<0.000000e+00> : vector<1xf32>
    %16 = vector.multi_reduction <add>, %15, %cst_5 [1, 2] : vector<1x2x1024xf32> to vector<1xf32>
    %17 = vector.shape_cast %16 : vector<1xf32> to vector<1x1x1xf32>
    %18 = vector.extract %17[0, 0, 0] : f32 from vector<1x1x1xf32>
    %19 = vector.broadcast %18 : f32 to vector<1x1xf32>
    %cst_6 = arith.constant 2.048000e+03 : f32
    %20 = vector.broadcast %cst_6 : f32 to vector<1x1xf32>
    %21 = arith.divf %19, %20 : vector<1x1xf32>
    %c0_7 = arith.constant 0 : index
    %c0_8 = arith.constant 0 : index
    %22 = vector.load %arg4[%c0_7, %c0_8] : memref<1x1xf32, #tpu.memory_space<vmem>>, vector<1x1xf32>
    tpu.vector_store %arg4[%c0_7, %c0_8], %21 {strides = array<i32>} : memref<1x1xf32, #tpu.memory_space<vmem>>, vector<1x1xf32>,
    %cst_9 = arith.constant 1.000000e+00 : f32
    %23 = vector.broadcast %cst_9 : f32 to vector<2x1024xf32>
    %24 = arith.subf %2, %23 : vector<2x1024xf32>
    %25 = arith.mulf %24, %24 : vector<2x1024xf32>
    %26 = vector.shape_cast %25 : vector<2x1024xf32> to vector<1x2x1024xf32>
    %cst_10 = arith.constant dense<0.000000e+00> : vector<1xf32>
    %27 = vector.multi_reduction <add>, %26, %cst_10 [1, 2] : vector<1x2x1024xf32> to vector<1xf32>
    %28 = vector.shape_cast %27 : vector<1xf32> to vector<1x1x1xf32>
    %29 = vector.extract %28[0, 0, 0] : f32 from vector<1x1x1xf32>
    %30 = vector.broadcast %29 : f32 to vector<1x1xf32>
    %cst_11 = arith.constant 2.048000e+03 : f32
    %31 = vector.broadcast %cst_11 : f32 to vector<1x1xf32>
    %32 = arith.divf %30, %31 : vector<1x1xf32>
    %c0_12 = arith.constant 0 : index
    %c0_13 = arith.constant 0 : index
    %33 = vector.load %arg5[%c0_12, %c0_13] : memref<1x1xf32, #tpu.memory_space<vmem>>, vector<1x1xf32>
    tpu.vector_store %arg5[%c0_12, %c0_13], %32 {strides = array<i32>} : memref<1x1xf32, #tpu.memory_space<vmem>>, vector<1x1xf32>,
    %34 = vector.shape_cast %1 : vector<2x1024xf32> to vector<1x2x1024xf32>
    %cst_14 = arith.constant dense<0.000000e+00> : vector<1xf32>
    %35 = vector.multi_reduction <add>, %34, %cst_14 [1, 2] : vector<1x2x1024xf32> to vector<1xf32>
    %36 = vector.shape_cast %35 : vector<1xf32> to vector<1x1x1xf32>
    %37 = vector.extract %36[0, 0, 0] : f32 from vector<1x1x1xf32>
    %38 = vector.broadcast %37 : f32 to vector<1x1xf32>
    %cst_15 = arith.constant 2.048000e+03 : f32
    %39 = vector.broadcast %cst_15 : f32 to vector<1x1xf32>
    %40 = arith.divf %38, %39 : vector<1x1xf32>
    %c0_16 = arith.constant 0 : index
    %c0_17 = arith.constant 0 : index
    %41 = vector.load %arg6[%c0_16, %c0_17] : memref<1x1xf32, #tpu.memory_space<vmem>>, vector<1x1xf32>
    tpu.vector_store %arg6[%c0_16, %c0_17], %40 {strides = array<i32>} : memref<1x1xf32, #tpu.memory_space<vmem>>, vector<1x1xf32>,
    %42 = vector.shape_cast %2 : vector<2x1024xf32> to vector<1x2x1024xf32>
    %cst_18 = arith.constant dense<0.000000e+00> : vector<1xf32>
    %43 = vector.multi_reduction <add>, %42, %cst_18 [1, 2] : vector<1x2x1024xf32> to vector<1xf32>
    %44 = vector.shape_cast %43 : vector<1xf32> to vector<1x1x1xf32>
    %45 = vector.extract %44[0, 0, 0] : f32 from vector<1x1x1xf32>
    %46 = vector.broadcast %45 : f32 to vector<1x1xf32>
    %cst_19 = arith.constant 2.048000e+03 : f32
    %47 = vector.broadcast %cst_19 : f32 to vector<1x1xf32>
    %48 = arith.divf %46, %47 : vector<1x1xf32>
    %c0_20 = arith.constant 0 : index
    %c0_21 = arith.constant 0 : index
    %49 = vector.load %arg7[%c0_20, %c0_21] : memref<1x1xf32, #tpu.memory_space<vmem>>, vector<1x1xf32>
    tpu.vector_store %arg7[%c0_20, %c0_21], %48 {strides = array<i32>} : memref<1x1xf32, #tpu.memory_space<vmem>>, vector<1x1xf32>,
    %c0_22 = arith.constant 0 : index
    %c0_23 = arith.constant 0 : index
    %50 = vector.load %arg1[%c0_22, %c0_23] : memref<768x128xf32, #tpu.memory_space<vmem>>, vector<768x128xf32>
    %c0_24 = arith.constant 0 : index
    %c0_25 = arith.constant 0 : index
    %51 = vector.load %arg2[%c0_24, %c0_25] : memref<768x128xf32, #tpu.memory_space<vmem>>, vector<768x128xf32>
    %52 = arith.subf %50, %51 : vector<768x128xf32>
    %53 = math.absf %52 : vector<768x128xf32>
    %54 = vector.shape_cast %53 : vector<768x128xf32> to vector<1x768x128xf32>
    %cst_26 = arith.constant dense<0.000000e+00> : vector<1xf32>
    %55 = vector.multi_reduction <add>, %54, %cst_26 [1, 2] : vector<1x768x128xf32> to vector<1xf32>
    %56 = vector.shape_cast %55 : vector<1xf32> to vector<1x1x1xf32>
    %57 = vector.extract %56[0, 0, 0] : f32 from vector<1x1x1xf32>
    %58 = vector.broadcast %57 : f32 to vector<1x1xf32>
    %cst_27 = arith.constant 9.830400e+04 : f32
    %59 = vector.broadcast %cst_27 : f32 to vector<1x1xf32>
    %60 = arith.divf %58, %59 : vector<1x1xf32>
    %c0_28 = arith.constant 0 : index
    %c0_29 = arith.constant 0 : index
    %61 = vector.load %arg8[%c0_28, %c0_29] : memref<1x1xf32, #tpu.memory_space<vmem>>, vector<1x1xf32>
    tpu.vector_store %arg8[%c0_28, %c0_29], %60 {strides = array<i32>} : memref<1x1xf32, #tpu.memory_space<vmem>>, vector<1x1xf32>,
    return
  }
}

module attributes {stable_mosaic.version = 11 : i64} {
  func.func @_tail_kernel(%arg0: i32, %arg1: memref<1x256x256xbf16, #tpu.memory_space<vmem>>, %arg2: memref<32x256xbf16, #tpu.memory_space<vmem>>, %arg3: memref<32x1xf32, #tpu.memory_space<vmem>>, %arg4: memref<16x256x64xbf16, #tpu.memory_space<vmem>>, %arg5: memref<16x64x32xbf16, #tpu.memory_space<vmem>>, %arg6: memref<64x1xf32, #tpu.memory_space<vmem>>, %arg7: memref<16x64x16xbf16, #tpu.memory_space<vmem>>, %arg8: memref<16x128x64xbf16, #tpu.memory_space<vmem>>, %arg9: memref<128x1xf32, #tpu.memory_space<vmem>>, %arg10: memref<128x16xf32, #tpu.memory_space<vmem>>, %arg11: memref<1x1xf32, #tpu.memory_space<vmem>>, %arg12: memref<1x8x128xf32, #tpu.memory_space<vmem>>) attributes {dimension_semantics = [#tpu.dimension_semantics<parallel>], iteration_bounds = array<i64: 4>, scalar_prefetch = 0 : i64, scratch_operands = 0 : i64, tpu.core_type = #tpu.core_type<tc>, window_params = [{transform_indices = @transform_0, window_bounds = array<i64: 1, 256, 256>}, {pipeline_mode = #tpu.pipeline_mode<synchronous>, transform_indices = @transform_1, window_bounds = array<i64: 32, 256>}, {pipeline_mode = #tpu.pipeline_mode<synchronous>, transform_indices = @transform_2, window_bounds = array<i64: 32, 1>}, {pipeline_mode = #tpu.pipeline_mode<synchronous>, transform_indices = @transform_3, window_bounds = array<i64: 16, 256, 64>}, {pipeline_mode = #tpu.pipeline_mode<synchronous>, transform_indices = @transform_4, window_bounds = array<i64: 16, 64, 32>}, {pipeline_mode = #tpu.pipeline_mode<synchronous>, transform_indices = @transform_5, window_bounds = array<i64: 64, 1>}, {pipeline_mode = #tpu.pipeline_mode<synchronous>, transform_indices = @transform_6, window_bounds = array<i64: 16, 64, 16>}, {pipeline_mode = #tpu.pipeline_mode<synchronous>, transform_indices = @transform_7, window_bounds = array<i64: 16, 128, 64>}, {pipeline_mode = #tpu.pipeline_mode<synchronous>, transform_indices = @transform_8, window_bounds = array<i64: 128, 1>}, {pipeline_mode = #tpu.pipeline_mode<synchronous>, transform_indices = @transform_9, window_bounds = array<i64: 128, 16>}, {pipeline_mode = #tpu.pipeline_mode<synchronous>, transform_indices = @transform_10, window_bounds = array<i64: 1, 1>}, {transform_indices = @transform_11, window_bounds = array<i64: 1, 8, 128>}]} {
    %c0 = arith.constant 0 : index
    %c0_0 = arith.constant 0 : index
    %0 = vector.load %arg2[%c0, %c0_0] : memref<32x256xbf16, #tpu.memory_space<vmem>>, vector<32x256xbf16>
    %c0_1 = arith.constant 0 : index
    %c0_2 = arith.constant 0 : index
    %c0_3 = arith.constant 0 : index
    %1 = vector.load %arg1[%c0_1, %c0_2, %c0_3] : memref<1x256x256xbf16, #tpu.memory_space<vmem>>, vector<1x256x256xbf16>
    %2 = vector.shape_cast %1 : vector<1x256x256xbf16> to vector<256x256xbf16>
    %cst = arith.constant dense<0.000000e+00> : vector<32x256xf32>
    %3 = tpu.matmul %0, %2, %cst {dimension_numbers = #tpu.dot_dimension_numbers<[1], [0], [0], [1], [0, 0, 1, 1], [], []>} : vector<32x256xbf16>, vector<256x256xbf16>, vector<32x256xf32> -> vector<32x256xf32>
    %c0_4 = arith.constant 0 : index
    %c0_5 = arith.constant 0 : index
    %4 = vector.load %arg3[%c0_4, %c0_5] : memref<32x1xf32, #tpu.memory_space<vmem>>, vector<32x1xf32>
    %5 = vector.broadcast %4 : vector<32x1xf32> to vector<32x256xf32>
    %6 = arith.addf %3, %5 : vector<32x256xf32>
    %cst_6 = arith.constant dense<0.000000e+00> : vector<32xf32>
    %7 = vector.multi_reduction <add>, %6, %cst_6 [1] : vector<32x256xf32> to vector<32xf32>
    %8 = vector.shape_cast %7 : vector<32xf32> to vector<32x1xf32>
    %cst_7 = arith.constant 2.560000e+02 : f32
    %9 = vector.broadcast %cst_7 : f32 to vector<32x1xf32>
    %10 = arith.divf %8, %9 : vector<32x1xf32>
    %11 = vector.broadcast %10 : vector<32x1xf32> to vector<32x256xf32>
    %12 = arith.subf %6, %11 : vector<32x256xf32>
    %13 = arith.mulf %12, %12 : vector<32x256xf32>
    %cst_8 = arith.constant dense<0.000000e+00> : vector<32xf32>
    %14 = vector.multi_reduction <add>, %13, %cst_8 [1] : vector<32x256xf32> to vector<32xf32>
    %15 = vector.shape_cast %14 : vector<32xf32> to vector<32x1xf32>
    %cst_9 = arith.constant 2.560000e+02 : f32
    %16 = vector.broadcast %cst_9 : f32 to vector<32x1xf32>
    %17 = arith.divf %15, %16 : vector<32x1xf32>
    %18 = vector.broadcast %10 : vector<32x1xf32> to vector<32x256xf32>
    %19 = arith.subf %6, %18 : vector<32x256xf32>
    %cst_10 = arith.constant 9.99999974E-6 : f32
    %20 = vector.broadcast %cst_10 : f32 to vector<32x1xf32>
    %21 = arith.addf %17, %20 : vector<32x1xf32>
    %22 = math.rsqrt %21 : vector<32x1xf32>
    %23 = vector.broadcast %22 : vector<32x1xf32> to vector<32x256xf32>
    %24 = arith.mulf %19, %23 : vector<32x256xf32>
    %cst_11 = arith.constant 0.000000e+00 : f32
    %25 = vector.broadcast %cst_11 : f32 to vector<32x256xf32>
    %26 = arith.cmpf oge, %24, %25 : vector<32x256xf32>
    %cst_12 = arith.constant 2.000000e-01 : f32
    %27 = vector.broadcast %cst_12 : f32 to vector<32x256xf32>
    %28 = arith.mulf %27, %24 : vector<32x256xf32>
    %29 = arith.select %26, %24, %28 : vector<32x256xi1>, vector<32x256xf32>
    %30 = arith.truncf %29 : vector<32x256xf32> to vector<32x256xbf16>
    %cst_13 = arith.constant 0.000000e+00 : f32
    %31 = vector.broadcast %cst_13 : f32 to vector<64x64xf32>
    %c0_14 = arith.constant 0 : index
    %c0_15 = arith.constant 0 : index
    %c0_16 = arith.constant 0 : index
    %32 = vector.load %arg4[%c0_14, %c0_15, %c0_16] : memref<16x256x64xbf16, #tpu.memory_space<vmem>>, vector<1x256x64xbf16>
    %33 = vector.shape_cast %32 : vector<1x256x64xbf16> to vector<256x64xbf16>
    %cst_17 = arith.constant dense<0.000000e+00> : vector<32x64xf32>
    %34 = tpu.matmul %30, %33, %cst_17 {dimension_numbers = #tpu.dot_dimension_numbers<[1], [0], [0], [1], [0, 0, 1, 1], [], []>} : vector<32x256xbf16>, vector<256x64xbf16>, vector<32x64xf32> -> vector<32x64xf32>
    %c0_18 = arith.constant 0 : index
    %c0_19 = arith.constant 0 : index
    %c0_20 = arith.constant 0 : index
    %35 = vector.load %arg5[%c0_18, %c0_19, %c0_20] : memref<16x64x32xbf16, #tpu.memory_space<vmem>>, vector<1x64x32xbf16>
    %36 = vector.shape_cast %35 : vector<1x64x32xbf16> to vector<64x32xbf16>
    %37 = arith.truncf %34 : vector<32x64xf32> to vector<32x64xbf16>
    %cst_21 = arith.constant dense<0.000000e+00> : vector<64x64xf32>
    %38 = tpu.matmul %36, %37, %cst_21 {dimension_numbers = #tpu.dot_dimension_numbers<[1], [0], [0], [1], [0, 0, 1, 1], [], []>} : vector<64x32xbf16>, vector<32x64xbf16>, vector<64x64xf32> -> vector<64x64xf32>
    %39 = arith.addf %31, %38 : vector<64x64xf32>
    %c1 = arith.constant 1 : index
    %c0_22 = arith.constant 0 : index
    %c0_23 = arith.constant 0 : index
    %40 = vector.load %arg4[%c1, %c0_22, %c0_23] : memref<16x256x64xbf16, #tpu.memory_space<vmem>>, vector<1x256x64xbf16>
    %41 = vector.shape_cast %40 : vector<1x256x64xbf16> to vector<256x64xbf16>
    %cst_24 = arith.constant dense<0.000000e+00> : vector<32x64xf32>
    %42 = tpu.matmul %30, %41, %cst_24 {dimension_numbers = #tpu.dot_dimension_numbers<[1], [0], [0], [1], [0, 0, 1, 1], [], []>} : vector<32x256xbf16>, vector<256x64xbf16>, vector<32x64xf32> -> vector<32x64xf32>
    %c1_25 = arith.constant 1 : index
    %c0_26 = arith.constant 0 : index
    %c0_27 = arith.constant 0 : index
    %43 = vector.load %arg5[%c1_25, %c0_26, %c0_27] : memref<16x64x32xbf16, #tpu.memory_space<vmem>>, vector<1x64x32xbf16>
    %44 = vector.shape_cast %43 : vector<1x64x32xbf16> to vector<64x32xbf16>
    %45 = arith.truncf %42 : vector<32x64xf32> to vector<32x64xbf16>
    %cst_28 = arith.constant dense<0.000000e+00> : vector<64x64xf32>
    %46 = tpu.matmul %44, %45, %cst_28 {dimension_numbers = #tpu.dot_dimension_numbers<[1], [0], [0], [1], [0, 0, 1, 1], [], []>} : vector<64x32xbf16>, vector<32x64xbf16>, vector<64x64xf32> -> vector<64x64xf32>
    %47 = arith.addf %39, %46 : vector<64x64xf32>
    %c2 = arith.constant 2 : index
    %c0_29 = arith.constant 0 : index
    %c0_30 = arith.constant 0 : index
    %48 = vector.load %arg4[%c2, %c0_29, %c0_30] : memref<16x256x64xbf16, #tpu.memory_space<vmem>>, vector<1x256x64xbf16>
    %49 = vector.shape_cast %48 : vector<1x256x64xbf16> to vector<256x64xbf16>
    %cst_31 = arith.constant dense<0.000000e+00> : vector<32x64xf32>
    %50 = tpu.matmul %30, %49, %cst_31 {dimension_numbers = #tpu.dot_dimension_numbers<[1], [0], [0], [1], [0, 0, 1, 1], [], []>} : vector<32x256xbf16>, vector<256x64xbf16>, vector<32x64xf32> -> vector<32x64xf32>
    %c2_32 = arith.constant 2 : index
    %c0_33 = arith.constant 0 : index
    %c0_34 = arith.constant 0 : index
    %51 = vector.load %arg5[%c2_32, %c0_33, %c0_34] : memref<16x64x32xbf16, #tpu.memory_space<vmem>>, vector<1x64x32xbf16>
    %52 = vector.shape_cast %51 : vector<1x64x32xbf16> to vector<64x32xbf16>
    %53 = arith.truncf %50 : vector<32x64xf32> to vector<32x64xbf16>
    %cst_35 = arith.constant dense<0.000000e+00> : vector<64x64xf32>
    %54 = tpu.matmul %52, %53, %cst_35 {dimension_numbers = #tpu.dot_dimension_numbers<[1], [0], [0], [1], [0, 0, 1, 1], [], []>} : vector<64x32xbf16>, vector<32x64xbf16>, vector<64x64xf32> -> vector<64x64xf32>
    %55 = arith.addf %47, %54 : vector<64x64xf32>
    %c3 = arith.constant 3 : index
    %c0_36 = arith.constant 0 : index
    %c0_37 = arith.constant 0 : index
    %56 = vector.load %arg4[%c3, %c0_36, %c0_37] : memref<16x256x64xbf16, #tpu.memory_space<vmem>>, vector<1x256x64xbf16>
    %57 = vector.shape_cast %56 : vector<1x256x64xbf16> to vector<256x64xbf16>
    %cst_38 = arith.constant dense<0.000000e+00> : vector<32x64xf32>
    %58 = tpu.matmul %30, %57, %cst_38 {dimension_numbers = #tpu.dot_dimension_numbers<[1], [0], [0], [1], [0, 0, 1, 1], [], []>} : vector<32x256xbf16>, vector<256x64xbf16>, vector<32x64xf32> -> vector<32x64xf32>
    %c3_39 = arith.constant 3 : index
    %c0_40 = arith.constant 0 : index
    %c0_41 = arith.constant 0 : index
    %59 = vector.load %arg5[%c3_39, %c0_40, %c0_41] : memref<16x64x32xbf16, #tpu.memory_space<vmem>>, vector<1x64x32xbf16>
    %60 = vector.shape_cast %59 : vector<1x64x32xbf16> to vector<64x32xbf16>
    %61 = arith.truncf %58 : vector<32x64xf32> to vector<32x64xbf16>
    %cst_42 = arith.constant dense<0.000000e+00> : vector<64x64xf32>
    %62 = tpu.matmul %60, %61, %cst_42 {dimension_numbers = #tpu.dot_dimension_numbers<[1], [0], [0], [1], [0, 0, 1, 1], [], []>} : vector<64x32xbf16>, vector<32x64xbf16>, vector<64x64xf32> -> vector<64x64xf32>
    %63 = arith.addf %55, %62 : vector<64x64xf32>
    %c4 = arith.constant 4 : index
    %c0_43 = arith.constant 0 : index
    %c0_44 = arith.constant 0 : index
    %64 = vector.load %arg4[%c4, %c0_43, %c0_44] : memref<16x256x64xbf16, #tpu.memory_space<vmem>>, vector<1x256x64xbf16>
    %65 = vector.shape_cast %64 : vector<1x256x64xbf16> to vector<256x64xbf16>
    %cst_45 = arith.constant dense<0.000000e+00> : vector<32x64xf32>
    %66 = tpu.matmul %30, %65, %cst_45 {dimension_numbers = #tpu.dot_dimension_numbers<[1], [0], [0], [1], [0, 0, 1, 1], [], []>} : vector<32x256xbf16>, vector<256x64xbf16>, vector<32x64xf32> -> vector<32x64xf32>
    %c4_46 = arith.constant 4 : index
    %c0_47 = arith.constant 0 : index
    %c0_48 = arith.constant 0 : index
    %67 = vector.load %arg5[%c4_46, %c0_47, %c0_48] : memref<16x64x32xbf16, #tpu.memory_space<vmem>>, vector<1x64x32xbf16>
    %68 = vector.shape_cast %67 : vector<1x64x32xbf16> to vector<64x32xbf16>
    %69 = arith.truncf %66 : vector<32x64xf32> to vector<32x64xbf16>
    %cst_49 = arith.constant dense<0.000000e+00> : vector<64x64xf32>
    %70 = tpu.matmul %68, %69, %cst_49 {dimension_numbers = #tpu.dot_dimension_numbers<[1], [0], [0], [1], [0, 0, 1, 1], [], []>} : vector<64x32xbf16>, vector<32x64xbf16>, vector<64x64xf32> -> vector<64x64xf32>
    %71 = arith.addf %63, %70 : vector<64x64xf32>
    %c5 = arith.constant 5 : index
    %c0_50 = arith.constant 0 : index
    %c0_51 = arith.constant 0 : index
    %72 = vector.load %arg4[%c5, %c0_50, %c0_51] : memref<16x256x64xbf16, #tpu.memory_space<vmem>>, vector<1x256x64xbf16>
    %73 = vector.shape_cast %72 : vector<1x256x64xbf16> to vector<256x64xbf16>
    %cst_52 = arith.constant dense<0.000000e+00> : vector<32x64xf32>
    %74 = tpu.matmul %30, %73, %cst_52 {dimension_numbers = #tpu.dot_dimension_numbers<[1], [0], [0], [1], [0, 0, 1, 1], [], []>} : vector<32x256xbf16>, vector<256x64xbf16>, vector<32x64xf32> -> vector<32x64xf32>
    %c5_53 = arith.constant 5 : index
    %c0_54 = arith.constant 0 : index
    %c0_55 = arith.constant 0 : index
    %75 = vector.load %arg5[%c5_53, %c0_54, %c0_55] : memref<16x64x32xbf16, #tpu.memory_space<vmem>>, vector<1x64x32xbf16>
    %76 = vector.shape_cast %75 : vector<1x64x32xbf16> to vector<64x32xbf16>
    %77 = arith.truncf %74 : vector<32x64xf32> to vector<32x64xbf16>
    %cst_56 = arith.constant dense<0.000000e+00> : vector<64x64xf32>
    %78 = tpu.matmul %76, %77, %cst_56 {dimension_numbers = #tpu.dot_dimension_numbers<[1], [0], [0], [1], [0, 0, 1, 1], [], []>} : vector<64x32xbf16>, vector<32x64xbf16>, vector<64x64xf32> -> vector<64x64xf32>
    %79 = arith.addf %71, %78 : vector<64x64xf32>
    %c6 = arith.constant 6 : index
    %c0_57 = arith.constant 0 : index
    %c0_58 = arith.constant 0 : index
    %80 = vector.load %arg4[%c6, %c0_57, %c0_58] : memref<16x256x64xbf16, #tpu.memory_space<vmem>>, vector<1x256x64xbf16>
    %81 = vector.shape_cast %80 : vector<1x256x64xbf16> to vector<256x64xbf16>
    %cst_59 = arith.constant dense<0.000000e+00> : vector<32x64xf32>
    %82 = tpu.matmul %30, %81, %cst_59 {dimension_numbers = #tpu.dot_dimension_numbers<[1], [0], [0], [1], [0, 0, 1, 1], [], []>} : vector<32x256xbf16>, vector<256x64xbf16>, vector<32x64xf32> -> vector<32x64xf32>
    %c6_60 = arith.constant 6 : index
    %c0_61 = arith.constant 0 : index
    %c0_62 = arith.constant 0 : index
    %83 = vector.load %arg5[%c6_60, %c0_61, %c0_62] : memref<16x64x32xbf16, #tpu.memory_space<vmem>>, vector<1x64x32xbf16>
    %84 = vector.shape_cast %83 : vector<1x64x32xbf16> to vector<64x32xbf16>
    %85 = arith.truncf %82 : vector<32x64xf32> to vector<32x64xbf16>
    %cst_63 = arith.constant dense<0.000000e+00> : vector<64x64xf32>
    %86 = tpu.matmul %84, %85, %cst_63 {dimension_numbers = #tpu.dot_dimension_numbers<[1], [0], [0], [1], [0, 0, 1, 1], [], []>} : vector<64x32xbf16>, vector<32x64xbf16>, vector<64x64xf32> -> vector<64x64xf32>
    %87 = arith.addf %79, %86 : vector<64x64xf32>
    %c7 = arith.constant 7 : index
    %c0_64 = arith.constant 0 : index
    %c0_65 = arith.constant 0 : index
    %88 = vector.load %arg4[%c7, %c0_64, %c0_65] : memref<16x256x64xbf16, #tpu.memory_space<vmem>>, vector<1x256x64xbf16>
    %89 = vector.shape_cast %88 : vector<1x256x64xbf16> to vector<256x64xbf16>
    %cst_66 = arith.constant dense<0.000000e+00> : vector<32x64xf32>
    %90 = tpu.matmul %30, %89, %cst_66 {dimension_numbers = #tpu.dot_dimension_numbers<[1], [0], [0], [1], [0, 0, 1, 1], [], []>} : vector<32x256xbf16>, vector<256x64xbf16>, vector<32x64xf32> -> vector<32x64xf32>
    %c7_67 = arith.constant 7 : index
    %c0_68 = arith.constant 0 : index
    %c0_69 = arith.constant 0 : index
    %91 = vector.load %arg5[%c7_67, %c0_68, %c0_69] : memref<16x64x32xbf16, #tpu.memory_space<vmem>>, vector<1x64x32xbf16>
    %92 = vector.shape_cast %91 : vector<1x64x32xbf16> to vector<64x32xbf16>
    %93 = arith.truncf %90 : vector<32x64xf32> to vector<32x64xbf16>
    %cst_70 = arith.constant dense<0.000000e+00> : vector<64x64xf32>
    %94 = tpu.matmul %92, %93, %cst_70 {dimension_numbers = #tpu.dot_dimension_numbers<[1], [0], [0], [1], [0, 0, 1, 1], [], []>} : vector<64x32xbf16>, vector<32x64xbf16>, vector<64x64xf32> -> vector<64x64xf32>
    %95 = arith.addf %87, %94 : vector<64x64xf32>
    %c8 = arith.constant 8 : index
    %c0_71 = arith.constant 0 : index
    %c0_72 = arith.constant 0 : index
    %96 = vector.load %arg4[%c8, %c0_71, %c0_72] : memref<16x256x64xbf16, #tpu.memory_space<vmem>>, vector<1x256x64xbf16>
    %97 = vector.shape_cast %96 : vector<1x256x64xbf16> to vector<256x64xbf16>
    %cst_73 = arith.constant dense<0.000000e+00> : vector<32x64xf32>
    %98 = tpu.matmul %30, %97, %cst_73 {dimension_numbers = #tpu.dot_dimension_numbers<[1], [0], [0], [1], [0, 0, 1, 1], [], []>} : vector<32x256xbf16>, vector<256x64xbf16>, vector<32x64xf32> -> vector<32x64xf32>
    %c8_74 = arith.constant 8 : index
    %c0_75 = arith.constant 0 : index
    %c0_76 = arith.constant 0 : index
    %99 = vector.load %arg5[%c8_74, %c0_75, %c0_76] : memref<16x64x32xbf16, #tpu.memory_space<vmem>>, vector<1x64x32xbf16>
    %100 = vector.shape_cast %99 : vector<1x64x32xbf16> to vector<64x32xbf16>
    %101 = arith.truncf %98 : vector<32x64xf32> to vector<32x64xbf16>
    %cst_77 = arith.constant dense<0.000000e+00> : vector<64x64xf32>
    %102 = tpu.matmul %100, %101, %cst_77 {dimension_numbers = #tpu.dot_dimension_numbers<[1], [0], [0], [1], [0, 0, 1, 1], [], []>} : vector<64x32xbf16>, vector<32x64xbf16>, vector<64x64xf32> -> vector<64x64xf32>
    %103 = arith.addf %95, %102 : vector<64x64xf32>
    %c9 = arith.constant 9 : index
    %c0_78 = arith.constant 0 : index
    %c0_79 = arith.constant 0 : index
    %104 = vector.load %arg4[%c9, %c0_78, %c0_79] : memref<16x256x64xbf16, #tpu.memory_space<vmem>>, vector<1x256x64xbf16>
    %105 = vector.shape_cast %104 : vector<1x256x64xbf16> to vector<256x64xbf16>
    %cst_80 = arith.constant dense<0.000000e+00> : vector<32x64xf32>
    %106 = tpu.matmul %30, %105, %cst_80 {dimension_numbers = #tpu.dot_dimension_numbers<[1], [0], [0], [1], [0, 0, 1, 1], [], []>} : vector<32x256xbf16>, vector<256x64xbf16>, vector<32x64xf32> -> vector<32x64xf32>
    %c9_81 = arith.constant 9 : index
    %c0_82 = arith.constant 0 : index
    %c0_83 = arith.constant 0 : index
    %107 = vector.load %arg5[%c9_81, %c0_82, %c0_83] : memref<16x64x32xbf16, #tpu.memory_space<vmem>>, vector<1x64x32xbf16>
    %108 = vector.shape_cast %107 : vector<1x64x32xbf16> to vector<64x32xbf16>
    %109 = arith.truncf %106 : vector<32x64xf32> to vector<32x64xbf16>
    %cst_84 = arith.constant dense<0.000000e+00> : vector<64x64xf32>
    %110 = tpu.matmul %108, %109, %cst_84 {dimension_numbers = #tpu.dot_dimension_numbers<[1], [0], [0], [1], [0, 0, 1, 1], [], []>} : vector<64x32xbf16>, vector<32x64xbf16>, vector<64x64xf32> -> vector<64x64xf32>
    %111 = arith.addf %103, %110 : vector<64x64xf32>
    %c10 = arith.constant 10 : index
    %c0_85 = arith.constant 0 : index
    %c0_86 = arith.constant 0 : index
    %112 = vector.load %arg4[%c10, %c0_85, %c0_86] : memref<16x256x64xbf16, #tpu.memory_space<vmem>>, vector<1x256x64xbf16>
    %113 = vector.shape_cast %112 : vector<1x256x64xbf16> to vector<256x64xbf16>
    %cst_87 = arith.constant dense<0.000000e+00> : vector<32x64xf32>
    %114 = tpu.matmul %30, %113, %cst_87 {dimension_numbers = #tpu.dot_dimension_numbers<[1], [0], [0], [1], [0, 0, 1, 1], [], []>} : vector<32x256xbf16>, vector<256x64xbf16>, vector<32x64xf32> -> vector<32x64xf32>
    %c10_88 = arith.constant 10 : index
    %c0_89 = arith.constant 0 : index
    %c0_90 = arith.constant 0 : index
    %115 = vector.load %arg5[%c10_88, %c0_89, %c0_90] : memref<16x64x32xbf16, #tpu.memory_space<vmem>>, vector<1x64x32xbf16>
    %116 = vector.shape_cast %115 : vector<1x64x32xbf16> to vector<64x32xbf16>
    %117 = arith.truncf %114 : vector<32x64xf32> to vector<32x64xbf16>
    %cst_91 = arith.constant dense<0.000000e+00> : vector<64x64xf32>
    %118 = tpu.matmul %116, %117, %cst_91 {dimension_numbers = #tpu.dot_dimension_numbers<[1], [0], [0], [1], [0, 0, 1, 1], [], []>} : vector<64x32xbf16>, vector<32x64xbf16>, vector<64x64xf32> -> vector<64x64xf32>
    %119 = arith.addf %111, %118 : vector<64x64xf32>
    %c11 = arith.constant 11 : index
    %c0_92 = arith.constant 0 : index
    %c0_93 = arith.constant 0 : index
    %120 = vector.load %arg4[%c11, %c0_92, %c0_93] : memref<16x256x64xbf16, #tpu.memory_space<vmem>>, vector<1x256x64xbf16>
    %121 = vector.shape_cast %120 : vector<1x256x64xbf16> to vector<256x64xbf16>
    %cst_94 = arith.constant dense<0.000000e+00> : vector<32x64xf32>
    %122 = tpu.matmul %30, %121, %cst_94 {dimension_numbers = #tpu.dot_dimension_numbers<[1], [0], [0], [1], [0, 0, 1, 1], [], []>} : vector<32x256xbf16>, vector<256x64xbf16>, vector<32x64xf32> -> vector<32x64xf32>
    %c11_95 = arith.constant 11 : index
    %c0_96 = arith.constant 0 : index
    %c0_97 = arith.constant 0 : index
    %123 = vector.load %arg5[%c11_95, %c0_96, %c0_97] : memref<16x64x32xbf16, #tpu.memory_space<vmem>>, vector<1x64x32xbf16>
    %124 = vector.shape_cast %123 : vector<1x64x32xbf16> to vector<64x32xbf16>
    %125 = arith.truncf %122 : vector<32x64xf32> to vector<32x64xbf16>
    %cst_98 = arith.constant dense<0.000000e+00> : vector<64x64xf32>
    %126 = tpu.matmul %124, %125, %cst_98 {dimension_numbers = #tpu.dot_dimension_numbers<[1], [0], [0], [1], [0, 0, 1, 1], [], []>} : vector<64x32xbf16>, vector<32x64xbf16>, vector<64x64xf32> -> vector<64x64xf32>
    %127 = arith.addf %119, %126 : vector<64x64xf32>
    %c12 = arith.constant 12 : index
    %c0_99 = arith.constant 0 : index
    %c0_100 = arith.constant 0 : index
    %128 = vector.load %arg4[%c12, %c0_99, %c0_100] : memref<16x256x64xbf16, #tpu.memory_space<vmem>>, vector<1x256x64xbf16>
    %129 = vector.shape_cast %128 : vector<1x256x64xbf16> to vector<256x64xbf16>
    %cst_101 = arith.constant dense<0.000000e+00> : vector<32x64xf32>
    %130 = tpu.matmul %30, %129, %cst_101 {dimension_numbers = #tpu.dot_dimension_numbers<[1], [0], [0], [1], [0, 0, 1, 1], [], []>} : vector<32x256xbf16>, vector<256x64xbf16>, vector<32x64xf32> -> vector<32x64xf32>
    %c12_102 = arith.constant 12 : index
    %c0_103 = arith.constant 0 : index
    %c0_104 = arith.constant 0 : index
    %131 = vector.load %arg5[%c12_102, %c0_103, %c0_104] : memref<16x64x32xbf16, #tpu.memory_space<vmem>>, vector<1x64x32xbf16>
    %132 = vector.shape_cast %131 : vector<1x64x32xbf16> to vector<64x32xbf16>
    %133 = arith.truncf %130 : vector<32x64xf32> to vector<32x64xbf16>
    %cst_105 = arith.constant dense<0.000000e+00> : vector<64x64xf32>
    %134 = tpu.matmul %132, %133, %cst_105 {dimension_numbers = #tpu.dot_dimension_numbers<[1], [0], [0], [1], [0, 0, 1, 1], [], []>} : vector<64x32xbf16>, vector<32x64xbf16>, vector<64x64xf32> -> vector<64x64xf32>
    %135 = arith.addf %127, %134 : vector<64x64xf32>
    %c13 = arith.constant 13 : index
    %c0_106 = arith.constant 0 : index
    %c0_107 = arith.constant 0 : index
    %136 = vector.load %arg4[%c13, %c0_106, %c0_107] : memref<16x256x64xbf16, #tpu.memory_space<vmem>>, vector<1x256x64xbf16>
    %137 = vector.shape_cast %136 : vector<1x256x64xbf16> to vector<256x64xbf16>
    %cst_108 = arith.constant dense<0.000000e+00> : vector<32x64xf32>
    %138 = tpu.matmul %30, %137, %cst_108 {dimension_numbers = #tpu.dot_dimension_numbers<[1], [0], [0], [1], [0, 0, 1, 1], [], []>} : vector<32x256xbf16>, vector<256x64xbf16>, vector<32x64xf32> -> vector<32x64xf32>
    %c13_109 = arith.constant 13 : index
    %c0_110 = arith.constant 0 : index
    %c0_111 = arith.constant 0 : index
    %139 = vector.load %arg5[%c13_109, %c0_110, %c0_111] : memref<16x64x32xbf16, #tpu.memory_space<vmem>>, vector<1x64x32xbf16>
    %140 = vector.shape_cast %139 : vector<1x64x32xbf16> to vector<64x32xbf16>
    %141 = arith.truncf %138 : vector<32x64xf32> to vector<32x64xbf16>
    %cst_112 = arith.constant dense<0.000000e+00> : vector<64x64xf32>
    %142 = tpu.matmul %140, %141, %cst_112 {dimension_numbers = #tpu.dot_dimension_numbers<[1], [0], [0], [1], [0, 0, 1, 1], [], []>} : vector<64x32xbf16>, vector<32x64xbf16>, vector<64x64xf32> -> vector<64x64xf32>
    %143 = arith.addf %135, %142 : vector<64x64xf32>
    %c14 = arith.constant 14 : index
    %c0_113 = arith.constant 0 : index
    %c0_114 = arith.constant 0 : index
    %144 = vector.load %arg4[%c14, %c0_113, %c0_114] : memref<16x256x64xbf16, #tpu.memory_space<vmem>>, vector<1x256x64xbf16>
    %145 = vector.shape_cast %144 : vector<1x256x64xbf16> to vector<256x64xbf16>
    %cst_115 = arith.constant dense<0.000000e+00> : vector<32x64xf32>
    %146 = tpu.matmul %30, %145, %cst_115 {dimension_numbers = #tpu.dot_dimension_numbers<[1], [0], [0], [1], [0, 0, 1, 1], [], []>} : vector<32x256xbf16>, vector<256x64xbf16>, vector<32x64xf32> -> vector<32x64xf32>
    %c14_116 = arith.constant 14 : index
    %c0_117 = arith.constant 0 : index
    %c0_118 = arith.constant 0 : index
    %147 = vector.load %arg5[%c14_116, %c0_117, %c0_118] : memref<16x64x32xbf16, #tpu.memory_space<vmem>>, vector<1x64x32xbf16>
    %148 = vector.shape_cast %147 : vector<1x64x32xbf16> to vector<64x32xbf16>
    %149 = arith.truncf %146 : vector<32x64xf32> to vector<32x64xbf16>
    %cst_119 = arith.constant dense<0.000000e+00> : vector<64x64xf32>
    %150 = tpu.matmul %148, %149, %cst_119 {dimension_numbers = #tpu.dot_dimension_numbers<[1], [0], [0], [1], [0, 0, 1, 1], [], []>} : vector<64x32xbf16>, vector<32x64xbf16>, vector<64x64xf32> -> vector<64x64xf32>
    %151 = arith.addf %143, %150 : vector<64x64xf32>
    %c15 = arith.constant 15 : index
    %c0_120 = arith.constant 0 : index
    %c0_121 = arith.constant 0 : index
    %152 = vector.load %arg4[%c15, %c0_120, %c0_121] : memref<16x256x64xbf16, #tpu.memory_space<vmem>>, vector<1x256x64xbf16>
    %153 = vector.shape_cast %152 : vector<1x256x64xbf16> to vector<256x64xbf16>
    %cst_122 = arith.constant dense<0.000000e+00> : vector<32x64xf32>
    %154 = tpu.matmul %30, %153, %cst_122 {dimension_numbers = #tpu.dot_dimension_numbers<[1], [0], [0], [1], [0, 0, 1, 1], [], []>} : vector<32x256xbf16>, vector<256x64xbf16>, vector<32x64xf32> -> vector<32x64xf32>
    %c15_123 = arith.constant 15 : index
    %c0_124 = arith.constant 0 : index
    %c0_125 = arith.constant 0 : index
    %155 = vector.load %arg5[%c15_123, %c0_124, %c0_125] : memref<16x64x32xbf16, #tpu.memory_space<vmem>>, vector<1x64x32xbf16>
    %156 = vector.shape_cast %155 : vector<1x64x32xbf16> to vector<64x32xbf16>
    %157 = arith.truncf %154 : vector<32x64xf32> to vector<32x64xbf16>
    %cst_126 = arith.constant dense<0.000000e+00> : vector<64x64xf32>
    %158 = tpu.matmul %156, %157, %cst_126 {dimension_numbers = #tpu.dot_dimension_numbers<[1], [0], [0], [1], [0, 0, 1, 1], [], []>} : vector<64x32xbf16>, vector<32x64xbf16>, vector<64x64xf32> -> vector<64x64xf32>
    %159 = arith.addf %151, %158 : vector<64x64xf32>
    %c0_127 = arith.constant 0 : index
    %c0_128 = arith.constant 0 : index
    %160 = vector.load %arg6[%c0_127, %c0_128] : memref<64x1xf32, #tpu.memory_space<vmem>>, vector<64x1xf32>
    %161 = vector.broadcast %160 : vector<64x1xf32> to vector<64x64xf32>
    %162 = arith.addf %159, %161 : vector<64x64xf32>
    %cst_129 = arith.constant dense<0.000000e+00> : vector<64xf32>
    %163 = vector.multi_reduction <add>, %162, %cst_129 [1] : vector<64x64xf32> to vector<64xf32>
    %164 = vector.shape_cast %163 : vector<64xf32> to vector<64x1xf32>
    %cst_130 = arith.constant 6.400000e+01 : f32
    %165 = vector.broadcast %cst_130 : f32 to vector<64x1xf32>
    %166 = arith.divf %164, %165 : vector<64x1xf32>
    %167 = vector.broadcast %166 : vector<64x1xf32> to vector<64x64xf32>
    %168 = arith.subf %162, %167 : vector<64x64xf32>
    %169 = arith.mulf %168, %168 : vector<64x64xf32>
    %cst_131 = arith.constant dense<0.000000e+00> : vector<64xf32>
    %170 = vector.multi_reduction <add>, %169, %cst_131 [1] : vector<64x64xf32> to vector<64xf32>
    %171 = vector.shape_cast %170 : vector<64xf32> to vector<64x1xf32>
    %cst_132 = arith.constant 6.400000e+01 : f32
    %172 = vector.broadcast %cst_132 : f32 to vector<64x1xf32>
    %173 = arith.divf %171, %172 : vector<64x1xf32>
    %174 = vector.broadcast %166 : vector<64x1xf32> to vector<64x64xf32>
    %175 = arith.subf %162, %174 : vector<64x64xf32>
    %cst_133 = arith.constant 9.99999974E-6 : f32
    %176 = vector.broadcast %cst_133 : f32 to vector<64x1xf32>
    %177 = arith.addf %173, %176 : vector<64x1xf32>
    %178 = math.rsqrt %177 : vector<64x1xf32>
    %179 = vector.broadcast %178 : vector<64x1xf32> to vector<64x64xf32>
    %180 = arith.mulf %175, %179 : vector<64x64xf32>
    %cst_134 = arith.constant 0.000000e+00 : f32
    %181 = vector.broadcast %cst_134 : f32 to vector<64x64xf32>
    %182 = arith.cmpf oge, %180, %181 : vector<64x64xf32>
    %cst_135 = arith.constant 2.000000e-01 : f32
    %183 = vector.broadcast %cst_135 : f32 to vector<64x64xf32>
    %184 = arith.mulf %183, %180 : vector<64x64xf32>
    %185 = arith.select %182, %180, %184 : vector<64x64xi1>, vector<64x64xf32>
    %186 = arith.truncf %185 : vector<64x64xf32> to vector<64x64xbf16>
    %cst_136 = arith.constant 0.000000e+00 : f32
    %187 = vector.broadcast %cst_136 : f32 to vector<128x16xf32>
    %c0_137 = arith.constant 0 : index
    %c0_138 = arith.constant 0 : index
    %c0_139 = arith.constant 0 : index
    %188 = vector.load %arg7[%c0_137, %c0_138, %c0_139] : memref<16x64x16xbf16, #tpu.memory_space<vmem>>, vector<1x64x16xbf16>
    %189 = vector.shape_cast %188 : vector<1x64x16xbf16> to vector<64x16xbf16>
    %cst_140 = arith.constant dense<0.000000e+00> : vector<64x16xf32>
    %190 = tpu.matmul %186, %189, %cst_140 {dimension_numbers = #tpu.dot_dimension_numbers<[1], [0], [0], [1], [0, 0, 1, 1], [], []>} : vector<64x64xbf16>, vector<64x16xbf16>, vector<64x16xf32> -> vector<64x16xf32>
    %c0_141 = arith.constant 0 : index
    %c0_142 = arith.constant 0 : index
    %c0_143 = arith.constant 0 : index
    %191 = vector.load %arg8[%c0_141, %c0_142, %c0_143] : memref<16x128x64xbf16, #tpu.memory_space<vmem>>, vector<1x128x64xbf16>
    %192 = vector.shape_cast %191 : vector<1x128x64xbf16> to vector<128x64xbf16>
    %193 = arith.truncf %190 : vector<64x16xf32> to vector<64x16xbf16>
    %cst_144 = arith.constant dense<0.000000e+00> : vector<128x16xf32>
    %194 = tpu.matmul %192, %193, %cst_144 {dimension_numbers = #tpu.dot_dimension_numbers<[1], [0], [0], [1], [0, 0, 1, 1], [], []>} : vector<128x64xbf16>, vector<64x16xbf16>, vector<128x16xf32> -> vector<128x16xf32>
    %195 = arith.addf %187, %194 : vector<128x16xf32>
    %c1_145 = arith.constant 1 : index
    %c0_146 = arith.constant 0 : index
    %c0_147 = arith.constant 0 : index
    %196 = vector.load %arg7[%c1_145, %c0_146, %c0_147] : memref<16x64x16xbf16, #tpu.memory_space<vmem>>, vector<1x64x16xbf16>
    %197 = vector.shape_cast %196 : vector<1x64x16xbf16> to vector<64x16xbf16>
    %cst_148 = arith.constant dense<0.000000e+00> : vector<64x16xf32>
    %198 = tpu.matmul %186, %197, %cst_148 {dimension_numbers = #tpu.dot_dimension_numbers<[1], [0], [0], [1], [0, 0, 1, 1], [], []>} : vector<64x64xbf16>, vector<64x16xbf16>, vector<64x16xf32> -> vector<64x16xf32>
    %c1_149 = arith.constant 1 : index
    %c0_150 = arith.constant 0 : index
    %c0_151 = arith.constant 0 : index
    %199 = vector.load %arg8[%c1_149, %c0_150, %c0_151] : memref<16x128x64xbf16, #tpu.memory_space<vmem>>, vector<1x128x64xbf16>
    %200 = vector.shape_cast %199 : vector<1x128x64xbf16> to vector<128x64xbf16>
    %201 = arith.truncf %198 : vector<64x16xf32> to vector<64x16xbf16>
    %cst_152 = arith.constant dense<0.000000e+00> : vector<128x16xf32>
    %202 = tpu.matmul %200, %201, %cst_152 {dimension_numbers = #tpu.dot_dimension_numbers<[1], [0], [0], [1], [0, 0, 1, 1], [], []>} : vector<128x64xbf16>, vector<64x16xbf16>, vector<128x16xf32> -> vector<128x16xf32>
    %203 = arith.addf %195, %202 : vector<128x16xf32>
    %c2_153 = arith.constant 2 : index
    %c0_154 = arith.constant 0 : index
    %c0_155 = arith.constant 0 : index
    %204 = vector.load %arg7[%c2_153, %c0_154, %c0_155] : memref<16x64x16xbf16, #tpu.memory_space<vmem>>, vector<1x64x16xbf16>
    %205 = vector.shape_cast %204 : vector<1x64x16xbf16> to vector<64x16xbf16>
    %cst_156 = arith.constant dense<0.000000e+00> : vector<64x16xf32>
    %206 = tpu.matmul %186, %205, %cst_156 {dimension_numbers = #tpu.dot_dimension_numbers<[1], [0], [0], [1], [0, 0, 1, 1], [], []>} : vector<64x64xbf16>, vector<64x16xbf16>, vector<64x16xf32> -> vector<64x16xf32>
    %c2_157 = arith.constant 2 : index
    %c0_158 = arith.constant 0 : index
    %c0_159 = arith.constant 0 : index
    %207 = vector.load %arg8[%c2_157, %c0_158, %c0_159] : memref<16x128x64xbf16, #tpu.memory_space<vmem>>, vector<1x128x64xbf16>
    %208 = vector.shape_cast %207 : vector<1x128x64xbf16> to vector<128x64xbf16>
    %209 = arith.truncf %206 : vector<64x16xf32> to vector<64x16xbf16>
    %cst_160 = arith.constant dense<0.000000e+00> : vector<128x16xf32>
    %210 = tpu.matmul %208, %209, %cst_160 {dimension_numbers = #tpu.dot_dimension_numbers<[1], [0], [0], [1], [0, 0, 1, 1], [], []>} : vector<128x64xbf16>, vector<64x16xbf16>, vector<128x16xf32> -> vector<128x16xf32>
    %211 = arith.addf %203, %210 : vector<128x16xf32>
    %c3_161 = arith.constant 3 : index
    %c0_162 = arith.constant 0 : index
    %c0_163 = arith.constant 0 : index
    %212 = vector.load %arg7[%c3_161, %c0_162, %c0_163] : memref<16x64x16xbf16, #tpu.memory_space<vmem>>, vector<1x64x16xbf16>
    %213 = vector.shape_cast %212 : vector<1x64x16xbf16> to vector<64x16xbf16>
    %cst_164 = arith.constant dense<0.000000e+00> : vector<64x16xf32>
    %214 = tpu.matmul %186, %213, %cst_164 {dimension_numbers = #tpu.dot_dimension_numbers<[1], [0], [0], [1], [0, 0, 1, 1], [], []>} : vector<64x64xbf16>, vector<64x16xbf16>, vector<64x16xf32> -> vector<64x16xf32>
    %c3_165 = arith.constant 3 : index
    %c0_166 = arith.constant 0 : index
    %c0_167 = arith.constant 0 : index
    %215 = vector.load %arg8[%c3_165, %c0_166, %c0_167] : memref<16x128x64xbf16, #tpu.memory_space<vmem>>, vector<1x128x64xbf16>
    %216 = vector.shape_cast %215 : vector<1x128x64xbf16> to vector<128x64xbf16>
    %217 = arith.truncf %214 : vector<64x16xf32> to vector<64x16xbf16>
    %cst_168 = arith.constant dense<0.000000e+00> : vector<128x16xf32>
    %218 = tpu.matmul %216, %217, %cst_168 {dimension_numbers = #tpu.dot_dimension_numbers<[1], [0], [0], [1], [0, 0, 1, 1], [], []>} : vector<128x64xbf16>, vector<64x16xbf16>, vector<128x16xf32> -> vector<128x16xf32>
    %219 = arith.addf %211, %218 : vector<128x16xf32>
    %c4_169 = arith.constant 4 : index
    %c0_170 = arith.constant 0 : index
    %c0_171 = arith.constant 0 : index
    %220 = vector.load %arg7[%c4_169, %c0_170, %c0_171] : memref<16x64x16xbf16, #tpu.memory_space<vmem>>, vector<1x64x16xbf16>
    %221 = vector.shape_cast %220 : vector<1x64x16xbf16> to vector<64x16xbf16>
    %cst_172 = arith.constant dense<0.000000e+00> : vector<64x16xf32>
    %222 = tpu.matmul %186, %221, %cst_172 {dimension_numbers = #tpu.dot_dimension_numbers<[1], [0], [0], [1], [0, 0, 1, 1], [], []>} : vector<64x64xbf16>, vector<64x16xbf16>, vector<64x16xf32> -> vector<64x16xf32>
    %c4_173 = arith.constant 4 : index
    %c0_174 = arith.constant 0 : index
    %c0_175 = arith.constant 0 : index
    %223 = vector.load %arg8[%c4_173, %c0_174, %c0_175] : memref<16x128x64xbf16, #tpu.memory_space<vmem>>, vector<1x128x64xbf16>
    %224 = vector.shape_cast %223 : vector<1x128x64xbf16> to vector<128x64xbf16>
    %225 = arith.truncf %222 : vector<64x16xf32> to vector<64x16xbf16>
    %cst_176 = arith.constant dense<0.000000e+00> : vector<128x16xf32>
    %226 = tpu.matmul %224, %225, %cst_176 {dimension_numbers = #tpu.dot_dimension_numbers<[1], [0], [0], [1], [0, 0, 1, 1], [], []>} : vector<128x64xbf16>, vector<64x16xbf16>, vector<128x16xf32> -> vector<128x16xf32>
    %227 = arith.addf %219, %226 : vector<128x16xf32>
    %c5_177 = arith.constant 5 : index
    %c0_178 = arith.constant 0 : index
    %c0_179 = arith.constant 0 : index
    %228 = vector.load %arg7[%c5_177, %c0_178, %c0_179] : memref<16x64x16xbf16, #tpu.memory_space<vmem>>, vector<1x64x16xbf16>
    %229 = vector.shape_cast %228 : vector<1x64x16xbf16> to vector<64x16xbf16>
    %cst_180 = arith.constant dense<0.000000e+00> : vector<64x16xf32>
    %230 = tpu.matmul %186, %229, %cst_180 {dimension_numbers = #tpu.dot_dimension_numbers<[1], [0], [0], [1], [0, 0, 1, 1], [], []>} : vector<64x64xbf16>, vector<64x16xbf16>, vector<64x16xf32> -> vector<64x16xf32>
    %c5_181 = arith.constant 5 : index
    %c0_182 = arith.constant 0 : index
    %c0_183 = arith.constant 0 : index
    %231 = vector.load %arg8[%c5_181, %c0_182, %c0_183] : memref<16x128x64xbf16, #tpu.memory_space<vmem>>, vector<1x128x64xbf16>
    %232 = vector.shape_cast %231 : vector<1x128x64xbf16> to vector<128x64xbf16>
    %233 = arith.truncf %230 : vector<64x16xf32> to vector<64x16xbf16>
    %cst_184 = arith.constant dense<0.000000e+00> : vector<128x16xf32>
    %234 = tpu.matmul %232, %233, %cst_184 {dimension_numbers = #tpu.dot_dimension_numbers<[1], [0], [0], [1], [0, 0, 1, 1], [], []>} : vector<128x64xbf16>, vector<64x16xbf16>, vector<128x16xf32> -> vector<128x16xf32>
    %235 = arith.addf %227, %234 : vector<128x16xf32>
    %c6_185 = arith.constant 6 : index
    %c0_186 = arith.constant 0 : index
    %c0_187 = arith.constant 0 : index
    %236 = vector.load %arg7[%c6_185, %c0_186, %c0_187] : memref<16x64x16xbf16, #tpu.memory_space<vmem>>, vector<1x64x16xbf16>
    %237 = vector.shape_cast %236 : vector<1x64x16xbf16> to vector<64x16xbf16>
    %cst_188 = arith.constant dense<0.000000e+00> : vector<64x16xf32>
    %238 = tpu.matmul %186, %237, %cst_188 {dimension_numbers = #tpu.dot_dimension_numbers<[1], [0], [0], [1], [0, 0, 1, 1], [], []>} : vector<64x64xbf16>, vector<64x16xbf16>, vector<64x16xf32> -> vector<64x16xf32>
    %c6_189 = arith.constant 6 : index
    %c0_190 = arith.constant 0 : index
    %c0_191 = arith.constant 0 : index
    %239 = vector.load %arg8[%c6_189, %c0_190, %c0_191] : memref<16x128x64xbf16, #tpu.memory_space<vmem>>, vector<1x128x64xbf16>
    %240 = vector.shape_cast %239 : vector<1x128x64xbf16> to vector<128x64xbf16>
    %241 = arith.truncf %238 : vector<64x16xf32> to vector<64x16xbf16>
    %cst_192 = arith.constant dense<0.000000e+00> : vector<128x16xf32>
    %242 = tpu.matmul %240, %241, %cst_192 {dimension_numbers = #tpu.dot_dimension_numbers<[1], [0], [0], [1], [0, 0, 1, 1], [], []>} : vector<128x64xbf16>, vector<64x16xbf16>, vector<128x16xf32> -> vector<128x16xf32>
    %243 = arith.addf %235, %242 : vector<128x16xf32>
    %c7_193 = arith.constant 7 : index
    %c0_194 = arith.constant 0 : index
    %c0_195 = arith.constant 0 : index
    %244 = vector.load %arg7[%c7_193, %c0_194, %c0_195] : memref<16x64x16xbf16, #tpu.memory_space<vmem>>, vector<1x64x16xbf16>
    %245 = vector.shape_cast %244 : vector<1x64x16xbf16> to vector<64x16xbf16>
    %cst_196 = arith.constant dense<0.000000e+00> : vector<64x16xf32>
    %246 = tpu.matmul %186, %245, %cst_196 {dimension_numbers = #tpu.dot_dimension_numbers<[1], [0], [0], [1], [0, 0, 1, 1], [], []>} : vector<64x64xbf16>, vector<64x16xbf16>, vector<64x16xf32> -> vector<64x16xf32>
    %c7_197 = arith.constant 7 : index
    %c0_198 = arith.constant 0 : index
    %c0_199 = arith.constant 0 : index
    %247 = vector.load %arg8[%c7_197, %c0_198, %c0_199] : memref<16x128x64xbf16, #tpu.memory_space<vmem>>, vector<1x128x64xbf16>
    %248 = vector.shape_cast %247 : vector<1x128x64xbf16> to vector<128x64xbf16>
    %249 = arith.truncf %246 : vector<64x16xf32> to vector<64x16xbf16>
    %cst_200 = arith.constant dense<0.000000e+00> : vector<128x16xf32>
    %250 = tpu.matmul %248, %249, %cst_200 {dimension_numbers = #tpu.dot_dimension_numbers<[1], [0], [0], [1], [0, 0, 1, 1], [], []>} : vector<128x64xbf16>, vector<64x16xbf16>, vector<128x16xf32> -> vector<128x16xf32>
    %251 = arith.addf %243, %250 : vector<128x16xf32>
    %c8_201 = arith.constant 8 : index
    %c0_202 = arith.constant 0 : index
    %c0_203 = arith.constant 0 : index
    %252 = vector.load %arg7[%c8_201, %c0_202, %c0_203] : memref<16x64x16xbf16, #tpu.memory_space<vmem>>, vector<1x64x16xbf16>
    %253 = vector.shape_cast %252 : vector<1x64x16xbf16> to vector<64x16xbf16>
    %cst_204 = arith.constant dense<0.000000e+00> : vector<64x16xf32>
    %254 = tpu.matmul %186, %253, %cst_204 {dimension_numbers = #tpu.dot_dimension_numbers<[1], [0], [0], [1], [0, 0, 1, 1], [], []>} : vector<64x64xbf16>, vector<64x16xbf16>, vector<64x16xf32> -> vector<64x16xf32>
    %c8_205 = arith.constant 8 : index
    %c0_206 = arith.constant 0 : index
    %c0_207 = arith.constant 0 : index
    %255 = vector.load %arg8[%c8_205, %c0_206, %c0_207] : memref<16x128x64xbf16, #tpu.memory_space<vmem>>, vector<1x128x64xbf16>
    %256 = vector.shape_cast %255 : vector<1x128x64xbf16> to vector<128x64xbf16>
    %257 = arith.truncf %254 : vector<64x16xf32> to vector<64x16xbf16>
    %cst_208 = arith.constant dense<0.000000e+00> : vector<128x16xf32>
    %258 = tpu.matmul %256, %257, %cst_208 {dimension_numbers = #tpu.dot_dimension_numbers<[1], [0], [0], [1], [0, 0, 1, 1], [], []>} : vector<128x64xbf16>, vector<64x16xbf16>, vector<128x16xf32> -> vector<128x16xf32>
    %259 = arith.addf %251, %258 : vector<128x16xf32>
    %c9_209 = arith.constant 9 : index
    %c0_210 = arith.constant 0 : index
    %c0_211 = arith.constant 0 : index
    %260 = vector.load %arg7[%c9_209, %c0_210, %c0_211] : memref<16x64x16xbf16, #tpu.memory_space<vmem>>, vector<1x64x16xbf16>
    %261 = vector.shape_cast %260 : vector<1x64x16xbf16> to vector<64x16xbf16>
    %cst_212 = arith.constant dense<0.000000e+00> : vector<64x16xf32>
    %262 = tpu.matmul %186, %261, %cst_212 {dimension_numbers = #tpu.dot_dimension_numbers<[1], [0], [0], [1], [0, 0, 1, 1], [], []>} : vector<64x64xbf16>, vector<64x16xbf16>, vector<64x16xf32> -> vector<64x16xf32>
    %c9_213 = arith.constant 9 : index
    %c0_214 = arith.constant 0 : index
    %c0_215 = arith.constant 0 : index
    %263 = vector.load %arg8[%c9_213, %c0_214, %c0_215] : memref<16x128x64xbf16, #tpu.memory_space<vmem>>, vector<1x128x64xbf16>
    %264 = vector.shape_cast %263 : vector<1x128x64xbf16> to vector<128x64xbf16>
    %265 = arith.truncf %262 : vector<64x16xf32> to vector<64x16xbf16>
    %cst_216 = arith.constant dense<0.000000e+00> : vector<128x16xf32>
    %266 = tpu.matmul %264, %265, %cst_216 {dimension_numbers = #tpu.dot_dimension_numbers<[1], [0], [0], [1], [0, 0, 1, 1], [], []>} : vector<128x64xbf16>, vector<64x16xbf16>, vector<128x16xf32> -> vector<128x16xf32>
    %267 = arith.addf %259, %266 : vector<128x16xf32>
    %c10_217 = arith.constant 10 : index
    %c0_218 = arith.constant 0 : index
    %c0_219 = arith.constant 0 : index
    %268 = vector.load %arg7[%c10_217, %c0_218, %c0_219] : memref<16x64x16xbf16, #tpu.memory_space<vmem>>, vector<1x64x16xbf16>
    %269 = vector.shape_cast %268 : vector<1x64x16xbf16> to vector<64x16xbf16>
    %cst_220 = arith.constant dense<0.000000e+00> : vector<64x16xf32>
    %270 = tpu.matmul %186, %269, %cst_220 {dimension_numbers = #tpu.dot_dimension_numbers<[1], [0], [0], [1], [0, 0, 1, 1], [], []>} : vector<64x64xbf16>, vector<64x16xbf16>, vector<64x16xf32> -> vector<64x16xf32>
    %c10_221 = arith.constant 10 : index
    %c0_222 = arith.constant 0 : index
    %c0_223 = arith.constant 0 : index
    %271 = vector.load %arg8[%c10_221, %c0_222, %c0_223] : memref<16x128x64xbf16, #tpu.memory_space<vmem>>, vector<1x128x64xbf16>
    %272 = vector.shape_cast %271 : vector<1x128x64xbf16> to vector<128x64xbf16>
    %273 = arith.truncf %270 : vector<64x16xf32> to vector<64x16xbf16>
    %cst_224 = arith.constant dense<0.000000e+00> : vector<128x16xf32>
    %274 = tpu.matmul %272, %273, %cst_224 {dimension_numbers = #tpu.dot_dimension_numbers<[1], [0], [0], [1], [0, 0, 1, 1], [], []>} : vector<128x64xbf16>, vector<64x16xbf16>, vector<128x16xf32> -> vector<128x16xf32>
    %275 = arith.addf %267, %274 : vector<128x16xf32>
    %c11_225 = arith.constant 11 : index
    %c0_226 = arith.constant 0 : index
    %c0_227 = arith.constant 0 : index
    %276 = vector.load %arg7[%c11_225, %c0_226, %c0_227] : memref<16x64x16xbf16, #tpu.memory_space<vmem>>, vector<1x64x16xbf16>
    %277 = vector.shape_cast %276 : vector<1x64x16xbf16> to vector<64x16xbf16>
    %cst_228 = arith.constant dense<0.000000e+00> : vector<64x16xf32>
    %278 = tpu.matmul %186, %277, %cst_228 {dimension_numbers = #tpu.dot_dimension_numbers<[1], [0], [0], [1], [0, 0, 1, 1], [], []>} : vector<64x64xbf16>, vector<64x16xbf16>, vector<64x16xf32> -> vector<64x16xf32>
    %c11_229 = arith.constant 11 : index
    %c0_230 = arith.constant 0 : index
    %c0_231 = arith.constant 0 : index
    %279 = vector.load %arg8[%c11_229, %c0_230, %c0_231] : memref<16x128x64xbf16, #tpu.memory_space<vmem>>, vector<1x128x64xbf16>
    %280 = vector.shape_cast %279 : vector<1x128x64xbf16> to vector<128x64xbf16>
    %281 = arith.truncf %278 : vector<64x16xf32> to vector<64x16xbf16>
    %cst_232 = arith.constant dense<0.000000e+00> : vector<128x16xf32>
    %282 = tpu.matmul %280, %281, %cst_232 {dimension_numbers = #tpu.dot_dimension_numbers<[1], [0], [0], [1], [0, 0, 1, 1], [], []>} : vector<128x64xbf16>, vector<64x16xbf16>, vector<128x16xf32> -> vector<128x16xf32>
    %283 = arith.addf %275, %282 : vector<128x16xf32>
    %c12_233 = arith.constant 12 : index
    %c0_234 = arith.constant 0 : index
    %c0_235 = arith.constant 0 : index
    %284 = vector.load %arg7[%c12_233, %c0_234, %c0_235] : memref<16x64x16xbf16, #tpu.memory_space<vmem>>, vector<1x64x16xbf16>
    %285 = vector.shape_cast %284 : vector<1x64x16xbf16> to vector<64x16xbf16>
    %cst_236 = arith.constant dense<0.000000e+00> : vector<64x16xf32>
    %286 = tpu.matmul %186, %285, %cst_236 {dimension_numbers = #tpu.dot_dimension_numbers<[1], [0], [0], [1], [0, 0, 1, 1], [], []>} : vector<64x64xbf16>, vector<64x16xbf16>, vector<64x16xf32> -> vector<64x16xf32>
    %c12_237 = arith.constant 12 : index
    %c0_238 = arith.constant 0 : index
    %c0_239 = arith.constant 0 : index
    %287 = vector.load %arg8[%c12_237, %c0_238, %c0_239] : memref<16x128x64xbf16, #tpu.memory_space<vmem>>, vector<1x128x64xbf16>
    %288 = vector.shape_cast %287 : vector<1x128x64xbf16> to vector<128x64xbf16>
    %289 = arith.truncf %286 : vector<64x16xf32> to vector<64x16xbf16>
    %cst_240 = arith.constant dense<0.000000e+00> : vector<128x16xf32>
    %290 = tpu.matmul %288, %289, %cst_240 {dimension_numbers = #tpu.dot_dimension_numbers<[1], [0], [0], [1], [0, 0, 1, 1], [], []>} : vector<128x64xbf16>, vector<64x16xbf16>, vector<128x16xf32> -> vector<128x16xf32>
    %291 = arith.addf %283, %290 : vector<128x16xf32>
    %c13_241 = arith.constant 13 : index
    %c0_242 = arith.constant 0 : index
    %c0_243 = arith.constant 0 : index
    %292 = vector.load %arg7[%c13_241, %c0_242, %c0_243] : memref<16x64x16xbf16, #tpu.memory_space<vmem>>, vector<1x64x16xbf16>
    %293 = vector.shape_cast %292 : vector<1x64x16xbf16> to vector<64x16xbf16>
    %cst_244 = arith.constant dense<0.000000e+00> : vector<64x16xf32>
    %294 = tpu.matmul %186, %293, %cst_244 {dimension_numbers = #tpu.dot_dimension_numbers<[1], [0], [0], [1], [0, 0, 1, 1], [], []>} : vector<64x64xbf16>, vector<64x16xbf16>, vector<64x16xf32> -> vector<64x16xf32>
    %c13_245 = arith.constant 13 : index
    %c0_246 = arith.constant 0 : index
    %c0_247 = arith.constant 0 : index
    %295 = vector.load %arg8[%c13_245, %c0_246, %c0_247] : memref<16x128x64xbf16, #tpu.memory_space<vmem>>, vector<1x128x64xbf16>
    %296 = vector.shape_cast %295 : vector<1x128x64xbf16> to vector<128x64xbf16>
    %297 = arith.truncf %294 : vector<64x16xf32> to vector<64x16xbf16>
    %cst_248 = arith.constant dense<0.000000e+00> : vector<128x16xf32>
    %298 = tpu.matmul %296, %297, %cst_248 {dimension_numbers = #tpu.dot_dimension_numbers<[1], [0], [0], [1], [0, 0, 1, 1], [], []>} : vector<128x64xbf16>, vector<64x16xbf16>, vector<128x16xf32> -> vector<128x16xf32>
    %299 = arith.addf %291, %298 : vector<128x16xf32>
    %c14_249 = arith.constant 14 : index
    %c0_250 = arith.constant 0 : index
    %c0_251 = arith.constant 0 : index
    %300 = vector.load %arg7[%c14_249, %c0_250, %c0_251] : memref<16x64x16xbf16, #tpu.memory_space<vmem>>, vector<1x64x16xbf16>
    %301 = vector.shape_cast %300 : vector<1x64x16xbf16> to vector<64x16xbf16>
    %cst_252 = arith.constant dense<0.000000e+00> : vector<64x16xf32>
    %302 = tpu.matmul %186, %301, %cst_252 {dimension_numbers = #tpu.dot_dimension_numbers<[1], [0], [0], [1], [0, 0, 1, 1], [], []>} : vector<64x64xbf16>, vector<64x16xbf16>, vector<64x16xf32> -> vector<64x16xf32>
    %c14_253 = arith.constant 14 : index
    %c0_254 = arith.constant 0 : index
    %c0_255 = arith.constant 0 : index
    %303 = vector.load %arg8[%c14_253, %c0_254, %c0_255] : memref<16x128x64xbf16, #tpu.memory_space<vmem>>, vector<1x128x64xbf16>
    %304 = vector.shape_cast %303 : vector<1x128x64xbf16> to vector<128x64xbf16>
    %305 = arith.truncf %302 : vector<64x16xf32> to vector<64x16xbf16>
    %cst_256 = arith.constant dense<0.000000e+00> : vector<128x16xf32>
    %306 = tpu.matmul %304, %305, %cst_256 {dimension_numbers = #tpu.dot_dimension_numbers<[1], [0], [0], [1], [0, 0, 1, 1], [], []>} : vector<128x64xbf16>, vector<64x16xbf16>, vector<128x16xf32> -> vector<128x16xf32>
    %307 = arith.addf %299, %306 : vector<128x16xf32>
    %c15_257 = arith.constant 15 : index
    %c0_258 = arith.constant 0 : index
    %c0_259 = arith.constant 0 : index
    %308 = vector.load %arg7[%c15_257, %c0_258, %c0_259] : memref<16x64x16xbf16, #tpu.memory_space<vmem>>, vector<1x64x16xbf16>
    %309 = vector.shape_cast %308 : vector<1x64x16xbf16> to vector<64x16xbf16>
    %cst_260 = arith.constant dense<0.000000e+00> : vector<64x16xf32>
    %310 = tpu.matmul %186, %309, %cst_260 {dimension_numbers = #tpu.dot_dimension_numbers<[1], [0], [0], [1], [0, 0, 1, 1], [], []>} : vector<64x64xbf16>, vector<64x16xbf16>, vector<64x16xf32> -> vector<64x16xf32>
    %c15_261 = arith.constant 15 : index
    %c0_262 = arith.constant 0 : index
    %c0_263 = arith.constant 0 : index
    %311 = vector.load %arg8[%c15_261, %c0_262, %c0_263] : memref<16x128x64xbf16, #tpu.memory_space<vmem>>, vector<1x128x64xbf16>
    %312 = vector.shape_cast %311 : vector<1x128x64xbf16> to vector<128x64xbf16>
    %313 = arith.truncf %310 : vector<64x16xf32> to vector<64x16xbf16>
    %cst_264 = arith.constant dense<0.000000e+00> : vector<128x16xf32>
    %314 = tpu.matmul %312, %313, %cst_264 {dimension_numbers = #tpu.dot_dimension_numbers<[1], [0], [0], [1], [0, 0, 1, 1], [], []>} : vector<128x64xbf16>, vector<64x16xbf16>, vector<128x16xf32> -> vector<128x16xf32>
    %315 = arith.addf %307, %314 : vector<128x16xf32>
    %c0_265 = arith.constant 0 : index
    %c0_266 = arith.constant 0 : index
    %316 = vector.load %arg9[%c0_265, %c0_266] : memref<128x1xf32, #tpu.memory_space<vmem>>, vector<128x1xf32>
    %317 = vector.broadcast %316 : vector<128x1xf32> to vector<128x16xf32>
    %318 = arith.addf %315, %317 : vector<128x16xf32>
    %cst_267 = arith.constant dense<0.000000e+00> : vector<128xf32>
    %319 = vector.multi_reduction <add>, %318, %cst_267 [1] : vector<128x16xf32> to vector<128xf32>
    %320 = vector.shape_cast %319 : vector<128xf32> to vector<128x1xf32>
    %cst_268 = arith.constant 1.600000e+01 : f32
    %321 = vector.broadcast %cst_268 : f32 to vector<128x1xf32>
    %322 = arith.divf %320, %321 : vector<128x1xf32>
    %323 = vector.broadcast %322 : vector<128x1xf32> to vector<128x16xf32>
    %324 = arith.subf %318, %323 : vector<128x16xf32>
    %325 = arith.mulf %324, %324 : vector<128x16xf32>
    %cst_269 = arith.constant dense<0.000000e+00> : vector<128xf32>
    %326 = vector.multi_reduction <add>, %325, %cst_269 [1] : vector<128x16xf32> to vector<128xf32>
    %327 = vector.shape_cast %326 : vector<128xf32> to vector<128x1xf32>
    %cst_270 = arith.constant 1.600000e+01 : f32
    %328 = vector.broadcast %cst_270 : f32 to vector<128x1xf32>
    %329 = arith.divf %327, %328 : vector<128x1xf32>
    %330 = vector.broadcast %322 : vector<128x1xf32> to vector<128x16xf32>
    %331 = arith.subf %318, %330 : vector<128x16xf32>
    %cst_271 = arith.constant 9.99999974E-6 : f32
    %332 = vector.broadcast %cst_271 : f32 to vector<128x1xf32>
    %333 = arith.addf %329, %332 : vector<128x1xf32>
    %334 = math.rsqrt %333 : vector<128x1xf32>
    %335 = vector.broadcast %334 : vector<128x1xf32> to vector<128x16xf32>
    %336 = arith.mulf %331, %335 : vector<128x16xf32>
    %cst_272 = arith.constant 0.000000e+00 : f32
    %337 = vector.broadcast %cst_272 : f32 to vector<128x16xf32>
    %338 = arith.cmpf oge, %336, %337 : vector<128x16xf32>
    %cst_273 = arith.constant 2.000000e-01 : f32
    %339 = vector.broadcast %cst_273 : f32 to vector<128x16xf32>
    %340 = arith.mulf %339, %336 : vector<128x16xf32>
    %341 = arith.select %338, %336, %340 : vector<128x16xi1>, vector<128x16xf32>
    %c0_274 = arith.constant 0 : index
    %c0_275 = arith.constant 0 : index
    %342 = vector.load %arg10[%c0_274, %c0_275] : memref<128x16xf32, #tpu.memory_space<vmem>>, vector<128x16xf32>
    %343 = arith.mulf %341, %342 : vector<128x16xf32>
    %cst_276 = arith.constant dense<0.000000e+00> : vector<128xf32>
    %344 = vector.multi_reduction <add>, %343, %cst_276 [1] : vector<128x16xf32> to vector<128xf32>
    %345 = vector.shape_cast %344 : vector<128xf32> to vector<128x1xf32>
    %cst_277 = arith.constant dense<0.000000e+00> : vector<1xf32>
    %346 = vector.multi_reduction <add>, %345, %cst_277 [0] : vector<128x1xf32> to vector<1xf32>
    %347 = vector.shape_cast %346 : vector<1xf32> to vector<1x1xf32>
    %c0_278 = arith.constant 0 : index
    %c0_279 = arith.constant 0 : index
    %348 = vector.load %arg11[%c0_278, %c0_279] : memref<1x1xf32, #tpu.memory_space<vmem>>, vector<1x1xf32>
    %349 = arith.addf %347, %348 : vector<1x1xf32>
    %350 = vector.shape_cast %349 : vector<1x1xf32> to vector<1x1x1xf32>
    %351 = vector.shape_cast %350 : vector<1x1x1xf32> to vector<1x1x1xf32>
    %352 = vector.broadcast %351 : vector<1x1x1xf32> to vector<1x8x128xf32>
    %c0_280 = arith.constant 0 : index
    %c0_281 = arith.constant 0 : index
    %c0_282 = arith.constant 0 : index
    %353 = vector.load %arg12[%c0_280, %c0_281, %c0_282] : memref<1x8x128xf32, #tpu.memory_space<vmem>>, vector<1x8x128xf32>
    tpu.vector_store %arg12[%c0_280, %c0_281, %c0_282], %352 {strides = array<i32>} : memref<1x8x128xf32, #tpu.memory_space<vmem>>, vector<1x8x128xf32>,
    return
  }
  func.func @transform_0(%arg0: i32) -> (i32, i32, i32) {
    %c0_i32 = arith.constant 0 : i32
    %c0_i32_0 = arith.constant 0 : i32
    %c0_i32_1 = arith.constant 0 : i32
    return %arg0, %c0_i32, %c0_i32_0 : i32, i32, i32
  }
  func.func @transform_1(%arg0: i32) -> (i32, i32) {
    %c0_i32 = arith.constant 0 : i32
    %c0_i32_0 = arith.constant 0 : i32
    %c0_i32_1 = arith.constant 0 : i32
    return %c0_i32, %c0_i32_0 : i32, i32
  }
  func.func @transform_2(%arg0: i32) -> (i32, i32) {
    %c0_i32 = arith.constant 0 : i32
    %c0_i32_0 = arith.constant 0 : i32
    %c0_i32_1 = arith.constant 0 : i32
    return %c0_i32, %c0_i32_0 : i32, i32
  }
  func.func @transform_3(%arg0: i32) -> (i32, i32, i32) {
    %c0_i32 = arith.constant 0 : i32
    %c0_i32_0 = arith.constant 0 : i32
    %c0_i32_1 = arith.constant 0 : i32
    %c0_i32_2 = arith.constant 0 : i32
    return %c0_i32, %c0_i32_0, %c0_i32_1 : i32, i32, i32
  }
  func.func @transform_4(%arg0: i32) -> (i32, i32, i32) {
    %c0_i32 = arith.constant 0 : i32
    %c0_i32_0 = arith.constant 0 : i32
    %c0_i32_1 = arith.constant 0 : i32
    %c0_i32_2 = arith.constant 0 : i32
    return %c0_i32, %c0_i32_0, %c0_i32_1 : i32, i32, i32
  }
  func.func @transform_5(%arg0: i32) -> (i32, i32) {
    %c0_i32 = arith.constant 0 : i32
    %c0_i32_0 = arith.constant 0 : i32
    %c0_i32_1 = arith.constant 0 : i32
    return %c0_i32, %c0_i32_0 : i32, i32
  }
  func.func @transform_6(%arg0: i32) -> (i32, i32, i32) {
    %c0_i32 = arith.constant 0 : i32
    %c0_i32_0 = arith.constant 0 : i32
    %c0_i32_1 = arith.constant 0 : i32
    %c0_i32_2 = arith.constant 0 : i32
    return %c0_i32, %c0_i32_0, %c0_i32_1 : i32, i32, i32
  }
  func.func @transform_7(%arg0: i32) -> (i32, i32, i32) {
    %c0_i32 = arith.constant 0 : i32
    %c0_i32_0 = arith.constant 0 : i32
    %c0_i32_1 = arith.constant 0 : i32
    %c0_i32_2 = arith.constant 0 : i32
    return %c0_i32, %c0_i32_0, %c0_i32_1 : i32, i32, i32
  }
  func.func @transform_8(%arg0: i32) -> (i32, i32) {
    %c0_i32 = arith.constant 0 : i32
    %c0_i32_0 = arith.constant 0 : i32
    %c0_i32_1 = arith.constant 0 : i32
    return %c0_i32, %c0_i32_0 : i32, i32
  }
  func.func @transform_9(%arg0: i32) -> (i32, i32) {
    %c0_i32 = arith.constant 0 : i32
    %c0_i32_0 = arith.constant 0 : i32
    %c0_i32_1 = arith.constant 0 : i32
    return %c0_i32, %c0_i32_0 : i32, i32
  }
  func.func @transform_10(%arg0: i32) -> (i32, i32) {
    %c0_i32 = arith.constant 0 : i32
    %c0_i32_0 = arith.constant 0 : i32
    %c0_i32_1 = arith.constant 0 : i32
    return %c0_i32, %c0_i32_0 : i32, i32
  }
  func.func @transform_11(%arg0: i32) -> (i32, i32, i32) {
    %c0_i32 = arith.constant 0 : i32
    %c0_i32_0 = arith.constant 0 : i32
    %c0_i32_1 = arith.constant 0 : i32
    return %arg0, %c0_i32, %c0_i32_0 : i32, i32, i32
  }
}

</mosaic_0001>

<bundles_post_ra>
// kernel: pix2pix_forward.4
= control target key start
LH: loop header
LB: loop body
LE: loop exit
PB: predicated region body
PF: predicated region fallthrough
CT: control target
= control target key end

     0   :  { %s2008_s12 = smov 0   ;;  %s2010_s13 = smov 0   ;;  %s2556_s0 = inlined_call_operand.vmem [shape: bf16[4,96,4096], index: 0, kind: input, shape index: {}]   ;;  %s2557_s1 = inlined_call_operand.vmem [shape: bf16[8,96], index: 1, kind: input, shape index: {}]   ;;  %s2558_s2 = inlined_call_operand.vmem [shape: f32[8,1], index: 2, kind: input, shape index: {}]   ;;  %s2559_s3 = inlined_call_operand.vmem [shape: bf16[4,8,4096], index: 3, kind: output, shape index: {}]  }
   0x1   :  { %s2012_s14 = smov 0   ;;  %s2014_s15 = smov 0  }
   0x2   :  { %s2016_s16 = smov 0   ;;  %s2018_s17 = smov 0  }
   0x3   :  { %s2020_s18 = smov 0  }
   0x4 LB: > { %s22_s19 = sadd.s32 1, %s1977_s16  ;;  %s25_s20 = sadd.s32 1, %s1981_s17  ;;  %s1985_s18 = sphi %s2020_s18, %s13_s18   ;;  %s1981_s17 = sphi %s2018_s17, %s2565_s17   ;;  %s1977_s16 = sphi %s2016_s16, %s2564_s16   ;;  %s1973_s15 = sphi %s2014_s15, %s2563_s15   ;;  %s1969_s14 = sphi %s2012_s14, %s2562_s14   ;;  %s1965_s13 = sphi %s2010_s13, %s2561_s13   ;;  %s1961_s12 = sphi %s2008_s12, %s2560_s12  }
   0x5   : > { %p23_p0 = scmp.ge.s32.totalorder %s22_s19, 2  ;;  %p41_p1 = scmp.ne.s32.totalorder %s1965_s13, %s1961_s12 }
   0x6   : > { %p42_p2 = scmp.eq.s32.totalorder %s1985_s18, 0  ;;  %s34_s24 = sadd.s32 1, %s1965_s13 }
   0x7   : > { %s2567_s19 = smov (%p23_p0, %s22_s19), 0  ;;  %s2569_s20 = smov (!%p23_p0, %s25_s20), %s1981_s17 }
   0x8   : > { %p43_p3 = por %p42_p2, %p41_p1  ;;  %p27_p4 = scmp.ge.s32.totalorder %s2569_s20, 4 }
   0x9   : > { %s30_s21 = ssub.s32 %s1977_s16, %s2567_s19  ;;  %p1365_p6 = scmp.ge.s32.totalorder %s1985_s18, 8 }
   0xa   : > { %s2571_s20 = smov (%p27_p4, %s2569_s20), 0 }
   0xb   : > { %s29_s22 = ssub.s32 %s1981_s17, %s2571_s20  ;;  %143 = sbr.rel (%p1365_p6) target bundleno = 120 (0x78), region = 24 }
   0xc   : > { %s31_s23 = sor.u32 %s30_s21, %s29_s22 }
   0xd   : > { %p32_p5 = scmp.eq.s32.totalorder %s31_s23, 0 }
   0xf   : > { %s2059_s25 = scalar_select %p32_p5, %s1965_s13, %s34_s24  }
  0x10   : > { %146 = sbr.rel (!%p43_p3) target bundleno = 120 (0x78), region = 28  ;;  %s148_s26 = sand.u32 (%p43_p3), 1, %s1965_s13  }
  0x11   : > { %s1870_s27 = smul.u32 (%p43_p3), 768, %s148_s26  ;;  %s1366_s28 = sshll.u32 (%p43_p3), %s1977_s16, 4 }
  0x12   : > { %s1871_s29 = smul.u32 (%p43_p3), 384, %s1981_s17 }
  0x13   : > { %s2073_s8 = scalar_lea.vmem (%p43_p3), [#allocation2], %s1870_s27 }
  0x14   : > { %s153_s30 = sadd.s32 (%p43_p3), %s1871_s29, %s1366_s28 }
  0x15   : > { %s1367_s4 = sshll.u32 %s153_s30, 2 }
  0x16   : > { %s2068_s7 = scalar_lea.vmem %s2556_s0, %s1367_s4 }
  0x17   : > { %v168_v0 = vld [vmem:[%s2068_s7] sm:$0xff]  ;;  %v170_v1 = vld [vmem:[%s2068_s7 + $0x8] sm:$0xff]  ;;  %v172_v2 = vld [vmem:[%s2068_s7 + $0x10] sm:$0xff] }
  0x18   : > { %169 = vst [vmem:[%s2073_s8] sm:$0xff] %v168_v0  ;;  %v174_v3 = vld [vmem:[%s2068_s7 + $0x18] sm:$0xff]  ;;  %v176_v4 = vld [vmem:[%s2068_s7 + $0x20] sm:$0xff]  ;;  %v178_v5 = vld [vmem:[%s2068_s7 + $0x28] sm:$0xff] }
  0x19   : > { %171 = vst [vmem:[%s2073_s8 + $0x8] sm:$0xff] %v170_v1  ;;  %v180_v6 = vld [vmem:[%s2068_s7 + $0x30] sm:$0xff]  ;;  %v182_v7 = vld [vmem:[%s2068_s7 + $0x38] sm:$0xff]  ;;  %v184_v8 = vld [vmem:[%s2068_s7 + $0x80] sm:$0xff] }
  0x1a   : > { %173 = vst [vmem:[%s2073_s8 + $0x10] sm:$0xff] %v172_v2  ;;  %v186_v9 = vld [vmem:[%s2068_s7 + $0x88] sm:$0xff]  ;;  %v188_v10 = vld [vmem:[%s2068_s7 + $0x90] sm:$0xff]  ;;  %v190_v11 = vld [vmem:[%s2068_s7 + $0x98] sm:$0xff] }
  0x1b   : > { %175 = vst [vmem:[%s2073_s8 + $0x18] sm:$0xff] %v174_v3  ;;  %v192_v12 = vld [vmem:[%s2068_s7 + $0xa0] sm:$0xff]  ;;  %v194_v13 = vld [vmem:[%s2068_s7 + $0xa8] sm:$0xff]  ;;  %v196_v14 = vld [vmem:[%s2068_s7 + $0xb0] sm:$0xff] }
  0x1c   : > { %177 = vst [vmem:[%s2073_s8 + $0x20] sm:$0xff] %v176_v4  ;;  %v198_v15 = vld [vmem:[%s2068_s7 + $0xb8] sm:$0xff]  ;;  %v200_v16 = vld [vmem:[%s2068_s7 + $0x100] sm:$0xff]  ;;  %v202_v17 = vld [vmem:[%s2068_s7 + $0x108] sm:$0xff] }
  0x1d   : > { %179 = vst [vmem:[%s2073_s8 + $0x28] sm:$0xff] %v178_v5  ;;  %v204_v18 = vld [vmem:[%s2068_s7 + $0x110] sm:$0xff]  ;;  %v206_v19 = vld [vmem:[%s2068_s7 + $0x118] sm:$0xff]  ;;  %v208_v20 = vld [vmem:[%s2068_s7 + $0x120] sm:$0xff] }
  0x1e   : > { %181 = vst [vmem:[%s2073_s8 + $0x30] sm:$0xff] %v180_v6  ;;  %v210_v21 = vld [vmem:[%s2068_s7 + $0x128] sm:$0xff]  ;;  %v212_v22 = vld [vmem:[%s2068_s7 + $0x130] sm:$0xff]  ;;  %v214_v23 = vld [vmem:[%s2068_s7 + $0x138] sm:$0xff] }
  0x1f   : > { %183 = vst [vmem:[%s2073_s8 + $0x38] sm:$0xff] %v182_v7  ;;  %v216_v24 = vld [vmem:[%s2068_s7 + $0x180] sm:$0xff]  ;;  %v218_v25 = vld [vmem:[%s2068_s7 + $0x188] sm:$0xff]  ;;  %v220_v26 = vld [vmem:[%s2068_s7 + $0x190] sm:$0xff] }
  0x20   : > { %185 = vst [vmem:[%s2073_s8 + $0x40] sm:$0xff] %v184_v8  ;;  %v222_v27 = vld [vmem:[%s2068_s7 + $0x198] sm:$0xff]  ;;  %v224_v28 = vld [vmem:[%s2068_s7 + $0x1a0] sm:$0xff]  ;;  %v226_v29 = vld [vmem:[%s2068_s7 + $0x1a8] sm:$0xff] }
  0x21   : > { %187 = vst [vmem:[%s2073_s8 + $0x48] sm:$0xff] %v186_v9  ;;  %v228_v30 = vld [vmem:[%s2068_s7 + $0x1b0] sm:$0xff]  ;;  %v230_v31 = vld [vmem:[%s2068_s7 + $0x1b8] sm:$0xff]  ;;  %v232_v32 = vld [vmem:[%s2068_s7 + $0x200] sm:$0xff] }
  0x22   : > { %189 = vst [vmem:[%s2073_s8 + $0x50] sm:$0xff] %v188_v10  ;;  %v234_v33 = vld [vmem:[%s2068_s7 + $0x208] sm:$0xff]  ;;  %v236_v34 = vld [vmem:[%s2068_s7 + $0x210] sm:$0xff]  ;;  %v238_v35 = vld [vmem:[%s2068_s7 + $0x218] sm:$0xff] }
  0x23   : > { %191 = vst [vmem:[%s2073_s8 + $0x58] sm:$0xff] %v190_v11  ;;  %v240_v36 = vld [vmem:[%s2068_s7 + $0x220] sm:$0xff]  ;;  %v242_v37 = vld [vmem:[%s2068_s7 + $0x228] sm:$0xff]  ;;  %v244_v38 = vld [vmem:[%s2068_s7 + $0x230] sm:$0xff] }
  0x24   : > { %193 = vst [vmem:[%s2073_s8 + $0x60] sm:$0xff] %v192_v12  ;;  %v246_v39 = vld [vmem:[%s2068_s7 + $0x238] sm:$0xff]  ;;  %v248_v40 = vld [vmem:[%s2068_s7 + $0x280] sm:$0xff]  ;;  %v250_v41 = vld [vmem:[%s2068_s7 + $0x288] sm:$0xff] }
  0x25   : > { %195 = vst [vmem:[%s2073_s8 + $0x68] sm:$0xff] %v194_v13  ;;  %v252_v42 = vld [vmem:[%s2068_s7 + $0x290] sm:$0xff]  ;;  %v254_v43 = vld [vmem:[%s2068_s7 + $0x298] sm:$0xff]  ;;  %v256_v44 = vld [vmem:[%s2068_s7 + $0x2a0] sm:$0xff] }
  0x26   : > { %197 = vst [vmem:[%s2073_s8 + $0x70] sm:$0xff] %v196_v14  ;;  %v258_v45 = vld [vmem:[%s2068_s7 + $0x2a8] sm:$0xff]  ;;  %v260_v46 = vld [vmem:[%s2068_s7 + $0x2b0] sm:$0xff]  ;;  %v262_v47 = vld [vmem:[%s2068_s7 + $0x2b8] sm:$0xff] }
  0x27   : > { %199 = vst [vmem:[%s2073_s8 + $0x78] sm:$0xff] %v198_v15  ;;  %v264_v48 = vld [vmem:[%s2068_s7 + $0x300] sm:$0xff]  ;;  %v266_v49 = vld [vmem:[%s2068_s7 + $0x308] sm:$0xff]  ;;  %v268_v50 = vld [vmem:[%s2068_s7 + $0x310] sm:$0xff] }
  0x28   : > { %201 = vst [vmem:[%s2073_s8 + $0x80] sm:$0xff] %v200_v16  ;;  %v270_v51 = vld [vmem:[%s2068_s7 + $0x318] sm:$0xff]  ;;  %v272_v52 = vld [vmem:[%s2068_s7 + $0x320] sm:$0xff]  ;;  %v274_v53 = vld [vmem:[%s2068_s7 + $0x328] sm:$0xff] }
  0x29   : > { %203 = vst [vmem:[%s2073_s8 + $0x88] sm:$0xff] %v202_v17  ;;  %v276_v54 = vld [vmem:[%s2068_s7 + $0x330] sm:$0xff]  ;;  %v278_v55 = vld [vmem:[%s2068_s7 + $0x338] sm:$0xff]  ;;  %v280_v56 = vld [vmem:[%s2068_s7 + $0x380] sm:$0xff] }
  0x2a   : > { %205 = vst [vmem:[%s2073_s8 + $0x90] sm:$0xff] %v204_v18  ;;  %v282_v57 = vld [vmem:[%s2068_s7 + $0x388] sm:$0xff]  ;;  %v284_v58 = vld [vmem:[%s2068_s7 + $0x390] sm:$0xff]  ;;  %v286_v59 = vld [vmem:[%s2068_s7 + $0x398] sm:$0xff] }
  0x2b   : > { %207 = vst [vmem:[%s2073_s8 + $0x98] sm:$0xff] %v206_v19  ;;  %v288_v60 = vld [vmem:[%s2068_s7 + $0x3a0] sm:$0xff]  ;;  %v290_v61 = vld [vmem:[%s2068_s7 + $0x3a8] sm:$0xff]  ;;  %v292_v62 = vld [vmem:[%s2068_s7 + $0x3b0] sm:$0xff] }
  0x2c   : > { %209 = vst [vmem:[%s2073_s8 + $0xa0] sm:$0xff] %v208_v20  ;;  %v294_v63 = vld [vmem:[%s2068_s7 + $0x3b8] sm:$0xff]  ;;  %v296_v0 = vld [vmem:[%s2068_s7 + $0x400] sm:$0xff]  ;;  %v298_v1 = vld [vmem:[%s2068_s7 + $0x408] sm:$0xff] }
  0x2d   : > { %211 = vst [vmem:[%s2073_s8 + $0xa8] sm:$0xff] %v210_v21  ;;  %v300_v2 = vld [vmem:[%s2068_s7 + $0x410] sm:$0xff]  ;;  %v302_v3 = vld [vmem:[%s2068_s7 + $0x418] sm:$0xff]  ;;  %v304_v4 = vld [vmem:[%s2068_s7 + $0x420] sm:$0xff] }
  0x2e   : > { %213 = vst [vmem:[%s2073_s8 + $0xb0] sm:$0xff] %v212_v22  ;;  %v306_v5 = vld [vmem:[%s2068_s7 + $0x428] sm:$0xff]  ;;  %v308_v6 = vld [vmem:[%s2068_s7 + $0x430] sm:$0xff]  ;;  %v310_v7 = vld [vmem:[%s2068_s7 + $0x438] sm:$0xff] }
  0x2f   : > { %215 = vst [vmem:[%s2073_s8 + $0xb8] sm:$0xff] %v214_v23  ;;  %v312_v8 = vld [vmem:[%s2068_s7 + $0x480] sm:$0xff]  ;;  %v314_v9 = vld [vmem:[%s2068_s7 + $0x488] sm:$0xff]  ;;  %v316_v10 = vld [vmem:[%s2068_s7 + $0x490] sm:$0xff] }
  0x30   : > { %217 = vst [vmem:[%s2073_s8 + $0xc0] sm:$0xff] %v216_v24  ;;  %v318_v11 = vld [vmem:[%s2068_s7 + $0x498] sm:$0xff]  ;;  %v320_v12 = vld [vmem:[%s2068_s7 + $0x4a0] sm:$0xff]  ;;  %v322_v13 = vld [vmem:[%s2068_s7 + $0x4a8] sm:$0xff] }
  0x31   : > { %219 = vst [vmem:[%s2073_s8 + $0xc8] sm:$0xff] %v218_v25  ;;  %v324_v14 = vld [vmem:[%s2068_s7 + $0x4b0] sm:$0xff]  ;;  %v326_v15 = vld [vmem:[%s2068_s7 + $0x4b8] sm:$0xff]  ;;  %v328_v16 = vld [vmem:[%s2068_s7 + $0x500] sm:$0xff] }
  0x32   : > { %221 = vst [vmem:[%s2073_s8 + $0xd0] sm:$0xff] %v220_v26  ;;  %v330_v17 = vld [vmem:[%s2068_s7 + $0x508] sm:$0xff]  ;;  %v332_v18 = vld [vmem:[%s2068_s7 + $0x510] sm:$0xff]  ;;  %v334_v19 = vld [vmem:[%s2068_s7 + $0x518] sm:$0xff] }
  0x33   : > { %223 = vst [vmem:[%s2073_s8 + $0xd8] sm:$0xff] %v222_v27  ;;  %v336_v20 = vld [vmem:[%s2068_s7 + $0x520] sm:$0xff]  ;;  %v338_v21 = vld [vmem:[%s2068_s7 + $0x528] sm:$0xff]  ;;  %v340_v22 = vld [vmem:[%s2068_s7 + $0x530] sm:$0xff] }
  0x34   : > { %225 = vst [vmem:[%s2073_s8 + $0xe0] sm:$0xff] %v224_v28  ;;  %v342_v23 = vld [vmem:[%s2068_s7 + $0x538] sm:$0xff]  ;;  %v344_v24 = vld [vmem:[%s2068_s7 + $0x580] sm:$0xff]  ;;  %v346_v25 = vld [vmem:[%s2068_s7 + $0x588] sm:$0xff] }
  0x35   : > { %227 = vst [vmem:[%s2073_s8 + $0xe8] sm:$0xff] %v226_v29  ;;  %v348_v26 = vld [vmem:[%s2068_s7 + $0x590] sm:$0xff]  ;;  %v350_v27 = vld [vmem:[%s2068_s7 + $0x598] sm:$0xff]  ;;  %v352_v28 = vld [vmem:[%s2068_s7 + $0x5a0] sm:$0xff] }
  0x36   : > { %229 = vst [vmem:[%s2073_s8 + $0xf0] sm:$0xff] %v228_v30  ;;  %v354_v29 = vld [vmem:[%s2068_s7 + $0x5a8] sm:$0xff]  ;;  %v356_v30 = vld [vmem:[%s2068_s7 + $0x5b0] sm:$0xff] }
  0x37   : > { %231 = vst [vmem:[%s2073_s8 + $0xf8] sm:$0xff] %v230_v31  ;;  %v358_v31 = vld [vmem:[%s2068_s7 + $0x5b8] sm:$0xff] }
  0x38   : > { %233 = vst [vmem:[%s2073_s8 + $0x100] sm:$0xff] %v232_v32 }
  0x39   : > { %235 = vst [vmem:[%s2073_s8 + $0x108] sm:$0xff] %v234_v33 }
  0x3a   : > { %237 = vst [vmem:[%s2073_s8 + $0x110] sm:$0xff] %v236_v34 }
  0x3b   : > { %239 = vst [vmem:[%s2073_s8 + $0x118] sm:$0xff] %v238_v35 }
  0x3c   : > { %241 = vst [vmem:[%s2073_s8 + $0x120] sm:$0xff] %v240_v36 }
  0x3d   : > { %243 = vst [vmem:[%s2073_s8 + $0x128] sm:$0xff] %v242_v37 }
  0x3e   : > { %245 = vst [vmem:[%s2073_s8 + $0x130] sm:$0xff] %v244_v38 }
  0x3f   : > { %247 = vst [vmem:[%s2073_s8 + $0x138] sm:$0xff] %v246_v39 }
  0x40   : > { %249 = vst [vmem:[%s2073_s8 + $0x140] sm:$0xff] %v248_v40 }
  0x41   : > { %251 = vst [vmem:[%s2073_s8 + $0x148] sm:$0xff] %v250_v41 }
  0x42   : > { %253 = vst [vmem:[%s2073_s8 + $0x150] sm:$0xff] %v252_v42 }
  0x43   : > { %255 = vst [vmem:[%s2073_s8 + $0x158] sm:$0xff] %v254_v43 }
  0x44   : > { %257 = vst [vmem:[%s2073_s8 + $0x160] sm:$0xff] %v256_v44 }
  0x45   : > { %259 = vst [vmem:[%s2073_s8 + $0x168] sm:$0xff] %v258_v45 }
  0x46   : > { %261 = vst [vmem:[%s2073_s8 + $0x170] sm:$0xff] %v260_v46 }
  0x47   : > { %263 = vst [vmem:[%s2073_s8 + $0x178] sm:$0xff] %v262_v47 }
  0x48   : > { %265 = vst [vmem:[%s2073_s8 + $0x180] sm:$0xff] %v264_v48 }
  0x49   : > { %267 = vst [vmem:[%s2073_s8 + $0x188] sm:$0xff] %v266_v49 }
  0x4a   : > { %269 = vst [vmem:[%s2073_s8 + $0x190] sm:$0xff] %v268_v50 }
  0x4b   : > { %271 = vst [vmem:[%s2073_s8 + $0x198] sm:$0xff] %v270_v51 }
  0x4c   : > { %273 = vst [vmem:[%s2073_s8 + $0x1a0] sm:$0xff] %v272_v52 }
  0x4d   : > { %275 = vst [vmem:[%s2073_s8 + $0x1a8] sm:$0xff] %v274_v53 }
  0x4e   : > { %277 = vst [vmem:[%s2073_s8 + $0x1b0] sm:$0xff] %v276_v54 }
  0x4f   : > { %279 = vst [vmem:[%s2073_s8 + $0x1b8] sm:$0xff] %v278_v55 }
  0x50   : > { %281 = vst [vmem:[%s2073_s8 + $0x1c0] sm:$0xff] %v280_v56 }
  0x51   : > { %283 = vst [vmem:[%s2073_s8 + $0x1c8] sm:$0xff] %v282_v57 }
  0x52   : > { %285 = vst [vmem:[%s2073_s8 + $0x1d0] sm:$0xff] %v284_v58 }
  0x53   : > { %287 = vst [vmem:[%s2073_s8 + $0x1d8] sm:$0xff] %v286_v59 }
  0x54   : > { %289 = vst [vmem:[%s2073_s8 + $0x1e0] sm:$0xff] %v288_v60 }
  0x55   : > { %291 = vst [vmem:[%s2073_s8 + $0x1e8] sm:$0xff] %v290_v61 }
  0x56   : > { %293 = vst [vmem:[%s2073_s8 + $0x1f0] sm:$0xff] %v292_v62 }
  0x57   : > { %295 = vst [vmem:[%s2073_s8 + $0x1f8] sm:$0xff] %v294_v63 }
  0x58   : > { %297 = vst [vmem:[%s2073_s8 + $0x200] sm:$0xff] %v296_v0 }
  0x59   : > { %299 = vst [vmem:[%s2073_s8 + $0x208] sm:$0xff] %v298_v1 }
  0x5a   : > { %301 = vst [vmem:[%s2073_s8 + $0x210] sm:$0xff] %v300_v2 }
  0x5b   : > { %303 = vst [vmem:[%s2073_s8 + $0x218] sm:$0xff] %v302_v3 }
  0x5c   : > { %305 = vst [vmem:[%s2073_s8 + $0x220] sm:$0xff] %v304_v4 }
  0x5d   : > { %307 = vst [vmem:[%s2073_s8 + $0x228] sm:$0xff] %v306_v5 }
  0x5e   : > { %309 = vst [vmem:[%s2073_s8 + $0x230] sm:$0xff] %v308_v6 }
  0x5f   : > { %311 = vst [vmem:[%s2073_s8 + $0x238] sm:$0xff] %v310_v7 }
  0x60   : > { %313 = vst [vmem:[%s2073_s8 + $0x240] sm:$0xff] %v312_v8 }
  0x61   : > { %315 = vst [vmem:[%s2073_s8 + $0x248] sm:$0xff] %v314_v9 }
  0x62   : > { %317 = vst [vmem:[%s2073_s8 + $0x250] sm:$0xff] %v316_v10 }
  0x63   : > { %319 = vst [vmem:[%s2073_s8 + $0x258] sm:$0xff] %v318_v11 }
  0x64   : > { %321 = vst [vmem:[%s2073_s8 + $0x260] sm:$0xff] %v320_v12 }
  0x65   : > { %323 = vst [vmem:[%s2073_s8 + $0x268] sm:$0xff] %v322_v13 }
  0x66   : > { %325 = vst [vmem:[%s2073_s8 + $0x270] sm:$0xff] %v324_v14 }
  0x67   : > { %327 = vst [vmem:[%s2073_s8 + $0x278] sm:$0xff] %v326_v15 }
  0x68   : > { %329 = vst [vmem:[%s2073_s8 + $0x280] sm:$0xff] %v328_v16 }
  0x69   : > { %331 = vst [vmem:[%s2073_s8 + $0x288] sm:$0xff] %v330_v17 }
  0x6a   : > { %333 = vst [vmem:[%s2073_s8 + $0x290] sm:$0xff] %v332_v18 }
  0x6b   : > { %335 = vst [vmem:[%s2073_s8 + $0x298] sm:$0xff] %v334_v19 }
  0x6c   : > { %337 = vst [vmem:[%s2073_s8 + $0x2a0] sm:$0xff] %v336_v20 }
  0x6d   : > { %339 = vst [vmem:[%s2073_s8 + $0x2a8] sm:$0xff] %v338_v21 }
  0x6e   : > { %341 = vst [vmem:[%s2073_s8 + $0x2b0] sm:$0xff] %v340_v22 }
  0x6f   : > { %343 = vst [vmem:[%s2073_s8 + $0x2b8] sm:$0xff] %v342_v23 }
  0x70   : > { %345 = vst [vmem:[%s2073_s8 + $0x2c0] sm:$0xff] %v344_v24 }
  0x71   : > { %347 = vst [vmem:[%s2073_s8 + $0x2c8] sm:$0xff] %v346_v25 }
  0x72   : > { %349 = vst [vmem:[%s2073_s8 + $0x2d0] sm:$0xff] %v348_v26 }
  0x73   : > { %351 = vst [vmem:[%s2073_s8 + $0x2d8] sm:$0xff] %v350_v27 }
  0x74   : > { %353 = vst [vmem:[%s2073_s8 + $0x2e0] sm:$0xff] %v352_v28 }
  0x75   : > { %355 = vst [vmem:[%s2073_s8 + $0x2e8] sm:$0xff] %v354_v29 }
  0x76   : > { %357 = vst [vmem:[%s2073_s8 + $0x2f0] sm:$0xff] %v356_v30 }
  0x77   : > { %359 = vst [vmem:[%s2073_s8 + $0x2f8] sm:$0xff] %v358_v31 }
  0x78 PF: > { %p1368_p7 = scmp.ge.s32.totalorder %s1985_s18, 1  ;;  %p364_p8 = scmp.lt.s32.totalorder %s1985_s18, 9 }
  0x7a   : > { %p365_p9 = pnand %p1368_p7, %p364_p8 }
  0x7b   : > { %s371_s9 = sand.u32 (!%p365_p9), 1, %s1961_s12   ;;  %s1369_s24 = sshll.u32 (!%p365_p9), %s1969_s14, 4 }
  0x7c   : > { %368 = sbr.rel (%p365_p9) target bundleno = 370 (0x172), region = 51  ;;  %p400_p10 = scmp.lt.s32.totalorder (!%p365_p9), %s1973_s15, 3 }
  0x7d   : > { %s1872_s10 = smul.u32 (!%p365_p9), 768, %s371_s9  ;;  %p402_p11 = scmp.lt.s32.totalorder (!%p365_p9), %s1369_s24, 31 }
  0x7f   : > { %s2267_s11 = scalar_lea.vmem (!%p365_p9), [#allocation2], %s1872_s10 }
  0x81   : > { %v1694_v32 = vld [vmem:[%s2267_s11 + $0x280] sm:$0xf]  ;;  %v1854_v34 = vld [vmem:[%s2267_s11 + $0x284] sm:$0xf]  ;;  %v1702_v37 = vld [vmem:[%s2267_s11 + $0x288] sm:$0xf] }
  0x82   : > { %v1862_v33 = vld [vmem:[%s2267_s11 + $0x2bc] sm:$0xf0]  ;;  %v1696_v36 = vld [vmem:[%s2267_s11 + $0x2c0] sm:$0xf0]  ;;  %v1863_v38 = vld [vmem:[%s2267_s11 + $0x2c4] sm:$0xf0] }
  0x83   : > { %v1695_v35 = vor.u32 %v1862_v33, %v1694_v32  ;;  %v1699_v39 = vor.u32 %v1854_v34, %v1696_v36  ;;  %v1703_v40 = vor.u32 %v1863_v38, %v1702_v37  ;;  %v1855_v41 = vld [vmem:[%s2267_s11 + $0x28c] sm:$0xf]  ;;  %v1630_v43 = vld [vmem:[%s2267_s11 + $0x200] sm:$0xf]  ;;  %v1838_v46 = vld [vmem:[%s2267_s11 + $0x204] sm:$0xf] }
  0x84   : > { %v1704_v42 = vld [vmem:[%s2267_s11 + $0x2c8] sm:$0xf0]  ;;  %v1846_v45 = vld [vmem:[%s2267_s11 + $0x23c] sm:$0xf0]  ;;  %v1632_v47 = vld [vmem:[%s2267_s11 + $0x240] sm:$0xf0] }
  0x85   : > { %999 = vmatpush.bf16.msra.mxu0 %v1695_v35  ;;  %v1707_v44 = vor.u32 %v1855_v41, %v1704_v42  ;;  %1012 = vmatpush.bf16.msra.mxu1 %v1699_v39  ;;  %v1631_v48 = vor.u32 %v1846_v45, %v1630_v43  ;;  %v1635_v49 = vor.u32 %v1838_v46, %v1632_v47  ;;  %v1638_v50 = vld [vmem:[%s2267_s11 + $0x208] sm:$0xf]  ;;  %v1839_v52 = vld [vmem:[%s2267_s11 + $0x20c] sm:$0xf]  ;;  %v1566_v55 = vld [vmem:[%s2267_s11 + $0x180] sm:$0xf] }
  0x86   : > { %1025 = vmatpush.bf16.msra.mxu2 %v1703_v40  ;;  %v1847_v51 = vld [vmem:[%s2267_s11 + $0x244] sm:$0xf0]  ;;  %v1640_v54 = vld [vmem:[%s2267_s11 + $0x248] sm:$0xf0]  ;;  %v1830_v56 = vld [vmem:[%s2267_s11 + $0x1bc] sm:$0xf0] }
  0x87   : > { %1038 = vmatpush.bf16.msra.mxu3 %v1707_v44  ;;  %v1639_v53 = vor.u32 %v1847_v51, %v1638_v50  ;;  %v1643_v57 = vor.u32 %v1839_v52, %v1640_v54  ;;  %v1822_v58 = vld [vmem:[%s2267_s11 + $0x184] sm:$0xf]  ;;  %v1574_v60 = vld [vmem:[%s2267_s11 + $0x188] sm:$0xf]  ;;  %v1567_v61 = vor.u32 %v1830_v56, %v1566_v55  ;;  %v1823_v63 = vld [vmem:[%s2267_s11 + $0x18c] sm:$0xf] }
  0x88   : > { %v1568_v59 = vld [vmem:[%s2267_s11 + $0x1c0] sm:$0xf0]  ;;  %v1831_v62 = vld [vmem:[%s2267_s11 + $0x1c4] sm:$0xf0]  ;;  %v1576_v0 = vld [vmem:[%s2267_s11 + $0x1c8] sm:$0xf0] }
  0x89   : > { %1000 = vmatpush.bf16.msra.mxu0 %v1631_v48  ;;  %1013 = vmatpush.bf16.msra.mxu1 %v1635_v49  ;;  %v1571_v1 = vor.u32 %v1822_v58, %v1568_v59  ;;  %v1575_v2 = vor.u32 %v1831_v62, %v1574_v60  ;;  %v1502_v3 = vld [vmem:[%s2267_s11 + $0x100] sm:$0xf]  ;;  %v1806_v5 = vld [vmem:[%s2267_s11 + $0x104] sm:$0xf]  ;;  %v1579_v6 = vor.u32 %v1823_v63, %v1576_v0  ;;  %v1510_v8 = vld [vmem:[%s2267_s11 + $0x108] sm:$0xf] }
  0x8a   : > { %1026 = vmatpush.bf16.msra.mxu2 %v1639_v53  ;;  %v1814_v4 = vld [vmem:[%s2267_s11 + $0x13c] sm:$0xf0]  ;;  %v1504_v7 = vld [vmem:[%s2267_s11 + $0x140] sm:$0xf0]  ;;  %v1815_v9 = vld [vmem:[%s2267_s11 + $0x144] sm:$0xf0] }
  0x8b   : > { %1039 = vmatpush.bf16.msra.mxu3 %v1643_v57  ;;  %v1807_v10 = vld [vmem:[%s2267_s11 + $0x10c] sm:$0xf]  ;;  %v1503_v12 = vor.u32 %v1814_v4, %v1502_v3  ;;  %v1507_v13 = vor.u32 %v1806_v5, %v1504_v7  ;;  %v1511_v14 = vor.u32 %v1815_v9, %v1510_v8  ;;  %v1438_v15 = vld [vmem:[%s2267_s11 + $0x80] sm:$0xf]  ;;  %v1790_v17 = vld [vmem:[%s2267_s11 + $0x84] sm:$0xf] }
  0x8c   : > { %v1512_v11 = vld [vmem:[%s2267_s11 + $0x148] sm:$0xf0]  ;;  %v1798_v16 = vld [vmem:[%s2267_s11 + $0xbc] sm:$0xf0]  ;;  %v1440_v19 = vld [vmem:[%s2267_s11 + $0xc0] sm:$0xf0] }
  0x8d   : > { %1001 = vmatpush.bf16.msra.mxu0 %v1567_v61  ;;  %1014 = vmatpush.bf16.msra.mxu1 %v1571_v1  ;;  %v1515_v18 = vor.u32 %v1807_v10, %v1512_v11  ;;  %v1446_v20 = vld [vmem:[%s2267_s11 + $0x88] sm:$0xf]  ;;  %v1791_v22 = vld [vmem:[%s2267_s11 + $0x8c] sm:$0xf]  ;;  %v1439_v24 = vor.u32 %v1798_v16, %v1438_v15  ;;  %v1374_v25 = vld [vmem:[%s2267_s11] sm:$0xf]  ;;  %v1443_v27 = vor.u32 %v1790_v17, %v1440_v19 }
  0x8e   : > { %1027 = vmatpush.bf16.msra.mxu2 %v1575_v2  ;;  %v1799_v21 = vld [vmem:[%s2267_s11 + $0xc4] sm:$0xf0]  ;;  %v1448_v23 = vld [vmem:[%s2267_s11 + $0xc8] sm:$0xf0]  ;;  %v1782_v26 = vld [vmem:[%s2267_s11 + $0x3c] sm:$0xf0] }
  0x8f   : > { %1040 = vmatpush.bf16.msra.mxu3 %v1579_v6  ;;  %v1447_v28 = vor.u32 %v1799_v21, %v1446_v20  ;;  %v1774_v29 = vld [vmem:[%s2267_s11 + $0x4] sm:$0xf]  ;;  %v1382_v31 = vld [vmem:[%s2267_s11 + $0x8] sm:$0xf]  ;;  %v1451_v32 = vor.u32 %v1791_v22, %v1448_v23  ;;  %v1775_v34 = vld [vmem:[%s2267_s11 + $0xc] sm:$0xf]  ;;  %v1375_v39 = vor.u32 %v1782_v26, %v1374_v25 }
  0x90   : > { %v1376_v30 = vld [vmem:[%s2267_s11 + $0x40] sm:$0xf0]  ;;  %v1783_v33 = vld [vmem:[%s2267_s11 + $0x44] sm:$0xf0]  ;;  %v1384_v35 = vld [vmem:[%s2267_s11 + $0x48] sm:$0xf0] }
  0x91   : > { %1002 = vmatpush.bf16.msra.mxu0 %v1503_v12  ;;  %1015 = vmatpush.bf16.msra.mxu1 %v1507_v13  ;;  %v1710_v36 = vld [vmem:[%s2267_s11 + $0x290] sm:$0xf]  ;;  %v1856_v38 = vld [vmem:[%s2267_s11 + $0x294] sm:$0xf]  ;;  %v1718_v41 = vld [vmem:[%s2267_s11 + $0x298] sm:$0xf]  ;;  %v1379_v43 = vor.u32 %v1774_v29, %v1376_v30  ;;  %v1383_v44 = vor.u32 %v1783_v33, %v1382_v31  ;;  %v1387_v47 = vor.u32 %v1775_v34, %v1384_v35 }
  0x92   : > { %1028 = vmatpush.bf16.msra.mxu2 %v1511_v14  ;;  %v1864_v37 = vld [vmem:[%s2267_s11 + $0x2cc] sm:$0xf0]  ;;  %v1712_v40 = vld [vmem:[%s2267_s11 + $0x2d0] sm:$0xf0]  ;;  %v1865_v42 = vld [vmem:[%s2267_s11 + $0x2d4] sm:$0xf0] }
  0x93   : > { %1041 = vmatpush.bf16.msra.mxu3 %v1515_v18  ;;  %v1857_v45 = vld [vmem:[%s2267_s11 + $0x29c] sm:$0xf]  ;;  %v1711_v48 = vor.u32 %v1864_v37, %v1710_v36  ;;  %v1646_v49 = vld [vmem:[%s2267_s11 + $0x210] sm:$0xf]  ;;  %v1715_v50 = vor.u32 %v1856_v38, %v1712_v40  ;;  %v1719_v51 = vor.u32 %v1865_v42, %v1718_v41  ;;  %v1840_v53 = vld [vmem:[%s2267_s11 + $0x214] sm:$0xf] }
  0x94   : > { %v1720_v46 = vld [vmem:[%s2267_s11 + $0x2d8] sm:$0xf0]  ;;  %v1848_v52 = vld [vmem:[%s2267_s11 + $0x24c] sm:$0xf0]  ;;  %v1648_v54 = vld [vmem:[%s2267_s11 + $0x250] sm:$0xf0] }
  0x95   : > { %1003 = vmatpush.bf16.msra.mxu0 %v1439_v24  ;;  %1016 = vmatpush.bf16.msra.mxu1 %v1443_v27  ;;  %v1723_v55 = vor.u32 %v1857_v45, %v1720_v46  ;;  %v1654_v56 = vld [vmem:[%s2267_s11 + $0x218] sm:$0xf]  ;;  %v1841_v58 = vld [vmem:[%s2267_s11 + $0x21c] sm:$0xf]  ;;  %v2336_v60 = vld [vmem:[%s2557_s1] sm:$0xf]  ;;  %v1647_v61 = vor.u32 %v1848_v52, %v1646_v49  ;;  %v1651_v62 = vor.u32 %v1840_v53, %v1648_v54 }
  0x96   : > { %1029 = vmatpush.bf16.msra.mxu2 %v1447_v28  ;;  %v1849_v57 = vld [vmem:[%s2267_s11 + $0x254] sm:$0xf0]  ;;  %v1656_v59 = vld [vmem:[%s2267_s11 + $0x258] sm:$0xf0]  ;;  %vm993_vm0 = vcmask 785408   ;;  %v1987_v53 = vmov 0  }
  0x97   : > { %1042 = vmatpush.bf16.msra.mxu3 %v1451_v32  ;;  %v1655_v63 = vor.u32 %v1849_v57, %v1654_v56  ;;  %v1582_v0 = vld [vmem:[%s2267_s11 + $0x190] sm:$0xf]  ;;  %v1824_v2 = vld [vmem:[%s2267_s11 + $0x194] sm:$0xf]  ;;  %v1659_v3 = vor.u32 %v1841_v58, %v1656_v59  ;;  %v1590_v5 = vld [vmem:[%s2267_s11 + $0x198] sm:$0xf]  ;;  %1930 = vset.pattern.permute.xlu0 %v1987_v53 }
  0x98   : > { %v1832_v1 = vld [vmem:[%s2267_s11 + $0x1cc] sm:$0xf0]  ;;  %v1584_v4 = vld [vmem:[%s2267_s11 + $0x1d0] sm:$0xf0]  ;;  %v1833_v6 = vld [vmem:[%s2267_s11 + $0x1d4] sm:$0xf0] }
  0x99   : > { %1004 = vmatpush.bf16.msra.mxu0 %v1375_v39  ;;  %1017 = vmatpush.bf16.msra.mxu1 %v1379_v43  ;;  %v1825_v7 = vld [vmem:[%s2267_s11 + $0x19c] sm:$0xf]  ;;  %v1583_v9 = vor.u32 %v1832_v1, %v1582_v0  ;;  %v1587_v10 = vor.u32 %v1824_v2, %v1584_v4  ;;  %v1591_v11 = vor.u32 %v1833_v6, %v1590_v5  ;;  %v1518_v12 = vld [vmem:[%s2267_s11 + $0x110] sm:$0xf]  ;;  %v1808_v14 = vld [vmem:[%s2267_s11 + $0x114] sm:$0xf] }
  0x9a   : > { %1030 = vmatpush.bf16.msra.mxu2 %v1383_v44  ;;  %v1592_v8 = vld [vmem:[%s2267_s11 + $0x1d8] sm:$0xf0]  ;;  %v1816_v13 = vld [vmem:[%s2267_s11 + $0x14c] sm:$0xf0]  ;;  %v1520_v16 = vld [vmem:[%s2267_s11 + $0x150] sm:$0xf0] }
  0x9b   : > { %1043 = vmatpush.bf16.msra.mxu3 %v1387_v47  ;;  %v1595_v15 = vor.u32 %v1825_v7, %v1592_v8  ;;  %v1526_v17 = vld [vmem:[%s2267_s11 + $0x118] sm:$0xf]  ;;  %v1809_v19 = vld [vmem:[%s2267_s11 + $0x11c] sm:$0xf]  ;;  %v1519_v21 = vor.u32 %v1816_v13, %v1518_v12  ;;  %v1523_v22 = vor.u32 %v1808_v14, %v1520_v16  ;;  %v1454_v24 = vld [vmem:[%s2267_s11 + $0x90] sm:$0xf] }
  0x9c   : > { %1756 = vmatmul.msk.bf16.vlgmr.msra.gmra.mxu0 %vm993_vm0, %v2336_v60  ;;  %1757 = vmatmul.msk.bf16.vlgmr.msra.gmra.mxu1 %vm993_vm0, %v2336_v60  ;;  %v1817_v18 = vld [vmem:[%s2267_s11 + $0x154] sm:$0xf0]  ;;  %v1528_v20 = vld [vmem:[%s2267_s11 + $0x158] sm:$0xf0]  ;;  %v1800_v25 = vld [vmem:[%s2267_s11 + $0xcc] sm:$0xf0] }
  0x9d   : > { %1051 = vmatpush.bf16.msrb.mxu0 %v1711_v48  ;;  %1064 = vmatpush.bf16.msrb.mxu1 %v1715_v50  ;;  %v1527_v23 = vor.u32 %v1817_v18, %v1526_v17  ;;  %v1792_v26 = vld [vmem:[%s2267_s11 + $0x94] sm:$0xf]  ;;  %v1531_v27 = vor.u32 %v1809_v19, %v1528_v20  ;;  %v1462_v29 = vld [vmem:[%s2267_s11 + $0x98] sm:$0xf]  ;;  %v1793_v31 = vld [vmem:[%s2267_s11 + $0x9c] sm:$0xf]  ;;  %v1455_v33 = vor.u32 %v1800_v25, %v1454_v24 }
  0x9e   : > { %1077 = vmatpush.bf16.msrb.mxu2 %v1719_v51  ;;  %1759 = vmatmul.msk.bf16.vlgmr.msra.gmra.mxu3 %vm993_vm0, %v2336_v60  ;;  %v1456_v28 = vld [vmem:[%s2267_s11 + $0xd0] sm:$0xf0]  ;;  %v1801_v30 = vld [vmem:[%s2267_s11 + $0xd4] sm:$0xf0]  ;;  %v1464_v32 = vld [vmem:[%s2267_s11 + $0xd8] sm:$0xf0] }
  0x9f   : > { %1090 = vmatpush.bf16.msrb.mxu3 %v1723_v55  ;;  %1758 = vmatmul.msk.bf16.vlgmr.msra.gmra.mxu2 %vm993_vm0, %v2336_v60  ;;  %v1390_v34 = vld [vmem:[%s2267_s11 + $0x10] sm:$0xf]  ;;  %v1776_v36 = vld [vmem:[%s2267_s11 + $0x14] sm:$0xf]  ;;  %v1459_v37 = vor.u32 %v1792_v26, %v1456_v28  ;;  %v1463_v38 = vor.u32 %v1801_v30, %v1462_v29  ;;  %v1398_v40 = vld [vmem:[%s2267_s11 + $0x18] sm:$0xf]  ;;  %v1467_v42 = vor.u32 %v1793_v31, %v1464_v32 }
  0xa0   : > { %v1784_v35 = vld [vmem:[%s2267_s11 + $0x4c] sm:$0xf0]  ;;  %v1392_v39 = vld [vmem:[%s2267_s11 + $0x50] sm:$0xf0]  ;;  %v1785_v41 = vld [vmem:[%s2267_s11 + $0x54] sm:$0xf0] }
  0xa1   : > { %1052 = vmatpush.bf16.msrb.mxu0 %v1647_v61  ;;  %1065 = vmatpush.bf16.msrb.mxu1 %v1651_v62  ;;  %v1777_v43 = vld [vmem:[%s2267_s11 + $0x1c] sm:$0xf]  ;;  %v1726_v45 = vld [vmem:[%s2267_s11 + $0x2a0] sm:$0xf]  ;;  %v1858_v47 = vld [vmem:[%s2267_s11 + $0x2a4] sm:$0xf]  ;;  %v1391_v49 = vor.u32 %v1784_v35, %v1390_v34  ;;  %v1395_v54 = vor.u32 %v1776_v36, %v1392_v39  ;;  %v1399_v55 = vor.u32 %v1785_v41, %v1398_v40 }
  0xa2   : > { %1078 = vmatpush.bf16.msrb.mxu2 %v1655_v63  ;;  %v1400_v44 = vld [vmem:[%s2267_s11 + $0x58] sm:$0xf0]  ;;  %v1866_v46 = vld [vmem:[%s2267_s11 + $0x2dc] sm:$0xf0]  ;;  %v1728_v50 = vld [vmem:[%s2267_s11 + $0x2e0] sm:$0xf0] }
  0xa3   : > { %1091 = vmatpush.bf16.msrb.mxu3 %v1659_v3  ;;  %v507_v48 = vld [vmem:[%s2558_s2] sm:$0xff]  ;;  %v1734_v51 = vld [vmem:[%s2267_s11 + $0x2a8] sm:$0xf]  ;;  %v1859_v56 = vld [vmem:[%s2267_s11 + $0x2ac] sm:$0xf]  ;;  %v1403_v58 = vor.u32 %v1777_v43, %v1400_v44  ;;  %v1727_v59 = vor.u32 %v1866_v46, %v1726_v45  ;;  %v1731_v61 = vor.u32 %v1858_v47, %v1728_v50  ;;  %s2573_s15 = smov (!%p400_p10, %s1973_s15), 3 }
  0xa4   : > { %v1867_v52 = vld [vmem:[%s2267_s11 + $0x2e4] sm:$0xf0]  ;;  %v1736_v57 = vld [vmem:[%s2267_s11 + $0x2e8] sm:$0xf0]  ;;  %510 = vperm.xlu0 %1930, %v507_v48   ;;  %v1662_v63 = vld [vmem:[%s2267_s11 + $0x220] sm:$0xf] }
  0xa5   : > { %1053 = vmatpush.bf16.msrb.mxu0 %v1583_v9  ;;  %1066 = vmatpush.bf16.msrb.mxu1 %v1587_v10  ;;  %v1735_v62 = vor.u32 %v1867_v52, %v1734_v51  ;;  %v1850_v0 = vld [vmem:[%s2267_s11 + $0x25c] sm:$0xf0]  ;;  %v1842_v1 = vld [vmem:[%s2267_s11 + $0x224] sm:$0xf]  ;;  %v1739_v2 = vor.u32 %v1859_v56, %v1736_v57  ;;  %v1670_v4 = vld [vmem:[%s2267_s11 + $0x228] sm:$0xf] }
  0xa6   : > { %1079 = vmatpush.bf16.msrb.mxu2 %v1591_v11  ;;  %v1664_v3 = vld [vmem:[%s2267_s11 + $0x260] sm:$0xf0]  ;;  %v1851_v5 = vld [vmem:[%s2267_s11 + $0x264] sm:$0xf0]  ;;  %v1843_v6 = vld [vmem:[%s2267_s11 + $0x22c] sm:$0xf]  ;;  %v1663_v8 = vor.u32 %v1850_v0, %v1662_v63 }
  0xa7   : > { %1092 = vmatpush.bf16.msrb.mxu3 %v1595_v15  ;;  %v1672_v7 = vld [vmem:[%s2267_s11 + $0x268] sm:$0xf0]  ;;  %v1667_v9 = vor.u32 %v1842_v1, %v1664_v3  ;;  %v1671_v10 = vor.u32 %v1851_v5, %v1670_v4  ;;  %v1598_v11 = vld [vmem:[%s2267_s11 + $0x1a0] sm:$0xf]  ;;  %v1826_v13 = vld [vmem:[%s2267_s11 + $0x1a4] sm:$0xf] }
  0xa8   : > { %v1834_v12 = vld [vmem:[%s2267_s11 + $0x1dc] sm:$0xf0]  ;;  %v1675_v14 = vor.u32 %v1843_v6, %v1672_v7  ;;  %v1600_v15 = vld [vmem:[%s2267_s11 + $0x1e0] sm:$0xf0]  ;;  %v1606_v16 = vld [vmem:[%s2267_s11 + $0x1a8] sm:$0xf] }
  0xa9   : > { %1054 = vmatpush.bf16.msrb.mxu0 %v1519_v21  ;;  %1067 = vmatpush.bf16.msrb.mxu1 %v1523_v22  ;;  %v1835_v17 = vld [vmem:[%s2267_s11 + $0x1e4] sm:$0xf0]  ;;  %v1827_v18 = vld [vmem:[%s2267_s11 + $0x1ac] sm:$0xf]  ;;  %v1599_v20 = vor.u32 %v1834_v12, %v1598_v11  ;;  %v1603_v21 = vor.u32 %v1826_v13, %v1600_v15  ;;  %v1818_v24 = vld [vmem:[%s2267_s11 + $0x15c] sm:$0xf0] }
  0xaa   : > { %1080 = vmatpush.bf16.msrb.mxu2 %v1527_v23  ;;  %v1608_v19 = vld [vmem:[%s2267_s11 + $0x1e8] sm:$0xf0]  ;;  %v1607_v22 = vor.u32 %v1835_v17, %v1606_v16  ;;  %v1534_v23 = vld [vmem:[%s2267_s11 + $0x120] sm:$0xf]  ;;  %v1810_v25 = vld [vmem:[%s2267_s11 + $0x124] sm:$0xf] }
  0xab   : > { %1093 = vmatpush.bf16.msrb.mxu3 %v1531_v27  ;;  %v1611_v26 = vor.u32 %v1827_v18, %v1608_v19  ;;  %v1536_v27 = vld [vmem:[%s2267_s11 + $0x160] sm:$0xf0]  ;;  %v1542_v28 = vld [vmem:[%s2267_s11 + $0x128] sm:$0xf]  ;;  %v1811_v30 = vld [vmem:[%s2267_s11 + $0x12c] sm:$0xf]  ;;  %v1535_v32 = vor.u32 %v1818_v24, %v1534_v23 }
  0xac   : > { %v1819_v29 = vld [vmem:[%s2267_s11 + $0x164] sm:$0xf0]  ;;  %v1544_v31 = vld [vmem:[%s2267_s11 + $0x168] sm:$0xf0]  ;;  %v1470_v35 = vld [vmem:[%s2267_s11 + $0xa0] sm:$0xf] }
  0xad   : > { %1055 = vmatpush.bf16.msrb.mxu0 %v1455_v33  ;;  %1068 = vmatpush.bf16.msrb.mxu1 %v1459_v37  ;;  %v1539_v33 = vor.u32 %v1810_v25, %v1536_v27  ;;  %v1543_v34 = vor.u32 %v1819_v29, %v1542_v28  ;;  %v1802_v36 = vld [vmem:[%s2267_s11 + $0xdc] sm:$0xf0]  ;;  %v1794_v37 = vld [vmem:[%s2267_s11 + $0xa4] sm:$0xf]  ;;  %v1478_v40 = vld [vmem:[%s2267_s11 + $0xa8] sm:$0xf] }
  0xae   : > { %1081 = vmatpush.bf16.msrb.mxu2 %v1463_v38  ;;  %v1547_v38 = vor.u32 %v1811_v30, %v1544_v31  ;;  %v1472_v39 = vld [vmem:[%s2267_s11 + $0xe0] sm:$0xf0]  ;;  %v1803_v41 = vld [vmem:[%s2267_s11 + $0xe4] sm:$0xf0]  ;;  %v1480_v43 = vld [vmem:[%s2267_s11 + $0xe8] sm:$0xf0]  ;;  %v1471_v44 = vor.u32 %v1802_v36, %v1470_v35 }
  0xaf   : > { %1094 = vmatpush.bf16.msrb.mxu3 %v1467_v42  ;;  %v1795_v42 = vld [vmem:[%s2267_s11 + $0xac] sm:$0xf]  ;;  %v1406_v45 = vld [vmem:[%s2267_s11 + $0x20] sm:$0xf]  ;;  %v1475_v47 = vor.u32 %v1794_v37, %v1472_v39  ;;  %v1479_v48 = vor.u32 %v1803_v41, %v1478_v40  ;;  %v1408_v50 = vld [vmem:[%s2267_s11 + $0x60] sm:$0xf0] }
  0xb0   : > { %v1786_v46 = vld [vmem:[%s2267_s11 + $0x5c] sm:$0xf0]  ;;  %v1414_v51 = vld [vmem:[%s2267_s11 + $0x28] sm:$0xf]  ;;  %v1483_v52 = vor.u32 %v1795_v42, %v1480_v43  ;;  %v1742_v56 = vld [vmem:[%s2267_s11 + $0x2b0] sm:$0xf] }
  0xb1   : > { %1056 = vmatpush.bf16.msrb.mxu0 %v1391_v49  ;;  %1069 = vmatpush.bf16.msrb.mxu1 %v1395_v54  ;;  %v1778_v49 = vld [vmem:[%s2267_s11 + $0x24] sm:$0xf]  ;;  %v1787_v53 = vld [vmem:[%s2267_s11 + $0x64] sm:$0xf0]  ;;  %v1779_v54 = vld [vmem:[%s2267_s11 + $0x2c] sm:$0xf] }
  0xb2   : > { %1082 = vmatpush.bf16.msrb.mxu2 %v1399_v55  ;;  %v1416_v55 = vld [vmem:[%s2267_s11 + $0x68] sm:$0xf0]  ;;  %v1868_v57 = vld [vmem:[%s2267_s11 + $0x2ec] sm:$0xf0]  ;;  %v1869_v63 = vld [vmem:[%s2267_s11 + $0x2f4] sm:$0xf0]  ;;  %v1411_v0 = vor.u32 %v1778_v49, %v1408_v50  ;;  %v1415_v1 = vor.u32 %v1787_v53, %v1414_v51 }
  0xb3   : > { %1095 = vmatpush.bf16.msrb.mxu3 %v1403_v58  ;;  %v1860_v58 = vld [vmem:[%s2267_s11 + $0x2b4] sm:$0xf]  ;;  %v1752_v3 = vld [vmem:[%s2267_s11 + $0x2f8] sm:$0xf0]  ;;  %v1419_v4 = vor.u32 %v1779_v54, %v1416_v55  ;;  %v1743_v5 = vor.u32 %v1868_v57, %v1742_v56  ;;  %v1686_v13 = vld [vmem:[%s2267_s11 + $0x238] sm:$0xf] }
  0xb4   : > { %1760 = vmatmul.msk.bf16.vlgmr.msrb.gmra.mxu0 %vm993_vm0, %v2336_v60  ;;  %1761 = vmatmul.msk.bf16.vlgmr.msrb.gmra.mxu1 %vm993_vm0, %v2336_v60  ;;  %v1680_v12 = vld [vmem:[%s2267_s11 + $0x270] sm:$0xf0]  ;;  %v1845_v15 = vld [vmem:[%s2267_s11 + $0x23c] sm:$0xf]  ;;  %v1622_v25 = vld [vmem:[%s2267_s11 + $0x1b8] sm:$0xf] }
  0xb5   : > { %1103 = vmatpush.bf16.msra.mxu0 %v1727_v59  ;;  %1116 = vmatpush.bf16.msra.mxu1 %v1731_v61  ;;  %v1407_v59 = vor.u32 %v1786_v46, %v1406_v45  ;;  %v1744_v61 = vld [vmem:[%s2267_s11 + $0x2f0] sm:$0xf0]  ;;  %v1688_v16 = vld [vmem:[%s2267_s11 + $0x278] sm:$0xf0]  ;;  %v1558_v37 = vld [vmem:[%s2267_s11 + $0x138] sm:$0xf] }
  0xb6   : > { %1129 = vmatpush.bf16.msra.mxu2 %v1735_v62  ;;  %1763 = vmatmul.msk.bf16.vlgmr.msrb.gmra.mxu3 %vm993_vm0, %v2336_v60  ;;  %v1750_v62 = vld [vmem:[%s2267_s11 + $0x2b8] sm:$0xf]  ;;  %v1747_v6 = vor.u32 %v1860_v58, %v1744_v61  ;;  %v1691_v23 = vor.u32 %v1845_v15, %v1688_v16  ;;  %v1616_v24 = vld [vmem:[%s2267_s11 + $0x1f0] sm:$0xf0]  ;;  %v1829_v27 = vld [vmem:[%s2267_s11 + $0x1bc] sm:$0xf] }
  0xb7   : > { %1142 = vmatpush.bf16.msra.mxu3 %v1739_v2  ;;  %1762 = vmatmul.msk.bf16.vlgmr.msrb.gmra.mxu2 %vm993_vm0, %v2336_v60  ;;  %v1861_v2 = vld [vmem:[%s2267_s11 + $0x2bc] sm:$0xf]  ;;  %v1751_v7 = vor.u32 %v1869_v63, %v1750_v62  ;;  %v1552_v36 = vld [vmem:[%s2267_s11 + $0x170] sm:$0xf0]  ;;  %v1804_v45 = vld [vmem:[%s2267_s11 + $0xec] sm:$0xf0] }
  0xb8   : > { %v1755_v11 = vor.u32 %v1861_v2, %v1752_v3  ;;  %v1624_v28 = vld [vmem:[%s2267_s11 + $0x1f8] sm:$0xf0]  ;;  %v1796_v46 = vld [vmem:[%s2267_s11 + $0xb4] sm:$0xf]  ;;  %v1494_v49 = vld [vmem:[%s2267_s11 + $0xb8] sm:$0xf] }
  0xb9   : > { %1104 = vmatpush.bf16.msra.mxu0 %v1663_v8  ;;  %1117 = vmatpush.bf16.msra.mxu1 %v1667_v9  ;;  %v1678_v8 = vld [vmem:[%s2267_s11 + $0x230] sm:$0xf]  ;;  %v1627_v35 = vor.u32 %v1829_v27, %v1624_v28  ;;  %v1813_v39 = vld [vmem:[%s2267_s11 + $0x13c] sm:$0xf]  ;;  %v1805_v50 = vld [vmem:[%s2267_s11 + $0xf4] sm:$0xf0] }
  0xba   : > { %1130 = vmatpush.bf16.msra.mxu2 %v1671_v10  ;;  %v1852_v9 = vld [vmem:[%s2267_s11 + $0x26c] sm:$0xf0]  ;;  %v1844_v10 = vld [vmem:[%s2267_s11 + $0x234] sm:$0xf]  ;;  %v1560_v40 = vld [vmem:[%s2267_s11 + $0x178] sm:$0xf0]  ;;  %v1495_v55 = vor.u32 %v1805_v50, %v1494_v49 }
  0xbb   : > { %1143 = vmatpush.bf16.msra.mxu3 %v1675_v14  ;;  %v1853_v14 = vld [vmem:[%s2267_s11 + $0x274] sm:$0xf0]  ;;  %v1679_v17 = vor.u32 %v1852_v9, %v1678_v8  ;;  %v1683_v18 = vor.u32 %v1844_v10, %v1680_v12  ;;  %v1797_v51 = vld [vmem:[%s2267_s11 + $0xbc] sm:$0xf]  ;;  %v1422_v56 = vld [vmem:[%s2267_s11 + $0x30] sm:$0xf] }
  0xbc   : > { %v1687_v19 = vor.u32 %v1853_v14, %v1686_v13  ;;  %v1788_v57 = vld [vmem:[%s2267_s11 + $0x6c] sm:$0xf0]  ;;  %v1780_v58 = vld [vmem:[%s2267_s11 + $0x34] sm:$0xf]  ;;  %v1430_v62 = vld [vmem:[%s2267_s11 + $0x38] sm:$0xf] }
  0xbd   : > { %1105 = vmatpush.bf16.msra.mxu0 %v1599_v20  ;;  %1118 = vmatpush.bf16.msra.mxu1 %v1603_v21  ;;  %v1614_v20 = vld [vmem:[%s2267_s11 + $0x1b0] sm:$0xf]  ;;  %v1424_v61 = vld [vmem:[%s2267_s11 + $0x70] sm:$0xf0]  ;;  %v1789_v63 = vld [vmem:[%s2267_s11 + $0x74] sm:$0xf0]  ;;  %v1423_v2 = vor.u32 %v1788_v57, %v1422_v56 }
  0xbe   : > { %1131 = vmatpush.bf16.msra.mxu2 %v1607_v22  ;;  %v1836_v21 = vld [vmem:[%s2267_s11 + $0x1ec] sm:$0xf0]  ;;  %v1828_v22 = vld [vmem:[%s2267_s11 + $0x1b4] sm:$0xf]  ;;  %v1427_v3 = vor.u32 %v1780_v58, %v1424_v61  ;;  %s2575_s24 = smov (!%p402_p11, %s1369_s24), 31  ;;  %s1370_s26 = sshll.u32 %s2573_s15, 5 }
  0xbf   : > { %1144 = vmatpush.bf16.msra.mxu3 %v1611_v26  ;;  %v1837_v26 = vld [vmem:[%s2267_s11 + $0x1f4] sm:$0xf0]  ;;  %v1615_v29 = vor.u32 %v1836_v21, %v1614_v20  ;;  %v1619_v30 = vor.u32 %v1828_v22, %v1616_v24  ;;  %s405_s27 = sadd.s32 %s1370_s26, %s2575_s24 }
  0xc0   : > { %v1623_v31 = vor.u32 %v1837_v26, %v1622_v25  ;;  %s1371_s28 = sshll.u32 %s405_s27, 2 }
  0xc1   : > { %1106 = vmatpush.bf16.msra.mxu0 %v1535_v32  ;;  %1119 = vmatpush.bf16.msra.mxu1 %v1539_v33  ;;  %v1550_v32 = vld [vmem:[%s2267_s11 + $0x130] sm:$0xf]  ;;  %s2513_s29 = scalar_lea.vmem %s2559_s3, %s1371_s28 }
  0xc2   : > { %1132 = vmatpush.bf16.msra.mxu2 %v1543_v34  ;;  %v1820_v33 = vld [vmem:[%s2267_s11 + $0x16c] sm:$0xf0]  ;;  %v1812_v34 = vld [vmem:[%s2267_s11 + $0x134] sm:$0xf] }
  0xc3   : > { %1145 = vmatpush.bf16.msra.mxu3 %v1547_v38  ;;  %v1821_v38 = vld [vmem:[%s2267_s11 + $0x174] sm:$0xf0]  ;;  %v1551_v41 = vor.u32 %v1820_v33, %v1550_v32  ;;  %v1555_v42 = vor.u32 %v1812_v34, %v1552_v36 }
  0xc4   : > { %v1559_v43 = vor.u32 %v1821_v38, %v1558_v37 }
  0xc5   : > { %1107 = vmatpush.bf16.msra.mxu0 %v1471_v44  ;;  %1120 = vmatpush.bf16.msra.mxu1 %v1475_v47  ;;  %v1486_v44 = vld [vmem:[%s2267_s11 + $0xb0] sm:$0xf]  ;;  %v1563_v47 = vor.u32 %v1813_v39, %v1560_v40 }
  0xc6   : > { %1133 = vmatpush.bf16.msra.mxu2 %v1479_v48  ;;  %v1488_v48 = vld [vmem:[%s2267_s11 + $0xf0] sm:$0xf0]  ;;  %v1487_v53 = vor.u32 %v1804_v45, %v1486_v44 }
  0xc7   : > { %1146 = vmatpush.bf16.msra.mxu3 %v1483_v52  ;;  %v1496_v52 = vld [vmem:[%s2267_s11 + $0xf8] sm:$0xf0]  ;;  %v1491_v54 = vor.u32 %v1796_v46, %v1488_v48 }
  0xc9   : > { %1108 = vmatpush.bf16.msra.mxu0 %v1407_v59  ;;  %1121 = vmatpush.bf16.msra.mxu1 %v1411_v0  ;;  %v1499_v59 = vor.u32 %v1797_v51, %v1496_v52  ;;  %v1781_v0 = vld [vmem:[%s2267_s11 + $0x3c] sm:$0xf] }
  0xca   : > { %1134 = vmatpush.bf16.msra.mxu2 %v1415_v1  ;;  %v1432_v1 = vld [vmem:[%s2267_s11 + $0x78] sm:$0xf0] }
  0xcb   : > { %1147 = vmatpush.bf16.msra.mxu3 %v1419_v4  ;;  %v1431_v4 = vor.u32 %v1789_v63, %v1430_v62 }
  0xcc   : > { %1764 = vmatmul.msk.bf16.vlgmr.msra.gmra.mxu0 %vm993_vm0, %v2336_v60  ;;  %1765 = vmatmul.msk.bf16.vlgmr.msra.gmra.mxu1 %vm993_vm0, %v2336_v60 }
  0xcd   : > { %1155 = vmatpush.bf16.msrb.mxu0 %v1743_v5  ;;  %1168 = vmatpush.bf16.msrb.mxu1 %v1747_v6  ;;  %v1435_v5 = vor.u32 %v1781_v0, %v1432_v1 }
  0xce   : > { %1181 = vmatpush.bf16.msrb.mxu2 %v1751_v7  ;;  %1767 = vmatmul.msk.bf16.vlgmr.msra.gmra.mxu3 %vm993_vm0, %v2336_v60 }
  0xcf   : > { %1194 = vmatpush.bf16.msrb.mxu3 %v1755_v11  ;;  %1766 = vmatmul.msk.bf16.vlgmr.msra.gmra.mxu2 %vm993_vm0, %v2336_v60 }
  0xd1   : > { %1156 = vmatpush.bf16.msrb.mxu0 %v1679_v17  ;;  %1169 = vmatpush.bf16.msrb.mxu1 %v1683_v18 }
  0xd2   : > { %1182 = vmatpush.bf16.msrb.mxu2 %v1687_v19 }
  0xd3   : > { %1195 = vmatpush.bf16.msrb.mxu3 %v1691_v23 }
  0xd5   : > { %1157 = vmatpush.bf16.msrb.mxu0 %v1615_v29  ;;  %1170 = vmatpush.bf16.msrb.mxu1 %v1619_v30 }
  0xd6   : > { %1183 = vmatpush.bf16.msrb.mxu2 %v1623_v31 }
  0xd7   : > { %1196 = vmatpush.bf16.msrb.mxu3 %v1627_v35 }
  0xd9   : > { %1158 = vmatpush.bf16.msrb.mxu0 %v1551_v41  ;;  %1171 = vmatpush.bf16.msrb.mxu1 %v1555_v42 }
  0xda   : > { %1184 = vmatpush.bf16.msrb.mxu2 %v1559_v43 }
  0xdb   : > { %1197 = vmatpush.bf16.msrb.mxu3 %v1563_v47 }
  0xdd   : > { %1159 = vmatpush.bf16.msrb.mxu0 %v1487_v53  ;;  %1172 = vmatpush.bf16.msrb.mxu1 %v1491_v54 }
  0xde   : > { %1185 = vmatpush.bf16.msrb.mxu2 %v1495_v55 }
  0xdf   : > { %1198 = vmatpush.bf16.msrb.mxu3 %v1499_v59 }
  0xe1   : > { %1160 = vmatpush.bf16.msrb.mxu0 %v1423_v2  ;;  %1173 = vmatpush.bf16.msrb.mxu1 %v1427_v3 }
  0xe2   : > { %1186 = vmatpush.bf16.msrb.mxu2 %v1431_v4 }
  0xe3   : > { %1199 = vmatpush.bf16.msrb.mxu3 %v1435_v5 }
  0xe4   : > { %1768 = vmatmul.msk.bf16.vlgmr.msrb.gmra.mxu0 %vm993_vm0, %v2336_v60  ;;  %1769 = vmatmul.msk.bf16.vlgmr.msrb.gmra.mxu1 %vm993_vm0, %v2336_v60 }
  0xe5   : > { %1770 = vmatmul.msk.bf16.vlgmr.msrb.gmra.mxu2 %vm993_vm0, %v2336_v60 }
  0xe6   : > { %1771 = vmatmul.msk.bf16.vlgmr.msrb.gmra.mxu3 %vm993_vm0, %v2336_v60 }
 0x116   : > { %v2504_v8 = vpop.permute.xlu0 %510 }
 0x119   : > { %v1006_v6 = vpop.f32.mrf.mxu0  ;;  %v1019_v7 = vpop.f32.mrf.mxu1 }
 0x11a   : > { %v1007_v10 = vadd.f32 %v1006_v6, %v2504_v8  ;;  %v1020_v11 = vadd.f32 %v1019_v7, %v2504_v8 }
 0x11c   : > { %vm1205_vm1 = vcmp.ge.f32.partialorder %v1007_v10, 0.0  ;;  %vm1206_vm2 = vcmp.ge.f32.partialorder %v1020_v11, 0.0  ;;  %v1221_v14 = vmul.f32 0.2, %v1007_v10  ;;  %v1222_v16 = vmul.f32 0.2, %v1020_v11 }
 0x11e   : > { %v1237_v20 = vsel %vm1205_vm1, %v1007_v10, %v1221_v14  ;;  %v1238_v21 = vsel %vm1206_vm2, %v1020_v11, %v1222_v16 }
 0x11f   : > { %v1253_v24 = vpack.c.bf16 %v1238_v21, %v1237_v20 }
 0x121   : > { %v1045_v12 = vpop.f32.mrf.mxu3  ;;  %v1008_v15 = vpop.f32.mrf.mxu0  ;;  %1261 = vst [vmem:[%s2513_s29] sm:$0xff] %v1253_v24 }
 0x122   : > { %v1032_v9 = vpop.f32.mrf.mxu2  ;;  %v1046_v60 = vadd.f32 %v1045_v12, %v2504_v8  ;;  %v1021_v18 = vpop.f32.mrf.mxu1 }
 0x123   : > { %v1033_v13 = vadd.f32 %v1032_v9, %v2504_v8 }
 0x124   : > { %vm1208_vm4 = vcmp.ge.f32.partialorder %v1046_v60, 0.0  ;;  %v1224_v19 = vmul.f32 0.2, %v1046_v60 }
 0x125   : > { %vm1207_vm3 = vcmp.ge.f32.partialorder %v1033_v13, 0.0  ;;  %v1223_v17 = vmul.f32 0.2, %v1033_v13 }
 0x126   : > { %v1240_v23 = vsel %vm1208_vm4, %v1046_v60, %v1224_v19 }
 0x127   : > { %v1239_v22 = vsel %vm1207_vm3, %v1033_v13, %v1223_v17 }
 0x128   : > { %v1254_v25 = vpack.c.bf16 %v1240_v23, %v1239_v22 }
 0x129   : > { %v1047_v27 = vpop.f32.mrf.mxu3 }
 0x12a   : > { %v1034_v26 = vpop.f32.mrf.mxu2  ;;  %1262 = vst [vmem:[%s2513_s29 + $0x8] sm:$0xff] %v1254_v25 }
 0x131   : > { %v1058_v28 = vpop.f32.mrf.mxu0  ;;  %v1071_v30 = vpop.f32.mrf.mxu1 }
 0x132   : > { %v1059_v29 = vadd.f32 %v1058_v28, %v2504_v8  ;;  %v1072_v31 = vadd.f32 %v1071_v30, %v2504_v8 }
 0x134   : > { %vm1209_vm5 = vcmp.ge.f32.partialorder %v1059_v29, 0.0  ;;  %v1225_v32 = vmul.f32 0.2, %v1059_v29  ;;  %vm1210_vm6 = vcmp.ge.f32.partialorder %v1072_v31, 0.0  ;;  %v1226_v33 = vmul.f32 0.2, %v1072_v31 }
 0x136   : > { %v1241_v34 = vsel %vm1209_vm5, %v1059_v29, %v1225_v32  ;;  %v1242_v36 = vsel %vm1210_vm6, %v1072_v31, %v1226_v33 }
 0x137   : > { %v1255_v39 = vpack.c.bf16 %v1242_v36, %v1241_v34 }
 0x139   : > { %v1097_v38 = vpop.f32.mrf.mxu3  ;;  %v1060_v42 = vpop.f32.mrf.mxu0  ;;  %1263 = vst [vmem:[%s2513_s29 + $0x10] sm:$0xff] %v1255_v39 }
 0x13a   : > { %v1084_v35 = vpop.f32.mrf.mxu2  ;;  %v1098_v40 = vadd.f32 %v1097_v38, %v2504_v8  ;;  %v1073_v44 = vpop.f32.mrf.mxu1 }
 0x13b   : > { %v1085_v37 = vadd.f32 %v1084_v35, %v2504_v8 }
 0x13c   : > { %vm1212_vm8 = vcmp.ge.f32.partialorder %v1098_v40, 0.0  ;;  %v1228_v43 = vmul.f32 0.2, %v1098_v40 }
 0x13d   : > { %vm1211_vm7 = vcmp.ge.f32.partialorder %v1085_v37, 0.0  ;;  %v1227_v41 = vmul.f32 0.2, %v1085_v37 }
 0x13e   : > { %v1244_v46 = vsel %vm1212_vm8, %v1098_v40, %v1228_v43 }
 0x13f   : > { %v1243_v45 = vsel %vm1211_vm7, %v1085_v37, %v1227_v41 }
 0x140   : > { %v1256_v47 = vpack.c.bf16 %v1244_v46, %v1243_v45 }
 0x141   : > { %v1099_v49 = vpop.f32.mrf.mxu3 }
 0x142   : > { %v1086_v48 = vpop.f32.mrf.mxu2  ;;  %1264 = vst [vmem:[%s2513_s29 + $0x18] sm:$0xff] %v1256_v47 }
 0x149   : > { %v1110_v50 = vpop.f32.mrf.mxu0  ;;  %v1123_v52 = vpop.f32.mrf.mxu1 }
 0x14a   : > { %v1111_v51 = vadd.f32 %v1110_v50, %v2504_v8  ;;  %v1124_v53 = vadd.f32 %v1123_v52, %v2504_v8 }
 0x14c   : > { %vm1213_vm9 = vcmp.ge.f32.partialorder %v1111_v51, 0.0  ;;  %v1229_v54 = vmul.f32 0.2, %v1111_v51  ;;  %vm1214_vm10 = vcmp.ge.f32.partialorder %v1124_v53, 0.0  ;;  %v1230_v55 = vmul.f32 0.2, %v1124_v53 }
 0x14e   : > { %v1245_v56 = vsel %vm1213_vm9, %v1111_v51, %v1229_v54  ;;  %v1246_v58 = vsel %vm1214_vm10, %v1124_v53, %v1230_v55 }
 0x14f   : > { %v1257_v62 = vpack.c.bf16 %v1246_v58, %v1245_v56 }
 0x151   : > { %v1149_v61 = vpop.f32.mrf.mxu3  ;;  %v1112_v1 = vpop.f32.mrf.mxu0  ;;  %1265 = vst [vmem:[%s2513_s29 + $0x20] sm:$0xff] %v1257_v62 }
 0x152   : > { %v1136_v57 = vpop.f32.mrf.mxu2  ;;  %v1150_v63 = vadd.f32 %v1149_v61, %v2504_v8  ;;  %v1125_v3 = vpop.f32.mrf.mxu1 }
 0x153   : > { %v1137_v59 = vadd.f32 %v1136_v57, %v2504_v8 }
 0x154   : > { %vm1216_vm12 = vcmp.ge.f32.partialorder %v1150_v63, 0.0  ;;  %v1232_v2 = vmul.f32 0.2, %v1150_v63 }
 0x155   : > { %vm1215_vm11 = vcmp.ge.f32.partialorder %v1137_v59, 0.0  ;;  %v1231_v0 = vmul.f32 0.2, %v1137_v59 }
 0x156   : > { %v1248_v5 = vsel %vm1216_vm12, %v1150_v63, %v1232_v2 }
 0x157   : > { %v1247_v4 = vsel %vm1215_vm11, %v1137_v59, %v1231_v0 }
 0x158   : > { %v1258_v6 = vpack.c.bf16 %v1248_v5, %v1247_v4 }
 0x159   : > { %v1151_v9 = vpop.f32.mrf.mxu3 }
 0x15a   : > { %v1138_v7 = vpop.f32.mrf.mxu2  ;;  %1266 = vst [vmem:[%s2513_s29 + $0x28] sm:$0xff] %v1258_v6 }
 0x161   : > { %v1162_v10 = vpop.f32.mrf.mxu0  ;;  %v1175_v12 = vpop.f32.mrf.mxu1 }
 0x162   : > { %v1163_v11 = vadd.f32 %v1162_v10, %v2504_v8  ;;  %v1176_v13 = vadd.f32 %v1175_v12, %v2504_v8 }
 0x164   : > { %vm1217_vm13 = vcmp.ge.f32.partialorder %v1163_v11, 0.0  ;;  %v1233_v60 = vmul.f32 0.2, %v1163_v11  ;;  %vm1218_vm14 = vcmp.ge.f32.partialorder %v1176_v13, 0.0  ;;  %v1234_v14 = vmul.f32 0.2, %v1176_v13 }
 0x166   : > { %v1249_v15 = vsel %vm1217_vm13, %v1163_v11, %v1233_v60  ;;  %v1250_v16 = vsel %vm1218_vm14, %v1176_v13, %v1234_v14 }
 0x167   : > { %v1259_v17 = vpack.c.bf16 %v1250_v16, %v1249_v15 }
 0x168   : > { %v1188_v18 = vpop.f32.mrf.mxu2 }
 0x169   : > { %v1189_v19 = vadd.f32 %v1188_v18, %v2504_v8  ;;  %v1201_v20 = vpop.f32.mrf.mxu3  ;;  %v1164_v21 = vpop.f32.mrf.mxu0  ;;  %1267 = vst [vmem:[%s2513_s29 + $0x30] sm:$0xff] %v1259_v17 }
 0x16a   : > { %v1202_v22 = vadd.f32 %v1201_v20, %v2504_v8  ;;  %v1177_v23 = vpop.f32.mrf.mxu1 }
 0x16b   : > { %vm1219_vm15 = vcmp.ge.f32.partialorder %v1189_v19, 0.0  ;;  %v1235_v24 = vmul.f32 0.2, %v1189_v19 }
 0x16c   : > { %vm1220_vm0 = vcmp.ge.f32.partialorder %v1202_v22, 0.0  ;;  %v1236_v25 = vmul.f32 0.2, %v1202_v22 }
 0x16d   : > { %v1251_v26 = vsel %vm1219_vm15, %v1189_v19, %v1235_v24 }
 0x16e   : > { %v1252_v27 = vsel %vm1220_vm0, %v1202_v22, %v1236_v25 }
 0x16f   : > { %v1260_v28 = vpack.c.bf16 %v1252_v27, %v1251_v26 }
 0x170   : > { %v1190_v29 = vpop.f32.mrf.mxu2 }
 0x171   : > { %1268 = vst [vmem:[%s2513_s29 + $0x38] sm:$0xff] %v1260_v28  ;;  %v1203_v30 = vpop.f32.mrf.mxu3 }
 0x172 PF: > { %s13_s18 = sadd.s32 1, %s1985_s18   ;;  %s2560_s12 = smov %s1965_s13 }
 0x173   : > { %p10_p12 = scmp.ge.s32.totalorder %s13_s18, 10   ;;  %s2561_s13 = smov %s2059_s25 }
 0x174   : > { %s2562_s14 = smov %s1977_s16  ;;  %s2563_s15 = smov %s1981_s17 }
 0x175   : > { %s2564_s16 = smov %s2567_s19  ;;  %s2565_s17 = smov %s2571_s20 }
 0x176   :  { %12 = sbr.rel (!%p10_p12) target bundleno = 4 (0x4), region = 90 }

// kernel: pix2pix_forward.5
= control target key start
LH: loop header
LB: loop body
LE: loop exit
PB: predicated region body
PF: predicated region fallthrough
CT: control target
= control target key end

     0   :  { %s1308_s12 = smov 0   ;;  %s1582_s0 = inlined_call_operand.vmem [shape: bf16[4,128,1024], index: 0, kind: input, shape index: {}]   ;;  %s1583_s1 = inlined_call_operand.vmem [shape: bf16[16,128], index: 1, kind: input, shape index: {}]   ;;  %s1584_s2 = inlined_call_operand.vmem [shape: f32[16,1], index: 2, kind: input, shape index: {}]   ;;  %s1585_s3 = inlined_call_operand.vmem [shape: bf16[4,16,1024], index: 3, kind: output, shape index: {}]  }
   0x1 LB: > { %s923_s13 = sadd.s32 4294967295, %s1284_s12   ;;  %p927_p0 = scmp.ge.s32.totalorder %s1284_s12, 1  ;;  %s1284_s12 = sphi %s1308_s12, %s13_s12  }
   0x2   : > { %p137_p1 = scmp.lt.s32.totalorder %s1284_s12, 5 }
   0x4   : > { %p138_p2 = pnand %p927_p0, %p137_p1 }
   0x5   : > { %p161_p3 = scmp.lt.s32.totalorder (!%p138_p2), %s923_s13, 3 }
   0x6   : > { %141 = sbr.rel (%p138_p2) target bundleno = 524 (0x20c), region = 32 }
   0xb   : > { %s1587_s13 = smov (!%p161_p3, %s923_s13), 3 }
   0xc   : > { %s1194_s14 = sshll.u32 %s1587_s13, 9  ;;  %s1195_s24 = sshll.u32 %s1587_s13, 6 }
   0xd   : > { %s1322_s17 = scalar_lea.vmem %s1582_s0, %s1194_s14  ;;  %s1547_s27 = scalar_lea.vmem %s1585_s3, %s1195_s24 }
   0xe   : > { %v1162_v0 = vld [vmem:[%s1322_s17 + $0x1c0] sm:$0xf]  ;;  %v1253_v2 = vld [vmem:[%s1322_s17 + $0x1c4] sm:$0xf]  ;;  %v1170_v5 = vld [vmem:[%s1322_s17 + $0x1c8] sm:$0xf] }
   0xf   : > { %v1257_v1 = vld [vmem:[%s1322_s17 + $0x1dc] sm:$0xf0]  ;;  %v1164_v4 = vld [vmem:[%s1322_s17 + $0x1e0] sm:$0xf0]  ;;  %v1258_v6 = vld [vmem:[%s1322_s17 + $0x1e4] sm:$0xf0] }
  0x10   : > { %v1163_v3 = vor.u32 %v1257_v1, %v1162_v0  ;;  %v1167_v7 = vor.u32 %v1253_v2, %v1164_v4  ;;  %v1171_v8 = vor.u32 %v1258_v6, %v1170_v5  ;;  %v1254_v9 = vld [vmem:[%s1322_s17 + $0x1cc] sm:$0xf]  ;;  %v1130_v11 = vld [vmem:[%s1322_s17 + $0x180] sm:$0xf]  ;;  %v1245_v14 = vld [vmem:[%s1322_s17 + $0x184] sm:$0xf] }
  0x11   : > { %v1172_v10 = vld [vmem:[%s1322_s17 + $0x1e8] sm:$0xf0]  ;;  %v1249_v13 = vld [vmem:[%s1322_s17 + $0x19c] sm:$0xf0]  ;;  %v1132_v15 = vld [vmem:[%s1322_s17 + $0x1a0] sm:$0xf0] }
  0x12   : > { %575 = vmatpush.bf16.msra.mxu0 %v1163_v3  ;;  %v1175_v12 = vor.u32 %v1254_v9, %v1172_v10  ;;  %589 = vmatpush.bf16.msra.mxu1 %v1167_v7  ;;  %v1131_v16 = vor.u32 %v1249_v13, %v1130_v11  ;;  %v1135_v17 = vor.u32 %v1245_v14, %v1132_v15  ;;  %v1138_v18 = vld [vmem:[%s1322_s17 + $0x188] sm:$0xf]  ;;  %v1246_v20 = vld [vmem:[%s1322_s17 + $0x18c] sm:$0xf]  ;;  %v1098_v23 = vld [vmem:[%s1322_s17 + $0x140] sm:$0xf] }
  0x13   : > { %603 = vmatpush.bf16.msra.mxu2 %v1171_v8  ;;  %v1250_v19 = vld [vmem:[%s1322_s17 + $0x1a4] sm:$0xf0]  ;;  %v1140_v22 = vld [vmem:[%s1322_s17 + $0x1a8] sm:$0xf0]  ;;  %v1241_v24 = vld [vmem:[%s1322_s17 + $0x15c] sm:$0xf0] }
  0x14   : > { %617 = vmatpush.bf16.msra.mxu3 %v1175_v12  ;;  %v1139_v21 = vor.u32 %v1250_v19, %v1138_v18  ;;  %v1143_v25 = vor.u32 %v1246_v20, %v1140_v22  ;;  %v1237_v26 = vld [vmem:[%s1322_s17 + $0x144] sm:$0xf]  ;;  %v1106_v28 = vld [vmem:[%s1322_s17 + $0x148] sm:$0xf]  ;;  %v1099_v29 = vor.u32 %v1241_v24, %v1098_v23  ;;  %v1238_v31 = vld [vmem:[%s1322_s17 + $0x14c] sm:$0xf] }
  0x15   : > { %v1100_v27 = vld [vmem:[%s1322_s17 + $0x160] sm:$0xf0]  ;;  %v1242_v30 = vld [vmem:[%s1322_s17 + $0x164] sm:$0xf0]  ;;  %v1108_v32 = vld [vmem:[%s1322_s17 + $0x168] sm:$0xf0] }
  0x16   : > { %576 = vmatpush.bf16.msra.mxu0 %v1131_v16  ;;  %590 = vmatpush.bf16.msra.mxu1 %v1135_v17  ;;  %v1103_v33 = vor.u32 %v1237_v26, %v1100_v27  ;;  %v1107_v34 = vor.u32 %v1242_v30, %v1106_v28  ;;  %v1066_v35 = vld [vmem:[%s1322_s17 + $0x100] sm:$0xf]  ;;  %v1229_v37 = vld [vmem:[%s1322_s17 + $0x104] sm:$0xf]  ;;  %v1111_v38 = vor.u32 %v1238_v31, %v1108_v32  ;;  %v1074_v40 = vld [vmem:[%s1322_s17 + $0x108] sm:$0xf] }
  0x17   : > { %604 = vmatpush.bf16.msra.mxu2 %v1139_v21  ;;  %v1233_v36 = vld [vmem:[%s1322_s17 + $0x11c] sm:$0xf0]  ;;  %v1068_v39 = vld [vmem:[%s1322_s17 + $0x120] sm:$0xf0]  ;;  %v1234_v41 = vld [vmem:[%s1322_s17 + $0x124] sm:$0xf0] }
  0x18   : > { %618 = vmatpush.bf16.msra.mxu3 %v1143_v25  ;;  %v1230_v42 = vld [vmem:[%s1322_s17 + $0x10c] sm:$0xf]  ;;  %v1067_v44 = vor.u32 %v1233_v36, %v1066_v35  ;;  %v1071_v45 = vor.u32 %v1229_v37, %v1068_v39  ;;  %v1075_v46 = vor.u32 %v1234_v41, %v1074_v40  ;;  %v1034_v47 = vld [vmem:[%s1322_s17 + $0xc0] sm:$0xf]  ;;  %v1221_v49 = vld [vmem:[%s1322_s17 + $0xc4] sm:$0xf] }
  0x19   : > { %v1076_v43 = vld [vmem:[%s1322_s17 + $0x128] sm:$0xf0]  ;;  %v1225_v48 = vld [vmem:[%s1322_s17 + $0xdc] sm:$0xf0]  ;;  %v1036_v51 = vld [vmem:[%s1322_s17 + $0xe0] sm:$0xf0] }
  0x1a   : > { %577 = vmatpush.bf16.msra.mxu0 %v1099_v29  ;;  %591 = vmatpush.bf16.msra.mxu1 %v1103_v33  ;;  %v1079_v50 = vor.u32 %v1230_v42, %v1076_v43  ;;  %v1042_v52 = vld [vmem:[%s1322_s17 + $0xc8] sm:$0xf]  ;;  %v1222_v54 = vld [vmem:[%s1322_s17 + $0xcc] sm:$0xf]  ;;  %v1035_v56 = vor.u32 %v1225_v48, %v1034_v47  ;;  %v1039_v57 = vor.u32 %v1221_v49, %v1036_v51  ;;  %v1002_v59 = vld [vmem:[%s1322_s17 + $0x80] sm:$0xf] }
  0x1b   : > { %605 = vmatpush.bf16.msra.mxu2 %v1107_v34  ;;  %v1226_v53 = vld [vmem:[%s1322_s17 + $0xe4] sm:$0xf0]  ;;  %v1044_v55 = vld [vmem:[%s1322_s17 + $0xe8] sm:$0xf0]  ;;  %v1217_v60 = vld [vmem:[%s1322_s17 + $0x9c] sm:$0xf0] }
  0x1c   : > { %619 = vmatpush.bf16.msra.mxu3 %v1111_v38  ;;  %v1043_v58 = vor.u32 %v1226_v53, %v1042_v52  ;;  %v1213_v61 = vld [vmem:[%s1322_s17 + $0x84] sm:$0xf]  ;;  %v1047_v62 = vor.u32 %v1222_v54, %v1044_v55  ;;  %v1010_v0 = vld [vmem:[%s1322_s17 + $0x88] sm:$0xf]  ;;  %v1214_v2 = vld [vmem:[%s1322_s17 + $0x8c] sm:$0xf]  ;;  %v1003_v4 = vor.u32 %v1217_v60, %v1002_v59 }
  0x1d   : > { %v1004_v63 = vld [vmem:[%s1322_s17 + $0xa0] sm:$0xf0]  ;;  %v1218_v1 = vld [vmem:[%s1322_s17 + $0xa4] sm:$0xf0]  ;;  %v1012_v3 = vld [vmem:[%s1322_s17 + $0xa8] sm:$0xf0] }
  0x1e   : > { %578 = vmatpush.bf16.msra.mxu0 %v1067_v44  ;;  %592 = vmatpush.bf16.msra.mxu1 %v1071_v45  ;;  %v1007_v5 = vor.u32 %v1213_v61, %v1004_v63  ;;  %v1011_v6 = vor.u32 %v1218_v1, %v1010_v0  ;;  %v970_v7 = vld [vmem:[%s1322_s17 + $0x40] sm:$0xf]  ;;  %v1205_v9 = vld [vmem:[%s1322_s17 + $0x44] sm:$0xf]  ;;  %v1015_v10 = vor.u32 %v1214_v2, %v1012_v3  ;;  %v978_v12 = vld [vmem:[%s1322_s17 + $0x48] sm:$0xf] }
  0x1f   : > { %606 = vmatpush.bf16.msra.mxu2 %v1075_v46  ;;  %v1209_v8 = vld [vmem:[%s1322_s17 + $0x5c] sm:$0xf0]  ;;  %v972_v11 = vld [vmem:[%s1322_s17 + $0x60] sm:$0xf0]  ;;  %v1210_v13 = vld [vmem:[%s1322_s17 + $0x64] sm:$0xf0] }
  0x20   : > { %620 = vmatpush.bf16.msra.mxu3 %v1079_v50  ;;  %v1206_v14 = vld [vmem:[%s1322_s17 + $0x4c] sm:$0xf]  ;;  %v971_v16 = vor.u32 %v1209_v8, %v970_v7  ;;  %v938_v17 = vld [vmem:[%s1322_s17] sm:$0xf]  ;;  %v1197_v19 = vld [vmem:[%s1322_s17 + $0x4] sm:$0xf]  ;;  %v975_v20 = vor.u32 %v1205_v9, %v972_v11  ;;  %v979_v21 = vor.u32 %v1210_v13, %v978_v12 }
  0x21   : > { %v980_v15 = vld [vmem:[%s1322_s17 + $0x68] sm:$0xf0]  ;;  %v1201_v18 = vld [vmem:[%s1322_s17 + $0x1c] sm:$0xf0]  ;;  %v940_v22 = vld [vmem:[%s1322_s17 + $0x20] sm:$0xf0] }
  0x22   : > { %579 = vmatpush.bf16.msra.mxu0 %v1035_v56  ;;  %593 = vmatpush.bf16.msra.mxu1 %v1039_v57  ;;  %v946_v23 = vld [vmem:[%s1322_s17 + $0x8] sm:$0xf]  ;;  %v983_v25 = vor.u32 %v1206_v14, %v980_v15  ;;  %v1198_v26 = vld [vmem:[%s1322_s17 + $0xc] sm:$0xf]  ;;  %v1178_v28 = vld [vmem:[%s1322_s17 + $0x1d0] sm:$0xf]  ;;  %v939_v31 = vor.u32 %v1201_v18, %v938_v17  ;;  %v943_v36 = vor.u32 %v1197_v19, %v940_v22 }
  0x23   : > { %607 = vmatpush.bf16.msra.mxu2 %v1043_v58  ;;  %v1202_v24 = vld [vmem:[%s1322_s17 + $0x24] sm:$0xf0]  ;;  %v948_v27 = vld [vmem:[%s1322_s17 + $0x28] sm:$0xf0]  ;;  %v1259_v29 = vld [vmem:[%s1322_s17 + $0x1ec] sm:$0xf0] }
  0x24   : > { %621 = vmatpush.bf16.msra.mxu3 %v1047_v62  ;;  %v1255_v30 = vld [vmem:[%s1322_s17 + $0x1d4] sm:$0xf]  ;;  %v1186_v33 = vld [vmem:[%s1322_s17 + $0x1d8] sm:$0xf]  ;;  %v1286_v35 = vmov 0   ;;  %v947_v37 = vor.u32 %v1202_v24, %v946_v23  ;;  %v951_v40 = vor.u32 %v1198_v26, %v948_v27  ;;  %v1179_v41 = vor.u32 %v1259_v29, %v1178_v28  ;;  %v1405_v51 = vld [vmem:[%s1583_s1] sm:$0xff] }
  0x25   : > { %v1180_v32 = vld [vmem:[%s1322_s17 + $0x1f0] sm:$0xf0]  ;;  %v1260_v34 = vld [vmem:[%s1322_s17 + $0x1f4] sm:$0xf0]  ;;  %1271 = vset.pattern.permute.xlu0 %v1286_v35  ;;  %v1256_v38 = vld [vmem:[%s1322_s17 + $0x1dc] sm:$0xf] }
  0x26   : > { %580 = vmatpush.bf16.msra.mxu0 %v1003_v4  ;;  %594 = vmatpush.bf16.msra.mxu1 %v1007_v5  ;;  %v1188_v39 = vld [vmem:[%s1322_s17 + $0x1f8] sm:$0xf0]  ;;  %v1146_v42 = vld [vmem:[%s1322_s17 + $0x190] sm:$0xf]  ;;  %v1183_v43 = vor.u32 %v1255_v30, %v1180_v32  ;;  %v1187_v44 = vor.u32 %v1260_v34, %v1186_v33  ;;  %v1247_v46 = vld [vmem:[%s1322_s17 + $0x194] sm:$0xf] }
  0x27   : > { %608 = vmatpush.bf16.msra.mxu2 %v1011_v6  ;;  %v1251_v45 = vld [vmem:[%s1322_s17 + $0x1ac] sm:$0xf0]  ;;  %v1148_v47 = vld [vmem:[%s1322_s17 + $0x1b0] sm:$0xf0]  ;;  %v1191_v48 = vor.u32 %v1256_v38, %v1188_v39  ;;  %v1154_v49 = vld [vmem:[%s1322_s17 + $0x198] sm:$0xf] }
  0x28   : > { %622 = vmatpush.bf16.msra.mxu3 %v1015_v10  ;;  %v1252_v50 = vld [vmem:[%s1322_s17 + $0x1b4] sm:$0xf0]  ;;  %v1248_v52 = vld [vmem:[%s1322_s17 + $0x19c] sm:$0xf]  ;;  %v1147_v54 = vor.u32 %v1251_v45, %v1146_v42  ;;  %v1151_v55 = vor.u32 %v1247_v46, %v1148_v47  ;;  %v1114_v57 = vld [vmem:[%s1322_s17 + $0x150] sm:$0xf] }
  0x29   : > { %v1156_v53 = vld [vmem:[%s1322_s17 + $0x1b8] sm:$0xf0]  ;;  %v1155_v56 = vor.u32 %v1252_v50, %v1154_v49  ;;  %v1243_v58 = vld [vmem:[%s1322_s17 + $0x16c] sm:$0xf0]  ;;  %v1239_v59 = vld [vmem:[%s1322_s17 + $0x154] sm:$0xf] }
  0x2a   : > { %581 = vmatpush.bf16.msra.mxu0 %v971_v16  ;;  %595 = vmatpush.bf16.msra.mxu1 %v975_v20  ;;  %v1159_v60 = vor.u32 %v1248_v52, %v1156_v53  ;;  %v1116_v61 = vld [vmem:[%s1322_s17 + $0x170] sm:$0xf0]  ;;  %v1122_v62 = vld [vmem:[%s1322_s17 + $0x158] sm:$0xf]  ;;  %v1240_v0 = vld [vmem:[%s1322_s17 + $0x15c] sm:$0xf]  ;;  %v1115_v3 = vor.u32 %v1243_v58, %v1114_v57 }
  0x2b   : > { %609 = vmatpush.bf16.msra.mxu2 %v979_v21  ;;  %v1244_v63 = vld [vmem:[%s1322_s17 + $0x174] sm:$0xf0]  ;;  %v1124_v1 = vld [vmem:[%s1322_s17 + $0x178] sm:$0xf0]  ;;  %v237_v2 = vld [vmem:[%s1584_s2] sm:$0xff]  ;;  %v1119_v4 = vor.u32 %v1239_v59, %v1116_v61 }
  0x2c   : > { %623 = vmatpush.bf16.msra.mxu3 %v983_v25  ;;  %v1123_v5 = vor.u32 %v1244_v63, %v1122_v62  ;;  %v1082_v6 = vld [vmem:[%s1322_s17 + $0x110] sm:$0xf]  ;;  %v1231_v8 = vld [vmem:[%s1322_s17 + $0x114] sm:$0xf]  ;;  %v1127_v9 = vor.u32 %v1240_v0, %v1124_v1  ;;  %v1090_v11 = vld [vmem:[%s1322_s17 + $0x118] sm:$0xf]  ;;  %241 = vperm.xlu0 %1271, %v237_v2  }
  0x2d   : > { %v1235_v7 = vld [vmem:[%s1322_s17 + $0x12c] sm:$0xf0]  ;;  %v1084_v10 = vld [vmem:[%s1322_s17 + $0x130] sm:$0xf0]  ;;  %v1236_v12 = vld [vmem:[%s1322_s17 + $0x134] sm:$0xf0] }
  0x2e   : > { %582 = vmatpush.bf16.msra.mxu0 %v939_v31  ;;  %596 = vmatpush.bf16.msra.mxu1 %v943_v36  ;;  %v1232_v13 = vld [vmem:[%s1322_s17 + $0x11c] sm:$0xf]  ;;  %v1083_v15 = vor.u32 %v1235_v7, %v1082_v6  ;;  %v1087_v16 = vor.u32 %v1231_v8, %v1084_v10  ;;  %v1091_v17 = vor.u32 %v1236_v12, %v1090_v11  ;;  %v1050_v18 = vld [vmem:[%s1322_s17 + $0xd0] sm:$0xf]  ;;  %v1223_v20 = vld [vmem:[%s1322_s17 + $0xd4] sm:$0xf] }
  0x2f   : > { %610 = vmatpush.bf16.msra.mxu2 %v947_v37  ;;  %v1092_v14 = vld [vmem:[%s1322_s17 + $0x138] sm:$0xf0]  ;;  %v1227_v19 = vld [vmem:[%s1322_s17 + $0xec] sm:$0xf0]  ;;  %v1052_v22 = vld [vmem:[%s1322_s17 + $0xf0] sm:$0xf0] }
  0x30   : > { %624 = vmatpush.bf16.msra.mxu3 %v951_v40  ;;  %v1095_v21 = vor.u32 %v1232_v13, %v1092_v14  ;;  %v1058_v23 = vld [vmem:[%s1322_s17 + $0xd8] sm:$0xf]  ;;  %v1224_v25 = vld [vmem:[%s1322_s17 + $0xdc] sm:$0xf]  ;;  %v238_v27 = vld [vmem:[%s1584_s2 + $0x8] sm:$0xff]  ;;  %v1051_v28 = vor.u32 %v1227_v19, %v1050_v18  ;;  %v1055_v29 = vor.u32 %v1223_v20, %v1052_v22 }
  0x31   : > { %583 = vmatmul.bf16.vlgmr.msra.gmra.mxu0 %v1405_v51  ;;  %597 = vmatmul.bf16.vlgmr.msra.gmra.mxu1 %v1405_v51  ;;  %v1228_v24 = vld [vmem:[%s1322_s17 + $0xf4] sm:$0xf0]  ;;  %v1060_v26 = vld [vmem:[%s1322_s17 + $0xf8] sm:$0xf0]  ;;  %v1018_v31 = vld [vmem:[%s1322_s17 + $0x90] sm:$0xf] }
  0x32   : > { %631 = vmatpush.bf16.msrb.mxu0 %v1179_v41  ;;  %645 = vmatpush.bf16.msrb.mxu1 %v1183_v43  ;;  %v1059_v30 = vor.u32 %v1228_v24, %v1058_v23  ;;  %v1219_v32 = vld [vmem:[%s1322_s17 + $0xac] sm:$0xf0]  ;;  %v1215_v33 = vld [vmem:[%s1322_s17 + $0x94] sm:$0xf]  ;;  %v1063_v34 = vor.u32 %v1224_v25, %v1060_v26  ;;  %v1026_v36 = vld [vmem:[%s1322_s17 + $0x98] sm:$0xf] }
  0x33   : > { %659 = vmatpush.bf16.msrb.mxu2 %v1187_v44  ;;  %625 = vmatmul.bf16.vlgmr.msra.gmra.mxu3 %v1405_v51  ;;  %v1020_v35 = vld [vmem:[%s1322_s17 + $0xb0] sm:$0xf0]  ;;  %v1220_v37 = vld [vmem:[%s1322_s17 + $0xb4] sm:$0xf0]  ;;  %v1216_v38 = vld [vmem:[%s1322_s17 + $0x9c] sm:$0xf]  ;;  %v1019_v40 = vor.u32 %v1219_v32, %v1018_v31 }
  0x34   : > { %673 = vmatpush.bf16.msrb.mxu3 %v1191_v48  ;;  %611 = vmatmul.bf16.vlgmr.msra.gmra.mxu2 %v1405_v51  ;;  %v1028_v39 = vld [vmem:[%s1322_s17 + $0xb8] sm:$0xf0]  ;;  %v1023_v41 = vor.u32 %v1215_v33, %v1020_v35  ;;  %v1027_v42 = vor.u32 %v1220_v37, %v1026_v36  ;;  %v986_v43 = vld [vmem:[%s1322_s17 + $0x50] sm:$0xf]  ;;  %v1207_v45 = vld [vmem:[%s1322_s17 + $0x54] sm:$0xf] }
  0x35   : > { %246 = vperm.xlu0 %1271, %v238_v27   ;;  %v1211_v44 = vld [vmem:[%s1322_s17 + $0x6c] sm:$0xf0]  ;;  %v1031_v46 = vor.u32 %v1216_v38, %v1028_v39  ;;  %v988_v47 = vld [vmem:[%s1322_s17 + $0x70] sm:$0xf0]  ;;  %v994_v48 = vld [vmem:[%s1322_s17 + $0x58] sm:$0xf] }
  0x36   : > { %632 = vmatpush.bf16.msrb.mxu0 %v1147_v54  ;;  %646 = vmatpush.bf16.msrb.mxu1 %v1151_v55  ;;  %v1212_v49 = vld [vmem:[%s1322_s17 + $0x74] sm:$0xf0]  ;;  %v1208_v50 = vld [vmem:[%s1322_s17 + $0x5c] sm:$0xf]  ;;  %v987_v53 = vor.u32 %v1211_v44, %v986_v43  ;;  %v991_v54 = vor.u32 %v1207_v45, %v988_v47  ;;  %v1203_v57 = vld [vmem:[%s1322_s17 + $0x2c] sm:$0xf0] }
  0x37   : > { %660 = vmatpush.bf16.msrb.mxu2 %v1155_v56  ;;  %v996_v52 = vld [vmem:[%s1322_s17 + $0x78] sm:$0xf0]  ;;  %v995_v55 = vor.u32 %v1212_v49, %v994_v48  ;;  %v954_v56 = vld [vmem:[%s1322_s17 + $0x10] sm:$0xf]  ;;  %v1199_v58 = vld [vmem:[%s1322_s17 + $0x14] sm:$0xf] }
  0x38   : > { %674 = vmatpush.bf16.msrb.mxu3 %v1159_v60  ;;  %v999_v59 = vor.u32 %v1208_v50, %v996_v52  ;;  %v956_v60 = vld [vmem:[%s1322_s17 + $0x30] sm:$0xf0]  ;;  %v962_v61 = vld [vmem:[%s1322_s17 + $0x18] sm:$0xf]  ;;  %v1200_v63 = vld [vmem:[%s1322_s17 + $0x1c] sm:$0xf]  ;;  %v955_v1 = vor.u32 %v1203_v57, %v954_v56 }
  0x39   : > { %v1204_v62 = vld [vmem:[%s1322_s17 + $0x34] sm:$0xf0]  ;;  %v964_v0 = vld [vmem:[%s1322_s17 + $0x38] sm:$0xf0]  ;;  %v959_v2 = vor.u32 %v1199_v58, %v956_v60 }
  0x3a   : > { %633 = vmatpush.bf16.msrb.mxu0 %v1115_v3  ;;  %647 = vmatpush.bf16.msrb.mxu1 %v1119_v4  ;;  %v963_v3 = vor.u32 %v1204_v62, %v962_v61  ;;  %v967_v4 = vor.u32 %v1200_v63, %v964_v0 }
  0x3b   : > { %661 = vmatpush.bf16.msrb.mxu2 %v1123_v5 }
  0x3c   : > { %675 = vmatpush.bf16.msrb.mxu3 %v1127_v9 }
  0x3e   : > { %634 = vmatpush.bf16.msrb.mxu0 %v1083_v15  ;;  %648 = vmatpush.bf16.msrb.mxu1 %v1087_v16 }
  0x3f   : > { %662 = vmatpush.bf16.msrb.mxu2 %v1091_v17 }
  0x40   : > { %676 = vmatpush.bf16.msrb.mxu3 %v1095_v21 }
  0x42   : > { %635 = vmatpush.bf16.msrb.mxu0 %v1051_v28  ;;  %649 = vmatpush.bf16.msrb.mxu1 %v1055_v29 }
  0x43   : > { %663 = vmatpush.bf16.msrb.mxu2 %v1059_v30 }
  0x44   : > { %677 = vmatpush.bf16.msrb.mxu3 %v1063_v34 }
  0x46   : > { %636 = vmatpush.bf16.msrb.mxu0 %v1019_v40  ;;  %650 = vmatpush.bf16.msrb.mxu1 %v1023_v41 }
  0x47   : > { %664 = vmatpush.bf16.msrb.mxu2 %v1027_v42 }
  0x48   : > { %678 = vmatpush.bf16.msrb.mxu3 %v1031_v46 }
  0x4a   : > { %637 = vmatpush.bf16.msrb.mxu0 %v987_v53  ;;  %651 = vmatpush.bf16.msrb.mxu1 %v991_v54  ;;  %v1287_v53 = vmov 1024.0  }
  0x4b   : > { %665 = vmatpush.bf16.msrb.mxu2 %v995_v55  ;;  %1272 = vrcp.f32 %v1287_v53 }
  0x4c   : > { %679 = vmatpush.bf16.msrb.mxu3 %v999_v59 }
  0x4e   : > { %638 = vmatpush.bf16.msrb.mxu0 %v955_v1  ;;  %652 = vmatpush.bf16.msrb.mxu1 %v959_v2 }
  0x4f   : > { %666 = vmatpush.bf16.msrb.mxu2 %v963_v3 }
  0x50   : > { %680 = vmatpush.bf16.msrb.mxu3 %v967_v4 }
  0x51   : > { %639 = vmatmul.bf16.vlgmr.msrb.gmra.mxu0 %v1405_v51  ;;  %653 = vmatmul.bf16.vlgmr.msrb.gmra.mxu1 %v1405_v51  ;;  %v1273_v54 = vpop.eup %1272 }
  0x52   : > { %667 = vmatmul.bf16.vlgmr.msrb.gmra.mxu2 %v1405_v51  ;;  %v706_v55 = vmul.f32 1024.0, %v1273_v54  ;;  %vm710_vm0 = vweird.f32 %v1273_v54 }
  0x53   : > { %681 = vmatmul.bf16.vlgmr.msrb.gmra.mxu3 %v1405_v51 }
  0x54   : > { %v707_v56 = vsub.f32 1.0, %v706_v55 }
  0x56   : > { %v708_v57 = vmul.f32 %v1273_v54, %v707_v56 }
  0x58   : > { %v709_v58 = vadd.f32 %v1273_v54, %v708_v57 }
  0x5a   : > { %v711_v59 = vsel %vm710_vm0, %v1273_v54, %v709_v58 }
  0x9e   : > { %v242_v7 = vpop.permute.xlu0 %241 }
  0xa7   : > { %v247_v16 = vpop.permute.xlu0 %246 }
  0xae   : > { %v584_v5 = vpop.f32.mrf.mxu0  ;;  %v598_v6 = vpop.f32.mrf.mxu1 }
  0xaf   : > { %v585_v9 = vadd.f32 %v584_v5, %v242_v7  ;;  %v599_v10 = vadd.f32 %v598_v6, %v242_v7 }
  0xb1   : > { %v687_v14 = vadd.f32 %v599_v10, %v585_v9 }
  0xb6   : > { %v626_v11 = vpop.f32.mrf.mxu3  ;;  %v586_v12 = vpop.f32.mrf.mxu0 }
  0xb7   : > { %v612_v8 = vpop.f32.mrf.mxu2  ;;  %v600_v13 = vpop.f32.mrf.mxu1  ;;  %v627_v18 = vadd.f32 %v626_v11, %v242_v7  ;;  %v1471_v19 = vadd.f32 %v586_v12, %v247_v16 }
  0xb8   : > { %v613_v15 = vadd.f32 %v612_v8, %v242_v7  ;;  %v1473_v20 = vadd.f32 %v600_v13, %v247_v16 }
  0xba   : > { %v688_v17 = vadd.f32 %v687_v14, %v613_v15  ;;  %v696_v26 = vadd.f32 %v1473_v20, %v1471_v19 }
  0xbc   : > { %v689_v25 = vadd.f32 %v688_v17, %v627_v18 }
  0xbe   : > { %v628_v51 = vpop.f32.mrf.mxu3 }
  0xbf   : > { %v614_v21 = vpop.f32.mrf.mxu2  ;;  %v629_v30 = vadd.f32 %v628_v51, %v247_v16 }
  0xc0   : > { %v615_v27 = vadd.f32 %v614_v21, %v247_v16 }
  0xc2   : > { %v697_v29 = vadd.f32 %v696_v26, %v615_v27 }
  0xc4   : > { %v698_v38 = vadd.f32 %v697_v29, %v629_v30 }
  0xce   : > { %v640_v22 = vpop.f32.mrf.mxu0  ;;  %v654_v24 = vpop.f32.mrf.mxu1 }
  0xcf   : > { %v641_v23 = vadd.f32 %v640_v22, %v242_v7  ;;  %v655_v31 = vadd.f32 %v654_v24, %v242_v7 }
  0xd1   : > { %v690_v28 = vadd.f32 %v689_v25, %v641_v23 }
  0xd3   : > { %v691_v33 = vadd.f32 %v690_v28, %v655_v31 }
  0xd5   : > { %v668_v32 = vpop.f32.mrf.mxu2 }
  0xd6   : > { %v669_v34 = vadd.f32 %v668_v32, %v242_v7  ;;  %v682_v35 = vpop.f32.mrf.mxu3  ;;  %v642_v36 = vpop.f32.mrf.mxu0 }
  0xd7   : > { %v643_v37 = vadd.f32 %v642_v36, %v247_v16  ;;  %v683_v39 = vadd.f32 %v682_v35, %v242_v7  ;;  %v656_v41 = vpop.f32.mrf.mxu1 }
  0xd8   : > { %v692_v40 = vadd.f32 %v691_v33, %v669_v34  ;;  %v657_v44 = vadd.f32 %v656_v41, %v247_v16 }
  0xd9   : > { %v699_v42 = vadd.f32 %v698_v38, %v643_v37 }
  0xda   : > { %v693_v43 = vadd.f32 %v692_v40, %v683_v39 }
  0xdb   : > { %v700_v46 = vadd.f32 %v699_v42, %v657_v44 }
  0xdc   : > { %694 = vadd.xlane.f32.xlu1 %v693_v43 }
  0xdd   : > { %v670_v45 = vpop.f32.mrf.mxu2 }
  0xde   : > { %v671_v47 = vadd.f32 %v670_v45, %v247_v16  ;;  %v684_v48 = vpop.f32.mrf.mxu3 }
  0xdf   : > { %v685_v50 = vadd.f32 %v684_v48, %v247_v16 }
  0xe0   : > { %v701_v49 = vadd.f32 %v700_v46, %v671_v47 }
  0xe2   : > { %v702_v52 = vadd.f32 %v701_v49, %v685_v50 }
  0xe4   : > { %703 = vadd.xlane.f32.xlu1 %v702_v52 }
 0x14f   : > { %v695_v60 = vpop.xlane.xlu1 %694 }
 0x150   : > { %v712_v61 = vmul.f32 %v711_v59, %v695_v60 }
 0x152   : > { %v1477_v62 = vsub.f32 %v585_v9, %v712_v61  ;;  %v1479_v63 = vsub.f32 %v599_v10, %v712_v61  ;;  %v1481_v0 = vsub.f32 %v613_v15, %v712_v61  ;;  %v1483_v1 = vsub.f32 %v627_v18, %v712_v61 }
 0x153   : > { %v1489_v4 = vsub.f32 %v641_v23, %v712_v61  ;;  %v1493_v8 = vsub.f32 %v655_v31, %v712_v61  ;;  %v720_v12 = vsub.f32 %v669_v34, %v712_v61  ;;  %v721_v18 = vsub.f32 %v683_v39, %v712_v61 }
 0x154   : > { %v730_v2 = vmul.f32 %v1477_v62, %v1477_v62  ;;  %v731_v3 = vmul.f32 %v1479_v63, %v1479_v63  ;;  %v732_v5 = vmul.f32 %v1481_v0, %v1481_v0  ;;  %v733_v10 = vmul.f32 %v1483_v1, %v1483_v1 }
 0x155   : > { %v734_v13 = vmul.f32 %v1489_v4, %v1489_v4  ;;  %v735_v21 = vmul.f32 %v1493_v8, %v1493_v8  ;;  %v737_v28 = vmul.f32 %v721_v18, %v721_v18 }
 0x156   : > { %v746_v6 = vadd.f32 %v731_v3, %v730_v2 }
 0x157   : > { %v704_v7 = vpop.xlane.xlu1 %703 }
 0x158   : > { %v713_v9 = vmul.f32 %v711_v59, %v704_v7  ;;  %v747_v11 = vadd.f32 %v746_v6, %v732_v5 }
 0x15a   : > { %v748_v14 = vadd.f32 %v747_v11, %v733_v10  ;;  %v1500_v15 = vsub.f32 %v1471_v19, %v713_v9  ;;  %v1503_v16 = vsub.f32 %v1473_v20, %v713_v9  ;;  %v1505_v17 = vsub.f32 %v615_v27, %v713_v9 }
 0x15b   : > { %v1509_v22 = vsub.f32 %v629_v30, %v713_v9  ;;  %v736_v19 = vmul.f32 %v720_v12, %v720_v12  ;;  %v1515_v26 = vsub.f32 %v643_v37, %v713_v9  ;;  %v1519_v31 = vsub.f32 %v657_v44, %v713_v9 }
 0x15c   : > { %v749_v51 = vadd.f32 %v748_v14, %v734_v13  ;;  %v738_v23 = vmul.f32 %v1500_v15, %v1500_v15  ;;  %v739_v24 = vmul.f32 %v1503_v16, %v1503_v16  ;;  %v740_v20 = vmul.f32 %v1505_v17, %v1505_v17 }
 0x15d   : > { %v741_v30 = vmul.f32 %v1509_v22, %v1509_v22  ;;  %v1523_v34 = vsub.f32 %v671_v47, %v713_v9  ;;  %v742_v35 = vmul.f32 %v1515_v26, %v1515_v26  ;;  %v1527_v37 = vsub.f32 %v685_v50, %v713_v9 }
 0x15e   : > { %v750_v25 = vadd.f32 %v749_v51, %v735_v21  ;;  %v755_v27 = vadd.f32 %v739_v24, %v738_v23  ;;  %v743_v38 = vmul.f32 %v1519_v31, %v1519_v31 }
 0x15f   : > { %v744_v40 = vmul.f32 %v1523_v34, %v1523_v34  ;;  %v745_v42 = vmul.f32 %v1527_v37, %v1527_v37 }
 0x160   : > { %v751_v29 = vadd.f32 %v750_v25, %v736_v19  ;;  %v756_v32 = vadd.f32 %v755_v27, %v740_v20 }
 0x162   : > { %v752_v33 = vadd.f32 %v751_v29, %v737_v28  ;;  %v757_v36 = vadd.f32 %v756_v32, %v741_v30 }
 0x164   : > { %753 = vadd.xlane.f32.xlu2 %v752_v33  ;;  %v758_v39 = vadd.f32 %v757_v36, %v742_v35 }
 0x166   : > { %v759_v41 = vadd.f32 %v758_v39, %v743_v38 }
 0x168   : > { %v760_v43 = vadd.f32 %v759_v41, %v744_v40 }
 0x16a   : > { %v761_v44 = vadd.f32 %v760_v43, %v745_v42 }
 0x16c   : > { %762 = vadd.xlane.f32.xlu2 %v761_v44 }
 0x1d7   : > { %v754_v45 = vpop.xlane.xlu2 %753 }
 0x1d8   : > { %v764_v46 = vmul.f32 %v754_v45, %v711_v59 }
 0x1da   : > { %v766_v47 = vadd.f32 1e-05, %v764_v46 }
 0x1dc   : > { %1274 = vrsqrt.f32 %v766_v47  ;;  %vm774_vm2 = vweird.f32 %v766_v47 }
 0x1df   : > { %v763_v48 = vpop.xlane.xlu2 %762 }
 0x1e0   : > { %v765_v49 = vmul.f32 %v763_v48, %v711_v59 }
 0x1e2   : > { %v1275_v50 = vpop.eup %1274  ;;  %v767_v52 = vadd.f32 1e-05, %v765_v49 }
 0x1e3   : > { %v769_v53 = vmul.f32 %v1275_v50, %v766_v47  ;;  %vm775_vm1 = vweird.f32 %v1275_v50 }
 0x1e4   : > { %1276 = vrsqrt.f32 %v767_v52  ;;  %vm776_vm3 = vmor %vm774_vm2, %vm775_vm1  ;;  %vm784_vm13 = vweird.f32 %v767_v52 }
 0x1e5   : > { %v770_v54 = vmul.f32 %v1275_v50, %v769_v53 }
 0x1e7   : > { %v771_v55 = vmul.f32 0.5, %v770_v54 }
 0x1e9   : > { %v772_v56 = vsub.f32 1.5, %v771_v55 }
 0x1ea   : > { %v1277_v57 = vpop.eup %1276 }
 0x1eb   : > { %v773_v58 = vmul.f32 %v1275_v50, %v772_v56  ;;  %v779_v61 = vmul.f32 %v1277_v57, %v767_v52  ;;  %vm785_vm12 = vweird.f32 %v1277_v57 }
 0x1ec   : > { %vm786_vm14 = vmor %vm784_vm13, %vm785_vm12 }
 0x1ed   : > { %v777_v60 = vsel %vm776_vm3, %v1275_v50, %v773_v58 }
 0x1ee   : > { %v788_v2 = vmul.f32 %v777_v60, %v1477_v62  ;;  %v789_v3 = vmul.f32 %v777_v60, %v1479_v63  ;;  %v790_v59 = vmul.f32 %v777_v60, %v1481_v0  ;;  %v791_v5 = vmul.f32 %v777_v60, %v1483_v1 }
 0x1ef   : > { %v792_v6 = vmul.f32 %v777_v60, %v1489_v4  ;;  %v793_v7 = vmul.f32 %v777_v60, %v1493_v8  ;;  %v794_v9 = vmul.f32 %v777_v60, %v720_v12  ;;  %v795_v10 = vmul.f32 %v777_v60, %v721_v18 }
 0x1f0   : > { %vm804_vm4 = vcmp.ge.f32.partialorder %v788_v2, 0.0  ;;  %vm805_vm5 = vcmp.ge.f32.partialorder %v789_v3, 0.0  ;;  %vm806_vm6 = vcmp.ge.f32.partialorder %v790_v59, 0.0  ;;  %vm807_vm7 = vcmp.ge.f32.partialorder %v791_v5, 0.0 }
 0x1f1   : > { %vm808_vm8 = vcmp.ge.f32.partialorder %v792_v6, 0.0  ;;  %vm809_vm9 = vcmp.ge.f32.partialorder %v793_v7, 0.0  ;;  %vm810_vm10 = vcmp.ge.f32.partialorder %v794_v9, 0.0  ;;  %vm811_vm11 = vcmp.ge.f32.partialorder %v795_v10, 0.0 }
 0x1f2   : > { %v820_v62 = vmul.f32 0.2, %v788_v2  ;;  %v821_v63 = vmul.f32 0.2, %v789_v3  ;;  %v822_v0 = vmul.f32 0.2, %v790_v59  ;;  %v780_v4 = vmul.f32 %v1277_v57, %v779_v61 }
 0x1f3   : > { %v823_v11 = vmul.f32 0.2, %v791_v5  ;;  %v824_v1 = vmul.f32 0.2, %v792_v6  ;;  %v825_v13 = vmul.f32 0.2, %v793_v7 }
 0x1f4   : > { %v826_v14 = vmul.f32 0.2, %v794_v9  ;;  %v827_v8 = vmul.f32 0.2, %v795_v10  ;;  %v836_v12 = vsel %vm804_vm4, %v788_v2, %v820_v62  ;;  %v837_v18 = vsel %vm805_vm5, %v789_v3, %v821_v63 }
 0x1f5   : > { %v838_v21 = vsel %vm806_vm6, %v790_v59, %v822_v0  ;;  %v839_v51 = vsel %vm807_vm7, %v791_v5, %v823_v11  ;;  %v840_v23 = vsel %vm808_vm8, %v792_v6, %v824_v1  ;;  %v841_v24 = vsel %vm809_vm9, %v793_v7, %v825_v13 }
 0x1f6   : > { %v842_v19 = vsel %vm810_vm10, %v794_v9, %v826_v14  ;;  %v843_v25 = vsel %vm811_vm11, %v795_v10, %v827_v8  ;;  %v852_v20 = vpack.c.bf16 %v837_v18, %v836_v12  ;;  %v853_v27 = vpack.c.bf16 %v839_v51, %v838_v21 }
 0x1f7   : > { %v854_v28 = vpack.c.bf16 %v841_v24, %v840_v23  ;;  %v855_v29 = vpack.c.bf16 %v843_v25, %v842_v19  ;;  %v781_v30 = vmul.f32 0.5, %v780_v4 }
 0x1f8   : > { %860 = vst [vmem:[%s1547_s27] sm:$0xff] %v852_v20 }
 0x1f9   : > { %861 = vst [vmem:[%s1547_s27 + $0x8] sm:$0xff] %v853_v27  ;;  %v782_v32 = vsub.f32 1.5, %v781_v30 }
 0x1fa   : > { %862 = vst [vmem:[%s1547_s27 + $0x10] sm:$0xff] %v854_v28 }
 0x1fb   : > { %863 = vst [vmem:[%s1547_s27 + $0x18] sm:$0xff] %v855_v29  ;;  %v783_v33 = vmul.f32 %v1277_v57, %v782_v32 }
 0x1fd   : > { %v787_v35 = vsel %vm786_vm14, %v1277_v57, %v783_v33 }
 0x1fe   : > { %v796_v36 = vmul.f32 %v787_v35, %v1500_v15  ;;  %v797_v38 = vmul.f32 %v787_v35, %v1503_v16  ;;  %v798_v39 = vmul.f32 %v787_v35, %v1505_v17  ;;  %v799_v40 = vmul.f32 %v787_v35, %v1509_v22 }
 0x1ff   : > { %v800_v41 = vmul.f32 %v787_v35, %v1515_v26  ;;  %v801_v42 = vmul.f32 %v787_v35, %v1519_v31  ;;  %v802_v43 = vmul.f32 %v787_v35, %v1523_v34  ;;  %v803_v44 = vmul.f32 %v787_v35, %v1527_v37 }
 0x200   : > { %vm812_vm15 = vcmp.ge.f32.partialorder %v796_v36, 0.0  ;;  %vm813_vm0 = vcmp.ge.f32.partialorder %v797_v38, 0.0  ;;  %vm814_vm1 = vcmp.ge.f32.partialorder %v798_v39, 0.0  ;;  %vm815_vm2 = vcmp.ge.f32.partialorder %v799_v40, 0.0 }
 0x201   : > { %vm816_vm3 = vcmp.ge.f32.partialorder %v800_v41, 0.0  ;;  %vm817_vm4 = vcmp.ge.f32.partialorder %v801_v42, 0.0  ;;  %vm818_vm5 = vcmp.ge.f32.partialorder %v802_v43, 0.0  ;;  %vm819_vm6 = vcmp.ge.f32.partialorder %v803_v44, 0.0 }
 0x202   : > { %v828_v15 = vmul.f32 0.2, %v796_v36  ;;  %v829_v16 = vmul.f32 0.2, %v797_v38  ;;  %v830_v17 = vmul.f32 0.2, %v798_v39 }
 0x203   : > { %v831_v22 = vmul.f32 0.2, %v799_v40  ;;  %v832_v45 = vmul.f32 0.2, %v800_v41  ;;  %v833_v26 = vmul.f32 0.2, %v801_v42 }
 0x204   : > { %v834_v31 = vmul.f32 0.2, %v802_v43  ;;  %v835_v34 = vmul.f32 0.2, %v803_v44  ;;  %v844_v37 = vsel %vm812_vm15, %v796_v36, %v828_v15  ;;  %v845_v46 = vsel %vm813_vm0, %v797_v38, %v829_v16 }
 0x205   : > { %v846_v47 = vsel %vm814_vm1, %v798_v39, %v830_v17  ;;  %v847_v48 = vsel %vm815_vm2, %v799_v40, %v831_v22  ;;  %v848_v49 = vsel %vm816_vm3, %v800_v41, %v832_v45  ;;  %v849_v50 = vsel %vm817_vm4, %v801_v42, %v833_v26 }
 0x206   : > { %v850_v52 = vsel %vm818_vm5, %v802_v43, %v834_v31  ;;  %v851_v53 = vsel %vm819_vm6, %v803_v44, %v835_v34  ;;  %v856_v54 = vpack.c.bf16 %v845_v46, %v844_v37  ;;  %v857_v55 = vpack.c.bf16 %v847_v48, %v846_v47 }
 0x207   : > { %v858_v56 = vpack.c.bf16 %v849_v50, %v848_v49  ;;  %v859_v57 = vpack.c.bf16 %v851_v53, %v850_v52 }
 0x208   : > { %864 = vst [vmem:[%s1547_s27 + $0x20] sm:$0xff] %v856_v54 }
 0x209   : > { %865 = vst [vmem:[%s1547_s27 + $0x28] sm:$0xff] %v857_v55 }
 0x20a   : > { %866 = vst [vmem:[%s1547_s27 + $0x30] sm:$0xff] %v858_v56 }
 0x20b   : > { %867 = vst [vmem:[%s1547_s27 + $0x38] sm:$0xff] %v859_v57 }
 0x20c PF: > { %s13_s12 = sadd.s32 1, %s1284_s12  }
 0x20d   : > { %p10_p4 = scmp.ge.s32.totalorder %s13_s12, 6  }
 0x20f   :  { %12 = sbr.rel (!%p10_p4) target bundleno = 1 (0x1), region = 62 }

// kernel: pix2pix_forward.7
= control target key start
LH: loop header
LB: loop body
LE: loop exit
PB: predicated region body
PF: predicated region fallthrough
CT: control target
= control target key end

     0   :  { %14 = vsyncpa [#allocation3], 0  ;;  %s1884_s0 = inlined_call_operand.vmem [shape: f32[4,1024], index: 0, kind: input, shape index: {}]   ;;  %s1885_s1 = inlined_call_operand.vmem [shape: f32[768,128], index: 1, kind: input, shape index: {}]   ;;  %s1886_s2 = inlined_call_operand.vmem [shape: f32[768,128], index: 2, kind: input, shape index: {}]   ;;  %s1887_s3 = inlined_call_operand.hbm [shape: f32[1,1], index: 3, kind: output, shape index: {0}]   ;;  %s1888_s4 = inlined_call_operand.hbm [shape: f32[1,1], index: 4, kind: output, shape index: {1}]   ;;  %s1889_s5 = inlined_call_operand.hbm [shape: f32[1,1], index: 5, kind: output, shape index: {2}]   ;;  %s1890_s6 = inlined_call_operand.hbm [shape: f32[1,1], index: 6, kind: output, shape index: {3}]   ;;  %s1891_s7 = inlined_call_operand.hbm [shape: f32[1,1], index: 7, kind: output, shape index: {4}]   ;;  %s1892_s8 = inlined_call_operand.hbm [shape: f32[1,1], index: 8, kind: output, shape index: {5}]  }
   0x1   :  { %15 = vsyncpa [#allocation5], 0 }
   0x2   :  { %16 = vsyncpa [#allocation8], 0  ;;  %v1163_v0 = vld [vmem:[%s1884_s0] sm:$0xff]  ;;  %v1168_v1 = vld [vmem:[%s1884_s0 + $0x8] sm:$0xff]  ;;  %vm63_vm0 = vcmask 1041408  }
   0x3   :  { %v1173_v2 = vld [vmem:[%s1884_s0 + $0x10] sm:$0xff]  ;;  %v1178_v3 = vld [vmem:[%s1884_s0 + $0x18] sm:$0xff]  ;;  %v927_v4 = vadd.f32 -1.0, %v1163_v0  ;;  %v928_v5 = vadd.f32 -1.0, %v1168_v1  ;;  %v99_v14 = vmul.f32 %v1163_v0, %v1163_v0  ;;  %v100_v17 = vmul.f32 %v1168_v1, %v1168_v1  ;;  %v335_v32 = vld [vmem:[%s1885_s1] sm:$0xff] }
   0x4   :  { %v929_v6 = vadd.f32 -1.0, %v1173_v2  ;;  %v930_v7 = vadd.f32 -1.0, %v1178_v3  ;;  %v101_v20 = vmul.f32 %v1173_v2, %v1173_v2  ;;  %v102_v23 = vmul.f32 %v1178_v3, %v1178_v3  ;;  %v336_v36 = vld [vmem:[%s1885_s1 + $0x8] sm:$0xff]  ;;  %v431_v37 = vld [vmem:[%s1886_s2] sm:$0xff]  ;;  %v337_v42 = vld [vmem:[%s1885_s1 + $0x10] sm:$0xff] }
   0x5   :  { %v32_v8 = vmul.f32 %v927_v4, %v927_v4  ;;  %v33_v9 = vmul.f32 %v928_v5, %v928_v5  ;;  %v432_v38 = vld [vmem:[%s1886_s2 + $0x8] sm:$0xff]  ;;  %v433_v43 = vld [vmem:[%s1886_s2 + $0x10] sm:$0xff]  ;;  %v527_v51 = vsub.f32 %v335_v32, %v431_v37 }
   0x6   :  { %v34_v10 = vmul.f32 %v929_v6, %v929_v6  ;;  %v1184_v11 = vmul.f32 %v930_v7, %v930_v7  ;;  %v528_v52 = vsub.f32 %v336_v36, %v432_v38  ;;  %v529_v59 = vsub.f32 %v337_v42, %v433_v43  ;;  %v338_v7 = vld [vmem:[%s1885_s1 + $0x18] sm:$0xff] }
   0x7   :  { %40 = vst [vmem:[#allocation1] ss:$2 sm:$0xff] %v32_v8 }
   0x8   :  { %42 = vst [vmem:[#allocation1 + $0x10] ss:$2 sm:$0xff] %v33_v9 }
   0x9   :  { %44 = vst [vmem:[#allocation1 + $0x20] ss:$2 sm:$0xff] %v34_v10 }
   0xa   :  { %46 = vst [vmem:[#allocation1 + $0x30] ss:$2 sm:$0xff] %v1184_v11 }
   0xe   :  { %v47_v12 = vld.sshfl [vmem:[#allocation1] sm:$0xff pattern:$0x75316420]  ;;  %v48_v13 = vld.sshfl [vmem:[#allocation1 + $0x8] sm:$0xff pattern:$0x75316420] }
   0xf   :  { %v49_v15 = vld.sshfl [vmem:[#allocation1 + $0x10] sm:$0xff pattern:$0x75316420]  ;;  %v50_v16 = vld.sshfl [vmem:[#allocation1 + $0x18] sm:$0xff pattern:$0x75316420] }
  0x10   :  { %v51_v18 = vld.sshfl [vmem:[#allocation1 + $0x20] sm:$0xff pattern:$0x75316420]  ;;  %v52_v19 = vld.sshfl [vmem:[#allocation1 + $0x28] sm:$0xff pattern:$0x75316420] }
  0x11   :  { %v53_v21 = vld.sshfl [vmem:[#allocation1 + $0x30] sm:$0xff pattern:$0x75316420]  ;;  %v54_v22 = vld.sshfl [vmem:[#allocation1 + $0x38] sm:$0xff pattern:$0x75316420] }
  0x12   :  { %v64_v24 = vsel %vm63_vm0, %v47_v12, 0.0  ;;  %v65_v25 = vsel %vm63_vm0, %v48_v13, 0.0  ;;  %v67_v26 = vsel %vm63_vm0, %v49_v15, 0.0  ;;  %107 = vst [vmem:[#allocation1] ss:$2 sm:$0xff] %v99_v14  ;;  %v69_v28 = vsel %vm63_vm0, %v50_v16, 0.0 }
  0x13   :  { %v66_v27 = vadd.f32 %v65_v25, %v64_v24  ;;  %109 = vst [vmem:[#allocation1 + $0x10] ss:$2 sm:$0xff] %v100_v17  ;;  %v71_v30 = vsel %vm63_vm0, %v51_v18, 0.0  ;;  %v73_v33 = vsel %vm63_vm0, %v52_v19, 0.0  ;;  %v75_v34 = vsel %vm63_vm0, %v53_v21, 0.0  ;;  %v339_v12 = vld [vmem:[%s1885_s1 + $0x20] sm:$0xff] }
  0x14   :  { %111 = vst [vmem:[#allocation1 + $0x20] ss:$2 sm:$0xff] %v101_v20  ;;  %v77_v35 = vsel %vm63_vm0, %v54_v22, 0.0  ;;  %v434_v13 = vld [vmem:[%s1886_s2 + $0x18] sm:$0xff]  ;;  %v625_v14 = vand.u32 2147483647, %v529_v59 }
  0x15   :  { %v68_v29 = vadd.f32 %v67_v26, %v66_v27  ;;  %113 = vst [vmem:[#allocation1 + $0x30] ss:$2 sm:$0xff] %v102_v23  ;;  %v435_v19 = vld [vmem:[%s1886_s2 + $0x20] sm:$0xff]  ;;  %v436_v20 = vld [vmem:[%s1886_s2 + $0x28] sm:$0xff]  ;;  %v530_v26 = vsub.f32 %v338_v7, %v434_v13 }
  0x17   :  { %v70_v31 = vadd.f32 %v69_v28, %v68_v29 }
  0x19   :  { %v72_v39 = vadd.f32 %v71_v30, %v70_v31  ;;  %v114_v40 = vld.sshfl [vmem:[#allocation1] sm:$0xff pattern:$0x75316420]  ;;  %v115_v41 = vld.sshfl [vmem:[#allocation1 + $0x8] sm:$0xff pattern:$0x75316420] }
  0x1a   :  { %v116_v44 = vld.sshfl [vmem:[#allocation1 + $0x10] sm:$0xff pattern:$0x75316420]  ;;  %v117_v45 = vld.sshfl [vmem:[#allocation1 + $0x18] sm:$0xff pattern:$0x75316420] }
  0x1b   :  { %v74_v46 = vadd.f32 %v73_v33, %v72_v39  ;;  %v118_v47 = vld.sshfl [vmem:[#allocation1 + $0x20] sm:$0xff pattern:$0x75316420]  ;;  %v119_v48 = vld.sshfl [vmem:[#allocation1 + $0x28] sm:$0xff pattern:$0x75316420]  ;;  %v531_v33 = vsub.f32 %v339_v12, %v435_v19 }
  0x1c   :  { %v1221_v49 = vld.sshfl [vmem:[#allocation1 + $0x30] sm:$0xff pattern:$0x75316420]  ;;  %v1223_v50 = vld.sshfl [vmem:[#allocation1 + $0x38] sm:$0xff pattern:$0x75316420] }
  0x1d   :  { %v76_v53 = vadd.f32 %v75_v34, %v74_v46  ;;  %165 = vst [vmem:[#allocation1] ss:$2 sm:$0xff] %v32_v8  ;;  %v122_v54 = vrot.slane %v114_v40, 2  ;;  %v123_v55 = vrot.slane %v115_v41, 2  ;;  %v124_v56 = vrot.slane %v116_v44, 2 }
  0x1e   :  { %167 = vst [vmem:[#allocation1 + $0x10] ss:$2 sm:$0xff] %v33_v9  ;;  %v125_v57 = vrot.slane %v117_v45, 2  ;;  %v126_v58 = vrot.slane %v118_v47, 2  ;;  %v127_v61 = vrot.slane %v119_v48, 2  ;;  %v128_v15 = vrot.slane %v1221_v49, 2 }
  0x1f   :  { %v78_v60 = vadd.f32 %v77_v35, %v76_v53  ;;  %169 = vst [vmem:[#allocation1 + $0x20] ss:$2 sm:$0xff] %v34_v10  ;;  %v138_v62 = vsel %vm63_vm0, %v122_v54, 0.0  ;;  %v139_v63 = vsel %vm63_vm0, %v123_v55, 0.0  ;;  %v141_v5 = vsel %vm63_vm0, %v124_v56, 0.0 }
  0x20   :  { %171 = vst [vmem:[#allocation1 + $0x30] ss:$2 sm:$0xff] %v1184_v11  ;;  %v140_v4 = vadd.f32 %v139_v63, %v138_v62  ;;  %v143_v6 = vsel %vm63_vm0, %v125_v57, 0.0  ;;  %v623_v8 = vand.u32 2147483647, %v527_v51  ;;  %v340_v11 = vld [vmem:[%s1885_s1 + $0x28] sm:$0xff] }
  0x21   :  { %79 = vadd.xlane.f32.xlu0 %v78_v60  ;;  %v624_v9 = vand.u32 2147483647, %v528_v52  ;;  %v129_v16 = vrot.slane %v1223_v50, 2  ;;  %v145_v17 = vsel %vm63_vm0, %v126_v58, 0.0  ;;  %v147_v18 = vsel %vm63_vm0, %v127_v61, 0.0  ;;  %v341_v60 = vld [vmem:[%s1885_s1 + $0x30] sm:$0xff] }
  0x22   :  { %v142_v10 = vadd.f32 %v141_v5, %v140_v4  ;;  %v532_v34 = vsub.f32 %v340_v11, %v436_v20  ;;  %v626_v41 = vand.u32 2147483647, %v530_v26  ;;  %v149_v48 = vsel %vm63_vm0, %v128_v15, 0.0  ;;  %v437_v61 = vld [vmem:[%s1886_s2 + $0x30] sm:$0xff] }
  0x23   :  { %v719_v27 = vadd.f32 %v624_v9, %v623_v8  ;;  %v151_v51 = vsel %vm63_vm0, %v129_v16, 0.0  ;;  %v627_v52 = vand.u32 2147483647, %v531_v33  ;;  %v342_v9 = vld [vmem:[%s1885_s1 + $0x38] sm:$0xff]  ;;  %v533_v16 = vsub.f32 %v341_v60, %v437_v61 }
  0x24   :  { %v172_v21 = vld.sshfl [vmem:[#allocation1] sm:$0xff pattern:$0x75316420]  ;;  %v173_v22 = vld.sshfl [vmem:[#allocation1 + $0x8] sm:$0xff pattern:$0x75316420]  ;;  %v144_v23 = vadd.f32 %v143_v6, %v142_v10 }
  0x25   :  { %v174_v24 = vld.sshfl [vmem:[#allocation1 + $0x10] sm:$0xff pattern:$0x75316420]  ;;  %v175_v25 = vld.sshfl [vmem:[#allocation1 + $0x18] sm:$0xff pattern:$0x75316420]  ;;  %v720_v42 = vadd.f32 %v719_v27, %v625_v14 }
  0x26   :  { %v176_v28 = vld.sshfl [vmem:[#allocation1 + $0x20] sm:$0xff pattern:$0x75316420]  ;;  %v177_v29 = vld.sshfl [vmem:[#allocation1 + $0x28] sm:$0xff pattern:$0x75316420]  ;;  %v146_v32 = vadd.f32 %v145_v17, %v144_v23 }
  0x27   :  { %v178_v30 = vld.sshfl [vmem:[#allocation1 + $0x30] sm:$0xff pattern:$0x75316420]  ;;  %v179_v31 = vld.sshfl [vmem:[#allocation1 + $0x38] sm:$0xff pattern:$0x75316420]  ;;  %v721_v56 = vadd.f32 %v720_v42, %v626_v41 }
  0x28   :  { %v180_v35 = vrot.slane %v172_v21, 2  ;;  %v181_v36 = vrot.slane %v173_v22, 2  ;;  %v182_v37 = vrot.slane %v174_v24, 2  ;;  %v183_v38 = vrot.slane %v175_v25, 2  ;;  %227 = vst [vmem:[#allocation1] ss:$2 sm:$0xff] %v1163_v0 }
  0x29   :  { %v184_v39 = vrot.slane %v176_v28, 2  ;;  %v185_v40 = vrot.slane %v177_v29, 2  ;;  %229 = vst [vmem:[#allocation1 + $0x10] ss:$2 sm:$0xff] %v1168_v1  ;;  %v186_v43 = vrot.slane %v178_v30, 2  ;;  %v148_v50 = vadd.f32 %v147_v18, %v146_v32  ;;  %v438_v10 = vld [vmem:[%s1886_s2 + $0x38] sm:$0xff] }
  0x2a   :  { %v196_v44 = vsel %vm63_vm0, %v180_v35, 0.0  ;;  %v197_v45 = vsel %vm63_vm0, %v181_v36, 0.0  ;;  %v199_v46 = vsel %vm63_vm0, %v182_v37, 0.0  ;;  %231 = vst [vmem:[#allocation1 + $0x20] ss:$2 sm:$0xff] %v1173_v2  ;;  %v201_v49 = vsel %vm63_vm0, %v183_v38, 0.0 }
  0x2b   :  { %v198_v47 = vadd.f32 %v197_v45, %v196_v44  ;;  %233 = vst [vmem:[#allocation1 + $0x30] ss:$2 sm:$0xff] %v1178_v3  ;;  %v187_v53 = vrot.slane %v179_v31, 2  ;;  %v203_v55 = vsel %vm63_vm0, %v184_v39, 0.0  ;;  %v205_v57 = vsel %vm63_vm0, %v185_v40, 0.0  ;;  %v344_v40 = vld [vmem:[%s1885_s1 + $0x48] sm:$0xff] }
  0x2c   :  { %v207_v58 = vsel %vm63_vm0, %v186_v43, 0.0  ;;  %v150_v59 = vadd.f32 %v149_v48, %v148_v50  ;;  %v628_v62 = vand.u32 2147483647, %v532_v34  ;;  %v722_v17 = vadd.f32 %v721_v56, %v627_v52  ;;  %v440_v41 = vld [vmem:[%s1886_s2 + $0x48] sm:$0xff] }
  0x2d   :  { %v200_v54 = vadd.f32 %v199_v46, %v198_v47  ;;  %v209_v22 = vsel %vm63_vm0, %v187_v53, 0.0  ;;  %v534_v26 = vsub.f32 %v342_v9, %v438_v10  ;;  %v629_v29 = vand.u32 2147483647, %v533_v16 }
  0x2e   :  { %v152_v8 = vadd.f32 %v151_v51, %v150_v59  ;;  %v723_v30 = vadd.f32 %v722_v17, %v628_v62  ;;  %v536_v50 = vsub.f32 %v344_v40, %v440_v41 }
  0x2f   :  { %v202_v63 = vadd.f32 %v201_v49, %v200_v54  ;;  %v234_v4 = vld.sshfl [vmem:[#allocation1] sm:$0xff pattern:$0x75316420]  ;;  %v235_v5 = vld.sshfl [vmem:[#allocation1 + $0x8] sm:$0xff pattern:$0x75316420] }
  0x30   :  { %v236_v6 = vld.sshfl [vmem:[#allocation1 + $0x10] sm:$0xff pattern:$0x75316420]  ;;  %v237_v7 = vld.sshfl [vmem:[#allocation1 + $0x18] sm:$0xff pattern:$0x75316420]  ;;  %153 = vadd.xlane.f32.xlu0 %v152_v8  ;;  %v724_v39 = vadd.f32 %v723_v30, %v629_v29 }
  0x31   :  { %v204_v12 = vadd.f32 %v203_v55, %v202_v63  ;;  %v238_v11 = vld.sshfl [vmem:[#allocation1 + $0x20] sm:$0xff pattern:$0x75316420]  ;;  %v239_v13 = vld.sshfl [vmem:[#allocation1 + $0x28] sm:$0xff pattern:$0x75316420] }
  0x32   :  { %v240_v14 = vld.sshfl [vmem:[#allocation1 + $0x30] sm:$0xff pattern:$0x75316420]  ;;  %v241_v15 = vld.sshfl [vmem:[#allocation1 + $0x38] sm:$0xff pattern:$0x75316420] }
  0x33   :  { %v206_v18 = vadd.f32 %v205_v57, %v204_v12  ;;  %277 = vst [vmem:[#allocation1] ss:$2 sm:$0xff] %v1163_v0  ;;  %v250_v19 = vsel %vm63_vm0, %v234_v4, 0.0  ;;  %v251_v20 = vsel %vm63_vm0, %v235_v5, 0.0  ;;  %v253_v21 = vsel %vm63_vm0, %v236_v6, 0.0  ;;  %v345_v57 = vld [vmem:[%s1885_s1 + $0x50] sm:$0xff] }
  0x34   :  { %279 = vst [vmem:[#allocation1 + $0x10] ss:$2 sm:$0xff] %v1168_v1  ;;  %v252_v23 = vadd.f32 %v251_v20, %v250_v19  ;;  %v255_v25 = vsel %vm63_vm0, %v237_v7, 0.0  ;;  %v257_v28 = vsel %vm63_vm0, %v238_v11, 0.0  ;;  %v343_v1 = vld [vmem:[%s1885_s1 + $0x40] sm:$0xff]  ;;  %v259_v32 = vsel %vm63_vm0, %v239_v13, 0.0 }
  0x35   :  { %v208_v24 = vadd.f32 %v207_v58, %v206_v18  ;;  %281 = vst [vmem:[#allocation1 + $0x20] ss:$2 sm:$0xff] %v1173_v2  ;;  %v439_v2 = vld [vmem:[%s1886_s2 + $0x40] sm:$0xff]  ;;  %v630_v33 = vand.u32 2147483647, %v534_v26  ;;  %v261_v49 = vsel %vm63_vm0, %v240_v14, 0.0 }
  0x36   :  { %283 = vst [vmem:[#allocation1 + $0x30] ss:$2 sm:$0xff] %v1178_v3  ;;  %v254_v0 = vadd.f32 %v253_v21, %v252_v23  ;;  %v535_v38 = vsub.f32 %v343_v1, %v439_v2  ;;  %v441_v58 = vld [vmem:[%s1886_s2 + $0x50] sm:$0xff]  ;;  %v263_v61 = vsel %vm63_vm0, %v241_v15, 0.0  ;;  %v632_v8 = vand.u32 2147483647, %v536_v50 }
  0x37   :  { %v210_v27 = vadd.f32 %v209_v22, %v208_v24  ;;  %v725_v52 = vadd.f32 %v724_v39, %v630_v33  ;;  %v537_v7 = vsub.f32 %v345_v57, %v441_v58  ;;  %v346_v14 = vld [vmem:[%s1885_s1 + $0x58] sm:$0xff]  ;;  %v347_v24 = vld [vmem:[%s1885_s1 + $0x60] sm:$0xff]  ;;  %v444_v1 = vld [vmem:[%s1886_s2 + $0x68] sm:$0xff] }
  0x38   :  { %v256_v31 = vadd.f32 %v255_v25, %v254_v0  ;;  %v631_v51 = vand.u32 2147483647, %v535_v38  ;;  %v442_v15 = vld [vmem:[%s1886_s2 + $0x58] sm:$0xff]  ;;  %v443_v25 = vld [vmem:[%s1886_s2 + $0x60] sm:$0xff]  ;;  %v353_v50 = vld [vmem:[%s1885_s1 + $0x90] sm:$0xff] }
  0x39   :  { %211 = vadd.xlane.f32.xlu1 %v210_v27  ;;  %v538_v20 = vsub.f32 %v346_v14, %v442_v15  ;;  %v633_v21 = vand.u32 2147483647, %v537_v7  ;;  %v539_v27 = vsub.f32 %v347_v24, %v443_v25  ;;  %v350_v38 = vld [vmem:[%s1885_s1 + $0x78] sm:$0xff]  ;;  %v355_v58 = vld [vmem:[%s1885_s1 + $0xa0] sm:$0xff] }
  0x3a   :  { %v284_v3 = vld.sshfl [vmem:[#allocation1] sm:$0xff pattern:$0x75316420]  ;;  %v285_v34 = vld.sshfl [vmem:[#allocation1 + $0x8] sm:$0xff pattern:$0x75316420]  ;;  %v258_v35 = vadd.f32 %v257_v28, %v256_v31  ;;  %v726_v11 = vadd.f32 %v725_v52, %v631_v51 }
  0x3b   :  { %v286_v36 = vld.sshfl [vmem:[#allocation1 + $0x10] sm:$0xff pattern:$0x75316420]  ;;  %v287_v37 = vld.sshfl [vmem:[#allocation1 + $0x18] sm:$0xff pattern:$0x75316420] }
  0x3c   :  { %v288_v42 = vld.sshfl [vmem:[#allocation1 + $0x20] sm:$0xff pattern:$0x75316420]  ;;  %v260_v43 = vadd.f32 %v259_v32, %v258_v35  ;;  %v292_v44 = vrot.slane %v284_v3, 2  ;;  %v293_v45 = vrot.slane %v285_v34, 2  ;;  %v294_v46 = vrot.slane %v286_v36, 2 }
  0x3d   :  { %v295_v47 = vrot.slane %v287_v37, 2  ;;  %v289_v48 = vld.sshfl [vmem:[#allocation1 + $0x28] sm:$0xff pattern:$0x75316420]  ;;  %v296_v53 = vrot.slane %v288_v42, 2  ;;  %v727_v22 = vadd.f32 %v726_v11, %v632_v8  ;;  %v349_v3 = vld [vmem:[%s1885_s1 + $0x70] sm:$0xff] }
  0x3e   :  { %v308_v54 = vsel %vm63_vm0, %v292_v44, 0.0  ;;  %v309_v55 = vsel %vm63_vm0, %v293_v45, 0.0  ;;  %v311_v56 = vsel %vm63_vm0, %v294_v46, 0.0  ;;  %v290_v59 = vld.sshfl [vmem:[#allocation1 + $0x30] sm:$0xff pattern:$0x75316420]  ;;  %v262_v4 = vadd.f32 %v261_v49, %v260_v43 }
  0x3f   :  { %v310_v60 = vadd.f32 %v309_v55, %v308_v54  ;;  %v297_v62 = vrot.slane %v289_v48, 2  ;;  %v313_v63 = vsel %vm63_vm0, %v295_v47, 0.0  ;;  %v291_v5 = vld.sshfl [vmem:[#allocation1 + $0x38] sm:$0xff pattern:$0x75316420]  ;;  %v298_v9 = vrot.slane %v290_v59, 2 }
  0x40   :  { %v315_v10 = vsel %vm63_vm0, %v296_v53, 0.0  ;;  %v264_v12 = vadd.f32 %v263_v61, %v262_v4  ;;  %v299_v16 = vrot.slane %v291_v5, 2  ;;  %v634_v28 = vand.u32 2147483647, %v538_v20  ;;  %v348_v31 = vld [vmem:[%s1885_s1 + $0x68] sm:$0xff]  ;;  %v445_v34 = vld [vmem:[%s1886_s2 + $0x70] sm:$0xff] }
  0x41   :  { %v312_v6 = vadd.f32 %v311_v56, %v310_v60  ;;  %v317_v17 = vsel %vm63_vm0, %v297_v62, 0.0  ;;  %v319_v19 = vsel %vm63_vm0, %v298_v9, 0.0  ;;  %v728_v29 = vadd.f32 %v727_v22, %v633_v21  ;;  %v446_v39 = vld [vmem:[%s1886_s2 + $0x78] sm:$0xff]  ;;  %v351_v43 = vld [vmem:[%s1885_s1 + $0x80] sm:$0xff]  ;;  %v352_v45 = vld [vmem:[%s1885_s1 + $0x88] sm:$0xff] }
  0x42   :  { %265 = vadd.xlane.f32.xlu1 %v264_v12  ;;  %v321_v26 = vsel %vm63_vm0, %v299_v16, 0.0  ;;  %v540_v2 = vsub.f32 %v348_v31, %v444_v1  ;;  %v635_v32 = vand.u32 2147483647, %v539_v27  ;;  %v541_v35 = vsub.f32 %v349_v3, %v445_v34  ;;  %v447_v44 = vld [vmem:[%s1886_s2 + $0x80] sm:$0xff]  ;;  %v448_v46 = vld [vmem:[%s1886_s2 + $0x88] sm:$0xff]  ;;  %v449_v51 = vld [vmem:[%s1886_s2 + $0x90] sm:$0xff] }
  0x43   :  { %v314_v13 = vadd.f32 %v313_v63, %v312_v6  ;;  %v729_v33 = vadd.f32 %v728_v29, %v634_v28  ;;  %v542_v40 = vsub.f32 %v350_v38, %v446_v39  ;;  %v543_v47 = vsub.f32 %v351_v43, %v447_v44  ;;  %v354_v53 = vld [vmem:[%s1885_s1 + $0x98] sm:$0xff]  ;;  %v451_v59 = vld [vmem:[%s1886_s2 + $0xa0] sm:$0xff] }
  0x44   :  { %v636_v36 = vand.u32 2147483647, %v540_v2  ;;  %v637_v41 = vand.u32 2147483647, %v541_v35  ;;  %v544_v52 = vsub.f32 %v352_v45, %v448_v46  ;;  %v450_v54 = vld [vmem:[%s1886_s2 + $0x98] sm:$0xff]  ;;  %v545_v55 = vsub.f32 %v353_v50, %v449_v51 }
  0x45   :  { %v316_v18 = vadd.f32 %v315_v10, %v314_v13  ;;  %v730_v37 = vadd.f32 %v729_v33, %v635_v32  ;;  %v638_v48 = vand.u32 2147483647, %v542_v40  ;;  %v639_v56 = vand.u32 2147483647, %v543_v47 }
  0x46   :  { %v546_v60 = vsub.f32 %v354_v53, %v450_v54  ;;  %v640_v61 = vand.u32 2147483647, %v544_v52 }
  0x47   :  { %v318_v23 = vadd.f32 %v317_v17, %v316_v18  ;;  %v731_v42 = vadd.f32 %v730_v37, %v636_v36 }
  0x49   :  { %v320_v0 = vadd.f32 %v319_v19, %v318_v23  ;;  %v732_v49 = vadd.f32 %v731_v42, %v637_v41 }
  0x4b   :  { %v322_v30 = vadd.f32 %v321_v26, %v320_v0  ;;  %v733_v57 = vadd.f32 %v732_v49, %v638_v48 }
  0x4d   :  { %323 = vadd.xlane.f32.xlu2 %v322_v30 }
  0x4e   :  { %17 = vsyncpa [#allocation11], 0  ;;  %v356_v62 = vld [vmem:[%s1885_s1 + $0xa8] sm:$0xff]  ;;  %v547_v4 = vsub.f32 %v355_v58, %v451_v59  ;;  %v641_v5 = vand.u32 2147483647, %v545_v55  ;;  %v734_v6 = vadd.f32 %v733_v57, %v639_v56  ;;  %v357_v7 = vld [vmem:[%s1885_s1 + $0xb0] sm:$0xff] }
  0x4f   :  { %v452_v63 = vld [vmem:[%s1886_s2 + $0xa8] sm:$0xff]  ;;  %v453_v8 = vld [vmem:[%s1886_s2 + $0xb0] sm:$0xff]  ;;  %v642_v10 = vand.u32 2147483647, %v546_v60  ;;  %v358_v11 = vld [vmem:[%s1885_s1 + $0xb8] sm:$0xff]  ;;  %s1108_s30 = smov [#allocation4]  }
  0x50   :  { %v548_v9 = vsub.f32 %v356_v62, %v452_v63  ;;  %v735_v12 = vadd.f32 %v734_v6, %v640_v61  ;;  %v454_v13 = vld [vmem:[%s1886_s2 + $0xb8] sm:$0xff]  ;;  %v549_v14 = vsub.f32 %v357_v7, %v453_v8  ;;  %v643_v15 = vand.u32 2147483647, %v547_v4  ;;  %v359_v17 = vld [vmem:[%s1885_s1 + $0xc0] sm:$0xff]  ;;  %v360_v22 = vld [vmem:[%s1885_s1 + $0xc8] sm:$0xff]  ;;  %s1834_s9 = sshll.u32 %s1108_s30, 4  ;;  %s850_s9 = int_to_ptr.vmem [resolvable:$true] %s1834_s9 }
  0x51   :  { %v455_v18 = vld [vmem:[%s1886_s2 + $0xc0] sm:$0xff]  ;;  %v550_v19 = vsub.f32 %v358_v11, %v454_v13  ;;  %v456_v23 = vld [vmem:[%s1886_s2 + $0xc8] sm:$0xff]  ;;  %v361_v0 = vld [vmem:[%s1885_s1 + $0xd0] sm:$0xff]  ;;  %s851_s12 = sshll.u32 %s1888_s4, 4  ;;  %s1109_s13 = smov [#allocation7]   ;;  %vm97_vm2 = vcmask 0   ;;  %s1847_s12 = int_to_ptr.hbm [resolvable:$true] %s851_s12 }
  0x52   :  { %v736_v16 = vadd.f32 %v735_v12, %v641_v5  ;;  %v644_v20 = vand.u32 2147483647, %v548_v9  ;;  %v551_v24 = vsub.f32 %v359_v17, %v455_v18  ;;  %v645_v25 = vand.u32 2147483647, %v549_v14  ;;  %v457_v27 = vld [vmem:[%s1886_s2 + $0xd0] sm:$0xff]  ;;  %v362_v31 = vld [vmem:[%s1885_s1 + $0xd8] sm:$0xff] }
  0x53   :  { %v552_v28 = vsub.f32 %v360_v22, %v456_v23  ;;  %v646_v29 = vand.u32 2147483647, %v550_v19  ;;  %v458_v1 = vld [vmem:[%s1886_s2 + $0xd8] sm:$0xff]  ;;  %v553_v2 = vsub.f32 %v361_v0, %v457_v27  ;;  %v363_v3 = vld [vmem:[%s1885_s1 + $0xe0] sm:$0xff]  ;;  %v364_v38 = vld [vmem:[%s1885_s1 + $0xe8] sm:$0xff]  ;;  %s1841_s14 = sshll.u32 %s1109_s13, 4  ;;  %s872_s14 = int_to_ptr.vmem [resolvable:$true] %s1841_s14 }
  0x54   :  { %v737_v21 = vadd.f32 %v736_v16, %v642_v10  ;;  %v647_v32 = vand.u32 2147483647, %v551_v24  ;;  %v459_v34 = vld [vmem:[%s1886_s2 + $0xe0] sm:$0xff]  ;;  %v554_v35 = vsub.f32 %v362_v31, %v458_v1  ;;  %v460_v39 = vld [vmem:[%s1886_s2 + $0xe8] sm:$0xff]  ;;  %v365_v43 = vld [vmem:[%s1885_s1 + $0xf0] sm:$0xff]  ;;  %s873_s17 = sshll.u32 %s1890_s6, 4  ;;  %s1850_s17 = int_to_ptr.hbm [resolvable:$true] %s873_s17 }
  0x55   :  { %v648_v36 = vand.u32 2147483647, %v552_v28  ;;  %v555_v40 = vsub.f32 %v363_v3, %v459_v34  ;;  %v649_v41 = vand.u32 2147483647, %v553_v2  ;;  %v461_v44 = vld [vmem:[%s1886_s2 + $0xf0] sm:$0xff]  ;;  %v556_v45 = vsub.f32 %v364_v38, %v460_v39  ;;  %v366_v48 = vld [vmem:[%s1885_s1 + $0xf8] sm:$0xff] }
  0x56   :  { %v738_v26 = vadd.f32 %v737_v21, %v643_v15  ;;  %v650_v46 = vand.u32 2147483647, %v554_v35  ;;  %v462_v49 = vld [vmem:[%s1886_s2 + $0xf8] sm:$0xff]  ;;  %v557_v50 = vsub.f32 %v365_v43, %v461_v44  ;;  %v367_v53 = vld [vmem:[%s1885_s1 + $0x100] sm:$0xff]  ;;  %v368_v58 = vld [vmem:[%s1885_s1 + $0x108] sm:$0xff]  ;;  %s1110_s4 = smov [#allocation2]  }
  0x57   :  { %v651_v51 = vand.u32 2147483647, %v555_v40  ;;  %v463_v54 = vld [vmem:[%s1886_s2 + $0x100] sm:$0xff]  ;;  %v558_v55 = vsub.f32 %v366_v48, %v462_v49  ;;  %v652_v56 = vand.u32 2147483647, %v556_v45  ;;  %v464_v59 = vld [vmem:[%s1886_s2 + $0x108] sm:$0xff] }
  0x58   :  { %v739_v30 = vadd.f32 %v738_v26, %v644_v20  ;;  %v559_v60 = vsub.f32 %v367_v53, %v463_v54  ;;  %v653_v61 = vand.u32 2147483647, %v557_v50  ;;  %v369_v63 = vld [vmem:[%s1885_s1 + $0x110] sm:$0xff]  ;;  %v560_v5 = vsub.f32 %v368_v58, %v464_v59  ;;  %v370_v8 = vld [vmem:[%s1885_s1 + $0x118] sm:$0xff]  ;;  %v371_v13 = vld [vmem:[%s1885_s1 + $0x120] sm:$0xff]  ;;  %s838_s18 = sshll.u32 %s1110_s4, 4  ;;  %s839_s18 = int_to_ptr.vmem [resolvable:$true] %s838_s18 }
  0x59   :  { %v465_v4 = vld [vmem:[%s1886_s2 + $0x110] sm:$0xff]  ;;  %v654_v6 = vand.u32 2147483647, %v558_v55  ;;  %v466_v9 = vld [vmem:[%s1886_s2 + $0x118] sm:$0xff]  ;;  %v467_v14 = vld [vmem:[%s1886_s2 + $0x120] sm:$0xff]  ;;  %s840_s21 = sshll.u32 %s1887_s3, 4  ;;  %s841_s21 = int_to_ptr.hbm [resolvable:$true] %s840_s21 }
  0x5a   :  { %v740_v33 = vadd.f32 %v739_v30, %v645_v25  ;;  %v561_v10 = vsub.f32 %v369_v63, %v465_v4  ;;  %v655_v12 = vand.u32 2147483647, %v559_v60  ;;  %v562_v15 = vsub.f32 %v370_v8, %v466_v9  ;;  %v372_v18 = vld [vmem:[%s1885_s1 + $0x128] sm:$0xff]  ;;  %v373_v23 = vld [vmem:[%s1885_s1 + $0x130] sm:$0xff]  ;;  %v374_v27 = vld [vmem:[%s1885_s1 + $0x138] sm:$0xff]  ;;  %s1111_s6 = smov [#allocation6]  }
  0x5b   :  { %v656_v16 = vand.u32 2147483647, %v560_v5  ;;  %v468_v19 = vld [vmem:[%s1886_s2 + $0x128] sm:$0xff]  ;;  %v563_v20 = vsub.f32 %v371_v13, %v467_v14  ;;  %v469_v24 = vld [vmem:[%s1886_s2 + $0x130] sm:$0xff]  ;;  %v470_v28 = vld [vmem:[%s1886_s2 + $0x138] sm:$0xff]  ;;  %s1859_s22 = sshll.u32 %s1111_s6, 4  ;;  %s861_s22 = int_to_ptr.vmem [resolvable:$true] %s1859_s22 }
  0x5c   :  { %v741_v37 = vadd.f32 %v740_v33, %v646_v29  ;;  %v657_v21 = vand.u32 2147483647, %v561_v10  ;;  %v564_v25 = vsub.f32 %v372_v18, %v468_v19  ;;  %v658_v26 = vand.u32 2147483647, %v562_v15  ;;  %v375_v1 = vld [vmem:[%s1885_s1 + $0x140] sm:$0xff]  ;;  %v376_v34 = vld [vmem:[%s1885_s1 + $0x148] sm:$0xff] }
  0x5d   :  { %v565_v29 = vsub.f32 %v373_v23, %v469_v24  ;;  %v659_v30 = vand.u32 2147483647, %v563_v20  ;;  %v471_v2 = vld [vmem:[%s1886_s2 + $0x140] sm:$0xff]  ;;  %v472_v35 = vld [vmem:[%s1886_s2 + $0x148] sm:$0xff]  ;;  %v377_v39 = vld [vmem:[%s1885_s1 + $0x150] sm:$0xff]  ;;  %s862_s25 = sshll.u32 %s1889_s5, 4  ;;  %s863_s25 = int_to_ptr.hbm [resolvable:$true] %s862_s25 }
  0x5e   :  { %v742_v42 = vadd.f32 %v741_v37, %v647_v32  ;;  %v566_v32 = vsub.f32 %v374_v27, %v470_v28  ;;  %v660_v33 = vand.u32 2147483647, %v564_v25  ;;  %v473_v40 = vld [vmem:[%s1886_s2 + $0x150] sm:$0xff]  ;;  %v378_v44 = vld [vmem:[%s1885_s1 + $0x158] sm:$0xff]  ;;  %v379_v49 = vld [vmem:[%s1885_s1 + $0x160] sm:$0xff]  ;;  %s1112_s26 = smov [#allocation9]  }
  0x5f   :  { %v661_v37 = vand.u32 2147483647, %v565_v29  ;;  %v474_v45 = vld [vmem:[%s1886_s2 + $0x158] sm:$0xff]  ;;  %v475_v50 = vld [vmem:[%s1886_s2 + $0x160] sm:$0xff]  ;;  %v380_v54 = vld [vmem:[%s1885_s1 + $0x168] sm:$0xff]  ;;  %s882_s27 = sshll.u32 %s1112_s26, 4  ;;  %s883_s27 = int_to_ptr.vmem [resolvable:$true] %s882_s27 }
  0x60   :  { %v743_v47 = vadd.f32 %v742_v42, %v648_v36  ;;  %v567_v36 = vsub.f32 %v375_v1, %v471_v2  ;;  %v662_v42 = vand.u32 2147483647, %v566_v32  ;;  %v476_v55 = vld [vmem:[%s1886_s2 + $0x168] sm:$0xff]  ;;  %v381_v59 = vld [vmem:[%s1885_s1 + $0x170] sm:$0xff]  ;;  %v382_v4 = vld [vmem:[%s1885_s1 + $0x178] sm:$0xff]  ;;  %s1114_s3 = smov [#allocation10]  }
  0x61   :  { %v477_v60 = vld [vmem:[%s1886_s2 + $0x170] sm:$0xff]  ;;  %v478_v5 = vld [vmem:[%s1886_s2 + $0x178] sm:$0xff]  ;;  %v383_v9 = vld [vmem:[%s1885_s1 + $0x180] sm:$0xff]  ;;  %s893_s5 = sshll.u32 %s1114_s3, 4  ;;  %s895_s30 = sshll.u32 %s1892_s8, 4  ;;  %s894_s5 = int_to_ptr.vmem [resolvable:$true] %s893_s5  ;;  %s896_s30 = int_to_ptr.hbm [resolvable:$true] %s895_s30 }
  0x62   :  { %v744_v52 = vadd.f32 %v743_v47, %v649_v41  ;;  %v568_v41 = vsub.f32 %v376_v34, %v472_v35  ;;  %v663_v47 = vand.u32 2147483647, %v567_v36  ;;  %v479_v10 = vld [vmem:[%s1886_s2 + $0x180] sm:$0xff]  ;;  %v384_v14 = vld [vmem:[%s1885_s1 + $0x188] sm:$0xff]  ;;  %v385_v19 = vld [vmem:[%s1885_s1 + $0x190] sm:$0xff] }
  0x63   :  { %v480_v15 = vld [vmem:[%s1886_s2 + $0x188] sm:$0xff]  ;;  %v481_v20 = vld [vmem:[%s1886_s2 + $0x190] sm:$0xff]  ;;  %v386_v24 = vld [vmem:[%s1885_s1 + $0x198] sm:$0xff] }
  0x64   :  { %v745_v57 = vadd.f32 %v744_v52, %v650_v46  ;;  %v569_v46 = vsub.f32 %v377_v39, %v473_v40  ;;  %v664_v52 = vand.u32 2147483647, %v568_v41  ;;  %v482_v25 = vld [vmem:[%s1886_s2 + $0x198] sm:$0xff]  ;;  %v387_v28 = vld [vmem:[%s1885_s1 + $0x1a0] sm:$0xff]  ;;  %v388_v2 = vld [vmem:[%s1885_s1 + $0x1a8] sm:$0xff] }
  0x65   :  { %v483_v29 = vld [vmem:[%s1886_s2 + $0x1a0] sm:$0xff]  ;;  %v484_v32 = vld [vmem:[%s1886_s2 + $0x1a8] sm:$0xff]  ;;  %v389_v35 = vld [vmem:[%s1885_s1 + $0x1b0] sm:$0xff] }
  0x66   :  { %v746_v62 = vadd.f32 %v745_v57, %v651_v51  ;;  %v570_v51 = vsub.f32 %v378_v44, %v474_v45  ;;  %v665_v57 = vand.u32 2147483647, %v569_v46  ;;  %v485_v36 = vld [vmem:[%s1886_s2 + $0x1b0] sm:$0xff]  ;;  %v390_v40 = vld [vmem:[%s1885_s1 + $0x1b8] sm:$0xff]  ;;  %v391_v45 = vld [vmem:[%s1885_s1 + $0x1c0] sm:$0xff] }
  0x67   :  { %v486_v41 = vld [vmem:[%s1886_s2 + $0x1b8] sm:$0xff]  ;;  %v487_v46 = vld [vmem:[%s1886_s2 + $0x1c0] sm:$0xff] }
  0x68   :  { %v747_v7 = vadd.f32 %v746_v62, %v652_v56  ;;  %v571_v56 = vsub.f32 %v379_v49, %v475_v50  ;;  %v666_v62 = vand.u32 2147483647, %v570_v51  ;;  %v392_v50 = vld [vmem:[%s1885_s1 + $0x1c8] sm:$0xff] }
  0x69   :  { %v488_v51 = vld [vmem:[%s1886_s2 + $0x1c8] sm:$0xff] }
  0x6a   :  { %v748_v11 = vadd.f32 %v747_v7, %v653_v61  ;;  %v572_v61 = vsub.f32 %v380_v54, %v476_v55  ;;  %v667_v7 = vand.u32 2147483647, %v571_v56  ;;  %v393_v55 = vld [vmem:[%s1885_s1 + $0x1d0] sm:$0xff] }
  0x6b   :  { %v489_v56 = vld [vmem:[%s1886_s2 + $0x1d0] sm:$0xff] }
  0x6c   :  { %v749_v17 = vadd.f32 %v748_v11, %v654_v6  ;;  %v573_v6 = vsub.f32 %v381_v59, %v477_v60  ;;  %v668_v11 = vand.u32 2147483647, %v572_v61  ;;  %v394_v60 = vld [vmem:[%s1885_s1 + $0x1d8] sm:$0xff] }
  0x6d   :  { %v490_v61 = vld [vmem:[%s1886_s2 + $0x1d8] sm:$0xff] }
  0x6e   :  { %v750_v22 = vadd.f32 %v749_v17, %v655_v12  ;;  %v574_v12 = vsub.f32 %v382_v4, %v478_v5  ;;  %v669_v17 = vand.u32 2147483647, %v573_v6  ;;  %v395_v5 = vld [vmem:[%s1885_s1 + $0x1e0] sm:$0xff] }
  0x6f   :  { %v491_v6 = vld [vmem:[%s1886_s2 + $0x1e0] sm:$0xff] }
  0x70   :  { %v751_v0 = vadd.f32 %v750_v22, %v656_v16  ;;  %v575_v16 = vsub.f32 %v383_v9, %v479_v10  ;;  %v670_v22 = vand.u32 2147483647, %v574_v12  ;;  %v396_v10 = vld [vmem:[%s1885_s1 + $0x1e8] sm:$0xff] }
  0x71   :  { %v492_v12 = vld [vmem:[%s1886_s2 + $0x1e8] sm:$0xff] }
  0x72   :  { %v752_v31 = vadd.f32 %v751_v0, %v657_v21  ;;  %v576_v21 = vsub.f32 %v384_v14, %v480_v15  ;;  %v671_v0 = vand.u32 2147483647, %v575_v16  ;;  %v397_v15 = vld [vmem:[%s1885_s1 + $0x1f0] sm:$0xff] }
  0x73   :  { %v493_v16 = vld [vmem:[%s1886_s2 + $0x1f0] sm:$0xff] }
  0x74   :  { %v753_v3 = vadd.f32 %v752_v31, %v658_v26  ;;  %v577_v26 = vsub.f32 %v385_v19, %v481_v20  ;;  %v672_v31 = vand.u32 2147483647, %v576_v21  ;;  %v398_v20 = vld [vmem:[%s1885_s1 + $0x1f8] sm:$0xff] }
  0x75   :  { %v494_v21 = vld [vmem:[%s1886_s2 + $0x1f8] sm:$0xff] }
  0x76   :  { %v754_v38 = vadd.f32 %v753_v3, %v659_v30  ;;  %v578_v30 = vsub.f32 %v386_v24, %v482_v25  ;;  %v673_v3 = vand.u32 2147483647, %v577_v26  ;;  %v399_v25 = vld [vmem:[%s1885_s1 + $0x200] sm:$0xff] }
  0x77   :  { %v495_v26 = vld [vmem:[%s1886_s2 + $0x200] sm:$0xff] }
  0x78   :  { %v755_v43 = vadd.f32 %v754_v38, %v660_v33  ;;  %v579_v33 = vsub.f32 %v387_v28, %v483_v29  ;;  %v674_v38 = vand.u32 2147483647, %v578_v30  ;;  %v400_v29 = vld [vmem:[%s1885_s1 + $0x208] sm:$0xff] }
  0x79   :  { %v496_v30 = vld [vmem:[%s1886_s2 + $0x208] sm:$0xff] }
  0x7a   :  { %v756_v48 = vadd.f32 %v755_v43, %v661_v37  ;;  %v580_v37 = vsub.f32 %v388_v2, %v484_v32  ;;  %v675_v43 = vand.u32 2147483647, %v579_v33  ;;  %v401_v32 = vld [vmem:[%s1885_s1 + $0x210] sm:$0xff] }
  0x7b   :  { %v497_v33 = vld [vmem:[%s1886_s2 + $0x210] sm:$0xff] }
  0x7c   :  { %v757_v53 = vadd.f32 %v756_v48, %v662_v42  ;;  %v581_v42 = vsub.f32 %v389_v35, %v485_v36  ;;  %v676_v48 = vand.u32 2147483647, %v580_v37  ;;  %v402_v36 = vld [vmem:[%s1885_s1 + $0x218] sm:$0xff] }
  0x7d   :  { %v498_v37 = vld [vmem:[%s1886_s2 + $0x218] sm:$0xff] }
  0x7e   :  { %v758_v58 = vadd.f32 %v757_v53, %v663_v47  ;;  %v582_v47 = vsub.f32 %v390_v40, %v486_v41  ;;  %v677_v53 = vand.u32 2147483647, %v581_v42  ;;  %v403_v41 = vld [vmem:[%s1885_s1 + $0x220] sm:$0xff] }
  0x7f   :  { %v499_v42 = vld [vmem:[%s1886_s2 + $0x220] sm:$0xff] }
  0x80   :  { %v759_v63 = vadd.f32 %v758_v58, %v664_v52  ;;  %v583_v52 = vsub.f32 %v391_v45, %v487_v46  ;;  %v678_v58 = vand.u32 2147483647, %v582_v47  ;;  %v404_v46 = vld [vmem:[%s1885_s1 + $0x228] sm:$0xff] }
  0x81   :  { %v500_v47 = vld [vmem:[%s1886_s2 + $0x228] sm:$0xff] }
  0x82   :  { %v760_v8 = vadd.f32 %v759_v63, %v665_v57  ;;  %v584_v57 = vsub.f32 %v392_v50, %v488_v51  ;;  %v679_v63 = vand.u32 2147483647, %v583_v52  ;;  %v405_v51 = vld [vmem:[%s1885_s1 + $0x230] sm:$0xff] }
  0x83   :  { %v501_v52 = vld [vmem:[%s1886_s2 + $0x230] sm:$0xff] }
  0x84   :  { %v761_v13 = vadd.f32 %v760_v8, %v666_v62  ;;  %v585_v62 = vsub.f32 %v393_v55, %v489_v56  ;;  %v680_v8 = vand.u32 2147483647, %v584_v57  ;;  %v406_v56 = vld [vmem:[%s1885_s1 + $0x238] sm:$0xff] }
  0x85   :  { %v502_v57 = vld [vmem:[%s1886_s2 + $0x238] sm:$0xff] }
  0x86   :  { %v762_v18 = vadd.f32 %v761_v13, %v667_v7  ;;  %v586_v7 = vsub.f32 %v394_v60, %v490_v61  ;;  %v681_v13 = vand.u32 2147483647, %v585_v62  ;;  %v407_v61 = vld [vmem:[%s1885_s1 + $0x240] sm:$0xff] }
  0x87   :  { %v503_v62 = vld [vmem:[%s1886_s2 + $0x240] sm:$0xff] }
  0x88   :  { %v763_v23 = vadd.f32 %v762_v18, %v668_v11  ;;  %v587_v11 = vsub.f32 %v395_v5, %v491_v6  ;;  %v682_v18 = vand.u32 2147483647, %v586_v7  ;;  %v408_v6 = vld [vmem:[%s1885_s1 + $0x248] sm:$0xff] }
  0x89   :  { %v504_v7 = vld [vmem:[%s1886_s2 + $0x248] sm:$0xff] }
  0x8a   :  { %v764_v27 = vadd.f32 %v763_v23, %v669_v17  ;;  %v588_v17 = vsub.f32 %v396_v10, %v492_v12  ;;  %v683_v23 = vand.u32 2147483647, %v587_v11  ;;  %v409_v12 = vld [vmem:[%s1885_s1 + $0x250] sm:$0xff] }
  0x8b   :  { %v505_v11 = vld [vmem:[%s1886_s2 + $0x250] sm:$0xff] }
  0x8c   :  { %v765_v1 = vadd.f32 %v764_v27, %v670_v22  ;;  %v589_v22 = vsub.f32 %v397_v15, %v493_v16  ;;  %v684_v27 = vand.u32 2147483647, %v588_v17  ;;  %v410_v16 = vld [vmem:[%s1885_s1 + $0x258] sm:$0xff] }
  0x8d   :  { %v506_v17 = vld [vmem:[%s1886_s2 + $0x258] sm:$0xff] }
  0x8e   :  { %v766_v34 = vadd.f32 %v765_v1, %v671_v0  ;;  %v590_v0 = vsub.f32 %v398_v20, %v494_v21  ;;  %v685_v1 = vand.u32 2147483647, %v589_v22  ;;  %v411_v21 = vld [vmem:[%s1885_s1 + $0x260] sm:$0xff] }
  0x8f   :  { %v507_v22 = vld [vmem:[%s1886_s2 + $0x260] sm:$0xff] }
  0x90   :  { %v767_v39 = vadd.f32 %v766_v34, %v672_v31  ;;  %v591_v31 = vsub.f32 %v399_v25, %v495_v26  ;;  %v686_v34 = vand.u32 2147483647, %v590_v0  ;;  %v412_v26 = vld [vmem:[%s1885_s1 + $0x268] sm:$0xff] }
  0x91   :  { %v508_v0 = vld [vmem:[%s1886_s2 + $0x268] sm:$0xff] }
  0x92   :  { %v768_v44 = vadd.f32 %v767_v39, %v673_v3  ;;  %v592_v3 = vsub.f32 %v400_v29, %v496_v30  ;;  %v687_v39 = vand.u32 2147483647, %v591_v31  ;;  %v413_v30 = vld [vmem:[%s1885_s1 + $0x270] sm:$0xff] }
  0x93   :  { %v509_v31 = vld [vmem:[%s1886_s2 + $0x270] sm:$0xff] }
  0x94   :  { %v769_v49 = vadd.f32 %v768_v44, %v674_v38  ;;  %v593_v38 = vsub.f32 %v401_v32, %v497_v33  ;;  %v688_v44 = vand.u32 2147483647, %v592_v3  ;;  %v414_v33 = vld [vmem:[%s1885_s1 + $0x278] sm:$0xff] }
  0x95   :  { %v510_v3 = vld [vmem:[%s1886_s2 + $0x278] sm:$0xff] }
  0x96   :  { %v770_v54 = vadd.f32 %v769_v49, %v675_v43  ;;  %v594_v43 = vsub.f32 %v402_v36, %v498_v37  ;;  %v689_v49 = vand.u32 2147483647, %v593_v38  ;;  %v415_v37 = vld [vmem:[%s1885_s1 + $0x280] sm:$0xff] }
  0x97   :  { %v511_v38 = vld [vmem:[%s1886_s2 + $0x280] sm:$0xff] }
  0x98   :  { %v771_v59 = vadd.f32 %v770_v54, %v676_v48  ;;  %v595_v48 = vsub.f32 %v403_v41, %v499_v42  ;;  %v690_v54 = vand.u32 2147483647, %v594_v43  ;;  %v416_v42 = vld [vmem:[%s1885_s1 + $0x288] sm:$0xff] }
  0x99   :  { %v512_v43 = vld [vmem:[%s1886_s2 + $0x288] sm:$0xff] }
  0x9a   :  { %v772_v4 = vadd.f32 %v771_v59, %v677_v53  ;;  %v596_v53 = vsub.f32 %v404_v46, %v500_v47  ;;  %v691_v59 = vand.u32 2147483647, %v595_v48  ;;  %v417_v47 = vld [vmem:[%s1885_s1 + $0x290] sm:$0xff] }
  0x9b   :  { %v513_v48 = vld [vmem:[%s1886_s2 + $0x290] sm:$0xff] }
  0x9c   :  { %v773_v9 = vadd.f32 %v772_v4, %v678_v58  ;;  %v597_v58 = vsub.f32 %v405_v51, %v501_v52  ;;  %v692_v4 = vand.u32 2147483647, %v596_v53  ;;  %v418_v52 = vld [vmem:[%s1885_s1 + $0x298] sm:$0xff] }
  0x9d   :  { %v514_v53 = vld [vmem:[%s1886_s2 + $0x298] sm:$0xff] }
  0x9e   :  { %v774_v14 = vadd.f32 %v773_v9, %v679_v63  ;;  %v598_v63 = vsub.f32 %v406_v56, %v502_v57  ;;  %v693_v9 = vand.u32 2147483647, %v597_v58  ;;  %v419_v57 = vld [vmem:[%s1885_s1 + $0x2a0] sm:$0xff] }
  0x9f   :  { %v515_v58 = vld [vmem:[%s1886_s2 + $0x2a0] sm:$0xff] }
  0xa0   :  { %v775_v19 = vadd.f32 %v774_v14, %v680_v8  ;;  %v599_v8 = vsub.f32 %v407_v61, %v503_v62  ;;  %v694_v14 = vand.u32 2147483647, %v598_v63  ;;  %v420_v62 = vld [vmem:[%s1885_s1 + $0x2a8] sm:$0xff] }
  0xa1   :  { %v516_v63 = vld [vmem:[%s1886_s2 + $0x2a8] sm:$0xff] }
  0xa2   :  { %v776_v24 = vadd.f32 %v775_v19, %v681_v13  ;;  %v600_v13 = vsub.f32 %v408_v6, %v504_v7  ;;  %v695_v19 = vand.u32 2147483647, %v599_v8  ;;  %v80_v7 = vpop.xlane.xlu0 %79 }
  0xa4   :  { %v777_v28 = vadd.f32 %v776_v24, %v682_v18  ;;  %v601_v18 = vsub.f32 %v409_v12, %v505_v11  ;;  %v696_v24 = vand.u32 2147483647, %v600_v13  ;;  %v81_v12 = vrot.slane %v80_v7, 4 }
  0xa6   :  { %v778_v2 = vadd.f32 %v777_v28, %v683_v23  ;;  %v602_v23 = vsub.f32 %v410_v16, %v506_v17  ;;  %v697_v28 = vand.u32 2147483647, %v601_v18  ;;  %v422_v18 = vld [vmem:[%s1885_s1 + $0x2b8] sm:$0xff] }
  0xa8   :  { %v779_v35 = vadd.f32 %v778_v2, %v684_v27  ;;  %v603_v27 = vsub.f32 %v411_v21, %v507_v22  ;;  %v698_v2 = vand.u32 2147483647, %v602_v23 }
  0xaa   :  { %v780_v40 = vadd.f32 %v779_v35, %v685_v1  ;;  %v604_v1 = vsub.f32 %v412_v26, %v508_v0  ;;  %v699_v35 = vand.u32 2147483647, %v603_v27  ;;  %v423_v26 = vld [vmem:[%s1885_s1 + $0x2c0] sm:$0xff] }
  0xab   :  { %v519_v0 = vld [vmem:[%s1886_s2 + $0x2c0] sm:$0xff] }
  0xac   :  { %v781_v45 = vadd.f32 %v780_v40, %v686_v34  ;;  %v605_v34 = vsub.f32 %v413_v30, %v509_v31  ;;  %v700_v40 = vand.u32 2147483647, %v604_v1  ;;  %v212_v8 = vpop.xlane.xlu1 %211  ;;  %v424_v1 = vld [vmem:[%s1885_s1 + $0x2c8] sm:$0xff] }
  0xad   :  { %v213_v11 = vrot.slane %v212_v8, 4 }
  0xae   :  { %v782_v50 = vadd.f32 %v781_v45, %v687_v39  ;;  %v606_v39 = vsub.f32 %v414_v33, %v510_v3  ;;  %v701_v45 = vand.u32 2147483647, %v605_v34  ;;  %v615_v33 = vsub.f32 %v423_v26, %v519_v0 }
  0xaf   :  { %v214_v21 = vadd.f32 %v213_v11, %v212_v8  ;;  %v429_v11 = vld [vmem:[%s1885_s1 + $0x2f0] sm:$0xff] }
  0xb0   :  { %v783_v55 = vadd.f32 %v782_v50, %v688_v44  ;;  %v607_v44 = vsub.f32 %v415_v37, %v511_v38  ;;  %v702_v50 = vand.u32 2147483647, %v606_v39  ;;  %v425_v38 = vld [vmem:[%s1885_s1 + $0x2d0] sm:$0xff] }
  0xb1   :  { %v215_v31 = vrot.slane %v214_v21, 2  ;;  %v521_v39 = vld [vmem:[%s1886_s2 + $0x2d0] sm:$0xff] }
  0xb2   :  { %v784_v60 = vadd.f32 %v783_v55, %v689_v49  ;;  %v608_v49 = vsub.f32 %v416_v42, %v512_v43  ;;  %v703_v55 = vand.u32 2147483647, %v607_v44 }
  0xb4   :  { %v785_v5 = vadd.f32 %v784_v60, %v690_v54  ;;  %v609_v54 = vsub.f32 %v417_v47, %v513_v48  ;;  %v704_v60 = vand.u32 2147483647, %v608_v49  ;;  %v426_v47 = vld [vmem:[%s1885_s1 + $0x2d8] sm:$0xff] }
  0xb5   :  { %v266_v37 = vpop.xlane.xlu1 %265  ;;  %v522_v48 = vld [vmem:[%s1886_s2 + $0x2d8] sm:$0xff] }
  0xb6   :  { %v786_v10 = vadd.f32 %v785_v5, %v691_v59  ;;  %v610_v59 = vsub.f32 %v418_v52, %v514_v53  ;;  %v705_v5 = vand.u32 2147483647, %v609_v54  ;;  %v617_v52 = vsub.f32 %v425_v38, %v521_v39 }
  0xb7   :  { %v711_v53 = vand.u32 2147483647, %v615_v33 }
  0xb8   :  { %v787_v15 = vadd.f32 %v786_v10, %v692_v4  ;;  %v611_v4 = vsub.f32 %v419_v57, %v515_v58  ;;  %v517_v10 = vld [vmem:[%s1886_s2 + $0x2b0] sm:$0xff]  ;;  %v523_v57 = vld [vmem:[%s1886_s2 + $0x2e0] sm:$0xff] }
  0xba   :  { %v788_v20 = vadd.f32 %v787_v15, %v693_v9  ;;  %v421_v9 = vld [vmem:[%s1885_s1 + $0x2b0] sm:$0xff]  ;;  %v706_v15 = vand.u32 2147483647, %v610_v59  ;;  %v707_v23 = vand.u32 2147483647, %v611_v4  ;;  %v428_v4 = vld [vmem:[%s1885_s1 + $0x2e8] sm:$0xff] }
  0xbb   :  { %v613_v22 = vsub.f32 %v421_v9, %v517_v10  ;;  %v713_v9 = vand.u32 2147483647, %v617_v52 }
  0xbc   :  { %v789_v25 = vadd.f32 %v788_v20, %v694_v14  ;;  %v612_v14 = vsub.f32 %v420_v62, %v516_v63  ;;  %v82_v20 = vadd.f32 %v81_v12, %v80_v7 }
  0xbd   :  { %v709_v3 = vand.u32 2147483647, %v613_v22 }
  0xbe   :  { %v790_v29 = vadd.f32 %v789_v25, %v695_v19  ;;  %v518_v19 = vld [vmem:[%s1886_s2 + $0x2b8] sm:$0xff]  ;;  %v83_v27 = vrot.slane %v82_v20, 2 }
  0xc0   :  { %v791_v32 = vadd.f32 %v790_v29, %v696_v24  ;;  %v324_v13 = vpop.xlane.xlu2 %323  ;;  %v708_v29 = vand.u32 2147483647, %v612_v14 }
  0xc1   :  { %v325_v17 = vrot.slane %v324_v13, 4 }
  0xc2   :  { %v792_v36 = vadd.f32 %v791_v32, %v697_v28  ;;  %v614_v28 = vsub.f32 %v422_v18, %v518_v19  ;;  %v84_v32 = vadd.f32 %v83_v27, %v82_v20  ;;  %v430_v20 = vld [vmem:[%s1885_s1 + $0x2f8] sm:$0xff] }
  0xc3   :  { %v326_v25 = vadd.f32 %v325_v17, %v324_v13  ;;  %v525_v13 = vld [vmem:[%s1886_s2 + $0x2f0] sm:$0xff] }
  0xc4   :  { %v793_v41 = vadd.f32 %v792_v36, %v698_v2  ;;  %v520_v2 = vld [vmem:[%s1886_s2 + $0x2c8] sm:$0xff]  ;;  %v85_v42 = vrot.slane %v84_v32, 1  ;;  %v710_v44 = vand.u32 2147483647, %v614_v28 }
  0xc5   :  { %v327_v36 = vrot.slane %v326_v25, 2  ;;  %v616_v43 = vsub.f32 %v424_v1, %v520_v2 }
  0xc6   :  { %v794_v46 = vadd.f32 %v793_v41, %v699_v35  ;;  %v154_v35 = vpop.xlane.xlu0 %153  ;;  %v267_v41 = vrot.slane %v266_v37, 4 }
  0xc8   :  { %v795_v51 = vadd.f32 %v794_v46, %v700_v40  ;;  %v155_v40 = vrot.slane %v154_v35, 4  ;;  %v216_v46 = vadd.f32 %v215_v31, %v214_v21  ;;  %v526_v21 = vld [vmem:[%s1886_s2 + $0x2f8] sm:$0xff] }
  0xc9   :  { %v622_v27 = vsub.f32 %v430_v20, %v526_v21 }
  0xca   :  { %v796_v56 = vadd.f32 %v795_v51, %v701_v45  ;;  %v156_v49 = vadd.f32 %v155_v40, %v154_v35  ;;  %v86_v51 = vadd.f32 %v85_v42, %v84_v32  ;;  %v217_v63 = vrot.slane %v216_v46, 1 }
  0xcb   :  { %v718_v1 = vand.u32 2147483647, %v622_v27 }
  0xcc   :  { %v797_v61 = vadd.f32 %v796_v56, %v702_v50  ;;  %v268_v50 = vadd.f32 %v267_v41, %v266_v37  ;;  %v427_v56 = vld [vmem:[%s1885_s1 + $0x2e0] sm:$0xff]  ;;  %v157_v58 = vrot.slane %v156_v49, 2  ;;  %931 = vpush %v86_v51  ;;  %v218_v19 = vadd.f32 %v217_v63, %v216_v46 }
  0xcd   :  { %v619_v8 = vsub.f32 %v427_v56, %v523_v57  ;;  %v1113_v57 = vmov 98304.0  }
  0xce   :  { %v798_v6 = vadd.f32 %v797_v61, %v703_v55  ;;  %v328_v55 = vadd.f32 %v327_v36, %v326_v25  ;;  %v269_v59 = vrot.slane %v268_v50, 2  ;;  %v712_v61 = vand.u32 2147483647, %v616_v43 }
  0xcf   :  { %v715_v25 = vand.u32 2147483647, %v619_v8 }
  0xd0   :  { %v799_v16 = vadd.f32 %v798_v6, %v704_v60  ;;  %v618_v60 = vsub.f32 %v426_v47, %v522_v48  ;;  %v158_v6 = vadd.f32 %v157_v58, %v156_v49  ;;  %v270_v7 = vadd.f32 %v269_v59, %v268_v50 }
  0xd1   :  { %v329_v12 = vrot.slane %v328_v55, 1 }
  0xd2   :  { %v800_v24 = vadd.f32 %v799_v16, %v705_v5  ;;  %v524_v5 = vld [vmem:[%s1886_s2 + $0x2e8] sm:$0xff]  ;;  %v159_v14 = vrot.slane %v158_v6, 1  ;;  %v714_v17 = vand.u32 2147483647, %v618_v60 }
  0xd3   :  { %v620_v16 = vsub.f32 %v428_v4, %v524_v5  ;;  %v330_v0 = vadd.f32 %v329_v12, %v328_v55 }
  0xd4   :  { %v801_v30 = vadd.f32 %v800_v24, %v706_v15  ;;  %v271_v15 = vrot.slane %v270_v7, 1  ;;  %v160_v22 = vadd.f32 %v159_v14, %v158_v6  ;;  %v621_v24 = vsub.f32 %v429_v11, %v525_v13 }
  0xd5   :  { %v716_v28 = vand.u32 2147483647, %v620_v16 }
  0xd6   :  { %v802_v34 = vadd.f32 %v801_v30, %v707_v23  ;;  %v272_v23 = vadd.f32 %v271_v15, %v270_v7  ;;  %933 = vpush %v160_v22  ;;  %v717_v30 = vand.u32 2147483647, %v621_v24 }
  0xd7   :  { %935 = vpush %v218_v19 }
  0xd8   :  { %v803_v45 = vadd.f32 %v802_v34, %v708_v29  ;;  %937 = vpush %v272_v23 }
  0xd9   :  { %939 = vpush %v330_v0 }
  0xda   :  { %v804_v54 = vadd.f32 %v803_v45, %v709_v3  ;;  %v1107_v3 = vmov 2048.0  }
  0xdb   :  { %951 = vrcp.f32 %v1107_v3 }
  0xdc   :  { %v805_v62 = vadd.f32 %v804_v54, %v710_v44  ;;  %953 = vrcp.f32 %v1113_v57 }
  0xde   :  { %v806_v10 = vadd.f32 %v805_v62, %v711_v53 }
  0xe0   :  { %v807_v18 = vadd.f32 %v806_v10, %v712_v61 }
  0xe1   :  { %v952_v34 = vpop.eup %951 }
  0xe2   :  { %v808_v26 = vadd.f32 %v807_v18, %v713_v9  ;;  %v90_v35 = vmul.f32 2048.0, %v952_v34  ;;  %vm94_vm1 = vweird.f32 %v952_v34  ;;  %v954_v58 = vpop.eup %953 }
  0xe3   :  { %v825_v59 = vmul.f32 98304.0, %v954_v58  ;;  %vm829_vm3 = vweird.f32 %v954_v58 }
  0xe4   :  { %v809_v29 = vadd.f32 %v808_v26, %v714_v17  ;;  %v91_v36 = vsub.f32 1.0, %v90_v35 }
  0xe5   :  { %v826_v60 = vsub.f32 1.0, %v825_v59 }
  0xe6   :  { %v810_v31 = vadd.f32 %v809_v29, %v715_v25  ;;  %v92_v37 = vmul.f32 %v952_v34, %v91_v36 }
  0xe7   :  { %v827_v61 = vmul.f32 %v954_v58, %v826_v60 }
  0xe8   :  { %v811_v2 = vadd.f32 %v810_v31, %v716_v28  ;;  %v93_v39 = vadd.f32 %v952_v34, %v92_v37 }
  0xe9   :  { %v828_v62 = vadd.f32 %v954_v58, %v827_v61 }
  0xea   :  { %v812_v32 = vadd.f32 %v811_v2, %v717_v30  ;;  %v95_v43 = vsel %vm94_vm1, %v952_v34, %v93_v39 }
  0xeb   :  { %v830_v63 = vsel %vm829_vm3, %v954_v58, %v828_v62 }
  0xec   :  { %v813_v33 = vadd.f32 %v812_v32, %v718_v1 }
  0xee   :  { %814 = vadd.xlane.f32.xlu2 %v813_v33 }
  0xfd   :  { %s1826_s1 = spop %931 }
  0xfe   :  { %v88_v38 = vstv %s1826_s1 }
  0xff   :  { %v96_v45 = vmul.f32 %v95_v43, %v88_v38 }
 0x101   :  { %98 = vst.msk [vmem:[#allocation2] sm:$0x1] %vm97_vm2, %v96_v45 }
 0x102   :  { %843 = dma.vmem_to_hbm [thread:$0]  %s839_s18, 16, %s841_s21, [#allocation3]  }
 0x107   :  { %s1828_s2 = spop %933 }
 0x108   :  { %s1830_s28 = spop %935  ;;  %v162_v40 = vstv %s1828_s2 }
 0x109   :  { %s1832_s29 = spop %937  ;;  %v220_v41 = vstv %s1830_s28  ;;  %s884_s28 = sshll.u32 %s1891_s7, 4  ;;  %v163_v46 = vmul.f32 %v162_v40, %v95_v43  ;;  %s885_s28 = int_to_ptr.hbm [resolvable:$true] %s884_s28 }
 0x10a   :  { %s1839_s0 = spop %939  ;;  %v274_v42 = vstv %s1832_s29  ;;  %v221_v47 = vmul.f32 %v220_v41, %v95_v43 }
 0x10b   :  { %v332_v44 = vstv %s1839_s0  ;;  %v275_v48 = vmul.f32 %v274_v42, %v95_v43  ;;  %164 = vst.msk [vmem:[#allocation4] sm:$0x1] %vm97_vm2, %v163_v46 }
 0x10c   :  { %v333_v50 = vmul.f32 %v332_v44, %v95_v43  ;;  %222 = vst.msk [vmem:[#allocation6] sm:$0x1] %vm97_vm2, %v221_v47  ;;  %854 = dma.vmem_to_hbm [thread:$0]  %s850_s9, 16, %s1847_s12, [#allocation5]  }
 0x10d   :  { %276 = vst.msk [vmem:[#allocation7] sm:$0x1] %vm97_vm2, %v275_v48  ;;  %865 = dma.vmem_to_hbm [thread:$0]  %s861_s22, 16, %s863_s25, [#allocation5]  }
 0x10e   :  { %334 = vst.msk [vmem:[#allocation9] sm:$0x1] %vm97_vm2, %v333_v50  ;;  %876 = dma.vmem_to_hbm [thread:$0]  %s872_s14, 16, %s1850_s17, [#allocation8]  }
 0x10f   :  { %887 = dma.vmem_to_hbm [thread:$0]  %s883_s27, 16, %s885_s28, [#allocation8]  }
 0x161   :  { %v815_v49 = vpop.xlane.xlu2 %814 }
 0x162   :  { %v816_v51 = vrot.slane %v815_v49, 4 }
 0x164   :  { %v817_v52 = vadd.f32 %v816_v51, %v815_v49 }
 0x166   :  { %v818_v53 = vrot.slane %v817_v52, 2 }
 0x168   :  { %v819_v54 = vadd.f32 %v818_v53, %v817_v52 }
 0x16a   :  { %v820_v55 = vrot.slane %v819_v54, 1 }
 0x16c   :  { %v821_v56 = vadd.f32 %v820_v55, %v819_v54 }
 0x16e   :  { %941 = vpush %v821_v56 }
 0x19f   :  { %s942_s9 = spop %941 }
 0x1a0   :  { %v823_v4 = vstv %s942_s9 }
 0x1a1   :  { %v831_v5 = vmul.f32 %v830_v63, %v823_v4 }
 0x1a3   :  { %832 = vst.msk [vmem:[#allocation10] sm:$0x1] %vm97_vm2, %v831_v5 }
 0x1a4   :  { %898 = dma.vmem_to_hbm [thread:$0]  %s894_s5, 16, %s896_s30, [#allocation11]  }
 0x1a5   :  { %1099 = dma.done.wait [#allocation3], 16  }
 0x1a6   :  { %1100 = vsyncadd [#allocation3], 4294967280 }
 0x1a7   :  { %1101 = dma.done.wait [#allocation5], 32  }
 0x1a8   :  { %1102 = vsyncadd [#allocation5], 4294967264 }
 0x1a9   :  { %1103 = dma.done.wait [#allocation8], 32  }
 0x1aa   :  { %1104 = vsyncadd [#allocation8], 4294967264 }
 0x1ab   :  { %1105 = dma.done.wait [#allocation11], 16  }
 0x1ac   :  { %1106 = vsyncadd [#allocation11], 4294967280 }
 0x1ad   :  { %923 = vsyncpa [#allocation3], 1 }
 0x1ae   :  { %924 = vsyncpa [#allocation5], 1 }
 0x1af   :  { %925 = vsyncpa [#allocation8], 1 }
 0x1b0   :  { %926 = vsyncpa [#allocation11], 1 }

// kernel: pix2pix_forward.6
= control target key start
LH: loop header
LB: loop body
LE: loop exit
PB: predicated region body
PF: predicated region fallthrough
CT: control target
= control target key end

     0   :  { %s13226_s19 = smov 0   ;;  %s16387_s0 = inlined_call_operand.vmem [shape: bf16[4,256,256], index: 0, kind: input, shape index: {}]   ;;  %s16388_s1 = inlined_call_operand.vmem [shape: bf16[32,256], index: 1, kind: input, shape index: {}]   ;;  %s16389_s2 = inlined_call_operand.vmem [shape: f32[32,1], index: 2, kind: input, shape index: {}]   ;;  %s16390_s3 = inlined_call_operand.vmem [shape: bf16[16,256,64], index: 3, kind: input, shape index: {}]   ;;  %s16391_s4 = inlined_call_operand.vmem [shape: bf16[16,64,32], index: 4, kind: input, shape index: {}]   ;;  %s16392_s5 = inlined_call_operand.vmem [shape: f32[64,1], index: 5, kind: input, shape index: {}]   ;;  %s16393_s6 = inlined_call_operand.vmem [shape: bf16[16,64,16], index: 6, kind: input, shape index: {}]   ;;  %s16394_s7 = inlined_call_operand.vmem [shape: bf16[16,128,64], index: 7, kind: input, shape index: {}]   ;;  %s16395_s8 = inlined_call_operand.vmem [shape: f32[128,1], index: 8, kind: input, shape index: {}]   ;;  %s16396_s9 = inlined_call_operand.vmem [shape: f32[128,16], index: 9, kind: input, shape index: {}]   ;;  %s16397_s10 = inlined_call_operand.<no memory space> [shape: f32[1,1], index: 10, kind: input, shape index: {}]   ;;  %s16398_s11 = inlined_call_operand.vmem [shape: f32[4,8,128], index: 11, kind: output, shape index: {}]  }
   0x1   :  { %v16_v0 = vstv %s16397_s10 }
   0x2   :  { %17 = vst [vmem:[#allocation2] sm:$0x1] %v16_v0 }
   0x3 LB: > { %s9095_s20 = sadd.s32 4294967295, %s13157_s19   ;;  %p9099_p0 = scmp.ge.s32.totalorder %s13157_s19, 1  ;;  %s13157_s19 = sphi %s13226_s19, %s23_s19  }
   0x4   : > { %p339_p1 = scmp.lt.s32.totalorder %s13157_s19, 5 }
   0x6   : > { %p340_p2 = pnand %p9099_p0, %p339_p1 }
   0x8   : > { %343 = sbr.rel (%p340_p2) target bundleno = 4179 (0x1053), region = 64 }
   0xd   : > { %p378_p3 = scmp.lt.s32.totalorder %s9095_s20, 3  ;;  %v424_v47 = vld [vmem:[%s16389_s2] sm:$0xff]  ;;  %v13159_v51 = vmov 0  }
   0xe   : > { %13086 = vset.pattern.permute.xlu0 %v13159_v51  ;;  %13087 = vset.pattern.permute.xlu1 %v13159_v51 }
   0xf   : > { %s16482_s20 = smov (!%p378_p3, %s9095_s20), 3  ;;  %430 = vperm.xlu0 %13086, %v424_v47   ;;  %13088 = vset.pattern.permute.xlu2 %v13159_v51 }
  0x10   : > { %s12513_s10 = sshll.u32 %s16482_s20, 8  ;;  %s9102_s17 = sshll.u32 %s16482_s20, 3 }
  0x11   : > { %s13240_s23 = scalar_lea.vmem %s16387_s0, %s12513_s10  ;;  %s386_s21 = scalar_lea.vmem %s16398_s11, %s9102_s17 }
  0x12   : > { %v9177_v1 = vld [vmem:[%s13240_s23 + $0x70] sm:$0xf]  ;;  %v12533_v2 = vld [vmem:[%s13240_s23 + $0x74] sm:$0xf0]  ;;  %v9169_v3 = vld [vmem:[%s13240_s23 + $0x60] sm:$0xf] }
  0x13   : > { %v9178_v4 = vor.u32 %v12533_v2, %v9177_v1  ;;  %v12531_v5 = vld [vmem:[%s13240_s23 + $0x64] sm:$0xf0]  ;;  %v9241_v6 = vld [vmem:[%s13240_s23 + $0xf0] sm:$0xf]  ;;  %v12549_v7 = vld [vmem:[%s13240_s23 + $0xf4] sm:$0xf0] }
  0x14   : > { %v9170_v8 = vor.u32 %v12531_v5, %v9169_v3  ;;  %v9242_v9 = vor.u32 %v12549_v7, %v9241_v6  ;;  %v9233_v10 = vld [vmem:[%s13240_s23 + $0xe0] sm:$0xf]  ;;  %v12547_v11 = vld [vmem:[%s13240_s23 + $0xe4] sm:$0xf0]  ;;  %v9161_v12 = vld [vmem:[%s13240_s23 + $0x50] sm:$0xf] }
  0x15   : > { %628 = vmatpush.bf16.msra.mxu3 %v9178_v4  ;;  %v12529_v13 = vld [vmem:[%s13240_s23 + $0x54] sm:$0xf0]  ;;  %v9234_v14 = vor.u32 %v12547_v11, %v9233_v10  ;;  %v9225_v15 = vld [vmem:[%s13240_s23 + $0xd0] sm:$0xf]  ;;  %v12532_v17 = vld [vmem:[%s13240_s23 + $0x74] sm:$0xf] }
  0x16   : > { %647 = vmatpush.bf16.msra.mxu1 %v9242_v9  ;;  %v12545_v16 = vld [vmem:[%s13240_s23 + $0xd4] sm:$0xf0]  ;;  %v9162_v18 = vor.u32 %v12529_v13, %v9161_v12  ;;  %v9179_v19 = vld [vmem:[%s13240_s23 + $0x78] sm:$0xf0]  ;;  %v9153_v20 = vld [vmem:[%s13240_s23 + $0x40] sm:$0xf] }
  0x17   : > { %v12527_v21 = vld [vmem:[%s13240_s23 + $0x44] sm:$0xf0]  ;;  %v9182_v22 = vor.u32 %v12532_v17, %v9179_v19  ;;  %v12530_v23 = vld [vmem:[%s13240_s23 + $0x64] sm:$0xf]  ;;  %v9226_v24 = vor.u32 %v12545_v16, %v9225_v15  ;;  %v9171_v25 = vld [vmem:[%s13240_s23 + $0x68] sm:$0xf0] }
  0x18   : > { %v9217_v26 = vld [vmem:[%s13240_s23 + $0xc0] sm:$0xf]  ;;  %v12543_v27 = vld [vmem:[%s13240_s23 + $0xc4] sm:$0xf0]  ;;  %v9174_v28 = vor.u32 %v12530_v23, %v9171_v25  ;;  %v9154_v29 = vor.u32 %v12527_v21, %v9153_v20  ;;  %v12528_v30 = vld [vmem:[%s13240_s23 + $0x54] sm:$0xf] }
  0x19   : > { %629 = vmatpush.bf16.msra.mxu3 %v9170_v8  ;;  %666 = vmatpush.bf16.msra.mxu2 %v9182_v22  ;;  %v9163_v31 = vld [vmem:[%s13240_s23 + $0x58] sm:$0xf0]  ;;  %v9145_v32 = vld [vmem:[%s13240_s23 + $0x30] sm:$0xf]  ;;  %v12525_v33 = vld [vmem:[%s13240_s23 + $0x34] sm:$0xf0]  ;;  %v9218_v34 = vor.u32 %v12543_v27, %v9217_v26 }
  0x1a   : > { %648 = vmatpush.bf16.msra.mxu1 %v9234_v14  ;;  %v9209_v35 = vld [vmem:[%s13240_s23 + $0xb0] sm:$0xf]  ;;  %v12541_v36 = vld [vmem:[%s13240_s23 + $0xb4] sm:$0xf0]  ;;  %v9166_v37 = vor.u32 %v12528_v30, %v9163_v31  ;;  %v9146_v38 = vor.u32 %v12525_v33, %v9145_v32  ;;  %v12526_v39 = vld [vmem:[%s13240_s23 + $0x44] sm:$0xf] }
  0x1b   : > { %v9155_v40 = vld [vmem:[%s13240_s23 + $0x48] sm:$0xf0]  ;;  %v9137_v41 = vld [vmem:[%s13240_s23 + $0x20] sm:$0xf]  ;;  %v12523_v42 = vld [vmem:[%s13240_s23 + $0x24] sm:$0xf0]  ;;  %v9210_v43 = vor.u32 %v12541_v36, %v9209_v35 }
  0x1c   : > { %v9201_v44 = vld [vmem:[%s13240_s23 + $0xa0] sm:$0xf]  ;;  %v12539_v45 = vld [vmem:[%s13240_s23 + $0xa4] sm:$0xf0]  ;;  %v9158_v46 = vor.u32 %v12526_v39, %v9155_v40  ;;  %v9138_v48 = vor.u32 %v12523_v42, %v9137_v41  ;;  %v12524_v49 = vld [vmem:[%s13240_s23 + $0x34] sm:$0xf] }
  0x1d   : > { %630 = vmatpush.bf16.msra.mxu3 %v9162_v18  ;;  %667 = vmatpush.bf16.msra.mxu2 %v9174_v28  ;;  %v9147_v50 = vld [vmem:[%s13240_s23 + $0x38] sm:$0xf0]  ;;  %v9129_v52 = vld [vmem:[%s13240_s23 + $0x10] sm:$0xf]  ;;  %v12521_v53 = vld [vmem:[%s13240_s23 + $0x14] sm:$0xf0]  ;;  %v9202_v54 = vor.u32 %v12539_v45, %v9201_v44 }
  0x1e   : > { %649 = vmatpush.bf16.msra.mxu1 %v9226_v24  ;;  %v9193_v55 = vld [vmem:[%s13240_s23 + $0x90] sm:$0xf]  ;;  %v12537_v56 = vld [vmem:[%s13240_s23 + $0x94] sm:$0xf0]  ;;  %v9150_v57 = vor.u32 %v12524_v49, %v9147_v50  ;;  %v9130_v58 = vor.u32 %v12521_v53, %v9129_v52  ;;  %v12522_v59 = vld [vmem:[%s13240_s23 + $0x24] sm:$0xf] }
  0x1f   : > { %v9139_v60 = vld [vmem:[%s13240_s23 + $0x28] sm:$0xf0]  ;;  %v9121_v61 = vld [vmem:[%s13240_s23] sm:$0xf]  ;;  %v12519_v62 = vld [vmem:[%s13240_s23 + $0x4] sm:$0xf0]  ;;  %v9194_v63 = vor.u32 %v12537_v56, %v9193_v55 }
  0x20   : > { %v12548_v0 = vld [vmem:[%s13240_s23 + $0xf4] sm:$0xf]  ;;  %v9243_v1 = vld [vmem:[%s13240_s23 + $0xf8] sm:$0xf0]  ;;  %v425_v2 = vld [vmem:[%s16389_s2 + $0x8] sm:$0xff]  ;;  %v9142_v6 = vor.u32 %v12522_v59, %v9139_v60  ;;  %v9122_v7 = vor.u32 %v12519_v62, %v9121_v61 }
  0x21   : > { %631 = vmatpush.bf16.msra.mxu3 %v9154_v29  ;;  %668 = vmatpush.bf16.msra.mxu2 %v9166_v37  ;;  %v9105_v3 = vld [vmem:[%s16388_s1] sm:$0xf]  ;;  %v12535_v5 = vld [vmem:[%s13240_s23 + $0x84] sm:$0xf0]  ;;  %v12520_v9 = vld [vmem:[%s13240_s23 + $0x14] sm:$0xf]  ;;  %v9246_v11 = vor.u32 %v12548_v0, %v9243_v1 }
  0x22   : > { %650 = vmatpush.bf16.msra.mxu1 %v9218_v34  ;;  %v9185_v4 = vld [vmem:[%s13240_s23 + $0x80] sm:$0xf]  ;;  %v12515_v8 = vld [vmem:[%s16388_s1 + $0x4] sm:$0xf0]  ;;  %v9131_v10 = vld [vmem:[%s13240_s23 + $0x18] sm:$0xf0]  ;;  %435 = vperm.xlu0 %13086, %v425_v2  }
  0x23   : > { %v12546_v12 = vld [vmem:[%s13240_s23 + $0xe4] sm:$0xf]  ;;  %v9186_v13 = vor.u32 %v12535_v5, %v9185_v4  ;;  %v9235_v14 = vld [vmem:[%s13240_s23 + $0xe8] sm:$0xf0]  ;;  %v9106_v17 = vor.u32 %v12515_v8, %v9105_v3  ;;  %v9134_v18 = vor.u32 %v12520_v9, %v9131_v10  ;;  %v12544_v23 = vld [vmem:[%s13240_s23 + $0xd4] sm:$0xf] }
  0x24   : > { %v12514_v15 = vld [vmem:[%s16388_s1 + $0x4] sm:$0xf]  ;;  %v9107_v16 = vld [vmem:[%s16388_s1 + $0x8] sm:$0xf0]  ;;  %v9238_v21 = vor.u32 %v12546_v12, %v9235_v14  ;;  %v9227_v24 = vld [vmem:[%s13240_s23 + $0xd8] sm:$0xf0] }
  0x25   : > { %632 = vmatpush.bf16.msra.mxu3 %v9146_v38  ;;  %669 = vmatpush.bf16.msra.mxu2 %v9158_v46  ;;  %v12518_v19 = vld [vmem:[%s13240_s23 + $0x4] sm:$0xf]  ;;  %v9123_v20 = vld [vmem:[%s13240_s23 + $0x8] sm:$0xf0]  ;;  %v9110_v22 = vor.u32 %v12514_v15, %v9107_v16  ;;  %v426_v26 = vld [vmem:[%s16389_s2 + $0x10] sm:$0xff]  ;;  %v9230_v27 = vor.u32 %v12544_v23, %v9227_v24 }
  0x26   : > { %651 = vmatpush.bf16.msra.mxu1 %v9210_v43  ;;  %v9126_v25 = vor.u32 %v12518_v19, %v9123_v20  ;;  %440 = vperm.xlu1 %13087, %v426_v26   ;;  %v12542_v28 = vld [vmem:[%s13240_s23 + $0xc4] sm:$0xf]  ;;  %v9219_v29 = vld [vmem:[%s13240_s23 + $0xc8] sm:$0xf0]  ;;  %v427_v31 = vld [vmem:[%s16389_s2 + $0x18] sm:$0xff] }
  0x27   : > { %v9222_v30 = vor.u32 %v12542_v28, %v9219_v29  ;;  %v12540_v32 = vld [vmem:[%s13240_s23 + $0xb4] sm:$0xf]  ;;  %v9211_v33 = vld [vmem:[%s13240_s23 + $0xb8] sm:$0xf0]  ;;  %v9113_v34 = vld [vmem:[%s16388_s1 + $0x10] sm:$0xf] }
  0x28   : > { %v12517_v35 = vld [vmem:[%s16388_s1 + $0x14] sm:$0xf0]  ;;  %v9214_v36 = vor.u32 %v12540_v32, %v9211_v33  ;;  %v12538_v37 = vld [vmem:[%s13240_s23 + $0xa4] sm:$0xf]  ;;  %v9203_v38 = vld [vmem:[%s13240_s23 + $0xa8] sm:$0xf0] }
  0x29   : > { %633 = vmatpush.bf16.msra.mxu3 %v9138_v48  ;;  %670 = vmatpush.bf16.msra.mxu2 %v9150_v57  ;;  %v12516_v39 = vld [vmem:[%s16388_s1 + $0x14] sm:$0xf]  ;;  %v9115_v40 = vld [vmem:[%s16388_s1 + $0x18] sm:$0xf0]  ;;  %v9114_v41 = vor.u32 %v12517_v35, %v9113_v34  ;;  %v9206_v42 = vor.u32 %v12538_v37, %v9203_v38  ;;  %v12534_v47 = vld [vmem:[%s13240_s23 + $0x84] sm:$0xf] }
  0x2a   : > { %652 = vmatpush.bf16.msra.mxu1 %v9202_v54  ;;  %v9118_v43 = vor.u32 %v12516_v39, %v9115_v40  ;;  %v12536_v44 = vld [vmem:[%s13240_s23 + $0x94] sm:$0xf]  ;;  %v9195_v45 = vld [vmem:[%s13240_s23 + $0x98] sm:$0xf0]  ;;  %v9187_v48 = vld [vmem:[%s13240_s23 + $0x88] sm:$0xf0] }
  0x2b   : > { %v9198_v46 = vor.u32 %v12536_v44, %v9195_v45  ;;  %v9190_v49 = vor.u32 %v12534_v47, %v9187_v48  ;;  %v4775_v26 = vld [vmem:[%s16392_s5 + $0x8] sm:$0xff]  ;;  %v4776_v28 = vld [vmem:[%s16392_s5 + $0x10] sm:$0xff]  ;;  %v13160_v29 = vmov 256.0  }
  0x2c   : > { %13089 = vrcp.f32 %v13160_v29  ;;  %v12570_v29 = vld [vmem:[%s16390_s3 + $0x80] sm:$0xff] }
  0x2d   : > { %634 = vmatpush.bf16.msra.mxu3 %v9130_v58  ;;  %671 = vmatpush.bf16.msra.mxu2 %v9142_v6 }
  0x2e   : > { %653 = vmatpush.bf16.msra.mxu1 %v9194_v63  ;;  %445 = vperm.xlu1 %13087, %v427_v31  }
  0x31   : > { %635 = vmatpush.bf16.msra.mxu3 %v9122_v7  ;;  %672 = vmatpush.bf16.msra.mxu2 %v9134_v18 }
  0x32   : > { %654 = vmatpush.bf16.msra.mxu1 %v9186_v13 }
  0x34   : > { %636 = vmatmul.bf16.vlgmr.msra.gmra.mxu3 %v9106_v17 }
  0x35   : > { %685 = vmatpush.bf16.msrb.mxu3 %v9246_v11  ;;  %655 = vmatmul.bf16.vlgmr.msra.gmra.mxu1 %v9110_v22 }
  0x36   : > { %673 = vmatpush.bf16.msra.mxu2 %v9126_v25 }
  0x39   : > { %686 = vmatpush.bf16.msrb.mxu3 %v9238_v21  ;;  %674 = vmatmul.bf16.vlgmr.msra.gmra.mxu2 %v9106_v17 }
  0x3d   : > { %687 = vmatpush.bf16.msrb.mxu3 %v9230_v27  ;;  %v4778_v27 = vld [vmem:[%s16392_s5 + $0x20] sm:$0xff] }
  0x41   : > { %688 = vmatpush.bf16.msrb.mxu3 %v9222_v30  ;;  %v13090_v30 = vpop.eup %13089 }
  0x42   : > { %v717_v31 = vmul.f32 256.0, %v13090_v30  ;;  %vm721_vm0 = vweird.f32 %v13090_v30 }
  0x44   : > { %641 = vmatmul.bf16.gmra.mxu3 %v9114_v41  ;;  %v718_v32 = vsub.f32 1.0, %v717_v31  ;;  %v12561_v31 = vld [vmem:[%s16390_s3 + $0x58] sm:$0xff] }
  0x45   : > { %689 = vmatpush.bf16.msrb.mxu3 %v9214_v36  ;;  %660 = vmatmul.bf16.gmra.mxu1 %v9118_v43 }
  0x46   : > { %v719_v33 = vmul.f32 %v13090_v30, %v718_v32  ;;  %v12597_v32 = vld [vmem:[%s16390_s3 + $0x138] sm:$0xff] }
  0x48   : > { %v720_v34 = vadd.f32 %v13090_v30, %v719_v33  ;;  %v12605_v33 = vld [vmem:[%s16390_s3 + $0x178] sm:$0xff] }
  0x49   : > { %690 = vmatpush.bf16.msrb.mxu3 %v9206_v42  ;;  %679 = vmatmul.bf16.gmra.mxu2 %v9114_v41 }
  0x4a   : > { %v13351_v35 = vsel %vm721_vm0, %v13090_v30, %v720_v34  ;;  %v12578_v30 = vld [vmem:[%s16390_s3 + $0xc0] sm:$0xff] }
  0x4d   : > { %691 = vmatpush.bf16.msrb.mxu3 %v9198_v46 }
  0x51   : > { %692 = vmatpush.bf16.msrb.mxu3 %v9190_v49 }
  0x54   : > { %693 = vmatmul.bf16.vlgmr.msrb.gmra.mxu3 %v9110_v22 }
  0x64   : > { %698 = vmatmul.bf16.gmra.mxu3 %v9118_v43 }
  0x81   : > { %v431_v54 = vpop.permute.xlu0 %430 }
  0x94   : > { %v436_v63 = vpop.permute.xlu0 %435 }
  0x98   : > { %v441_v4 = vpop.permute.xlu1 %440 }
  0xa0   : > { %v446_v16 = vpop.permute.xlu1 %445 }
  0xb2   : > { %v656_v55 = vpop.f32.mrf.mxu1 }
  0xb7   : > { %v637_v50 = vpop.f32.mrf.mxu3 }
  0xb8   : > { %v638_v57 = vadd.f32 %v637_v50, %v431_v54 }
  0xba   : > { %v657_v61 = vadd.f32 %v656_v55, %v638_v57  ;;  %v658_v0 = vpop.f32.mrf.mxu1 }
  0xbc   : > { %v675_v53 = vpop.f32.mrf.mxu2 }
  0xbd   : > { %v676_v58 = vadd.f32 %v675_v53, %v431_v54 }
  0xbf   : > { %v639_v51 = vpop.f32.mrf.mxu3 }
  0xc0   : > { %v640_v2 = vadd.f32 %v639_v51, %v436_v63 }
  0xc2   : > { %v659_v6 = vadd.f32 %v658_v0, %v640_v2  ;;  %v661_v10 = vpop.f32.mrf.mxu1  ;;  %v12557_v0 = vld [vmem:[%s16390_s3 + $0x38] sm:$0xff] }
  0xc3   : > { %v12585_v2 = vld [vmem:[%s16390_s3 + $0xf8] sm:$0xff]  ;;  %967 = vmatpush.bf16.msra.mxu0 %v12557_v0 }
  0xc4   : > { %v677_v59 = vpop.f32.mrf.mxu2  ;;  %1163 = vmatpush.bf16.msra.mxu3 %v12585_v2 }
  0xc5   : > { %v678_v3 = vadd.f32 %v677_v59, %v436_v63 }
  0xc7   : > { %v642_v52 = vpop.f32.mrf.mxu3 }
  0xc8   : > { %v643_v11 = vadd.f32 %v642_v52, %v441_v4 }
  0xca   : > { %v662_v14 = vadd.f32 %v661_v10, %v643_v11  ;;  %v663_v20 = vpop.f32.mrf.mxu1  ;;  %v12574_v10 = vld [vmem:[%s16390_s3 + $0xa0] sm:$0xff] }
  0xcb   : > { %v12582_v11 = vld [vmem:[%s16390_s3 + $0xe0] sm:$0xff] }
  0xcc   : > { %v680_v8 = vpop.f32.mrf.mxu2 }
  0xcd   : > { %v681_v12 = vadd.f32 %v680_v8, %v441_v4  ;;  %v12576_v4 = vld [vmem:[%s16390_s3 + $0xb0] sm:$0xff]  ;;  %v12583_v8 = vld [vmem:[%s16390_s3 + $0xe8] sm:$0xff] }
  0xcf   : > { %v644_v56 = vpop.f32.mrf.mxu3 }
  0xd0   : > { %v645_v19 = vadd.f32 %v644_v56, %v446_v16 }
  0xd2   : > { %v664_v23 = vadd.f32 %v663_v20, %v645_v19  ;;  %v12580_v19 = vld [vmem:[%s16390_s3 + $0xd0] sm:$0xff]  ;;  %v12551_v20 = vld [vmem:[%s16390_s3 + $0x8] sm:$0xff] }
  0xd4   : > { %v682_v18 = vpop.f32.mrf.mxu2 }
  0xd5   : > { %v683_v21 = vadd.f32 %v682_v18, %v446_v16  ;;  %v12552_v16 = vld [vmem:[%s16390_s3 + $0x10] sm:$0xff] }
  0xd6   : > { %v12572_v18 = vld [vmem:[%s16390_s3 + $0x90] sm:$0xff] }
  0xd7   : > { %v694_v60 = vpop.f32.mrf.mxu3 }
  0xd8   : > { %v695_v62 = vadd.f32 %v694_v60, %v676_v58 }
  0xda   : > { %v704_v1 = vadd.f32 %v695_v62, %v657_v61 }
  0xdc   : > { %705 = vadd.xlane.f32.xlu2 %v704_v1  ;;  %v12577_v1 = vld [vmem:[%s16390_s3 + $0xb8] sm:$0xff] }
  0xdd   : > { %1144 = vmatpush.bf16.msrb.mxu2 %v12577_v1 }
  0xdf   : > { %v696_v5 = vpop.f32.mrf.mxu3 }
  0xe0   : > { %v697_v7 = vadd.f32 %v696_v5, %v678_v3  ;;  %v12556_v3 = vld [vmem:[%s16390_s3 + $0x30] sm:$0xff] }
  0xe1   : > { %v12584_v5 = vld [vmem:[%s16390_s3 + $0xf0] sm:$0xff]  ;;  %968 = vmatpush.bf16.msra.mxu0 %v12556_v3  ;;  %1145 = vmatpush.bf16.msrb.mxu2 %v12576_v4 }
  0xe2   : > { %v707_v9 = vadd.f32 %v697_v7, %v659_v6  ;;  %1164 = vmatpush.bf16.msra.mxu3 %v12584_v5 }
  0xe4   : > { %708 = vadd.xlane.f32.xlu2 %v707_v9  ;;  %v12554_v9 = vld [vmem:[%s16390_s3 + $0x20] sm:$0xff] }
  0xe6   : > { %1165 = vmatpush.bf16.msra.mxu3 %v12583_v8 }
  0xe7   : > { %v699_v13 = vpop.f32.mrf.mxu3 }
  0xe8   : > { %v700_v15 = vadd.f32 %v699_v13, %v681_v12  ;;  %v12553_v12 = vld [vmem:[%s16390_s3 + $0x18] sm:$0xff] }
  0xe9   : > { %v12565_v13 = vld [vmem:[%s16390_s3 + $0x78] sm:$0xff] }
  0xea   : > { %v710_v17 = vadd.f32 %v700_v15, %v662_v14  ;;  %1166 = vmatpush.bf16.msra.mxu3 %v12582_v11  ;;  %13062 = vmatpush.bf16.msrb.mxu1 %v12565_v13  ;;  %v12600_v11 = vld [vmem:[%s16390_s3 + $0x150] sm:$0xff] }
  0xec   : > { %711 = vadd.xlane.f32.xlu0 %v710_v17  ;;  %v12564_v17 = vld [vmem:[%s16390_s3 + $0x70] sm:$0xff] }
  0xee   : > { %13063 = vmatpush.bf16.msrb.mxu1 %v12564_v17 }
  0xef   : > { %v701_v22 = vpop.f32.mrf.mxu3 }
  0xf0   : > { %v702_v24 = vadd.f32 %v701_v22, %v683_v21  ;;  %v12563_v21 = vld [vmem:[%s16390_s3 + $0x68] sm:$0xff] }
  0xf1   : > { %v12571_v22 = vld [vmem:[%s16390_s3 + $0x88] sm:$0xff] }
  0xf2   : > { %v713_v25 = vadd.f32 %v702_v24, %v664_v23  ;;  %13064 = vmatpush.bf16.msrb.mxu1 %v12563_v21 }
  0xf4   : > { %714 = vadd.xlane.f32.xlu1 %v713_v25 }
 0x100   : > { %4789 = vperm.xlu0 %13086, %v4775_v26  }
 0x108   : > { %4804 = vperm.xlu0 %13086, %v4778_v27   ;;  %v12550_v27 = vld [vmem:[%s16390_s3] sm:$0xff] }
 0x10d   : > { %4794 = vperm.xlu1 %13087, %v4776_v28   ;;  %v12562_v28 = vld [vmem:[%s16390_s3 + $0x60] sm:$0xff] }
 0x10e   : > { %13065 = vmatpush.bf16.msrb.mxu1 %v12562_v28 }
 0x112   : > { %13066 = vmatpush.bf16.msrb.mxu1 %v12561_v31 }
 0x14f   : > { %v706_v36 = vpop.xlane.xlu2 %705 }
 0x150   : > { %v723_v37 = vmul.f32 %v13351_v35, %v706_v36 }
 0x152   : > { %v13354_v38 = vsub.f32 %v657_v61, %v723_v37  ;;  %v13356_v39 = vsub.f32 %v695_v62, %v723_v37 }
 0x154   : > { %v735_v40 = vmul.f32 %v13354_v38, %v13354_v38  ;;  %v736_v41 = vmul.f32 %v13356_v39, %v13356_v39 }
 0x156   : > { %v743_v42 = vadd.f32 %v736_v41, %v735_v40  ;;  %v12560_v41 = vld [vmem:[%s16390_s3 + $0x50] sm:$0xff] }
 0x157   : > { %v709_v43 = vpop.xlane.xlu2 %708  ;;  %13067 = vmatpush.bf16.msrb.mxu1 %v12560_v41 }
 0x158   : > { %v724_v44 = vmul.f32 %v13351_v35, %v709_v43  ;;  %744 = vadd.xlane.f32.xlu2 %v743_v42  ;;  %v12596_v42 = vld [vmem:[%s16390_s3 + $0x130] sm:$0xff] }
 0x159   : > { %v12604_v43 = vld [vmem:[%s16390_s3 + $0x170] sm:$0xff] }
 0x15a   : > { %v13363_v45 = vsub.f32 %v659_v6, %v724_v44  ;;  %v13365_v46 = vsub.f32 %v697_v7, %v724_v44  ;;  %v12555_v6 = vld [vmem:[%s16390_s3 + $0x28] sm:$0xff] }
 0x15b   : > { %v12575_v7 = vld [vmem:[%s16390_s3 + $0xa8] sm:$0xff]  ;;  %969 = vmatpush.bf16.msra.mxu0 %v12555_v6  ;;  %v12593_v6 = vld [vmem:[%s16390_s3 + $0x118] sm:$0xff] }
 0x15c   : > { %v737_v47 = vmul.f32 %v13363_v45, %v13363_v45  ;;  %v738_v48 = vmul.f32 %v13365_v46, %v13365_v46  ;;  %1146 = vmatpush.bf16.msrb.mxu2 %v12575_v7  ;;  %v12601_v7 = vld [vmem:[%s16390_s3 + $0x158] sm:$0xff] }
 0x15e   : > { %v746_v49 = vadd.f32 %v738_v48, %v737_v47  ;;  %v12559_v48 = vld [vmem:[%s16390_s3 + $0x48] sm:$0xff] }
 0x15f   : > { %v712_v50 = vpop.xlane.xlu0 %711  ;;  %970 = vmatpush.bf16.msra.mxu0 %v12554_v9  ;;  %13068 = vmatpush.bf16.msrb.mxu1 %v12559_v48 }
 0x160   : > { %v725_v51 = vmul.f32 %v13351_v35, %v712_v50  ;;  %747 = vadd.xlane.f32.xlu2 %v746_v49  ;;  %1147 = vmatpush.bf16.msrb.mxu2 %v12574_v10  ;;  %v12595_v49 = vld [vmem:[%s16390_s3 + $0x128] sm:$0xff]  ;;  %v12592_v10 = vld [vmem:[%s16390_s3 + $0x110] sm:$0xff] }
 0x161   : > { %v12603_v50 = vld [vmem:[%s16390_s3 + $0x168] sm:$0xff] }
 0x162   : > { %v13372_v52 = vsub.f32 %v662_v14, %v725_v51  ;;  %v13374_v53 = vsub.f32 %v700_v15, %v725_v51  ;;  %v12573_v14 = vld [vmem:[%s16390_s3 + $0x98] sm:$0xff] }
 0x163   : > { %v12581_v15 = vld [vmem:[%s16390_s3 + $0xd8] sm:$0xff]  ;;  %971 = vmatpush.bf16.msra.mxu0 %v12553_v12 }
 0x164   : > { %v739_v54 = vmul.f32 %v13372_v52, %v13372_v52  ;;  %v740_v55 = vmul.f32 %v13374_v53, %v13374_v53  ;;  %1148 = vmatpush.bf16.msrb.mxu2 %v12573_v14  ;;  %1167 = vmatpush.bf16.msra.mxu3 %v12581_v15 }
 0x166   : > { %v749_v56 = vadd.f32 %v740_v55, %v739_v54 }
 0x167   : > { %v715_v57 = vpop.xlane.xlu1 %714  ;;  %972 = vmatpush.bf16.msra.mxu0 %v12552_v16 }
 0x168   : > { %v726_v58 = vmul.f32 %v13351_v35, %v715_v57  ;;  %750 = vadd.xlane.f32.xlu2 %v749_v56  ;;  %1149 = vmatpush.bf16.msrb.mxu2 %v12572_v18 }
 0x169   : > { %1168 = vmatpush.bf16.msra.mxu3 %v12580_v19  ;;  %v12591_v19 = vld [vmem:[%s16390_s3 + $0x108] sm:$0xff] }
 0x16a   : > { %v13381_v59 = vsub.f32 %v664_v23, %v726_v58  ;;  %v13383_v60 = vsub.f32 %v702_v24, %v726_v58  ;;  %v12579_v24 = vld [vmem:[%s16390_s3 + $0xc8] sm:$0xff] }
 0x16b   : > { %973 = vmatpush.bf16.msra.mxu0 %v12551_v20 }
 0x16c   : > { %v741_v61 = vmul.f32 %v13381_v59, %v13381_v59  ;;  %v742_v62 = vmul.f32 %v13383_v60, %v13383_v60  ;;  %1150 = vmatpush.bf16.msrb.mxu2 %v12571_v22 }
 0x16d   : > { %1169 = vmatpush.bf16.msra.mxu3 %v12579_v24 }
 0x16e   : > { %v752_v63 = vadd.f32 %v742_v62, %v741_v61  ;;  %v12558_v61 = vld [vmem:[%s16390_s3 + $0x40] sm:$0xff] }
 0x16f   : > { %974 = vmatpush.bf16.msra.mxu0 %v12550_v27  ;;  %v12594_v62 = vld [vmem:[%s16390_s3 + $0x120] sm:$0xff]  ;;  %13069 = vmatpush.bf16.msrb.mxu1 %v12558_v61 }
 0x170   : > { %753 = vadd.xlane.f32.xlu2 %v752_v63  ;;  %1151 = vmatpush.bf16.msrb.mxu2 %v12570_v29  ;;  %v12602_v63 = vld [vmem:[%s16390_s3 + $0x160] sm:$0xff] }
 0x171   : > { %1170 = vmatpush.bf16.msra.mxu3 %v12578_v30 }
 0x173   : > { %986 = vmatpush.bf16.msrb.mxu0 %v12565_v13 }
 0x174   : > { %1445 = vmatpush.bf16.msra.mxu2 %v12597_v32 }
 0x175   : > { %1464 = vmatpush.bf16.msrb.mxu3 %v12605_v33  ;;  %v12598_v33 = vld [vmem:[%s16390_s3 + $0x140] sm:$0xff] }
 0x177   : > { %987 = vmatpush.bf16.msrb.mxu0 %v12564_v17 }
 0x178   : > { %1446 = vmatpush.bf16.msra.mxu2 %v12596_v42 }
 0x179   : > { %1465 = vmatpush.bf16.msrb.mxu3 %v12604_v43  ;;  %v12616_v43 = vld [vmem:[%s16390_s3 + $0x1b0] sm:$0xff] }
 0x17b   : > { %988 = vmatpush.bf16.msrb.mxu0 %v12563_v21 }
 0x17c   : > { %1447 = vmatpush.bf16.msra.mxu2 %v12595_v49 }
 0x17d   : > { %1466 = vmatpush.bf16.msrb.mxu3 %v12603_v50  ;;  %v12615_v50 = vld [vmem:[%s16390_s3 + $0x1a8] sm:$0xff] }
 0x17f   : > { %989 = vmatpush.bf16.msrb.mxu0 %v12562_v28 }
 0x180   : > { %1448 = vmatpush.bf16.msra.mxu2 %v12594_v62 }
 0x181   : > { %1467 = vmatpush.bf16.msrb.mxu3 %v12602_v63 }
 0x183   : > { %990 = vmatpush.bf16.msrb.mxu0 %v12561_v31 }
 0x184   : > { %1449 = vmatpush.bf16.msra.mxu2 %v12593_v6  ;;  %v12636_v6 = vld [vmem:[%s16390_s3 + $0x230] sm:$0xff] }
 0x185   : > { %1468 = vmatpush.bf16.msrb.mxu3 %v12601_v7  ;;  %v12635_v7 = vld [vmem:[%s16390_s3 + $0x228] sm:$0xff] }
 0x187   : > { %991 = vmatpush.bf16.msrb.mxu0 %v12560_v41 }
 0x188   : > { %1450 = vmatpush.bf16.msra.mxu2 %v12592_v10  ;;  %v12632_v10 = vld [vmem:[%s16390_s3 + $0x210] sm:$0xff] }
 0x189   : > { %1469 = vmatpush.bf16.msrb.mxu3 %v12600_v11  ;;  %v12631_v11 = vld [vmem:[%s16390_s3 + $0x208] sm:$0xff] }
 0x18b   : > { %992 = vmatpush.bf16.msrb.mxu0 %v12559_v48 }
 0x18c   : > { %1451 = vmatpush.bf16.msra.mxu2 %v12591_v19  ;;  %v12650_v19 = vld [vmem:[%s16390_s3 + $0x280] sm:$0xff] }
 0x18f   : > { %993 = vmatpush.bf16.msrb.mxu0 %v12558_v61 }
 0x1cb   : > { %v745_v23 = vpop.xlane.xlu2 %744 }
 0x1cc   : > { %v755_v25 = vmul.f32 %v745_v23, %v13351_v35 }
 0x1ce   : > { %v759_v26 = vadd.f32 1e-05, %v755_v25 }
 0x1d0   : > { %13091 = vrsqrt.f32 %v759_v26  ;;  %vm769_vm2 = vweird.f32 %v759_v26 }
 0x1d3   : > { %v748_v34 = vpop.xlane.xlu2 %747 }
 0x1d4   : > { %v756_v36 = vmul.f32 %v748_v34, %v13351_v35 }
 0x1d6   : > { %v13092_v37 = vpop.eup %13091  ;;  %v760_v40 = vadd.f32 1e-05, %v756_v36 }
 0x1d7   : > { %v764_v44 = vmul.f32 %v13092_v37, %v759_v26  ;;  %vm770_vm1 = vweird.f32 %v13092_v37 }
 0x1d8   : > { %13093 = vrsqrt.f32 %v760_v40  ;;  %vm771_vm3 = vmor %vm769_vm2, %vm770_vm1  ;;  %vm779_vm5 = vweird.f32 %v760_v40 }
 0x1d9   : > { %v765_v47 = vmul.f32 %v13092_v37, %v764_v44 }
 0x1db   : > { %v766_v51 = vmul.f32 0.5, %v765_v47  ;;  %v751_v54 = vpop.xlane.xlu2 %750 }
 0x1dc   : > { %v757_v55 = vmul.f32 %v751_v54, %v13351_v35 }
 0x1dd   : > { %v767_v56 = vsub.f32 1.5, %v766_v51 }
 0x1de   : > { %v13094_v57 = vpop.eup %13093  ;;  %v13503_v58 = vadd.f32 1e-05, %v757_v55 }
 0x1df   : > { %v768_v0 = vmul.f32 %v13092_v37, %v767_v56  ;;  %v774_v1 = vmul.f32 %v13094_v57, %v760_v40  ;;  %vm780_vm4 = vweird.f32 %v13094_v57  ;;  %v12617_v40 = vld [vmem:[%s16390_s3 + $0x1b8] sm:$0xff] }
 0x1e0   : > { %13095 = vrsqrt.f32 %v13503_v58  ;;  %vm781_vm6 = vmor %vm779_vm5, %vm780_vm4  ;;  %vm789_vm12 = vweird.f32 %v13503_v58  ;;  %vm1213_vm5 = vcmask 261120  }
 0x1e1   : > { %v775_v2 = vmul.f32 %v13094_v57, %v774_v1  ;;  %v772_v3 = vsel %vm771_vm3, %v13092_v37, %v768_v0 }
 0x1e2   : > { %v803_v13 = vmul.f32 %v772_v3, %v13354_v38  ;;  %v804_v14 = vmul.f32 %v772_v3, %v13356_v39  ;;  %v12599_v38 = vld [vmem:[%s16390_s3 + $0x148] sm:$0xff] }
 0x1e3   : > { %v776_v4 = vmul.f32 0.5, %v775_v2  ;;  %v754_v5 = vpop.xlane.xlu2 %753  ;;  %1470 = vmatpush.bf16.msrb.mxu3 %v12599_v38  ;;  %v12612_v2 = vld [vmem:[%s16390_s3 + $0x190] sm:$0xff]  ;;  %v12611_v3 = vld [vmem:[%s16390_s3 + $0x188] sm:$0xff]  ;;  %v12677_v38 = vld [vmem:[%s16390_s3 + $0x338] sm:$0xff] }
 0x1e4   : > { %v758_v9 = vmul.f32 %v754_v5, %v13351_v35  ;;  %v819_v39 = vmul.f32 0.2, %v803_v13  ;;  %v820_v20 = vmul.f32 0.2, %v804_v14  ;;  %vm811_vm7 = vcmp.ge.f32.partialorder %v803_v13, 0.0  ;;  %v12637_v5 = vld [vmem:[%s16390_s3 + $0x238] sm:$0xff] }
 0x1e5   : > { %v777_v8 = vsub.f32 1.5, %v776_v4  ;;  %vm812_vm8 = vcmp.ge.f32.partialorder %v804_v14, 0.0  ;;  %v12610_v4 = vld [vmem:[%s16390_s3 + $0x180] sm:$0xff] }
 0x1e6   : > { %v13096_v12 = vpop.eup %13095  ;;  %v762_v16 = vadd.f32 1e-05, %v758_v9  ;;  %v827_v27 = vsel %vm811_vm7, %v803_v13, %v819_v39  ;;  %v828_v28 = vsel %vm812_vm8, %v804_v14, %v820_v20  ;;  %v12633_v9 = vld [vmem:[%s16390_s3 + $0x218] sm:$0xff]  ;;  %v12656_v14 = vld [vmem:[%s16390_s3 + $0x2b0] sm:$0xff]  ;;  %v12675_v20 = vld [vmem:[%s16390_s3 + $0x328] sm:$0xff] }
 0x1e7   : > { %v778_v15 = vmul.f32 %v13094_v57, %v777_v8  ;;  %v784_v35 = vmul.f32 %v13096_v12, %v13503_v58  ;;  %vm790_vm11 = vweird.f32 %v13096_v12  ;;  %1471 = vmatpush.bf16.msrb.mxu3 %v12598_v33  ;;  %v12634_v8 = vld [vmem:[%s16390_s3 + $0x220] sm:$0xff]  ;;  %v12657_v13 = vld [vmem:[%s16390_s3 + $0x2b8] sm:$0xff]  ;;  %v12676_v39 = vld [vmem:[%s16390_s3 + $0x330] sm:$0xff] }
 0x1e8   : > { %13097 = vrsqrt.f32 %v762_v16  ;;  %vm791_vm13 = vmor %vm789_vm12, %vm790_vm11  ;;  %vm799_vm15 = vweird.f32 %v762_v16 }
 0x1e9   : > { %v782_v17 = vsel %vm781_vm6, %v13094_v57, %v778_v15  ;;  %v785_v18 = vmul.f32 %v13096_v12, %v784_v35  ;;  %v12655_v15 = vld [vmem:[%s16390_s3 + $0x2a8] sm:$0xff]  ;;  %v12654_v35 = vld [vmem:[%s16390_s3 + $0x2a0] sm:$0xff]  ;;  %vm4830_vm6 = vcmask 523264  }
 0x1ea   : > { %v805_v21 = vmul.f32 %v782_v17, %v13363_v45  ;;  %v806_v22 = vmul.f32 %v782_v17, %v13365_v46  ;;  %v12590_v45 = vld [vmem:[%s16390_s3 + $0x100] sm:$0xff]  ;;  %v12652_v17 = vld [vmem:[%s16390_s3 + $0x290] sm:$0xff] }
 0x1eb   : > { %v786_v23 = vmul.f32 0.5, %v785_v18  ;;  %1452 = vmatpush.bf16.msra.mxu2 %v12590_v45  ;;  %v12651_v18 = vld [vmem:[%s16390_s3 + $0x288] sm:$0xff]  ;;  %v12696_v45 = vld [vmem:[%s16390_s3 + $0x3b0] sm:$0xff] }
 0x1ec   : > { %vm813_vm9 = vcmp.ge.f32.partialorder %v805_v21, 0.0  ;;  %vm814_vm10 = vcmp.ge.f32.partialorder %v806_v22, 0.0  ;;  %v821_v24 = vmul.f32 0.2, %v805_v21  ;;  %v822_v25 = vmul.f32 0.2, %v806_v22 }
 0x1ed   : > { %v787_v26 = vsub.f32 1.5, %v786_v23  ;;  %v12672_v23 = vld [vmem:[%s16390_s3 + $0x310] sm:$0xff] }
 0x1ee   : > { %v829_v29 = vsel %vm813_vm9, %v805_v21, %v821_v24  ;;  %v830_v30 = vsel %vm814_vm10, %v806_v22, %v822_v25  ;;  %v13098_v46 = vpop.eup %13097  ;;  %v12674_v21 = vld [vmem:[%s16390_s3 + $0x320] sm:$0xff]  ;;  %v12673_v22 = vld [vmem:[%s16390_s3 + $0x318] sm:$0xff]  ;;  %v12671_v24 = vld [vmem:[%s16390_s3 + $0x308] sm:$0xff] }
 0x1ef   : > { %v13542_v31 = vpack.c.bf16 %v829_v29, %v827_v27  ;;  %v13544_v32 = vpack.c.bf16 %v830_v30, %v828_v28  ;;  %v794_v34 = vmul.f32 %v13098_v46, %v762_v16  ;;  %v788_v36 = vmul.f32 %v13096_v12, %v787_v26  ;;  %v12653_v16 = vld [vmem:[%s16390_s3 + $0x298] sm:$0xff]  ;;  %v12670_v26 = vld [vmem:[%s16390_s3 + $0x300] sm:$0xff] }
 0x1f0   : > { %vm800_vm14 = vweird.f32 %v13098_v46  ;;  %v12697_v27 = vld [vmem:[%s16390_s3 + $0x3b8] sm:$0xff] }
 0x1f1   : > { %975 = vmatmul.bf16.vlgmr.msra.gmra.mxu0 %v13542_v31  ;;  %1152 = vmatmul.bf16.vlgmr.msrb.gmra.mxu2 %v13542_v31  ;;  %v795_v37 = vmul.f32 %v13098_v46, %v794_v34  ;;  %v792_v41 = vsel %vm791_vm13, %v13096_v12, %v788_v36  ;;  %vm801_vm0 = vmor %vm799_vm15, %vm800_vm14  ;;  %v12630_v12 = vld [vmem:[%s16390_s3 + $0x200] sm:$0xff] }
 0x1f2   : > { %1171 = vmatmul.bf16.vlgmr.msra.gmra.mxu3 %v13544_v32  ;;  %v807_v47 = vmul.f32 %v792_v41, %v13372_v52  ;;  %v808_v48 = vmul.f32 %v792_v41, %v13374_v53  ;;  %v12614_v52 = vld [vmem:[%s16390_s3 + $0x1a0] sm:$0xff]  ;;  %v12693_v41 = vld [vmem:[%s16390_s3 + $0x398] sm:$0xff] }
 0x1f3   : > { %v796_v42 = vmul.f32 0.5, %v795_v37  ;;  %1692 = vmatpush.bf16.msra.mxu3 %v12617_v40  ;;  %v12694_v36 = vld [vmem:[%s16390_s3 + $0x3a0] sm:$0xff] }
 0x1f4   : > { %v823_v54 = vmul.f32 0.2, %v807_v47  ;;  %v824_v55 = vmul.f32 0.2, %v808_v48  ;;  %vm815_vm1 = vcmp.ge.f32.partialorder %v807_v47, 0.0  ;;  %vm816_vm2 = vcmp.ge.f32.partialorder %v808_v48, 0.0 }
 0x1f5   : > { %v797_v44 = vsub.f32 1.5, %v796_v42 }
 0x1f6   : > { %v831_v61 = vsel %vm815_vm1, %v807_v47, %v823_v54  ;;  %v832_v62 = vsel %vm816_vm2, %v808_v48, %v824_v55  ;;  %v12691_v54 = vld [vmem:[%s16390_s3 + $0x388] sm:$0xff] }
 0x1f7   : > { %v798_v49 = vmul.f32 %v13098_v46, %v797_v44  ;;  %1693 = vmatpush.bf16.msra.mxu3 %v12616_v43  ;;  %v12692_v44 = vld [vmem:[%s16390_s3 + $0x390] sm:$0xff] }
 0x1f9   : > { %v802_v51 = vsel %vm801_vm0, %v13098_v46, %v798_v49  ;;  %v12695_v46 = vld [vmem:[%s16390_s3 + $0x3a8] sm:$0xff] }
 0x1fa   : > { %v809_v56 = vmul.f32 %v802_v51, %v13381_v59  ;;  %v810_v57 = vmul.f32 %v802_v51, %v13383_v60  ;;  %v12613_v60 = vld [vmem:[%s16390_s3 + $0x198] sm:$0xff] }
 0x1fb   : > { %1694 = vmatpush.bf16.msra.mxu3 %v12615_v50 }
 0x1fc   : > { %vm817_vm3 = vcmp.ge.f32.partialorder %v809_v56, 0.0  ;;  %vm818_vm4 = vcmp.ge.f32.partialorder %v810_v57, 0.0  ;;  %v825_v53 = vmul.f32 0.2, %v809_v56  ;;  %v826_v58 = vmul.f32 0.2, %v810_v57 }
 0x1fe   : > { %v833_v63 = vsel %vm817_vm3, %v809_v56, %v825_v53  ;;  %v834_v0 = vsel %vm818_vm4, %v810_v57, %v826_v58  ;;  %v12690_v57 = vld [vmem:[%s16390_s3 + $0x380] sm:$0xff] }
 0x1ff   : > { %v13569_v1 = vpack.c.bf16 %v833_v63, %v831_v61  ;;  %v13571_v59 = vpack.c.bf16 %v834_v0, %v832_v62  ;;  %1695 = vmatpush.bf16.msra.mxu3 %v12614_v52  ;;  %v12717_v63 = vld [vmem:[%s16390_s3 + $0x438] sm:$0xff] }
 0x201   : > { %980 = vmatmul.bf16.gmra.mxu0 %v13569_v1  ;;  %999 = vmatmul.bf16.vlgmr.msrb.gmra.mxu1 %v13571_v59 }
 0x202   : > { %1157 = vmatmul.bf16.gmra.mxu2 %v13569_v1  ;;  %1176 = vmatmul.bf16.gmra.mxu3 %v13571_v59 }
 0x203   : > { %1696 = vmatpush.bf16.msra.mxu3 %v12613_v60 }
 0x207   : > { %1697 = vmatpush.bf16.msra.mxu3 %v12612_v2 }
 0x20b   : > { %1698 = vmatpush.bf16.msra.mxu3 %v12611_v3 }
 0x20f   : > { %1699 = vmatpush.bf16.msra.mxu3 %v12610_v4  ;;  %v12586_v4 = vld [vmem:[%s16391_s4 + $0x20] sm:$0xff] }
 0x211   : > { %994 = vmatmul.bf16.vlgmr.msrb.gmra.mxu0 %v13544_v32 }
 0x212   : > { %1453 = vmatmul.bf16.vlgmr.msra.gmra.mxu2 %v13542_v31  ;;  %1472 = vmatmul.bf16.vlgmr.msrb.gmra.mxu3 %v13544_v32 }
 0x213   : > { %1939 = vmatpush.bf16.msrb.mxu3 %v12637_v5  ;;  %v12716_v5 = vld [vmem:[%s16390_s3 + $0x430] sm:$0xff] }
 0x217   : > { %1940 = vmatpush.bf16.msrb.mxu3 %v12636_v6 }
 0x21b   : > { %1941 = vmatpush.bf16.msrb.mxu3 %v12635_v7 }
 0x21f   : > { %1942 = vmatpush.bf16.msrb.mxu3 %v12634_v8 }
 0x222   : > { %1458 = vmatmul.bf16.gmra.mxu2 %v13569_v1  ;;  %1477 = vmatmul.bf16.gmra.mxu3 %v13571_v59 }
 0x223   : > { %1943 = vmatpush.bf16.msrb.mxu3 %v12633_v9  ;;  %v12625_v9 = vld [vmem:[%s16390_s3 + $0x1f8] sm:$0xff] }
 0x227   : > { %1944 = vmatpush.bf16.msrb.mxu3 %v12632_v10 }
 0x22b   : > { %1945 = vmatpush.bf16.msrb.mxu3 %v12631_v11  ;;  %v12715_v11 = vld [vmem:[%s16390_s3 + $0x428] sm:$0xff] }
 0x22f   : > { %1946 = vmatpush.bf16.msrb.mxu3 %v12630_v12  ;;  %v12566_v12 = vld [vmem:[%s16391_s4] sm:$0xff] }
 0x232   : > { %1700 = vmatmul.bf16.vlgmr.msra.gmra.mxu3 %v13542_v31 }
 0x233   : > { %2186 = vmatpush.bf16.msra.mxu3 %v12657_v13  ;;  %v12624_v13 = vld [vmem:[%s16390_s3 + $0x1f0] sm:$0xff] }
 0x237   : > { %2187 = vmatpush.bf16.msra.mxu3 %v12656_v14 }
 0x23b   : > { %2188 = vmatpush.bf16.msra.mxu3 %v12655_v15 }
 0x23f   : > { %2189 = vmatpush.bf16.msra.mxu3 %v12654_v35  ;;  %v12714_v35 = vld [vmem:[%s16390_s3 + $0x420] sm:$0xff] }
 0x242   : > { %1705 = vmatmul.bf16.gmra.mxu3 %v13569_v1 }
 0x243   : > { %2190 = vmatpush.bf16.msra.mxu3 %v12653_v16  ;;  %v12623_v16 = vld [vmem:[%s16390_s3 + $0x1e8] sm:$0xff] }
 0x247   : > { %2191 = vmatpush.bf16.msra.mxu3 %v12652_v17  ;;  %v12713_v17 = vld [vmem:[%s16390_s3 + $0x418] sm:$0xff] }
 0x24b   : > { %2192 = vmatpush.bf16.msra.mxu3 %v12651_v18  ;;  %v12622_v18 = vld [vmem:[%s16390_s3 + $0x1e0] sm:$0xff] }
 0x24f   : > { %2193 = vmatpush.bf16.msra.mxu3 %v12650_v19 }
 0x252   : > { %1947 = vmatmul.bf16.vlgmr.msrb.gmra.mxu3 %v13542_v31 }
 0x253   : > { %2433 = vmatpush.bf16.msrb.mxu3 %v12677_v38 }
 0x257   : > { %2434 = vmatpush.bf16.msrb.mxu3 %v12676_v39  ;;  %v12587_v39 = vld [vmem:[%s16391_s4 + $0x28] sm:$0xff] }
 0x25b   : > { %2435 = vmatpush.bf16.msrb.mxu3 %v12675_v20  ;;  %v12712_v20 = vld [vmem:[%s16390_s3 + $0x410] sm:$0xff] }
 0x25f   : > { %2436 = vmatpush.bf16.msrb.mxu3 %v12674_v21  ;;  %v12621_v21 = vld [vmem:[%s16390_s3 + $0x1d8] sm:$0xff] }
 0x262   : > { %1952 = vmatmul.bf16.gmra.mxu3 %v13569_v1 }
 0x263   : > { %2437 = vmatpush.bf16.msrb.mxu3 %v12673_v22  ;;  %v12711_v22 = vld [vmem:[%s16390_s3 + $0x408] sm:$0xff] }
 0x267   : > { %2438 = vmatpush.bf16.msrb.mxu3 %v12672_v23  ;;  %v12567_v23 = vld [vmem:[%s16391_s4 + $0x8] sm:$0xff] }
 0x26b   : > { %2439 = vmatpush.bf16.msrb.mxu3 %v12671_v24  ;;  %v12620_v24 = vld [vmem:[%s16390_s3 + $0x1d0] sm:$0xff] }
 0x26e   : > { %v976_v25 = vpop.f32.mrf.mxu0 }
 0x26f   : > { %2440 = vmatpush.bf16.msrb.mxu3 %v12670_v26 }
 0x272   : > { %2194 = vmatmul.bf16.vlgmr.msra.gmra.mxu3 %v13542_v31 }
 0x273   : > { %2680 = vmatpush.bf16.msra.mxu3 %v12697_v27  ;;  %v12710_v27 = vld [vmem:[%s16390_s3 + $0x400] sm:$0xff] }
 0x274   : > { %v1153_v28 = vpop.f32.mrf.mxu2 }
 0x275   : > { %v1172_v29 = vpop.f32.mrf.mxu3 }
 0x276   : > { %v978_v30 = vpop.f32.mrf.mxu0  ;;  %v1173_v0 = vadd.f32 %v1172_v29, %v1153_v28 }
 0x277   : > { %2681 = vmatpush.bf16.msra.mxu3 %v12696_v45 }
 0x27b   : > { %2682 = vmatpush.bf16.msra.mxu3 %v12695_v46 }
 0x27c   : > { %v1155_v33 = vpop.f32.mrf.mxu2 }
 0x27d   : > { %v1174_v34 = vpop.f32.mrf.mxu3 }
 0x27e   : > { %v981_v37 = vpop.f32.mrf.mxu0  ;;  %v1000_v40 = vpop.f32.mrf.mxu1  ;;  %v1175_v61 = vadd.f32 %v1174_v34, %v1155_v33  ;;  %v12737_v33 = vld [vmem:[%s16390_s3 + $0x4b8] sm:$0xff] }
 0x27f   : > { %2683 = vmatpush.bf16.msra.mxu3 %v12694_v36  ;;  %v1001_v49 = vadd.f32 %v1000_v40, %v981_v37  ;;  %v12618_v37 = vld [vmem:[%s16390_s3 + $0x1c0] sm:$0xff] }
 0x280   : > { %v1191_v60 = vpack.c.bf16 %v1175_v61, %v1173_v0  ;;  %v12641_v61 = vld [vmem:[%s16390_s3 + $0x258] sm:$0xff]  ;;  %v12640_v0 = vld [vmem:[%s16390_s3 + $0x250] sm:$0xff] }
 0x282   : > { %2199 = vmatmul.bf16.gmra.mxu3 %v13569_v1 }
 0x283   : > { %2684 = vmatpush.bf16.msra.mxu3 %v12693_v41  ;;  %v12588_v41 = vld [vmem:[%s16391_s4 + $0x30] sm:$0xff] }
 0x285   : > { %v1158_v42 = vpop.f32.mrf.mxu2  ;;  %v1177_v43 = vpop.f32.mrf.mxu3 }
 0x286   : > { %v983_v47 = vpop.f32.mrf.mxu0  ;;  %v1002_v48 = vpop.f32.mrf.mxu1  ;;  %v1178_v52 = vadd.f32 %v1177_v43, %v1158_v42  ;;  %v12606_v42 = vld [vmem:[%s16391_s4 + $0x40] sm:$0xff]  ;;  %v12736_v43 = vld [vmem:[%s16390_s3 + $0x4b0] sm:$0xff] }
 0x287   : > { %v1003_v50 = vadd.f32 %v1002_v48, %v983_v47  ;;  %2685 = vmatpush.bf16.msra.mxu3 %v12692_v44  ;;  %v12645_v44 = vld [vmem:[%s16390_s3 + $0x278] sm:$0xff]  ;;  %v12735_v47 = vld [vmem:[%s16390_s3 + $0x4a8] sm:$0xff]  ;;  %v12568_v48 = vld [vmem:[%s16391_s4 + $0x10] sm:$0xff] }
 0x289   : > { %v1014_v51 = vpack.c.bf16 %v1003_v50, %v1001_v49  ;;  %v12644_v49 = vld [vmem:[%s16390_s3 + $0x270] sm:$0xff]  ;;  %v12734_v50 = vld [vmem:[%s16390_s3 + $0x4a0] sm:$0xff] }
 0x28b   : > { %1293 = vmatpush.bf16.msra.mxu1 %v1014_v51  ;;  %2686 = vmatpush.bf16.msra.mxu3 %v12691_v54  ;;  %v12643_v54 = vld [vmem:[%s16390_s3 + $0x268] sm:$0xff] }
 0x28d   : > { %v1160_v55 = vpop.f32.mrf.mxu2  ;;  %v1179_v56 = vpop.f32.mrf.mxu3 }
 0x28e   : > { %v1180_v53 = vadd.f32 %v1179_v56, %v1160_v55  ;;  %v995_v58 = vpop.f32.mrf.mxu0  ;;  %v12733_v55 = vld [vmem:[%s16390_s3 + $0x498] sm:$0xff]  ;;  %v12642_v56 = vld [vmem:[%s16390_s3 + $0x260] sm:$0xff] }
 0x28f   : > { %2687 = vmatpush.bf16.msra.mxu3 %v12690_v57  ;;  %v996_v7 = vadd.f32 %v995_v58, %v976_v25  ;;  %v12589_v57 = vld [vmem:[%s16391_s4 + $0x38] sm:$0xff] }
 0x290   : > { %v1192_v62 = vpack.c.bf16 %v1180_v53, %v1178_v52  ;;  %v12607_v52 = vld [vmem:[%s16391_s4 + $0x48] sm:$0xff]  ;;  %v12732_v53 = vld [vmem:[%s16390_s3 + $0x490] sm:$0xff] }
 0x292   : > { %1232 = vmatpush.bf16.msra.mxu0 %v1192_v62  ;;  %2441 = vmatmul.bf16.vlgmr.msrb.gmra.mxu3 %v13542_v31  ;;  %v12731_v62 = vld [vmem:[%s16390_s3 + $0x488] sm:$0xff] }
 0x293   : > { %2927 = vmatpush.bf16.msrb.mxu3 %v12717_v63  ;;  %v12569_v63 = vld [vmem:[%s16391_s4 + $0x18] sm:$0xff] }
 0x295   : > { %v1454_v2 = vpop.f32.mrf.mxu2  ;;  %v1473_v3 = vpop.f32.mrf.mxu3 }
 0x296   : > { %1233 = vmatpush.bf16.msra.mxu0 %v1191_v60  ;;  %v997_v6 = vpop.f32.mrf.mxu0  ;;  %v1474_v34 = vadd.f32 %v1473_v3, %v1454_v2  ;;  %v12730_v60 = vld [vmem:[%s16390_s3 + $0x480] sm:$0xff]  ;;  %v12639_v2 = vld [vmem:[%s16390_s3 + $0x248] sm:$0xff]  ;;  %v12757_v3 = vld [vmem:[%s16390_s3 + $0x538] sm:$0xff] }
 0x297   : > { %v998_v8 = vadd.f32 %v997_v6, %v978_v30  ;;  %2928 = vmatpush.bf16.msrb.mxu3 %v12716_v5  ;;  %v12619_v30 = vld [vmem:[%s16390_s3 + $0x1c8] sm:$0xff]  ;;  %v12638_v5 = vld [vmem:[%s16390_s3 + $0x240] sm:$0xff]  ;;  %v12608_v6 = vld [vmem:[%s16391_s4 + $0x50] sm:$0xff] }
 0x299   : > { %v1013_v10 = vpack.c.bf16 %v998_v8, %v996_v7  ;;  %9431 = vmatmul.msk.bf16.vlgmr.msra.gmra.mxu0 %vm1213_vm5, %v12586_v4  ;;  %v12756_v7 = vld [vmem:[%s16390_s3 + $0x530] sm:$0xff]  ;;  %v12665_v8 = vld [vmem:[%s16390_s3 + $0x2f8] sm:$0xff] }
 0x29a   : > { %1711 = vmatpush.bf16.msrb.mxu0 %v12625_v9  ;;  %v12755_v9 = vld [vmem:[%s16390_s3 + $0x528] sm:$0xff] }
 0x29b   : > { %1294 = vmatpush.bf16.msra.mxu1 %v1013_v10  ;;  %2929 = vmatpush.bf16.msrb.mxu3 %v12715_v11  ;;  %v12664_v11 = vld [vmem:[%s16390_s3 + $0x2f0] sm:$0xff] }
 0x29d   : > { %v1456_v14 = vpop.f32.mrf.mxu2  ;;  %v1475_v15 = vpop.f32.mrf.mxu3 }
 0x29e   : > { %9451 = vmatmul.msk.bf16.vlgmr.msra.gmra.mxu1 %vm1213_vm5, %v12566_v12  ;;  %1712 = vmatpush.bf16.msrb.mxu0 %v12624_v13  ;;  %v1476_v45 = vadd.f32 %v1475_v15, %v1456_v14  ;;  %v12754_v12 = vld [vmem:[%s16390_s3 + $0x520] sm:$0xff]  ;;  %v12663_v13 = vld [vmem:[%s16390_s3 + $0x2e8] sm:$0xff]  ;;  %v12753_v14 = vld [vmem:[%s16390_s3 + $0x518] sm:$0xff] }
 0x29f   : > { %2930 = vmatpush.bf16.msrb.mxu3 %v12714_v35  ;;  %v12662_v15 = vld [vmem:[%s16390_s3 + $0x2e0] sm:$0xff]  ;;  %v12609_v35 = vld [vmem:[%s16391_s4 + $0x58] sm:$0xff] }
 0x2a0   : > { %v1492_v36 = vpack.c.bf16 %v1476_v45, %v1474_v34  ;;  %v12773_v45 = vld [vmem:[%s16390_s3 + $0x598] sm:$0xff]  ;;  %v12772_v34 = vld [vmem:[%s16390_s3 + $0x590] sm:$0xff] }
 0x2a2   : > { %2446 = vmatmul.bf16.gmra.mxu3 %v13569_v1  ;;  %1713 = vmatpush.bf16.msrb.mxu0 %v12623_v16  ;;  %v12752_v16 = vld [vmem:[%s16390_s3 + $0x510] sm:$0xff] }
 0x2a3   : > { %2931 = vmatpush.bf16.msrb.mxu3 %v12713_v17 }
 0x2a5   : > { %v1459_v19 = vpop.f32.mrf.mxu2  ;;  %v1478_v38 = vpop.f32.mrf.mxu3 }
 0x2a6   : > { %1714 = vmatpush.bf16.msrb.mxu0 %v12622_v18  ;;  %v1479_v28 = vadd.f32 %v1478_v38, %v1459_v19  ;;  %v12661_v18 = vld [vmem:[%s16390_s3 + $0x2d8] sm:$0xff]  ;;  %v12751_v19 = vld [vmem:[%s16390_s3 + $0x508] sm:$0xff]  ;;  %v12660_v38 = vld [vmem:[%s16390_s3 + $0x2d0] sm:$0xff] }
 0x2a7   : > { %2932 = vmatpush.bf16.msrb.mxu3 %v12712_v20  ;;  %v12659_v20 = vld [vmem:[%s16390_s3 + $0x2c8] sm:$0xff] }
 0x2a9   : > { %9432 = vmatmul.msk.bf16.gmra.mxu0 %vm1213_vm5, %v12587_v39  ;;  %v12750_v39 = vld [vmem:[%s16390_s3 + $0x500] sm:$0xff] }
 0x2aa   : > { %1715 = vmatpush.bf16.msrb.mxu0 %v12621_v21 }
 0x2ab   : > { %2933 = vmatpush.bf16.msrb.mxu3 %v12711_v22  ;;  %v12777_v22 = vld [vmem:[%s16390_s3 + $0x5b8] sm:$0xff] }
 0x2ad   : > { %v1461_v25 = vpop.f32.mrf.mxu2  ;;  %v1480_v26 = vpop.f32.mrf.mxu3 }
 0x2ae   : > { %v1481_v29 = vadd.f32 %v1480_v26, %v1461_v25  ;;  %9452 = vmatmul.msk.bf16.gmra.mxu1 %vm1213_vm5, %v12567_v23  ;;  %1716 = vmatpush.bf16.msrb.mxu0 %v12620_v24  ;;  %v12658_v23 = vld [vmem:[%s16390_s3 + $0x2c0] sm:$0xff]  ;;  %v12776_v24 = vld [vmem:[%s16390_s3 + $0x5b0] sm:$0xff]  ;;  %v12685_v25 = vld [vmem:[%s16390_s3 + $0x378] sm:$0xff] }
 0x2af   : > { %2934 = vmatpush.bf16.msrb.mxu3 %v12710_v27  ;;  %v12775_v26 = vld [vmem:[%s16390_s3 + $0x5a8] sm:$0xff] }
 0x2b0   : > { %v1493_v46 = vpack.c.bf16 %v1481_v29, %v1479_v28  ;;  %v12684_v28 = vld [vmem:[%s16390_s3 + $0x370] sm:$0xff]  ;;  %v12774_v29 = vld [vmem:[%s16390_s3 + $0x5a0] sm:$0xff] }
 0x2b2   : > { %1532 = vmatpush.bf16.msrb.mxu2 %v1493_v46  ;;  %2688 = vmatmul.bf16.vlgmr.msra.gmra.mxu3 %v13542_v31 }
 0x2b3   : > { %1717 = vmatpush.bf16.msrb.mxu0 %v12619_v30  ;;  %3174 = vmatpush.bf16.msra.mxu3 %v12737_v33  ;;  %v12683_v30 = vld [vmem:[%s16390_s3 + $0x368] sm:$0xff]  ;;  %v12682_v33 = vld [vmem:[%s16390_s3 + $0x360] sm:$0xff] }
 0x2b5   : > { %v13766_v40 = vpop.f32.mrf.mxu3 }
 0x2b6   : > { %1533 = vmatpush.bf16.msrb.mxu2 %v1492_v36  ;;  %v12681_v36 = vld [vmem:[%s16390_s3 + $0x358] sm:$0xff] }
 0x2b7   : > { %1718 = vmatpush.bf16.msrb.mxu0 %v12618_v37  ;;  %3175 = vmatpush.bf16.msra.mxu3 %v12736_v43  ;;  %v12771_v37 = vld [vmem:[%s16390_s3 + $0x588] sm:$0xff] }
 0x2b9   : > { %9433 = vmatmul.msk.bf16.gmra.mxu0 %vm1213_vm5, %v12588_v41  ;;  %9575 = vmatmul.msk.bf16.vlgmr.msrb.gmra.mxu2 %vm1213_vm5, %v12606_v42  ;;  %v12680_v41 = vld [vmem:[%s16390_s3 + $0x350] sm:$0xff]  ;;  %v12770_v42 = vld [vmem:[%s16390_s3 + $0x580] sm:$0xff] }
 0x2bb   : > { %1958 = vmatpush.bf16.msra.mxu0 %v12645_v44  ;;  %3176 = vmatpush.bf16.msra.mxu3 %v12735_v47  ;;  %v12679_v44 = vld [vmem:[%s16390_s3 + $0x348] sm:$0xff]  ;;  %v12797_v47 = vld [vmem:[%s16390_s3 + $0x638] sm:$0xff] }
 0x2bd   : > { %v13794_v51 = vpop.f32.mrf.mxu3 }
 0x2be   : > { %9453 = vmatmul.msk.bf16.gmra.mxu1 %vm1213_vm5, %v12568_v48  ;;  %v12678_v48 = vld [vmem:[%s16390_s3 + $0x340] sm:$0xff] }
 0x2bf   : > { %1959 = vmatpush.bf16.msra.mxu0 %v12644_v49  ;;  %3177 = vmatpush.bf16.msra.mxu3 %v12734_v50  ;;  %v12796_v49 = vld [vmem:[%s16390_s3 + $0x630] sm:$0xff] }
 0x2c2   : > { %2693 = vmatmul.bf16.gmra.mxu3 %v13569_v1 }
 0x2c3   : > { %1960 = vmatpush.bf16.msra.mxu0 %v12643_v54  ;;  %3178 = vmatpush.bf16.msra.mxu3 %v12733_v55  ;;  %v12705_v55 = vld [vmem:[%s16390_s3 + $0x3f8] sm:$0xff] }
 0x2c5   : > { %v13816_v58 = vpop.f32.mrf.mxu3 }
 0x2c7   : > { %1961 = vmatpush.bf16.msra.mxu0 %v12642_v56  ;;  %3179 = vmatpush.bf16.msra.mxu3 %v12732_v53  ;;  %v12795_v56 = vld [vmem:[%s16390_s3 + $0x628] sm:$0xff]  ;;  %v12704_v53 = vld [vmem:[%s16390_s3 + $0x3f0] sm:$0xff] }
 0x2c9   : > { %9434 = vmatmul.msk.bf16.gmra.mxu0 %vm1213_vm5, %v12589_v57  ;;  %9576 = vmatmul.msk.bf16.gmra.mxu2 %vm1213_vm5, %v12607_v52 }
 0x2cb   : > { %1962 = vmatpush.bf16.msra.mxu0 %v12641_v61  ;;  %3180 = vmatpush.bf16.msra.mxu3 %v12731_v62  ;;  %v12794_v61 = vld [vmem:[%s16390_s3 + $0x620] sm:$0xff] }
 0x2cd   : > { %v13842_v4 = vpop.f32.mrf.mxu3 }
 0x2ce   : > { %9454 = vmatmul.msk.bf16.gmra.mxu1 %vm1213_vm5, %v12569_v63  ;;  %v12703_v63 = vld [vmem:[%s16390_s3 + $0x3e8] sm:$0xff] }
 0x2cf   : > { %1963 = vmatpush.bf16.msra.mxu0 %v12640_v0  ;;  %3181 = vmatpush.bf16.msra.mxu3 %v12730_v60  ;;  %v12793_v0 = vld [vmem:[%s16390_s3 + $0x618] sm:$0xff] }
 0x2d2   : > { %2935 = vmatmul.bf16.vlgmr.msrb.gmra.mxu3 %v13542_v31 }
 0x2d3   : > { %1964 = vmatpush.bf16.msra.mxu0 %v12639_v2  ;;  %3421 = vmatpush.bf16.msrb.mxu3 %v12757_v3  ;;  %v12702_v3 = vld [vmem:[%s16390_s3 + $0x3e0] sm:$0xff] }
 0x2d5   : > { %v13862_v10 = vpop.f32.mrf.mxu3 }
 0x2d7   : > { %1965 = vmatpush.bf16.msra.mxu0 %v12638_v5  ;;  %3422 = vmatpush.bf16.msrb.mxu3 %v12756_v7  ;;  %v12792_v5 = vld [vmem:[%s16390_s3 + $0x610] sm:$0xff]  ;;  %v12701_v7 = vld [vmem:[%s16390_s3 + $0x3d8] sm:$0xff] }
 0x2d9   : > { %9577 = vmatmul.msk.bf16.gmra.mxu2 %vm1213_vm5, %v12608_v6  ;;  %1719 = vmatmul.bf16.vlgmr.msrb.gmra.mxu0 %v13544_v32 }
 0x2db   : > { %2205 = vmatpush.bf16.msrb.mxu0 %v12665_v8  ;;  %3423 = vmatpush.bf16.msrb.mxu3 %v12755_v9  ;;  %v12791_v8 = vld [vmem:[%s16390_s3 + $0x608] sm:$0xff] }
 0x2dd   : > { %v13886_v17 = vpop.f32.mrf.mxu3 }
 0x2df   : > { %2206 = vmatpush.bf16.msrb.mxu0 %v12664_v11  ;;  %3424 = vmatpush.bf16.msrb.mxu3 %v12754_v12 }
 0x2e2   : > { %2940 = vmatmul.bf16.gmra.mxu3 %v13569_v1 }
 0x2e3   : > { %2207 = vmatpush.bf16.msrb.mxu0 %v12663_v13  ;;  %3425 = vmatpush.bf16.msrb.mxu3 %v12753_v14  ;;  %v12700_v13 = vld [vmem:[%s16390_s3 + $0x3d0] sm:$0xff]  ;;  %v12790_v14 = vld [vmem:[%s16390_s3 + $0x600] sm:$0xff] }
 0x2e5   : > { %v13905_v21 = vpop.f32.mrf.mxu3 }
 0x2e7   : > { %2208 = vmatpush.bf16.msrb.mxu0 %v12662_v15  ;;  %3426 = vmatpush.bf16.msrb.mxu3 %v12752_v16  ;;  %v12817_v16 = vld [vmem:[%s16390_s3 + $0x6b8] sm:$0xff] }
 0x2e9   : > { %9578 = vmatmul.msk.bf16.gmra.mxu2 %vm1213_vm5, %v12609_v35  ;;  %1724 = vmatmul.bf16.gmra.mxu0 %v13571_v59  ;;  %v12699_v35 = vld [vmem:[%s16390_s3 + $0x3c8] sm:$0xff] }
 0x2eb   : > { %2209 = vmatpush.bf16.msrb.mxu0 %v12661_v18  ;;  %3427 = vmatpush.bf16.msrb.mxu3 %v12751_v19  ;;  %v12698_v19 = vld [vmem:[%s16390_s3 + $0x3c0] sm:$0xff] }
 0x2ed   : > { %v13924_v27 = vpop.f32.mrf.mxu3 }
 0x2ef   : > { %2210 = vmatpush.bf16.msrb.mxu0 %v12660_v38  ;;  %3428 = vmatpush.bf16.msrb.mxu3 %v12750_v39  ;;  %v12816_v38 = vld [vmem:[%s16390_s3 + $0x6b0] sm:$0xff] }
 0x2f2   : > { %3182 = vmatmul.bf16.vlgmr.msra.gmra.mxu3 %v13542_v31 }
 0x2f3   : > { %2211 = vmatpush.bf16.msrb.mxu0 %v12659_v20  ;;  %3668 = vmatpush.bf16.msra.mxu3 %v12777_v22  ;;  %v12725_v22 = vld [vmem:[%s16390_s3 + $0x478] sm:$0xff] }
 0x2f5   : > { %v13939_v46 = vpop.f32.mrf.mxu3 }
 0x2f7   : > { %2212 = vmatpush.bf16.msrb.mxu0 %v12658_v23  ;;  %3669 = vmatpush.bf16.msra.mxu3 %v12776_v24  ;;  %v12815_v23 = vld [vmem:[%s16390_s3 + $0x6a8] sm:$0xff] }
 0x2f9   : > { %1966 = vmatmul.bf16.vlgmr.msra.gmra.mxu0 %v13544_v32 }
 0x2fb   : > { %2452 = vmatpush.bf16.msra.mxu0 %v12685_v25  ;;  %3670 = vmatpush.bf16.msra.mxu3 %v12775_v26 }
 0x2fd   : > { %v13960_v43 = vpop.f32.mrf.mxu3 }
 0x2ff   : > { %2453 = vmatpush.bf16.msra.mxu0 %v12684_v28  ;;  %3671 = vmatpush.bf16.msra.mxu3 %v12774_v29  ;;  %v12724_v28 = vld [vmem:[%s16390_s3 + $0x470] sm:$0xff] }
 0x302   : > { %3187 = vmatmul.bf16.gmra.mxu3 %v13569_v1 }
 0x303   : > { %2454 = vmatpush.bf16.msra.mxu0 %v12683_v30  ;;  %3672 = vmatpush.bf16.msra.mxu3 %v12773_v45  ;;  %v12814_v30 = vld [vmem:[%s16390_s3 + $0x6a0] sm:$0xff] }
 0x305   : > { %v13975_v54 = vpop.f32.mrf.mxu3 }
 0x307   : > { %2455 = vmatpush.bf16.msra.mxu0 %v12682_v33  ;;  %3673 = vmatpush.bf16.msra.mxu3 %v12772_v34  ;;  %v12723_v34 = vld [vmem:[%s16390_s3 + $0x468] sm:$0xff] }
 0x309   : > { %1971 = vmatmul.bf16.gmra.mxu0 %v13571_v59 }
 0x30b   : > { %2456 = vmatpush.bf16.msra.mxu0 %v12681_v36  ;;  %3674 = vmatpush.bf16.msra.mxu3 %v12771_v37  ;;  %v12813_v36 = vld [vmem:[%s16390_s3 + $0x698] sm:$0xff] }
 0x30d   : > { %v13998_v60 = vpop.f32.mrf.mxu3 }
 0x30f   : > { %2457 = vmatpush.bf16.msra.mxu0 %v12680_v41  ;;  %3675 = vmatpush.bf16.msra.mxu3 %v12770_v42  ;;  %v12722_v42 = vld [vmem:[%s16390_s3 + $0x460] sm:$0xff] }
 0x312   : > { %3429 = vmatmul.bf16.vlgmr.msrb.gmra.mxu3 %v13542_v31 }
 0x313   : > { %2458 = vmatpush.bf16.msra.mxu0 %v12679_v44  ;;  %3915 = vmatpush.bf16.msrb.mxu3 %v12797_v47  ;;  %v12812_v44 = vld [vmem:[%s16390_s3 + $0x690] sm:$0xff] }
 0x315   : > { %v14016_v11 = vpop.f32.mrf.mxu3 }
 0x316   : > { %v1235_v50 = vpop.f32.mrf.mxu0 }
 0x317   : > { %2459 = vmatpush.bf16.msra.mxu0 %v12678_v48  ;;  %3916 = vmatpush.bf16.msrb.mxu3 %v12796_v49  ;;  %v12721_v48 = vld [vmem:[%s16390_s3 + $0x458] sm:$0xff]  ;;  %v12811_v49 = vld [vmem:[%s16390_s3 + $0x688] sm:$0xff] }
 0x319   : > { %2213 = vmatmul.bf16.vlgmr.msrb.gmra.mxu0 %v13544_v32 }
 0x31b   : > { %2699 = vmatpush.bf16.msrb.mxu0 %v12705_v55  ;;  %v1296_v57 = vpop.f32.mrf.mxu1  ;;  %3917 = vmatpush.bf16.msrb.mxu3 %v12795_v56 }
 0x31c   : > { %v1297_v52 = vadd.f32 %v1296_v57, %v1235_v50 }
 0x31d   : > { %v14041_v39 = vpop.f32.mrf.mxu3 }
 0x31e   : > { %v13990_v62 = vpop.f32.mrf.mxu0 }
 0x31f   : > { %2700 = vmatpush.bf16.msrb.mxu0 %v12704_v53  ;;  %3918 = vmatpush.bf16.msrb.mxu3 %v12794_v61  ;;  %v12810_v61 = vld [vmem:[%s16390_s3 + $0x680] sm:$0xff] }
 0x322   : > { %3434 = vmatmul.bf16.gmra.mxu3 %v13569_v1 }
 0x323   : > { %2701 = vmatpush.bf16.msrb.mxu0 %v12703_v63  ;;  %v14001_v2 = vpop.f32.mrf.mxu1  ;;  %3919 = vmatpush.bf16.msrb.mxu3 %v12793_v0  ;;  %v12719_v0 = vld [vmem:[%s16390_s3 + $0x448] sm:$0xff] }
 0x325   : > { %v14060_v33 = vpop.f32.mrf.mxu3 }
 0x326   : > { %v1240_v6 = vpop.f32.mrf.mxu0 }
 0x327   : > { %2702 = vmatpush.bf16.msrb.mxu0 %v12702_v3  ;;  %3920 = vmatpush.bf16.msrb.mxu3 %v12792_v5  ;;  %v12837_v3 = vld [vmem:[%s16390_s3 + $0x738] sm:$0xff] }
 0x329   : > { %2218 = vmatmul.bf16.gmra.mxu0 %v13571_v59 }
 0x32b   : > { %2703 = vmatpush.bf16.msrb.mxu0 %v12701_v7  ;;  %v1301_v9 = vpop.f32.mrf.mxu1  ;;  %3921 = vmatpush.bf16.msrb.mxu3 %v12791_v8  ;;  %v12718_v7 = vld [vmem:[%s16390_s3 + $0x440] sm:$0xff]  ;;  %v12836_v8 = vld [vmem:[%s16390_s3 + $0x730] sm:$0xff] }
 0x32c   : > { %v1302_v12 = vadd.f32 %v1301_v9, %v1240_v6 }
 0x32d   : > { %v14086_v50 = vpop.f32.mrf.mxu3 }
 0x32e   : > { %v14024_v15 = vpop.f32.mrf.mxu0 }
 0x32f   : > { %2704 = vmatpush.bf16.msrb.mxu0 %v12700_v13  ;;  %3922 = vmatpush.bf16.msrb.mxu3 %v12790_v14  ;;  %v12835_v13 = vld [vmem:[%s16390_s3 + $0x728] sm:$0xff] }
 0x332   : > { %3676 = vmatmul.bf16.vlgmr.msra.gmra.mxu3 %v13542_v31 }
 0x333   : > { %2705 = vmatpush.bf16.msrb.mxu0 %v12699_v35  ;;  %v14033_v18 = vpop.f32.mrf.mxu1  ;;  %4162 = vmatpush.bf16.msra.mxu3 %v12817_v16  ;;  %v12744_v35 = vld [vmem:[%s16390_s3 + $0x4f0] sm:$0xff] }
 0x335   : > { %v14105_v5 = vpop.f32.mrf.mxu3 }
 0x336   : > { %v1245_v20 = vpop.f32.mrf.mxu0 }
 0x337   : > { %2706 = vmatpush.bf16.msrb.mxu0 %v12698_v19  ;;  %4163 = vmatpush.bf16.msra.mxu3 %v12816_v38  ;;  %v12834_v19 = vld [vmem:[%s16390_s3 + $0x720] sm:$0xff] }
 0x339   : > { %2460 = vmatmul.bf16.vlgmr.msra.gmra.mxu0 %v13544_v32 }
 0x33b   : > { %2946 = vmatpush.bf16.msra.mxu0 %v12725_v22  ;;  %v1306_v24 = vpop.f32.mrf.mxu1  ;;  %4164 = vmatpush.bf16.msra.mxu3 %v12815_v23  ;;  %v12743_v22 = vld [vmem:[%s16390_s3 + $0x4e8] sm:$0xff]  ;;  %v12833_v23 = vld [vmem:[%s16390_s3 + $0x718] sm:$0xff] }
 0x33c   : > { %v1307_v25 = vadd.f32 %v1306_v24, %v1245_v20  ;;  %v1535_v26 = vpop.f32.mrf.mxu2 }
 0x33d   : > { %v14053_v29 = vadd.f32 %v1535_v26, %v1297_v52  ;;  %v12720_v52 = vld [vmem:[%s16390_s3 + $0x450] sm:$0xff]  ;;  %v14130_v38 = vpop.f32.mrf.mxu3 }
 0x33e   : > { %v14058_v45 = vpop.f32.mrf.mxu0  ;;  %v12832_v26 = vld [vmem:[%s16390_s3 + $0x710] sm:$0xff] }
 0x33f   : > { %2947 = vmatpush.bf16.msra.mxu0 %v12724_v28  ;;  %4165 = vmatpush.bf16.msra.mxu3 %v12814_v30 }
 0x342   : > { %3681 = vmatmul.bf16.gmra.mxu3 %v13569_v1 }
 0x343   : > { %2948 = vmatpush.bf16.msra.mxu0 %v12723_v34  ;;  %v14069_v37 = vpop.f32.mrf.mxu1  ;;  %4166 = vmatpush.bf16.msra.mxu3 %v12813_v36  ;;  %v12741_v34 = vld [vmem:[%s16390_s3 + $0x4d8] sm:$0xff]  ;;  %v12831_v36 = vld [vmem:[%s16390_s3 + $0x708] sm:$0xff] }
 0x344   : > { %v14071_v41 = vpop.f32.mrf.mxu2 }
 0x345   : > { %v14147_v30 = vpop.f32.mrf.mxu3 }
 0x346   : > { %v1250_v47 = vpop.f32.mrf.mxu0 }
 0x347   : > { %2949 = vmatpush.bf16.msra.mxu0 %v12722_v42  ;;  %4167 = vmatpush.bf16.msra.mxu3 %v12812_v44  ;;  %v12740_v44 = vld [vmem:[%s16390_s3 + $0x4d0] sm:$0xff] }
 0x349   : > { %2465 = vmatmul.bf16.gmra.mxu0 %v13571_v59 }
 0x34b   : > { %2950 = vmatpush.bf16.msra.mxu0 %v12721_v48  ;;  %v1311_v55 = vpop.f32.mrf.mxu1  ;;  %4168 = vmatpush.bf16.msra.mxu3 %v12811_v49  ;;  %v12830_v48 = vld [vmem:[%s16390_s3 + $0x700] sm:$0xff] }
 0x34c   : > { %v1312_v56 = vadd.f32 %v1311_v55, %v1250_v47  ;;  %v1540_v57 = vpop.f32.mrf.mxu2 }
 0x34d   : > { %v14091_v53 = vadd.f32 %v1540_v57, %v1302_v12  ;;  %v12745_v12 = vld [vmem:[%s16390_s3 + $0x4f8] sm:$0xff] }
 0x34e   : > { %v14096_v63 = vpop.f32.mrf.mxu0 }
 0x34f   : > { %2951 = vmatpush.bf16.msra.mxu0 %v12720_v52  ;;  %4169 = vmatpush.bf16.msra.mxu3 %v12810_v61  ;;  %v12739_v52 = vld [vmem:[%s16390_s3 + $0x4c8] sm:$0xff] }
 0x352   : > { %3923 = vmatmul.bf16.vlgmr.msrb.gmra.mxu3 %v13542_v31 }
 0x353   : > { %2952 = vmatpush.bf16.msra.mxu0 %v12719_v0  ;;  %4409 = vmatpush.bf16.msrb.mxu3 %v12837_v3  ;;  %v14173_v3 = vpop.f32.mrf.mxu3 }
 0x354   : > { %v14107_v6 = vpop.f32.mrf.mxu2 }
 0x356   : > { %v1720_v9 = vpop.f32.mrf.mxu0 }
 0x357   : > { %2953 = vmatpush.bf16.msra.mxu0 %v12718_v7  ;;  %4410 = vmatpush.bf16.msrb.mxu3 %v12836_v8 }
 0x359   : > { %2707 = vmatmul.bf16.vlgmr.msrb.gmra.mxu0 %v13544_v32 }
 0x35b   : > { %3193 = vmatpush.bf16.msrb.mxu0 %v12745_v12  ;;  %4411 = vmatpush.bf16.msrb.mxu3 %v12835_v13  ;;  %v12626_v12 = vld [vmem:[%s16391_s4 + $0x60] sm:$0xff]  ;;  %v14194_v13 = vpop.f32.mrf.mxu3 }
 0x35c   : > { %v1545_v14 = vpop.f32.mrf.mxu2 }
 0x35d   : > { %v14125_v16 = vadd.f32 %v1545_v14, %v1307_v25  ;;  %v12742_v25 = vld [vmem:[%s16390_s3 + $0x4e0] sm:$0xff]  ;;  %v12764_v14 = vld [vmem:[%s16390_s3 + $0x570] sm:$0xff] }
 0x35e   : > { %v1722_v20 = vpop.f32.mrf.mxu0 }
 0x35f   : > { %3194 = vmatpush.bf16.msrb.mxu0 %v12744_v35  ;;  %4412 = vmatpush.bf16.msrb.mxu3 %v12834_v19  ;;  %v1723_v61 = vadd.f32 %v1722_v20, %v13794_v51  ;;  %v12856_v51 = vld [vmem:[%s16390_s3 + $0x7b0] sm:$0xff]  ;;  %v12854_v35 = vld [vmem:[%s16390_s3 + $0x7a0] sm:$0xff]  ;;  %v12763_v20 = vld [vmem:[%s16390_s3 + $0x568] sm:$0xff] }
 0x362   : > { %3928 = vmatmul.bf16.gmra.mxu3 %v13569_v1 }
 0x363   : > { %3195 = vmatpush.bf16.msrb.mxu0 %v12743_v22  ;;  %4413 = vmatpush.bf16.msrb.mxu3 %v12833_v23  ;;  %v12853_v22 = vld [vmem:[%s16390_s3 + $0x798] sm:$0xff]  ;;  %v12762_v23 = vld [vmem:[%s16390_s3 + $0x560] sm:$0xff] }
 0x364   : > { %v14139_v24 = vpop.f32.mrf.mxu2 }
 0x366   : > { %v1725_v28 = vpop.f32.mrf.mxu0 }
 0x367   : > { %3196 = vmatpush.bf16.msrb.mxu0 %v12742_v25  ;;  %4414 = vmatpush.bf16.msrb.mxu3 %v12832_v26  ;;  %v1726_v55 = vadd.f32 %v1725_v28, %v13816_v58  ;;  %v1721_v58 = vadd.f32 %v1720_v9, %v13766_v40  ;;  %v12765_v40 = vld [vmem:[%s16390_s3 + $0x578] sm:$0xff]  ;;  %v12855_v9 = vld [vmem:[%s16390_s3 + $0x7a8] sm:$0xff]  ;;  %v12852_v25 = vld [vmem:[%s16390_s3 + $0x790] sm:$0xff]  ;;  %v14215_v26 = vpop.f32.mrf.mxu3 }
 0x369   : > { %2712 = vmatmul.bf16.gmra.mxu0 %v13571_v59  ;;  %v1739_v7 = vpack.c.bf16 %v1723_v61, %v1721_v58  ;;  %v12759_v61 = vld [vmem:[%s16390_s3 + $0x548] sm:$0xff] }
 0x36b   : > { %3197 = vmatpush.bf16.msrb.mxu0 %v12741_v34  ;;  %4415 = vmatpush.bf16.msrb.mxu3 %v12831_v36  ;;  %v12627_v34 = vld [vmem:[%s16391_s4 + $0x68] sm:$0xff]  ;;  %v12761_v36 = vld [vmem:[%s16390_s3 + $0x558] sm:$0xff] }
 0x36c   : > { %v1550_v42 = vpop.f32.mrf.mxu2 }
 0x36d   : > { %v14159_v47 = vadd.f32 %v1550_v42, %v1312_v56  ;;  %v12857_v56 = vld [vmem:[%s16390_s3 + $0x7b8] sm:$0xff]  ;;  %v12851_v42 = vld [vmem:[%s16390_s3 + $0x788] sm:$0xff] }
 0x36e   : > { %v1727_v49 = vpop.f32.mrf.mxu0 }
 0x36f   : > { %3198 = vmatpush.bf16.msrb.mxu0 %v12740_v44  ;;  %v1728_v57 = vadd.f32 %v1727_v49, %v13842_v4  ;;  %4416 = vmatpush.bf16.msrb.mxu3 %v12830_v48  ;;  %v12738_v4 = vld [vmem:[%s16390_s3 + $0x4c0] sm:$0xff]  ;;  %v12760_v44 = vld [vmem:[%s16390_s3 + $0x550] sm:$0xff] }
 0x370   : > { %v12850_v48 = vld [vmem:[%s16390_s3 + $0x780] sm:$0xff] }
 0x371   : > { %v1740_v0 = vpack.c.bf16 %v1728_v57, %v1726_v55 }
 0x372   : > { %4170 = vmatmul.bf16.vlgmr.msra.gmra.mxu3 %v13542_v31 }
 0x373   : > { %3199 = vmatpush.bf16.msrb.mxu0 %v12739_v52  ;;  %1779 = vmatpush.bf16.msrb.mxu1 %v1740_v0  ;;  %v14236_v52 = vpop.f32.mrf.mxu3 }
 0x374   : > { %4656 = vmatpush.bf16.msra.mxu3 %v12857_v56 }
 0x376   : > { %v1967_v8 = vpop.f32.mrf.mxu0 }
 0x377   : > { %3200 = vmatpush.bf16.msrb.mxu0 %v12738_v4  ;;  %1780 = vmatpush.bf16.msrb.mxu1 %v1739_v7  ;;  %v1968_v58 = vadd.f32 %v1967_v8, %v13862_v10  ;;  %v12628_v7 = vld [vmem:[%s16391_s4 + $0x70] sm:$0xff]  ;;  %v12785_v10 = vld [vmem:[%s16390_s3 + $0x5f8] sm:$0xff] }
 0x378   : > { %4657 = vmatpush.bf16.msra.mxu3 %v12856_v51  ;;  %v12784_v8 = vld [vmem:[%s16390_s3 + $0x5f0] sm:$0xff] }
 0x379   : > { %2954 = vmatmul.bf16.vlgmr.msra.gmra.mxu0 %v13544_v32 }
 0x37a   : > { %9699 = vmatmul.msk.bf16.vlgmr.msrb.gmra.mxu1 %vm1213_vm5, %v12626_v12 }
 0x37b   : > { %3440 = vmatpush.bf16.msra.mxu0 %v12765_v40  ;;  %v14257_v51 = vpop.f32.mrf.mxu3  ;;  %v12783_v40 = vld [vmem:[%s16390_s3 + $0x5e8] sm:$0xff] }
 0x37c   : > { %4658 = vmatpush.bf16.msra.mxu3 %v12855_v9 }
 0x37e   : > { %v1969_v19 = vpop.f32.mrf.mxu0 }
 0x37f   : > { %3441 = vmatpush.bf16.msra.mxu0 %v12764_v14  ;;  %v1970_v0 = vadd.f32 %v1969_v19, %v13886_v17  ;;  %v12646_v17 = vld [vmem:[%s16391_s4 + $0x80] sm:$0xff]  ;;  %v12629_v19 = vld [vmem:[%s16391_s4 + $0x78] sm:$0xff] }
 0x380   : > { %4659 = vmatpush.bf16.msra.mxu3 %v12854_v35  ;;  %v12782_v14 = vld [vmem:[%s16390_s3 + $0x5e0] sm:$0xff] }
 0x382   : > { %4175 = vmatmul.bf16.gmra.mxu3 %v13569_v1 }
 0x383   : > { %3442 = vmatpush.bf16.msra.mxu0 %v12763_v20  ;;  %v14268_v9 = vpop.f32.mrf.mxu3  ;;  %v12647_v20 = vld [vmem:[%s16391_s4 + $0x88] sm:$0xff] }
 0x384   : > { %4660 = vmatpush.bf16.msra.mxu3 %v12853_v22  ;;  %v12781_v22 = vld [vmem:[%s16390_s3 + $0x5d8] sm:$0xff] }
 0x386   : > { %v1972_v28 = vpop.f32.mrf.mxu0 }
 0x387   : > { %3443 = vmatpush.bf16.msra.mxu0 %v12762_v23  ;;  %v1973_v55 = vadd.f32 %v1972_v28, %v13905_v21  ;;  %v12758_v21 = vld [vmem:[%s16390_s3 + $0x540] sm:$0xff]  ;;  %v12780_v23 = vld [vmem:[%s16390_s3 + $0x5d0] sm:$0xff] }
 0x388   : > { %4661 = vmatpush.bf16.msra.mxu3 %v12852_v25 }
 0x389   : > { %2959 = vmatmul.bf16.gmra.mxu0 %v13571_v59 }
 0x38a   : > { %9700 = vmatmul.msk.bf16.gmra.mxu1 %vm1213_vm5, %v12627_v34 }
 0x38b   : > { %3444 = vmatpush.bf16.msra.mxu0 %v12761_v36  ;;  %v14288_v25 = vpop.f32.mrf.mxu3 }
 0x38c   : > { %4662 = vmatpush.bf16.msra.mxu3 %v12851_v42  ;;  %v12779_v42 = vld [vmem:[%s16390_s3 + $0x5c8] sm:$0xff] }
 0x38e   : > { %v1974_v49 = vpop.f32.mrf.mxu0 }
 0x38f   : > { %3445 = vmatpush.bf16.msra.mxu0 %v12760_v44  ;;  %v1975_v57 = vadd.f32 %v1974_v49, %v13924_v27  ;;  %v1986_v27 = vpack.c.bf16 %v1970_v0, %v1968_v58 }
 0x390   : > { %4663 = vmatpush.bf16.msra.mxu3 %v12850_v48 }
 0x391   : > { %v1987_v56 = vpack.c.bf16 %v1975_v57, %v1973_v55  ;;  %v12648_v57 = vld [vmem:[%s16391_s4 + $0x90] sm:$0xff] }
 0x392   : > { %4417 = vmatmul.bf16.vlgmr.msrb.gmra.mxu3 %v13542_v31 }
 0x393   : > { %3446 = vmatpush.bf16.msra.mxu0 %v12759_v61  ;;  %2026 = vmatpush.bf16.msra.mxu2 %v1987_v56  ;;  %v12804_v61 = vld [vmem:[%s16390_s3 + $0x670] sm:$0xff]  ;;  %v12803_v56 = vld [vmem:[%s16390_s3 + $0x668] sm:$0xff] }
 0x396   : > { %v2214_v4 = vpop.f32.mrf.mxu0 }
 0x397   : > { %3447 = vmatpush.bf16.msra.mxu0 %v12758_v21  ;;  %2027 = vmatpush.bf16.msra.mxu2 %v1986_v27  ;;  %v2215_v49 = vadd.f32 %v2214_v4, %v13939_v46  ;;  %v12805_v46 = vld [vmem:[%s16390_s3 + $0x678] sm:$0xff]  ;;  %v12802_v21 = vld [vmem:[%s16390_s3 + $0x660] sm:$0xff] }
 0x398   : > { %v12649_v4 = vld [vmem:[%s16391_s4 + $0x98] sm:$0xff] }
 0x399   : > { %3201 = vmatmul.bf16.vlgmr.msrb.gmra.mxu0 %v13544_v32 }
 0x39a   : > { %9701 = vmatmul.msk.bf16.gmra.mxu1 %vm1213_vm5, %v12628_v7  ;;  %9823 = vmatmul.msk.bf16.vlgmr.msra.gmra.mxu2 %vm1213_vm5, %v12646_v17  ;;  %v12667_v7 = vld [vmem:[%s16391_s4 + $0xa8] sm:$0xff]  ;;  %v12801_v17 = vld [vmem:[%s16390_s3 + $0x658] sm:$0xff] }
 0x39b   : > { %3687 = vmatpush.bf16.msrb.mxu0 %v12785_v10 }
 0x39e   : > { %v2216_v12 = vpop.f32.mrf.mxu0 }
 0x39f   : > { %3688 = vmatpush.bf16.msrb.mxu0 %v12784_v8  ;;  %v2217_v44 = vadd.f32 %v2216_v12, %v13960_v43  ;;  %v12666_v43 = vld [vmem:[%s16391_s4 + $0xa0] sm:$0xff] }
 0x3a1   : > { %v2233_v55 = vpack.c.bf16 %v2217_v44, %v2215_v49  ;;  %v12669_v44 = vld [vmem:[%s16391_s4 + $0xb8] sm:$0xff] }
 0x3a2   : > { %4422 = vmatmul.bf16.gmra.mxu3 %v13569_v1  ;;  %v12821_v49 = vld [vmem:[%s16390_s3 + $0x6d8] sm:$0xff] }
 0x3a3   : > { %3689 = vmatpush.bf16.msrb.mxu0 %v12783_v40  ;;  %v12799_v40 = vld [vmem:[%s16390_s3 + $0x648] sm:$0xff] }
 0x3a6   : > { %v2219_v35 = vpop.f32.mrf.mxu0 }
 0x3a7   : > { %3690 = vmatpush.bf16.msrb.mxu0 %v12782_v14  ;;  %v2220_v34 = vadd.f32 %v2219_v35, %v13975_v54  ;;  %v12778_v54 = vld [vmem:[%s16390_s3 + $0x5c0] sm:$0xff] }
 0x3a9   : > { %3206 = vmatmul.bf16.gmra.mxu0 %v13571_v59 }
 0x3aa   : > { %9702 = vmatmul.msk.bf16.gmra.mxu1 %vm1213_vm5, %v12629_v19  ;;  %9824 = vmatmul.msk.bf16.gmra.mxu2 %vm1213_vm5, %v12647_v20  ;;  %v12798_v20 = vld [vmem:[%s16390_s3 + $0x640] sm:$0xff] }
 0x3ab   : > { %3691 = vmatpush.bf16.msrb.mxu0 %v12781_v22 }
 0x3ae   : > { %v2221_v28 = vpop.f32.mrf.mxu0 }
 0x3af   : > { %v2222_v36 = vadd.f32 %v2221_v28, %v13998_v60  ;;  %3692 = vmatpush.bf16.msrb.mxu0 %v12780_v23  ;;  %v12686_v23 = vld [vmem:[%s16391_s4 + $0xc0] sm:$0xff] }
 0x3b1   : > { %v2234_v48 = vpack.c.bf16 %v2222_v36, %v2220_v34  ;;  %v12823_v34 = vld [vmem:[%s16390_s3 + $0x6e8] sm:$0xff]  ;;  %v12822_v36 = vld [vmem:[%s16390_s3 + $0x6e0] sm:$0xff] }
 0x3b2   : > { %4664 = vmatmul.bf16.vlgmr.msra.gmra.mxu3 %v13542_v31  ;;  %v14307_v31 = vpop.f32.mrf.mxu3 }
 0x3b3   : > { %2273 = vmatpush.bf16.msra.mxu1 %v2234_v48  ;;  %3693 = vmatpush.bf16.msrb.mxu0 %v12779_v42  ;;  %v12687_v48 = vld [vmem:[%s16391_s4 + $0xc8] sm:$0xff] }
 0x3b6   : > { %v2461_v60 = vpop.f32.mrf.mxu0 }
 0x3b7   : > { %2274 = vmatpush.bf16.msra.mxu1 %v2233_v55  ;;  %3694 = vmatpush.bf16.msrb.mxu0 %v12778_v54  ;;  %v2462_v19 = vadd.f32 %v2461_v60, %v14016_v11  ;;  %v12825_v11 = vld [vmem:[%s16390_s3 + $0x6f8] sm:$0xff]  ;;  %v12820_v54 = vld [vmem:[%s16390_s3 + $0x6d0] sm:$0xff]  ;;  %v14388_v60 = vpop.f32.mrf.mxu1 }
 0x3b9   : > { %3448 = vmatmul.bf16.vlgmr.msra.gmra.mxu0 %v13544_v32 }
 0x3ba   : > { %9825 = vmatmul.msk.bf16.gmra.mxu2 %vm1213_vm5, %v12648_v57  ;;  %9947 = vmatmul.msk.bf16.vlgmr.msra.gmra.mxu1 %vm1213_vm5, %v12666_v43  ;;  %v14321_v58 = vpop.f32.mrf.mxu3 }
 0x3bb   : > { %3934 = vmatpush.bf16.msra.mxu0 %v12805_v46  ;;  %v12819_v46 = vld [vmem:[%s16390_s3 + $0x6c8] sm:$0xff] }
 0x3be   : > { %v2463_v0 = vpop.f32.mrf.mxu0 }
 0x3bf   : > { %3935 = vmatpush.bf16.msra.mxu0 %v12804_v61  ;;  %v2464_v14 = vadd.f32 %v2463_v0, %v14041_v39  ;;  %v12824_v39 = vld [vmem:[%s16390_s3 + $0x6f0] sm:$0xff] }
 0x3c1   : > { %v2480_v22 = vpack.c.bf16 %v2464_v14, %v2462_v19  ;;  %v12842_v14 = vld [vmem:[%s16390_s3 + $0x760] sm:$0xff] }
 0x3c2   : > { %4669 = vmatmul.bf16.gmra.mxu3 %v13569_v1  ;;  %v12800_v1 = vld [vmem:[%s16390_s3 + $0x650] sm:$0xff]  ;;  %v14433_v19 = vpop.f32.mrf.mxu3 }
 0x3c3   : > { %3936 = vmatpush.bf16.msra.mxu0 %v12803_v56 }
 0x3c6   : > { %v2466_v27 = vpop.f32.mrf.mxu0 }
 0x3c7   : > { %3937 = vmatpush.bf16.msra.mxu0 %v12802_v21  ;;  %v2467_v8 = vadd.f32 %v2466_v27, %v14060_v33  ;;  %v12818_v21 = vld [vmem:[%s16390_s3 + $0x6c0] sm:$0xff] }
 0x3c9   : > { %3453 = vmatmul.bf16.gmra.mxu0 %v13571_v59 }
 0x3ca   : > { %9826 = vmatmul.msk.bf16.gmra.mxu2 %vm1213_vm5, %v12649_v4  ;;  %9948 = vmatmul.msk.bf16.gmra.mxu1 %vm1213_vm5, %v12667_v7  ;;  %v12706_v4 = vld [vmem:[%s16391_s4 + $0xe0] sm:$0xff]  ;;  %v12845_v7 = vld [vmem:[%s16390_s3 + $0x778] sm:$0xff] }
 0x3cb   : > { %3938 = vmatpush.bf16.msra.mxu0 %v12801_v17  ;;  %v1299_v17 = vadd.f32 %v14001_v2, %v13990_v62  ;;  %v12689_v2 = vld [vmem:[%s16391_s4 + $0xd8] sm:$0xff] }
 0x3ce   : > { %v2468_v10 = vpop.f32.mrf.mxu0 }
 0x3cf   : > { %v2469_v12 = vadd.f32 %v2468_v10, %v14086_v50  ;;  %3939 = vmatpush.bf16.msra.mxu0 %v12800_v1  ;;  %v12668_v50 = vld [vmem:[%s16391_s4 + $0xb0] sm:$0xff] }
 0x3d0   : > { %v12844_v1 = vld [vmem:[%s16390_s3 + $0x770] sm:$0xff] }
 0x3d1   : > { %v2481_v35 = vpack.c.bf16 %v2469_v12, %v2467_v8 }
 0x3d3   : > { %2520 = vmatpush.bf16.msrb.mxu2 %v2481_v35  ;;  %3940 = vmatpush.bf16.msra.mxu0 %v12799_v40  ;;  %v12843_v40 = vld [vmem:[%s16390_s3 + $0x768] sm:$0xff] }
 0x3d6   : > { %v2708_v33 = vpop.f32.mrf.mxu0 }
 0x3d7   : > { %2521 = vmatpush.bf16.msrb.mxu2 %v2480_v22  ;;  %3941 = vmatpush.bf16.msra.mxu0 %v12798_v20  ;;  %v2709_v56 = vadd.f32 %v2708_v33, %v14105_v5  ;;  %v12841_v22 = vld [vmem:[%s16390_s3 + $0x758] sm:$0xff]  ;;  %v1304_v33 = vadd.f32 %v14033_v18, %v14024_v15 }
 0x3d9   : > { %3695 = vmatmul.bf16.vlgmr.msrb.gmra.mxu0 %v13544_v32 }
 0x3da   : > { %9949 = vmatmul.msk.bf16.gmra.mxu1 %vm1213_vm5, %v12668_v50  ;;  %10071 = vmatmul.msk.bf16.vlgmr.msrb.gmra.mxu2 %vm1213_vm5, %v12686_v23  ;;  %v12840_v50 = vld [vmem:[%s16390_s3 + $0x750] sm:$0xff] }
 0x3db   : > { %4181 = vmatpush.bf16.msrb.mxu0 %v12825_v11 }
 0x3de   : > { %v2710_v28 = vpop.f32.mrf.mxu0 }
 0x3df   : > { %4182 = vmatpush.bf16.msrb.mxu0 %v12824_v39  ;;  %v2711_v61 = vadd.f32 %v2710_v28, %v14130_v38 }
 0x3e1   : > { %v2727_v27 = vpack.c.bf16 %v2711_v61, %v2709_v56 }
 0x3e3   : > { %4183 = vmatpush.bf16.msrb.mxu0 %v12823_v34 }
 0x3e6   : > { %v2713_v42 = vpop.f32.mrf.mxu0 }
 0x3e7   : > { %4184 = vmatpush.bf16.msrb.mxu0 %v12822_v36  ;;  %v2714_v57 = vadd.f32 %v2713_v42, %v14147_v30  ;;  %v12839_v36 = vld [vmem:[%s16390_s3 + $0x748] sm:$0xff]  ;;  %v14458_v42 = vpop.f32.mrf.mxu3 }
 0x3e9   : > { %3700 = vmatmul.bf16.gmra.mxu0 %v13571_v59 }
 0x3ea   : > { %9950 = vmatmul.msk.bf16.gmra.mxu1 %vm1213_vm5, %v12669_v44  ;;  %10072 = vmatmul.msk.bf16.gmra.mxu2 %vm1213_vm5, %v12687_v48 }
 0x3eb   : > { %4185 = vmatpush.bf16.msrb.mxu0 %v12821_v49  ;;  %v12708_v49 = vld [vmem:[%s16391_s4 + $0xf0] sm:$0xff] }
 0x3ee   : > { %v2715_v55 = vpop.f32.mrf.mxu0 }
 0x3ef   : > { %v2716_v43 = vadd.f32 %v2715_v55, %v14173_v3  ;;  %4186 = vmatpush.bf16.msrb.mxu0 %v12820_v54  ;;  %v12688_v3 = vld [vmem:[%s16391_s4 + $0xd0] sm:$0xff]  ;;  %v12865_v55 = vld [vmem:[%s16390_s3 + $0x7f8] sm:$0xff] }
 0x3f1   : > { %v2728_v0 = vpack.c.bf16 %v2716_v43, %v2714_v57  ;;  %v1309_v57 = vadd.f32 %v14069_v37, %v14058_v45  ;;  %v14481_v43 = vpop.f32.mrf.mxu3  ;;  %v12862_v45 = vld [vmem:[%s16390_s3 + $0x7e0] sm:$0xff] }
 0x3f3   : > { %2767 = vmatpush.bf16.msrb.mxu1 %v2728_v0  ;;  %4187 = vmatpush.bf16.msrb.mxu0 %v12819_v46  ;;  %v1560_v61 = vadd.f32 %v14139_v24, %v1309_v57 }
 0x3f6   : > { %v2955_v30 = vpop.f32.mrf.mxu0 }
 0x3f7   : > { %v1782_v38 = vpop.f32.mrf.mxu1  ;;  %2768 = vmatpush.bf16.msrb.mxu1 %v2727_v27  ;;  %4188 = vmatpush.bf16.msrb.mxu0 %v12818_v21 }
 0x3f8   : > { %v14407_v5 = vadd.f32 %v1782_v38, %v14053_v29  ;;  %v1556_v29 = vadd.f32 %v14071_v41, %v1299_v17  ;;  %v12707_v41 = vld [vmem:[%s16391_s4 + $0xe8] sm:$0xff]  ;;  %v12709_v38 = vld [vmem:[%s16391_s4 + $0xf8] sm:$0xff] }
 0x3f9   : > { %3942 = vmatmul.bf16.vlgmr.msra.gmra.mxu0 %v13544_v32 }
 0x3fa   : > { %10073 = vmatmul.msk.bf16.gmra.mxu2 %vm1213_vm5, %v12688_v3  ;;  %10195 = vmatmul.msk.bf16.vlgmr.msrb.gmra.mxu1 %vm1213_vm5, %v12706_v4  ;;  %v14494_v3 = vpop.f32.mrf.mxu3 }
 0x3fb   : > { %4428 = vmatpush.bf16.msra.mxu0 %v12845_v7 }
 0x3fe   : > { %v2957_v10 = vpop.f32.mrf.mxu0 }
 0x3ff   : > { %v1784_v8 = vpop.f32.mrf.mxu1  ;;  %4429 = vmatpush.bf16.msra.mxu0 %v12844_v1  ;;  %v2958_v15 = vadd.f32 %v2957_v10, %v14215_v26  ;;  %v12726_v26 = vld [vmem:[%s16391_s4 + $0x100] sm:$0xff]  ;;  %v12861_v1 = vld [vmem:[%s16390_s3 + $0x7d8] sm:$0xff]  ;;  %v12860_v10 = vld [vmem:[%s16390_s3 + $0x7d0] sm:$0xff] }
 0x400   : > { %v1803_v12 = vadd.f32 %v1784_v8, %v1556_v29  ;;  %v1314_v29 = vadd.f32 %v14388_v60, %v14096_v63  ;;  %v12859_v63 = vld [vmem:[%s16390_s3 + $0x7c8] sm:$0xff] }
 0x403   : > { %4430 = vmatpush.bf16.msra.mxu0 %v12843_v40 }
 0x406   : > { %v2960_v62 = vpop.f32.mrf.mxu0 }
 0x407   : > { %v1787_v35 = vpop.f32.mrf.mxu1  ;;  %4431 = vmatpush.bf16.msra.mxu0 %v12842_v14  ;;  %v2961_v11 = vadd.f32 %v2960_v62, %v14236_v52  ;;  %v12838_v52 = vld [vmem:[%s16390_s3 + $0x740] sm:$0xff] }
 0x408   : > { %v14436_v20 = vadd.f32 %v1787_v35, %v14091_v53  ;;  %v1558_v53 = vadd.f32 %v14107_v6, %v1304_v33  ;;  %v2956_v6 = vadd.f32 %v2955_v30, %v14194_v13  ;;  %v12863_v30 = vld [vmem:[%s16390_s3 + $0x7e8] sm:$0xff] }
 0x409   : > { %3947 = vmatmul.bf16.gmra.mxu0 %v13571_v59 }
 0x40a   : > { %10074 = vmatmul.msk.bf16.gmra.mxu2 %vm1213_vm5, %v12689_v2  ;;  %10196 = vmatmul.msk.bf16.gmra.mxu1 %vm1213_vm5, %v12707_v41  ;;  %v2974_v44 = vpack.c.bf16 %v2958_v15, %v2956_v6  ;;  %v14517_v41 = vpop.f32.mrf.mxu3 }
 0x40b   : > { %4432 = vmatpush.bf16.msra.mxu0 %v12841_v22 }
 0x40e   : > { %v2962_v23 = vpop.f32.mrf.mxu0 }
 0x40f   : > { %v2963_v39 = vadd.f32 %v2962_v23, %v14257_v51  ;;  %v1789_v28 = vpop.f32.mrf.mxu1  ;;  %4433 = vmatpush.bf16.msra.mxu0 %v12840_v50  ;;  %v1552_v51 = vpop.f32.mrf.mxu2  ;;  %v12728_v23 = vld [vmem:[%s16391_s4 + $0x110] sm:$0xff] }
 0x410   : > { %v14452_v34 = vadd.f32 %v1789_v28, %v1558_v53 }
 0x411   : > { %v2975_v18 = vpack.c.bf16 %v2963_v39, %v2961_v11 }
 0x412   : > { %v14535_v39 = vpop.f32.mrf.mxu3 }
 0x413   : > { %3014 = vmatpush.bf16.msra.mxu2 %v2975_v18  ;;  %4434 = vmatpush.bf16.msra.mxu0 %v12839_v36 }
 0x416   : > { %v3202_v48 = vpop.f32.mrf.mxu0 }
 0x417   : > { %v1792_v54 = vpop.f32.mrf.mxu1  ;;  %3015 = vmatpush.bf16.msra.mxu2 %v2974_v44  ;;  %4435 = vmatpush.bf16.msra.mxu0 %v12838_v52  ;;  %v3203_v33 = vadd.f32 %v3202_v48, %v14268_v9  ;;  %v12729_v48 = vld [vmem:[%s16391_s4 + $0x118] sm:$0xff] }
 0x418   : > { %v14471_v13 = vadd.f32 %v1792_v54, %v14125_v16  ;;  %v12864_v16 = vld [vmem:[%s16390_s3 + $0x7f0] sm:$0xff] }
 0x419   : > { %4189 = vmatmul.bf16.vlgmr.msrb.gmra.mxu0 %v13544_v32 }
 0x41a   : > { %10197 = vmatmul.msk.bf16.gmra.mxu1 %vm1213_vm5, %v12708_v49  ;;  %10319 = vmatmul.msk.bf16.vlgmr.msra.gmra.mxu2 %vm1213_vm5, %v12726_v26  ;;  %v3682_v6 = vpop.f32.mrf.mxu3  ;;  %v12747_v49 = vld [vmem:[%s16391_s4 + $0x128] sm:$0xff] }
 0x41b   : > { %4675 = vmatpush.bf16.msrb.mxu0 %v12865_v55 }
 0x41d   : > { %v2029_v46 = vpop.f32.mrf.mxu2 }
 0x41e   : > { %v2049_v0 = vadd.f32 %v2029_v46, %v14407_v5  ;;  %v3204_v56 = vpop.f32.mrf.mxu0  ;;  %v12727_v5 = vld [vmem:[%s16391_s4 + $0x108] sm:$0xff] }
 0x41f   : > { %v1794_v21 = vpop.f32.mrf.mxu1  ;;  %4676 = vmatpush.bf16.msrb.mxu0 %v12864_v16  ;;  %v3205_v60 = vadd.f32 %v3204_v56, %v14288_v25  ;;  %v12746_v25 = vld [vmem:[%s16391_s4 + $0x120] sm:$0xff] }
 0x420   : > { %v1807_v27 = vadd.f32 %v1794_v21, %v1560_v61 }
 0x422   : > { %v3684_v55 = vpop.f32.mrf.mxu3 }
 0x423   : > { %4677 = vmatpush.bf16.msrb.mxu0 %v12863_v30 }
 0x425   : > { %v2031_v37 = vpop.f32.mrf.mxu2 }
 0x426   : > { %v2050_v4 = vadd.f32 %v2031_v37, %v1803_v12  ;;  %v3207_v24 = vpop.f32.mrf.mxu0 }
 0x427   : > { %v1797_v7 = vpop.f32.mrf.mxu1  ;;  %4678 = vmatpush.bf16.msrb.mxu0 %v12862_v45  ;;  %v3208_v14 = vadd.f32 %v3207_v24, %v14307_v31  ;;  %v12858_v31 = vld [vmem:[%s16390_s3 + $0x7c0] sm:$0xff] }
 0x428   : > { %v1808_v17 = vadd.f32 %v1797_v7, %v14159_v47  ;;  %v1562_v47 = vadd.f32 %v1552_v51, %v1314_v29 }
 0x429   : > { %4194 = vmatmul.bf16.gmra.mxu0 %v13571_v59 }
 0x42a   : > { %10198 = vmatmul.msk.bf16.gmra.mxu1 %vm1213_vm5, %v12709_v38  ;;  %10320 = vmatmul.msk.bf16.gmra.mxu2 %vm1213_vm5, %v12727_v5  ;;  %v12748_v38 = vld [vmem:[%s16391_s4 + $0x130] sm:$0xff]  ;;  %v14559_v5 = vpop.f32.mrf.mxu3 }
 0x42b   : > { %4679 = vmatpush.bf16.msrb.mxu0 %v12861_v1 }
 0x42d   : > { %v2034_v8 = vpop.f32.mrf.mxu2 }
 0x42e   : > { %v2051_v12 = vadd.f32 %v2034_v8, %v14436_v20  ;;  %v3209_v40 = vpop.f32.mrf.mxu0 }
 0x42f   : > { %v3210_v62 = vadd.f32 %v3209_v40, %v14321_v58  ;;  %v1799_v2 = vpop.f32.mrf.mxu1  ;;  %4680 = vmatpush.bf16.msrb.mxu0 %v12860_v10  ;;  %v3221_v58 = vpack.c.bf16 %v3205_v60, %v3203_v33  ;;  %v12749_v40 = vld [vmem:[%s16391_s4 + $0x138] sm:$0xff] }
 0x430   : > { %v1809_v35 = vadd.f32 %v1799_v2, %v1562_v47 }
 0x431   : > { %v3222_v22 = vpack.c.bf16 %v3210_v62, %v3208_v14 }
 0x432   : > { %v3926_v10 = vpop.f32.mrf.mxu3 }
 0x433   : > { %3261 = vmatpush.bf16.msra.mxu1 %v3222_v22  ;;  %4681 = vmatpush.bf16.msrb.mxu0 %v12859_v63 }
 0x435   : > { %v2036_v20 = vpop.f32.mrf.mxu2 }
 0x436   : > { %v2052_v50 = vadd.f32 %v2036_v20, %v14452_v34  ;;  %v3449_v53 = vpop.f32.mrf.mxu0 }
 0x437   : > { %v2276_v9 = vpop.f32.mrf.mxu1  ;;  %3262 = vmatpush.bf16.msra.mxu1 %v3221_v58  ;;  %4682 = vmatpush.bf16.msrb.mxu0 %v12858_v31  ;;  %v3450_v30 = vadd.f32 %v3449_v53, %v14433_v19 }
 0x438   : > { %v2296_v11 = vadd.f32 %v2276_v9, %v2049_v0 }
 0x439   : > { %4436 = vmatmul.bf16.vlgmr.msra.gmra.mxu0 %v13544_v32 }
 0x43a   : > { %10321 = vmatmul.msk.bf16.gmra.mxu2 %vm1213_vm5, %v12728_v23  ;;  %10443 = vmatmul.msk.bf16.vlgmr.msra.gmra.mxu1 %vm1213_vm5, %v12746_v25  ;;  %v3929_v2 = vpop.f32.mrf.mxu3 }
 0x43d   : > { %v2039_v28 = vpop.f32.mrf.mxu2 }
 0x43e   : > { %v2053_v34 = vadd.f32 %v2039_v28, %v14471_v13  ;;  %v3451_v36 = vpop.f32.mrf.mxu0  ;;  %v12768_v28 = vld [vmem:[%s16391_s4 + $0x150] sm:$0xff] }
 0x43f   : > { %v2278_v15 = vpop.f32.mrf.mxu1  ;;  %v3452_v21 = vadd.f32 %v3451_v36, %v14458_v42 }
 0x440   : > { %v2297_v18 = vadd.f32 %v2278_v15, %v2050_v4 }
 0x441   : > { %v3468_v45 = vpack.c.bf16 %v3452_v21, %v3450_v30 }
 0x442   : > { %v3931_v25 = vpop.f32.mrf.mxu3 }
 0x445   : > { %v2041_v52 = vpop.f32.mrf.mxu2 }
 0x446   : > { %v2054_v51 = vadd.f32 %v2041_v52, %v1807_v27  ;;  %v3454_v44 = vpop.f32.mrf.mxu0 }
 0x447   : > { %v2281_v26 = vpop.f32.mrf.mxu1  ;;  %v3455_v46 = vadd.f32 %v3454_v44, %v14481_v43  ;;  %v12766_v43 = vld [vmem:[%s16391_s4 + $0x140] sm:$0xff] }
 0x448   : > { %v2298_v54 = vadd.f32 %v2281_v26, %v2051_v12  ;;  %v12769_v26 = vld [vmem:[%s16391_s4 + $0x158] sm:$0xff] }
 0x449   : > { %4441 = vmatmul.bf16.gmra.mxu0 %v13571_v59 }
 0x44a   : > { %10322 = vmatmul.msk.bf16.gmra.mxu2 %vm1213_vm5, %v12729_v48  ;;  %10444 = vmatmul.msk.bf16.gmra.mxu1 %vm1213_vm5, %v12747_v49  ;;  %v4171_v52 = vpop.f32.mrf.mxu3 }
 0x44d   : > { %v2044_v13 = vpop.f32.mrf.mxu2 }
 0x44e   : > { %v2055_v57 = vadd.f32 %v2044_v13, %v1808_v17  ;;  %v3456_v16 = vpop.f32.mrf.mxu0 }
 0x44f   : > { %v3457_v61 = vadd.f32 %v3456_v16, %v14494_v3  ;;  %v2283_v0 = vpop.f32.mrf.mxu1 }
 0x450   : > { %v2299_v56 = vadd.f32 %v2283_v0, %v2052_v50 }
 0x451   : > { %v3469_v27 = vpack.c.bf16 %v3457_v61, %v3455_v46 }
 0x453   : > { %3508 = vmatpush.bf16.msrb.mxu2 %v3469_v27 }
 0x455   : > { %v2046_v37 = vpop.f32.mrf.mxu2 }
 0x456   : > { %v2056_v4 = vadd.f32 %v2046_v37, %v1809_v35  ;;  %v3696_v24 = vpop.f32.mrf.mxu0 }
 0x457   : > { %v2286_v3 = vpop.f32.mrf.mxu1  ;;  %3509 = vmatpush.bf16.msrb.mxu2 %v3468_v45  ;;  %v3697_v53 = vadd.f32 %v3696_v24, %v14517_v41 }
 0x458   : > { %v2300_v42 = vadd.f32 %v2286_v3, %v2053_v34  ;;  %v12786_v34 = vld [vmem:[%s16391_s4 + $0x160] sm:$0xff] }
 0x459   : > { %4683 = vmatmul.bf16.vlgmr.msrb.gmra.mxu0 %v13544_v32  ;;  %v12767_v32 = vld [vmem:[%s16391_s4 + $0x148] sm:$0xff] }
 0x45a   : > { %10445 = vmatmul.msk.bf16.gmra.mxu1 %vm1213_vm5, %v12748_v38  ;;  %10567 = vmatmul.msk.bf16.vlgmr.msrb.gmra.mxu2 %vm1213_vm5, %v12766_v43 }
 0x45d   : > { %v2523_v19 = vpop.f32.mrf.mxu2 }
 0x45e   : > { %v2543_v7 = vadd.f32 %v2523_v19, %v2296_v11  ;;  %v3698_v17 = vpop.f32.mrf.mxu0  ;;  %v12806_v19 = vld [vmem:[%s16391_s4 + $0x180] sm:$0xff] }
 0x45f   : > { %v2288_v1 = vpop.f32.mrf.mxu1  ;;  %v3699_v20 = vadd.f32 %v3698_v17, %v14535_v39 }
 0x460   : > { %v2301_v29 = vadd.f32 %v2288_v1, %v2054_v51 }
 0x461   : > { %v3715_v23 = vpack.c.bf16 %v3699_v20, %v3697_v53 }
 0x465   : > { %v2525_v8 = vpop.f32.mrf.mxu2 }
 0x466   : > { %v2544_v47 = vadd.f32 %v2525_v8, %v2297_v18  ;;  %v3701_v12 = vpop.f32.mrf.mxu0 }
 0x467   : > { %v2291_v14 = vpop.f32.mrf.mxu1  ;;  %v3702_v22 = vadd.f32 %v3701_v12, %v3682_v6 }
 0x468   : > { %v2302_v62 = vadd.f32 %v2291_v14, %v2055_v57  ;;  %v4173_v57 = vpop.f32.mrf.mxu3  ;;  %v12789_v14 = vld [vmem:[%s16391_s4 + $0x178] sm:$0xff] }
 0x469   : > { %4688 = vmatmul.bf16.gmra.mxu0 %v13571_v59 }
 0x46a   : > { %10446 = vmatmul.msk.bf16.gmra.mxu1 %vm1213_vm5, %v12749_v40  ;;  %10568 = vmatmul.msk.bf16.gmra.mxu2 %vm1213_vm5, %v12767_v32 }
 0x46d   : > { %v2528_v35 = vpop.f32.mrf.mxu2 }
 0x46e   : > { %v2545_v63 = vadd.f32 %v2528_v35, %v2298_v54  ;;  %v3703_v60 = vpop.f32.mrf.mxu0  ;;  %v12787_v54 = vld [vmem:[%s16391_s4 + $0x168] sm:$0xff] }
 0x46f   : > { %v3704_v33 = vadd.f32 %v3703_v60, %v3684_v55  ;;  %v2293_v31 = vpop.f32.mrf.mxu1 }
 0x470   : > { %v2303_v58 = vadd.f32 %v2293_v31, %v2056_v4  ;;  %v4176_v4 = vpop.f32.mrf.mxu3 }
 0x471   : > { %v3716_v50 = vpack.c.bf16 %v3704_v33, %v3702_v22 }
 0x473   : > { %3755 = vmatpush.bf16.msrb.mxu1 %v3716_v50 }
 0x475   : > { %v2530_v59 = vpop.f32.mrf.mxu2 }
 0x476   : > { %v2546_v9 = vadd.f32 %v2530_v59, %v2299_v56  ;;  %v3943_v11 = vpop.f32.mrf.mxu0 }
 0x477   : > { %v2770_v36 = vpop.f32.mrf.mxu1  ;;  %3756 = vmatpush.bf16.msrb.mxu1 %v3715_v23  ;;  %v3944_v37 = vadd.f32 %v3943_v11, %v14559_v5 }
 0x478   : > { %v2790_v39 = vadd.f32 %v2770_v36, %v2543_v7  ;;  %v4178_v1 = vpop.f32.mrf.mxu3  ;;  %v12808_v36 = vld [vmem:[%s16391_s4 + $0x190] sm:$0xff] }
 0x47a   : > { %10569 = vmatmul.msk.bf16.gmra.mxu2 %vm1213_vm5, %v12768_v28  ;;  %10691 = vmatmul.msk.bf16.vlgmr.msrb.gmra.mxu1 %vm1213_vm5, %v12786_v34 }
 0x47d   : > { %v2533_v41 = vpop.f32.mrf.mxu2 }
 0x47e   : > { %v2547_v15 = vadd.f32 %v2533_v41, %v2300_v42  ;;  %v3945_v18 = vpop.f32.mrf.mxu0  ;;  %v12788_v42 = vld [vmem:[%s16391_s4 + $0x170] sm:$0xff] }
 0x47f   : > { %v2772_v6 = vpop.f32.mrf.mxu1  ;;  %v3946_v30 = vadd.f32 %v3945_v18, %v3926_v10 }
 0x480   : > { %v2791_v51 = vadd.f32 %v2772_v6, %v2544_v47  ;;  %v4418_v35 = vpop.f32.mrf.mxu3 }
 0x481   : > { %v3962_v24 = vpack.c.bf16 %v3946_v30, %v3944_v37 }
 0x485   : > { %v2535_v44 = vpop.f32.mrf.mxu2 }
 0x486   : > { %v2548_v48 = vadd.f32 %v2535_v44, %v2301_v29  ;;  %v3948_v49 = vpop.f32.mrf.mxu0 }
 0x487   : > { %v2775_v13 = vpop.f32.mrf.mxu1  ;;  %v3949_v0 = vadd.f32 %v3948_v49, %v3929_v2 }
 0x488   : > { %v2792_v55 = vadd.f32 %v2775_v13, %v2545_v63  ;;  %v4420_v59 = vpop.f32.mrf.mxu3 }
 0x48a   : > { %10570 = vmatmul.msk.bf16.gmra.mxu2 %vm1213_vm5, %v12769_v26  ;;  %10692 = vmatmul.msk.bf16.gmra.mxu1 %vm1213_vm5, %v12787_v54 }
 0x48d   : > { %v2538_v16 = vpop.f32.mrf.mxu2 }
 0x48e   : > { %v2549_v46 = vadd.f32 %v2538_v16, %v2302_v62  ;;  %v3950_v61 = vpop.f32.mrf.mxu0  ;;  %v12807_v62 = vld [vmem:[%s16391_s4 + $0x188] sm:$0xff] }
 0x48f   : > { %v3951_v56 = vadd.f32 %v3950_v61, %v3931_v25  ;;  %v2777_v21 = vpop.f32.mrf.mxu1 }
 0x490   : > { %v2793_v27 = vadd.f32 %v2777_v21, %v2546_v9  ;;  %v4423_v18 = vpop.f32.mrf.mxu3 }
 0x491   : > { %v3963_v45 = vpack.c.bf16 %v3951_v56, %v3949_v0 }
 0x493   : > { %4002 = vmatpush.bf16.msra.mxu2 %v3963_v45 }
 0x495   : > { %v2540_v38 = vpop.f32.mrf.mxu2 }
 0x496   : > { %v2550_v43 = vadd.f32 %v2540_v38, %v2303_v58  ;;  %v4190_v3 = vpop.f32.mrf.mxu0 }
 0x497   : > { %v2780_v7 = vpop.f32.mrf.mxu1  ;;  %4003 = vmatpush.bf16.msra.mxu2 %v3962_v24  ;;  %v4191_v25 = vadd.f32 %v4190_v3, %v4171_v52 }
 0x498   : > { %v2794_v17 = vadd.f32 %v2780_v7, %v2547_v15  ;;  %v4425_v26 = vpop.f32.mrf.mxu3  ;;  %v12828_v7 = vld [vmem:[%s16391_s4 + $0x1b0] sm:$0xff] }
 0x49a   : > { %10693 = vmatmul.msk.bf16.gmra.mxu1 %vm1213_vm5, %v12788_v42  ;;  %10815 = vmatmul.msk.bf16.vlgmr.msra.gmra.mxu2 %vm1213_vm5, %v12806_v19 }
 0x49d   : > { %v3017_v5 = vpop.f32.mrf.mxu2 }
 0x49e   : > { %v3037_v29 = vadd.f32 %v3017_v5, %v2790_v39  ;;  %v4192_v10 = vpop.f32.mrf.mxu0  ;;  %v12826_v39 = vld [vmem:[%s16391_s4 + $0x1a0] sm:$0xff] }
 0x49f   : > { %v2782_v8 = vpop.f32.mrf.mxu1  ;;  %v4193_v53 = vadd.f32 %v4192_v10, %v4173_v57  ;;  %v12827_v57 = vld [vmem:[%s16391_s4 + $0x1a8] sm:$0xff] }
 0x4a0   : > { %v2795_v47 = vadd.f32 %v2782_v8, %v2548_v48  ;;  %v4665_v45 = vpop.f32.mrf.mxu3 }
 0x4a1   : > { %v4209_v9 = vpack.c.bf16 %v4193_v53, %v4191_v25  ;;  %v4779_v53 = vld [vmem:[%s16392_s5 + $0x28] sm:$0xff] }
 0x4a5   : > { %v3019_v12 = vpop.f32.mrf.mxu2 }
 0x4a6   : > { %v3038_v40 = vadd.f32 %v3019_v12, %v2791_v51  ;;  %v4195_v32 = vpop.f32.mrf.mxu0  ;;  %v4774_v12 = vld [vmem:[%s16392_s5] sm:$0xff] }
 0x4a7   : > { %v2785_v2 = vpop.f32.mrf.mxu1  ;;  %v4196_v31 = vadd.f32 %v4195_v32, %v4176_v4  ;;  %4784 = vperm.xlu2 %13088, %v4774_v12  }
 0x4a8   : > { %v2796_v63 = vadd.f32 %v2785_v2, %v2549_v46 }
 0x4aa   : > { %10694 = vmatmul.msk.bf16.gmra.mxu1 %vm1213_vm5, %v12789_v14  ;;  %10816 = vmatmul.msk.bf16.gmra.mxu2 %vm1213_vm5, %v12807_v62 }
 0x4ad   : > { %v3022_v60 = vpop.f32.mrf.mxu2 }
 0x4ae   : > { %v3039_v22 = vadd.f32 %v3022_v60, %v2792_v55  ;;  %v4197_v33 = vpop.f32.mrf.mxu0  ;;  %v12809_v55 = vld [vmem:[%s16391_s4 + $0x198] sm:$0xff] }
 0x4af   : > { %v4198_v58 = vadd.f32 %v4197_v33, %v4178_v1  ;;  %v2787_v20 = vpop.f32.mrf.mxu1  ;;  %v4777_v60 = vld [vmem:[%s16392_s5 + $0x18] sm:$0xff] }
 0x4b0   : > { %v2797_v50 = vadd.f32 %v2787_v20, %v2550_v43  ;;  %4799 = vperm.xlu2 %13088, %v4777_v60  }
 0x4b1   : > { %v4210_v23 = vpack.c.bf16 %v4198_v58, %v4196_v31 }
 0x4b3   : > { %4249 = vmatpush.bf16.msra.mxu1 %v4210_v23 }
 0x4b5   : > { %v3024_v11 = vpop.f32.mrf.mxu2 }
 0x4b6   : > { %v3040_v28 = vadd.f32 %v3024_v11, %v2793_v27  ;;  %v4437_v34 = vpop.f32.mrf.mxu0 }
 0x4b7   : > { %v3264_v41 = vpop.f32.mrf.mxu1  ;;  %4250 = vmatpush.bf16.msra.mxu1 %v4209_v9  ;;  %v4438_v38 = vadd.f32 %v4437_v34, %v4418_v35  ;;  %v12829_v35 = vld [vmem:[%s16391_s4 + $0x1b8] sm:$0xff] }
 0x4b8   : > { %v3284_v15 = vadd.f32 %v3264_v41, %v3037_v29  ;;  %v4667_v29 = vpop.f32.mrf.mxu3  ;;  %4809 = vperm.xlu2 %13088, %v4779_v53   ;;  %v12848_v41 = vld [vmem:[%s16391_s4 + $0x1d0] sm:$0xff] }
 0x4ba   : > { %10817 = vmatmul.msk.bf16.gmra.mxu2 %vm1213_vm5, %v12808_v36  ;;  %10939 = vmatmul.msk.bf16.vlgmr.msra.gmra.mxu1 %vm1213_vm5, %v12826_v39 }
 0x4bd   : > { %v3027_v6 = vpop.f32.mrf.mxu2 }
 0x4be   : > { %v3041_v52 = vadd.f32 %v3027_v6, %v2794_v17  ;;  %v4439_v51 = vpop.f32.mrf.mxu0  ;;  %v12846_v17 = vld [vmem:[%s16391_s4 + $0x1c0] sm:$0xff] }
 0x4bf   : > { %v3266_v44 = vpop.f32.mrf.mxu1  ;;  %v4440_v4 = vadd.f32 %v4439_v51, %v4420_v59 }
 0x4c0   : > { %v14616_v48 = vadd.f32 %v3266_v44, %v3038_v40  ;;  %v4670_v14 = vpop.f32.mrf.mxu3 }
 0x4c1   : > { %v4456_v43 = vpack.c.bf16 %v4440_v4, %v4438_v38  ;;  %v12869_v38 = vld [vmem:[%s16391_s4 + $0x1f8] sm:$0xff] }
 0x4c5   : > { %v3029_v49 = vpop.f32.mrf.mxu2 }
 0x4c6   : > { %v3042_v54 = vadd.f32 %v3029_v49, %v2795_v47  ;;  %v4442_v13 = vpop.f32.mrf.mxu0  ;;  %v4781_v49 = vld [vmem:[%s16392_s5 + $0x38] sm:$0xff] }
 0x4c7   : > { %v3269_v16 = vpop.f32.mrf.mxu1  ;;  %v4443_v21 = vadd.f32 %v4442_v13, %v4423_v18  ;;  %v4780_v18 = vld [vmem:[%s16392_s5 + $0x30] sm:$0xff]  ;;  %v12849_v13 = vld [vmem:[%s16391_s4 + $0x1d8] sm:$0xff] }
 0x4c8   : > { %v3286_v46 = vadd.f32 %v3269_v16, %v3039_v22  ;;  %v4672_v58 = vpop.f32.mrf.mxu3  ;;  %4814 = vperm.xlu2 %13088, %v4780_v18  }
 0x4ca   : > { %10818 = vmatmul.msk.bf16.gmra.mxu2 %vm1213_vm5, %v12809_v55  ;;  %10940 = vmatmul.msk.bf16.gmra.mxu1 %vm1213_vm5, %v12827_v57  ;;  %v12867_v55 = vld [vmem:[%s16391_s4 + $0x1e8] sm:$0xff] }
 0x4cd   : > { %v3032_v61 = vpop.f32.mrf.mxu2 }
 0x4ce   : > { %v3043_v0 = vadd.f32 %v3032_v61, %v2796_v63  ;;  %v4444_v56 = vpop.f32.mrf.mxu0  ;;  %v12847_v63 = vld [vmem:[%s16391_s4 + $0x1c8] sm:$0xff] }
 0x4cf   : > { %v4445_v27 = vadd.f32 %v4444_v56, %v4425_v26  ;;  %v3271_v30 = vpop.f32.mrf.mxu1 }
 0x4d0   : > { %v14626_v37 = vadd.f32 %v3271_v30, %v3040_v28  ;;  %4819 = vperm.xlu2 %13088, %v4781_v49  }
 0x4d1   : > { %v4457_v24 = vpack.c.bf16 %v4445_v27, %v4443_v21  ;;  %v12868_v21 = vld [vmem:[%s16391_s4 + $0x1f0] sm:$0xff] }
 0x4d3   : > { %4496 = vmatpush.bf16.msrb.mxu2 %v4457_v24 }
 0x4d5   : > { %v3034_v3 = vpop.f32.mrf.mxu2 }
 0x4d6   : > { %v3044_v42 = vadd.f32 %v3034_v3, %v2797_v50  ;;  %v4684_v19 = vpop.f32.mrf.mxu0 }
 0x4d7   : > { %v3274_v5 = vpop.f32.mrf.mxu1  ;;  %4497 = vmatpush.bf16.msrb.mxu2 %v4456_v43  ;;  %v4685_v34 = vadd.f32 %v4684_v19, %v4665_v45 }
 0x4d8   : > { %v3288_v1 = vadd.f32 %v3274_v5, %v3041_v52 }
 0x4da   : > { %10941 = vmatmul.msk.bf16.gmra.mxu1 %vm1213_vm5, %v12828_v7  ;;  %11063 = vmatmul.msk.bf16.vlgmr.msrb.gmra.mxu2 %vm1213_vm5, %v12846_v17 }
 0x4dd   : > { %v3511_v10 = vpop.f32.mrf.mxu2 }
 0x4de   : > { %v3531_v8 = vadd.f32 %v3511_v10, %v3284_v15  ;;  %v4686_v47 = vpop.f32.mrf.mxu0  ;;  %v12866_v15 = vld [vmem:[%s16391_s4 + $0x1e0] sm:$0xff] }
 0x4df   : > { %v3276_v40 = vpop.f32.mrf.mxu1  ;;  %v4687_v11 = vadd.f32 %v4686_v47, %v4667_v29 }
 0x4e0   : > { %v14639_v32 = vadd.f32 %v3276_v40, %v3042_v54 }
 0x4e1   : > { %v4703_v36 = vpack.c.bf16 %v4687_v11, %v4685_v34 }
 0x4e5   : > { %v14641_v62 = vpop.f32.mrf.mxu2 }
 0x4e6   : > { %v4689_v2 = vpop.f32.mrf.mxu0  ;;  %v3532_v53 = vadd.f32 %v14641_v62, %v14616_v48 }
 0x4e7   : > { %v3279_v22 = vpop.f32.mrf.mxu1  ;;  %v4690_v23 = vadd.f32 %v4689_v2, %v4670_v14 }
 0x4e8   : > { %v3290_v33 = vadd.f32 %v3279_v22, %v3043_v0 }
 0x4ea   : > { %10942 = vmatmul.msk.bf16.gmra.mxu1 %vm1213_vm5, %v12829_v35  ;;  %11064 = vmatmul.msk.bf16.gmra.mxu2 %vm1213_vm5, %v12847_v63 }
 0x4ed   : > { %v3516_v31 = vpop.f32.mrf.mxu2 }
 0x4ee   : > { %v3533_v20 = vadd.f32 %v3516_v31, %v3286_v46  ;;  %v4691_v50 = vpop.f32.mrf.mxu0 }
 0x4ef   : > { %v4692_v59 = vadd.f32 %v4691_v50, %v4672_v58  ;;  %v3281_v25 = vpop.f32.mrf.mxu1 }
 0x4f0   : > { %v14657_v9 = vadd.f32 %v3281_v25, %v3044_v42 }
 0x4f1   : > { %v4704_v28 = vpack.c.bf16 %v4692_v59, %v4690_v23 }
 0x4f3   : > { %4743 = vmatpush.bf16.msrb.mxu1 %v4704_v28 }
 0x4f5   : > { %v14659_v39 = vpop.f32.mrf.mxu2 }
 0x4f7   : > { %v3758_v6 = vpop.f32.mrf.mxu1  ;;  %4744 = vmatpush.bf16.msrb.mxu1 %v4703_v36 }
 0x4f8   : > { %v3778_v52 = vadd.f32 %v3758_v6, %v3531_v8 }
 0x4fa   : > { %11065 = vmatmul.msk.bf16.gmra.mxu2 %vm1213_vm5, %v12848_v41  ;;  %11187 = vmatmul.msk.bf16.vlgmr.msrb.gmra.mxu1 %vm1213_vm5, %v12866_v15 }
 0x4fd   : > { %v3521_v51 = vpop.f32.mrf.mxu2 }
 0x4fe   : > { %v3535_v44 = vadd.f32 %v3521_v51, %v3288_v1 }
 0x4ff   : > { %v3760_v26 = vpop.f32.mrf.mxu1 }
 0x500   : > { %v3779_v25 = vadd.f32 %v3760_v26, %v3532_v53 }
 0x501   : > { %v4785_v28 = vpop.permute.xlu2 %4784 }
 0x505   : > { %v14675_v54 = vpop.f32.mrf.mxu2 }
 0x507   : > { %v3763_v57 = vpop.f32.mrf.mxu1 }
 0x508   : > { %v3780_v16 = vadd.f32 %v3763_v57, %v3533_v20 }
 0x50a   : > { %11066 = vmatmul.msk.bf16.gmra.mxu2 %vm1213_vm5, %v12849_v13  ;;  %11188 = vmatmul.msk.bf16.gmra.mxu1 %vm1213_vm5, %v12867_v55  ;;  %v3534_v55 = vadd.f32 %v14659_v39, %v14626_v37 }
 0x50d   : > { %v3526_v46 = vpop.f32.mrf.mxu2 }
 0x50e   : > { %v3537_v61 = vadd.f32 %v3526_v46, %v3290_v33 }
 0x50f   : > { %v3765_v0 = vpop.f32.mrf.mxu1 }
 0x515   : > { %v14685_v56 = vpop.f32.mrf.mxu2 }
 0x517   : > { %v3768_v27 = vpop.f32.mrf.mxu1 }
 0x518   : > { %v14690_v30 = vadd.f32 %v3768_v27, %v3535_v44  ;;  %v4790_v44 = vpop.permute.xlu0 %4789  ;;  %v4795_v27 = vpop.permute.xlu1 %4794 }
 0x51a   : > { %11189 = vmatmul.msk.bf16.gmra.mxu1 %vm1213_vm5, %v12868_v21 }
 0x51d   : > { %v4005_v45 = vpop.f32.mrf.mxu2 }
 0x51e   : > { %v4025_v58 = vadd.f32 %v4005_v45, %v3778_v52 }
 0x51f   : > { %v14693_v4 = vpop.f32.mrf.mxu1 }
 0x525   : > { %v4007_v24 = vpop.f32.mrf.mxu2 }
 0x526   : > { %v4026_v34 = vadd.f32 %v4007_v24, %v3779_v25 }
 0x527   : > { %v3773_v43 = vpop.f32.mrf.mxu1 }
 0x528   : > { %v3784_v3 = vadd.f32 %v3773_v43, %v3537_v61  ;;  %v3781_v61 = vadd.f32 %v3765_v0, %v3534_v55 }
 0x52a   : > { %11190 = vmatmul.msk.bf16.gmra.mxu1 %vm1213_vm5, %v12869_v38 }
 0x52d   : > { %v4010_v42 = vpop.f32.mrf.mxu2 }
 0x52e   : > { %v4027_v48 = vadd.f32 %v4010_v42, %v3780_v16 }
 0x52f   : > { %v14699_v19 = vpop.f32.mrf.mxu1 }
 0x535   : > { %v4012_v7 = vpop.f32.mrf.mxu2 }
 0x536   : > { %v4028_v45 = vadd.f32 %v4012_v7, %v3781_v61 }
 0x537   : > { %v4252_v17 = vpop.f32.mrf.mxu1 }
 0x538   : > { %v4272_v20 = vadd.f32 %v4252_v17, %v4025_v58 }
 0x53d   : > { %v4015_v5 = vpop.f32.mrf.mxu2 }
 0x53e   : > { %v4029_v37 = vadd.f32 %v4015_v5, %v14690_v30 }
 0x53f   : > { %v4254_v1 = vpop.f32.mrf.mxu1 }
 0x540   : > { %v4273_v41 = vadd.f32 %v4254_v1, %v4026_v34 }
 0x545   : > { %v14701_v29 = vpop.f32.mrf.mxu2 }
 0x547   : > { %v4257_v10 = vpop.f32.mrf.mxu1 }
 0x548   : > { %v4274_v49 = vadd.f32 %v4257_v10, %v4027_v48  ;;  %v4800_v10 = vpop.permute.xlu2 %4799 }
 0x54d   : > { %v4020_v8 = vpop.f32.mrf.mxu2 }
 0x54e   : > { %v4031_v47 = vadd.f32 %v4020_v8, %v3784_v3  ;;  %v3536_v8 = vadd.f32 %v14675_v54, %v14639_v32 }
 0x54f   : > { %v4259_v12 = vpop.f32.mrf.mxu1 }
 0x550   : > { %v4275_v16 = vadd.f32 %v4259_v12, %v4028_v45 }
 0x555   : > { %v14703_v40 = vpop.f32.mrf.mxu2 }
 0x557   : > { %v4262_v14 = vpop.f32.mrf.mxu1 }
 0x558   : > { %v4276_v0 = vadd.f32 %v4262_v14, %v4029_v37  ;;  %v4810_v14 = vpop.permute.xlu2 %4809 }
 0x55d   : > { %v4499_v2 = vpop.f32.mrf.mxu2 }
 0x55e   : > { %v4519_v23 = vadd.f32 %v4499_v2, %v4272_v20  ;;  %v3783_v2 = vadd.f32 %v14693_v4, %v3536_v8  ;;  %v3538_v4 = vadd.f32 %v14685_v56, %v14657_v9 }
 0x55f   : > { %v4264_v35 = vpop.f32.mrf.mxu1 }
 0x560   : > { %v4815_v53 = vpop.permute.xlu2 %4814 }
 0x565   : > { %v4501_v63 = vpop.f32.mrf.mxu2 }
 0x566   : > { %v4520_v6 = vadd.f32 %v4501_v63, %v4273_v41 }
 0x567   : > { %v4267_v60 = vpop.f32.mrf.mxu1 }
 0x568   : > { %v4278_v22 = vadd.f32 %v4267_v60, %v4031_v47  ;;  %v4805_v60 = vpop.permute.xlu0 %4804 }
 0x56d   : > { %v4504_v33 = vpop.f32.mrf.mxu2 }
 0x56e   : > { %v4521_v57 = vadd.f32 %v4504_v33, %v4274_v49 }
 0x56f   : > { %v14705_v31 = vpop.f32.mrf.mxu1 }
 0x575   : > { %v4506_v50 = vpop.f32.mrf.mxu2 }
 0x576   : > { %v4522_v3 = vadd.f32 %v4506_v50, %v4275_v16 }
 0x577   : > { %v4746_v59 = vpop.f32.mrf.mxu1 }
 0x578   : > { %v4766_v11 = vadd.f32 %v4746_v59, %v4519_v23  ;;  %v3785_v23 = vadd.f32 %v14699_v19, %v3538_v4  ;;  %v8420_v4 = vld [vmem:[%s16395_s8 + $0x40] sm:$0xff] }
 0x57a   : > { %v14709_v36 = vadd.f32 %v4785_v28, %v4766_v11  ;;  %v4032_v59 = vadd.f32 %v14703_v40, %v3785_v23  ;;  %v12873_v23 = vld [vmem:[%s16393_s6 + $0x18] sm:$0xff] }
 0x57b   : > { %5090 = vmatpush.bf16.msrb.mxu3 %v12873_v23 }
 0x57c   : > { %v4831_v15 = vsel %vm4830_vm6, %v14709_v36, 0.0  ;;  %v4279_v11 = vadd.f32 %v14705_v31, %v4032_v59  ;;  %v12872_v59 = vld [vmem:[%s16393_s6 + $0x10] sm:$0xff] }
 0x57d   : > { %v4509_v18 = vpop.f32.mrf.mxu2  ;;  %4832 = vadd.xlane.f32.xlu1 %v4831_v15  ;;  %v4820_v15 = vpop.permute.xlu2 %4819 }
 0x57e   : > { %v4523_v47 = vadd.f32 %v4509_v18, %v4276_v0 }
 0x57f   : > { %v4748_v52 = vpop.f32.mrf.mxu1  ;;  %5091 = vmatpush.bf16.msrb.mxu3 %v12872_v59 }
 0x580   : > { %v4767_v51 = vadd.f32 %v4748_v52, %v4520_v6  ;;  %v13161_v52 = vmov 64.0  }
 0x581   : > { %13099 = vrcp.f32 %v13161_v52 }
 0x582   : > { %v14713_v62 = vadd.f32 %v4790_v44, %v4767_v51 }
 0x584   : > { %v4834_v26 = vsel %vm4830_vm6, %v14713_v62, 0.0 }
 0x585   : > { %v4511_v13 = vpop.f32.mrf.mxu2  ;;  %4835 = vadd.xlane.f32.xlu0 %v4834_v26 }
 0x587   : > { %v4751_v46 = vpop.f32.mrf.mxu1  ;;  %v13100_v9 = vpop.eup %13099 }
 0x588   : > { %v4768_v21 = vadd.f32 %v4751_v46, %v4521_v57  ;;  %v4856_v56 = vmul.f32 64.0, %v13100_v9  ;;  %vm4860_vm7 = vweird.f32 %v13100_v9 }
 0x58a   : > { %v14719_v24 = vadd.f32 %v4795_v27, %v4768_v21  ;;  %v4857_v51 = vsub.f32 1.0, %v4856_v56 }
 0x58c   : > { %v4837_v38 = vsel %vm4830_vm6, %v14719_v24, 0.0  ;;  %v4858_v19 = vmul.f32 %v13100_v9, %v4857_v51 }
 0x58d   : > { %v4514_v43 = vpop.f32.mrf.mxu2  ;;  %4838 = vadd.xlane.f32.xlu2 %v4837_v38 }
 0x58e   : > { %v4525_v42 = vadd.f32 %v4514_v43, %v4278_v22  ;;  %v4030_v22 = vadd.f32 %v14701_v29, %v3783_v2  ;;  %v4859_v44 = vadd.f32 %v13100_v9, %v4858_v19 }
 0x58f   : > { %v4753_v17 = vpop.f32.mrf.mxu1 }
 0x590   : > { %v4769_v1 = vadd.f32 %v4753_v17, %v4522_v3  ;;  %v4277_v30 = vadd.f32 %v4264_v35, %v4030_v22  ;;  %v14743_v40 = vsel %vm4860_vm7, %v13100_v9, %v4859_v44 }
 0x592   : > { %v14724_v39 = vadd.f32 %v4800_v10, %v4769_v1  ;;  %v4524_v58 = vadd.f32 %v4511_v13, %v4277_v30 }
 0x594   : > { %v4840_v7 = vsel %vm4830_vm6, %v14724_v39, 0.0 }
 0x595   : > { %4841 = vadd.xlane.f32.xlu1 %v4840_v7  ;;  %v4516_v25 = vpop.f32.mrf.mxu2 }
 0x596   : > { %v4526_v28 = vadd.f32 %v4516_v25, %v4279_v11  ;;  %v12884_v25 = vld [vmem:[%s16393_s6 + $0x30] sm:$0xff] }
 0x597   : > { %v4756_v12 = vpop.f32.mrf.mxu1  ;;  %v8426_v11 = vld [vmem:[%s16395_s8 + $0x70] sm:$0xff] }
 0x598   : > { %v4770_v63 = vadd.f32 %v4756_v12, %v4523_v47 }
 0x59a   : > { %v14732_v33 = vadd.f32 %v4805_v60, %v4770_v63 }
 0x59c   : > { %v4843_v5 = vsel %vm4830_vm6, %v14732_v33, 0.0 }
 0x59d   : > { %4844 = vadd.xlane.f32.xlu0 %v4843_v5 }
 0x59f   : > { %v4758_v20 = vpop.f32.mrf.mxu1 }
 0x5a0   : > { %v4771_v50 = vadd.f32 %v4758_v20, %v4524_v58  ;;  %v8416_v58 = vld [vmem:[%s16395_s8 + $0x20] sm:$0xff]  ;;  %v8414_v20 = vld [vmem:[%s16395_s8 + $0x10] sm:$0xff] }
 0x5a2   : > { %v4827_v32 = vadd.f32 %v4810_v14, %v4771_v50  ;;  %v8412_v14 = vld [vmem:[%s16395_s8] sm:$0xff]  ;;  %v8419_v50 = vld [vmem:[%s16395_s8 + $0x38] sm:$0xff] }
 0x5a4   : > { %v4846_v54 = vsel %vm4830_vm6, %v4827_v32, 0.0 }
 0x5a5   : > { %4847 = vadd.xlane.f32.xlu1 %v4846_v54  ;;  %v8422_v54 = vld [vmem:[%s16395_s8 + $0x50] sm:$0xff] }
 0x5a7   : > { %v4761_v29 = vpop.f32.mrf.mxu1 }
 0x5a8   : > { %v4772_v35 = vadd.f32 %v4761_v29, %v4525_v42  ;;  %v8423_v29 = vld [vmem:[%s16395_s8 + $0x58] sm:$0xff] }
 0x5aa   : > { %v14756_v61 = vadd.f32 %v4815_v53, %v4772_v35  ;;  %v8425_v53 = vld [vmem:[%s16395_s8 + $0x68] sm:$0xff]  ;;  %v12885_v35 = vld [vmem:[%s16393_s6 + $0x38] sm:$0xff] }
 0x5ab   : > { %5172 = vmatpush.bf16.msra.mxu0 %v12885_v35  ;;  %13070 = vmatpush.bf16.msra.mxu1 %v12885_v35 }
 0x5ac   : > { %v4849_v27 = vsel %vm4830_vm6, %v14756_v61, 0.0 }
 0x5af   : > { %v4763_v34 = vpop.f32.mrf.mxu1  ;;  %5173 = vmatpush.bf16.msra.mxu0 %v12884_v25  ;;  %13071 = vmatpush.bf16.msra.mxu1 %v12884_v25 }
 0x5b0   : > { %v4773_v41 = vadd.f32 %v4763_v34, %v4526_v28  ;;  %v12871_v28 = vld [vmem:[%s16393_s6 + $0x8] sm:$0xff] }
 0x5b1   : > { %v12883_v34 = vld [vmem:[%s16393_s6 + $0x28] sm:$0xff]  ;;  %5092 = vmatpush.bf16.msrb.mxu3 %v12871_v28 }
 0x5b2   : > { %v4829_v18 = vadd.f32 %v4820_v15, %v4773_v41 }
 0x5b3   : > { %5174 = vmatpush.bf16.msra.mxu0 %v12883_v34  ;;  %13072 = vmatpush.bf16.msra.mxu1 %v12883_v34  ;;  %v8415_v34 = vld [vmem:[%s16395_s8 + $0x18] sm:$0xff] }
 0x5b4   : > { %v4852_v6 = vsel %vm4830_vm6, %v4829_v18, 0.0 }
 0x5b5   : > { %4853 = vadd.xlane.f32.xlu2 %v4852_v6  ;;  %v12882_v6 = vld [vmem:[%s16393_s6 + $0x20] sm:$0xff] }
 0x5b7   : > { %5175 = vmatpush.bf16.msra.mxu0 %v12882_v6  ;;  %13073 = vmatpush.bf16.msra.mxu1 %v12882_v6 }
 0x5f0   : > { %v4833_v48 = vpop.xlane.xlu1 %4832 }
 0x5f1   : > { %v4862_v31 = vmul.f32 %v14743_v40, %v4833_v48 }
 0x5f3   : > { %v14747_v49 = vsub.f32 %v14709_v36, %v4862_v31 }
 0x5f5   : > { %v4878_v26 = vmul.f32 %v14747_v49, %v14747_v49 }
 0x5f7   : > { %v4886_v13 = vsel %vm4830_vm6, %v4878_v26, 0.0 }
 0x5f8   : > { %v4836_v55 = vpop.xlane.xlu0 %4835  ;;  %4887 = vadd.xlane.f32.xlu0 %v4886_v13 }
 0x5f9   : > { %v4863_v57 = vmul.f32 %v14743_v40, %v4836_v55 }
 0x5fb   : > { %v14754_v46 = vsub.f32 %v14713_v62, %v4863_v57 }
 0x5fd   : > { %v4879_v21 = vmul.f32 %v14754_v46, %v14754_v46 }
 0x5ff   : > { %v4889_v36 = vsel %vm4830_vm6, %v4879_v21, 0.0 }
 0x600   : > { %4890 = vadd.xlane.f32.xlu1 %v4889_v36  ;;  %4850 = vadd.xlane.f32.xlu0 %v4849_v27  ;;  %v4839_v45 = vpop.xlane.xlu2 %4838 }
 0x601   : > { %v4864_v16 = vmul.f32 %v14743_v40, %v4839_v45 }
 0x603   : > { %v14765_v38 = vsub.f32 %v14719_v24, %v4864_v16 }
 0x605   : > { %v4880_v62 = vmul.f32 %v14765_v38, %v14765_v38 }
 0x607   : > { %v4892_v43 = vsel %vm4830_vm6, %v4880_v62, 0.0 }
 0x608   : > { %v4842_v3 = vpop.xlane.xlu1 %4841  ;;  %4893 = vadd.xlane.f32.xlu1 %v4892_v43 }
 0x609   : > { %v4865_v42 = vmul.f32 %v14743_v40, %v4842_v3 }
 0x60b   : > { %v14772_v17 = vsub.f32 %v14724_v39, %v4865_v42 }
 0x60d   : > { %v4881_v1 = vmul.f32 %v14772_v17, %v14772_v17 }
 0x60f   : > { %v4895_v10 = vsel %vm4830_vm6, %v4881_v1, 0.0 }
 0x610   : > { %v4845_v37 = vpop.xlane.xlu0 %4844  ;;  %4896 = vadd.xlane.f32.xlu0 %v4895_v10 }
 0x611   : > { %v4866_v24 = vmul.f32 %v14743_v40, %v4845_v37 }
 0x613   : > { %v14779_v0 = vsub.f32 %v14732_v33, %v4866_v24 }
 0x615   : > { %v4882_v7 = vmul.f32 %v14779_v0, %v14779_v0 }
 0x617   : > { %v4898_v8 = vsel %vm4830_vm6, %v4882_v7, 0.0 }
 0x618   : > { %v4848_v47 = vpop.xlane.xlu1 %4847  ;;  %4899 = vadd.xlane.f32.xlu2 %v4898_v8 }
 0x619   : > { %v4867_v39 = vmul.f32 %v14743_v40, %v4848_v47 }
 0x61b   : > { %v14785_v12 = vsub.f32 %v4827_v32, %v4867_v39  ;;  %v8417_v32 = vld [vmem:[%s16395_s8 + $0x28] sm:$0xff] }
 0x61d   : > { %v4883_v2 = vmul.f32 %v14785_v12, %v14785_v12 }
 0x61f   : > { %v4901_v63 = vsel %vm4830_vm6, %v4883_v2, 0.0 }
 0x620   : > { %4902 = vadd.xlane.f32.xlu1 %v4901_v63 }
 0x628   : > { %v4854_v60 = vpop.xlane.xlu2 %4853 }
 0x629   : > { %v4869_v22 = vmul.f32 %v14743_v40, %v4854_v60 }
 0x62b   : > { %v14791_v33 = vsub.f32 %v4829_v18, %v4869_v22  ;;  %v12870_v18 = vld [vmem:[%s16393_s6] sm:$0xff] }
 0x62c   : > { %5093 = vmatpush.bf16.msrb.mxu3 %v12870_v18 }
 0x62d   : > { %v4885_v30 = vmul.f32 %v14791_v33, %v14791_v33 }
 0x62f   : > { %v4907_v5 = vsel %vm4830_vm6, %v4885_v30, 0.0 }
 0x630   : > { %4908 = vadd.xlane.f32.xlu2 %v4907_v5 }
 0x639   : > { %8430 = vperm.xlu1 %13087, %v8412_v14  }
 0x641   : > { %8450 = vperm.xlu1 %13087, %v8416_v58  }
 0x648   : > { %8440 = vperm.xlu2 %13088, %v8414_v20  }
 0x649   : > { %8465 = vperm.xlu1 %13087, %v8419_v50  }
 0x650   : > { %8455 = vperm.xlu2 %13088, %v8417_v32  }
 0x651   : > { %8480 = vperm.xlu1 %13087, %v8422_v54  }
 0x658   : > { %8470 = vperm.xlu2 %13088, %v8420_v4  }
 0x659   : > { %8495 = vperm.xlu1 %13087, %v8425_v53  }
 0x660   : > { %8485 = vperm.xlu2 %13088, %v8423_v29  }
 0x668   : > { %8500 = vperm.xlu2 %13088, %v8426_v11  }
 0x66b   : > { %v4888_v41 = vpop.xlane.xlu0 %4887 }
 0x66c   : > { %v4910_v15 = vmul.f32 %v4888_v41, %v14743_v40 }
 0x66e   : > { %v4918_v52 = vadd.f32 1e-05, %v4910_v15 }
 0x670   : > { %13101 = vrsqrt.f32 %v4918_v52  ;;  %vm4932_vm9 = vweird.f32 %v4918_v52 }
 0x673   : > { %v4891_v9 = vpop.xlane.xlu1 %4890  ;;  %v4851_v56 = vpop.xlane.xlu0 %4850 }
 0x674   : > { %v4911_v51 = vmul.f32 %v4891_v9, %v14743_v40  ;;  %v4868_v19 = vmul.f32 %v14743_v40, %v4851_v56 }
 0x676   : > { %v13102_v44 = vpop.eup %13101  ;;  %v4919_v48 = vadd.f32 1e-05, %v4911_v51  ;;  %v14854_v31 = vsub.f32 %v14756_v61, %v4868_v19 }
 0x677   : > { %v4927_v26 = vmul.f32 %v13102_v44, %v4918_v52  ;;  %vm4933_vm8 = vweird.f32 %v13102_v44 }
 0x678   : > { %13103 = vrsqrt.f32 %v4919_v48  ;;  %v4884_v13 = vmul.f32 %v14854_v31, %v14854_v31  ;;  %vm4934_vm10 = vmor %vm4932_vm9, %vm4933_vm8  ;;  %vm4942_vm12 = vweird.f32 %v4919_v48 }
 0x679   : > { %v4928_v55 = vmul.f32 %v13102_v44, %v4927_v26 }
 0x67a   : > { %v4904_v57 = vsel %vm4830_vm6, %v4884_v13, 0.0 }
 0x67b   : > { %v4929_v21 = vmul.f32 0.5, %v4928_v55  ;;  %4905 = vadd.xlane.f32.xlu0 %v4904_v57  ;;  %v4894_v36 = vpop.xlane.xlu1 %4893 }
 0x67c   : > { %v4912_v27 = vmul.f32 %v4894_v36, %v14743_v40 }
 0x67d   : > { %v4930_v45 = vsub.f32 1.5, %v4929_v21 }
 0x67e   : > { %v13104_v16 = vpop.eup %13103  ;;  %v4920_v62 = vadd.f32 1e-05, %v4912_v27 }
 0x67f   : > { %v4931_v43 = vmul.f32 %v13102_v44, %v4930_v45  ;;  %v4937_v61 = vmul.f32 %v13104_v16, %v4919_v48  ;;  %vm4943_vm11 = vweird.f32 %v13104_v16 }
 0x680   : > { %13105 = vrsqrt.f32 %v4920_v62  ;;  %vm4944_vm13 = vmor %vm4942_vm12, %vm4943_vm11  ;;  %vm4952_vm1 = vweird.f32 %v4920_v62 }
 0x681   : > { %v4938_v3 = vmul.f32 %v13104_v16, %v4937_v61  ;;  %v4935_v42 = vsel %vm4934_vm10, %v13102_v44, %v4931_v43  ;;  %v8421_v43 = vld [vmem:[%s16395_s8 + $0x48] sm:$0xff] }
 0x682   : > { %v5006_v8 = vmul.f32 %v4935_v42, %v14747_v49  ;;  %v8413_v49 = vld [vmem:[%s16395_s8 + $0x8] sm:$0xff] }
 0x683   : > { %v4939_v1 = vmul.f32 0.5, %v4938_v3  ;;  %v4897_v10 = vpop.xlane.xlu0 %4896 }
 0x684   : > { %v4913_v37 = vmul.f32 %v4897_v10, %v14743_v40  ;;  %v5022_v22 = vmul.f32 0.2, %v5006_v8  ;;  %vm5014_vm14 = vcmp.ge.f32.partialorder %v5006_v8, 0.0 }
 0x685   : > { %v4940_v24 = vsub.f32 1.5, %v4939_v1 }
 0x686   : > { %v13106_v7 = vpop.eup %13105  ;;  %v4921_v47 = vadd.f32 1e-05, %v4913_v37  ;;  %v5030_v54 = vsel %vm5014_vm14, %v5006_v8, %v5022_v22 }
 0x687   : > { %v4941_v39 = vmul.f32 %v13104_v16, %v4940_v24  ;;  %v4947_v2 = vmul.f32 %v13106_v7, %v4920_v62  ;;  %vm4953_vm0 = vweird.f32 %v13106_v7 }
 0x688   : > { %13107 = vrsqrt.f32 %v4921_v47  ;;  %vm4954_vm2 = vmor %vm4952_vm1, %vm4953_vm0  ;;  %vm4962_vm4 = vweird.f32 %v4921_v47 }
 0x689   : > { %v4945_v63 = vsel %vm4944_vm13, %v13104_v16, %v4941_v39  ;;  %v4948_v60 = vmul.f32 %v13106_v7, %v4947_v2 }
 0x68a   : > { %v5007_v30 = vmul.f32 %v4945_v63, %v14754_v46 }
 0x68b   : > { %v4949_v5 = vmul.f32 0.5, %v4948_v60  ;;  %v4900_v14 = vpop.xlane.xlu2 %4899 }
 0x68c   : > { %vm5015_vm15 = vcmp.ge.f32.partialorder %v5007_v30, 0.0  ;;  %v5023_v58 = vmul.f32 0.2, %v5007_v30  ;;  %v4914_v20 = vmul.f32 %v4900_v14, %v14743_v40 }
 0x68d   : > { %v4950_v50 = vsub.f32 1.5, %v4949_v5 }
 0x68e   : > { %v13108_v32 = vpop.eup %13107  ;;  %v5031_v4 = vsel %vm5015_vm15, %v5007_v30, %v5023_v58  ;;  %v4922_v53 = vadd.f32 1e-05, %v4914_v20  ;;  %v12897_v30 = vld [vmem:[%s16393_s6 + $0x58] sm:$0xff]  ;;  %v12896_v58 = vld [vmem:[%s16393_s6 + $0x50] sm:$0xff] }
 0x68f   : > { %v14867_v29 = vpack.c.bf16 %v5031_v4, %v5030_v54  ;;  %v4951_v23 = vmul.f32 %v13106_v7, %v4950_v50  ;;  %v4957_v46 = vmul.f32 %v13108_v32, %v4921_v47  ;;  %8435 = vperm.xlu0 %13086, %v8413_v49   ;;  %vm4963_vm3 = vweird.f32 %v13108_v32  ;;  %5481 = vmatpush.bf16.msra.mxu3 %v12897_v30  ;;  %v12894_v4 = vld [vmem:[%s16393_s6 + $0x40] sm:$0xff] }
 0x690   : > { %13109 = vrsqrt.f32 %v4922_v53  ;;  %vm4964_vm5 = vmor %vm4962_vm4, %vm4963_vm3  ;;  %vm4972_vm10 = vweird.f32 %v4922_v53 }
 0x691   : > { %v4958_v35 = vmul.f32 %v13108_v32, %v4957_v46  ;;  %11207 = vmatmul.msk.bf16.vlgmr.msrb.gmra.mxu3 %vm4830_vm6, %v14867_v29  ;;  %11235 = vmatmul.msk.bf16.vlgmr.msra.gmra.mxu0 %vm4830_vm6, %v14867_v29  ;;  %v4955_v59 = vsel %vm4954_vm2, %v13106_v7, %v4951_v23  ;;  %v8424_v7 = vld [vmem:[%s16395_s8 + $0x60] sm:$0xff] }
 0x692   : > { %v5008_v18 = vmul.f32 %v4955_v59, %v14765_v38  ;;  %v8418_v38 = vld [vmem:[%s16395_s8 + $0x30] sm:$0xff] }
 0x693   : > { %v4959_v25 = vmul.f32 0.5, %v4958_v35  ;;  %v4903_v11 = vpop.xlane.xlu1 %4902  ;;  %5482 = vmatpush.bf16.msra.mxu3 %v12896_v58  ;;  %v12876_v58 = vld [vmem:[%s16394_s7 + $0x10] sm:$0xff] }
 0x694   : > { %v4915_v28 = vmul.f32 %v4903_v11, %v14743_v40  ;;  %v5024_v19 = vmul.f32 0.2, %v5008_v18  ;;  %vm5016_vm7 = vcmp.ge.f32.partialorder %v5008_v18, 0.0 }
 0x695   : > { %v4960_v41 = vsub.f32 1.5, %v4959_v25 }
 0x696   : > { %v13110_v15 = vpop.eup %13109  ;;  %v4923_v6 = vadd.f32 1e-05, %v4915_v28  ;;  %v5032_v57 = vsel %vm5016_vm7, %v5008_v18, %v5024_v19 }
 0x697   : > { %v4961_v52 = vmul.f32 %v13108_v32, %v4960_v41  ;;  %v4967_v9 = vmul.f32 %v13110_v15, %v4922_v53  ;;  %8445 = vperm.xlu0 %13086, %v8415_v34   ;;  %vm4973_vm9 = vweird.f32 %v13110_v15 }
 0x698   : > { %13111 = vrsqrt.f32 %v4923_v6  ;;  %vm4974_vm11 = vmor %vm4972_vm10, %vm4973_vm9  ;;  %vm4982_vm13 = vweird.f32 %v4923_v6  ;;  %vm8524_vm10 = vcmask 130048  }
 0x699   : > { %v4965_v56 = vsel %vm4964_vm5, %v13108_v32, %v4961_v52  ;;  %v4968_v51 = vmul.f32 %v13110_v15, %v4967_v9  ;;  %v12895_v32 = vld [vmem:[%s16393_s6 + $0x48] sm:$0xff] }
 0x69a   : > { %v5009_v44 = vmul.f32 %v4965_v56, %v14772_v17  ;;  %5483 = vmatpush.bf16.msra.mxu3 %v12895_v32  ;;  %v12907_v56 = vld [vmem:[%s16393_s6 + $0x68] sm:$0xff]  ;;  %v12877_v32 = vld [vmem:[%s16394_s7 + $0x18] sm:$0xff] }
 0x69b   : > { %v4969_v48 = vmul.f32 0.5, %v4968_v51  ;;  %v12906_v51 = vld [vmem:[%s16393_s6 + $0x60] sm:$0xff] }
 0x69c   : > { %vm5017_vm8 = vcmp.ge.f32.partialorder %v5009_v44, 0.0  ;;  %v5025_v26 = vmul.f32 0.2, %v5009_v44 }
 0x69d   : > { %v4970_v13 = vsub.f32 1.5, %v4969_v48 }
 0x69e   : > { %v13112_v55 = vpop.eup %13111  ;;  %v5033_v21 = vsel %vm5017_vm8, %v5009_v44, %v5025_v26  ;;  %5484 = vmatpush.bf16.msra.mxu3 %v12894_v4 }
 0x69f   : > { %v14882_v36 = vpack.c.bf16 %v5033_v21, %v5032_v57  ;;  %v4971_v27 = vmul.f32 %v13110_v15, %v4970_v13  ;;  %v4977_v45 = vmul.f32 %v13112_v55, %v4923_v6  ;;  %8460 = vperm.xlu0 %13086, %v8418_v38   ;;  %vm4983_vm12 = vweird.f32 %v13112_v55 }
 0x6a0   : > { %vm4984_vm14 = vmor %vm4982_vm13, %vm4983_vm12 }
 0x6a1   : > { %v4978_v17 = vmul.f32 %v13112_v55, %v4977_v45  ;;  %11208 = vmatmul.msk.bf16.gmra.mxu3 %vm4830_vm6, %v14882_v36  ;;  %11236 = vmatmul.msk.bf16.vlgmr.msra.gmra.mxu1 %vm4830_vm6, %v14882_v36  ;;  %v4975_v16 = vsel %vm4974_vm11, %v13110_v15, %v4971_v27 }
 0x6a2   : > { %v5010_v3 = vmul.f32 %v4975_v16, %v14779_v0  ;;  %v8427_v0 = vld [vmem:[%s16395_s8 + $0x78] sm:$0xff] }
 0x6a3   : > { %v4979_v62 = vmul.f32 0.5, %v4978_v17 }
 0x6a4   : > { %v5026_v10 = vmul.f32 0.2, %v5010_v3  ;;  %vm5018_vm15 = vcmp.ge.f32.partialorder %v5010_v3, 0.0 }
 0x6a5   : > { %v4980_v61 = vsub.f32 1.5, %v4979_v62 }
 0x6a6   : > { %v5034_v8 = vsel %vm5018_vm15, %v5010_v3, %v5026_v10 }
 0x6a7   : > { %v4981_v42 = vmul.f32 %v13112_v55, %v4980_v61  ;;  %8475 = vperm.xlu0 %13086, %v8421_v43  }
 0x6a9   : > { %v4985_v1 = vsel %vm4984_vm14, %v13112_v55, %v4981_v42 }
 0x6aa   : > { %v5011_v37 = vmul.f32 %v4985_v1, %v14785_v12  ;;  %v4909_v12 = vpop.xlane.xlu2 %4908 }
 0x6ab   : > { %v4917_v2 = vmul.f32 %v4909_v12, %v14743_v40  ;;  %v12874_v12 = vld [vmem:[%s16394_s7] sm:$0xff] }
 0x6ac   : > { %vm5019_vm0 = vcmp.ge.f32.partialorder %v5011_v37, 0.0  ;;  %v5027_v24 = vmul.f32 0.2, %v5011_v37 }
 0x6ad   : > { %v4925_v63 = vadd.f32 1e-05, %v4917_v2 }
 0x6ae   : > { %v5035_v47 = vsel %vm5019_vm0, %v5011_v37, %v5027_v24 }
 0x6af   : > { %v14896_v39 = vpack.c.bf16 %v5035_v47, %v5034_v8  ;;  %8490 = vperm.xlu0 %13086, %v8424_v7   ;;  %13113 = vrsqrt.f32 %v4925_v63  ;;  %vm5002_vm2 = vweird.f32 %v4925_v63  ;;  %v12886_v8 = vld [vmem:[%s16394_s7 + $0x40] sm:$0xff] }
 0x6b1   : > { %11209 = vmatmul.msk.bf16.gmra.mxu3 %vm4830_vm6, %v14896_v39  ;;  %11237 = vmatmul.msk.bf16.gmra.mxu1 %vm4830_vm6, %v14896_v39 }
 0x6b5   : > { %v13114_v60 = vpop.eup %13113 }
 0x6b6   : > { %v4997_v22 = vmul.f32 %v13114_v60, %v4925_v63  ;;  %vm5003_vm1 = vweird.f32 %v13114_v60 }
 0x6b7   : > { %8505 = vperm.xlu0 %13086, %v8427_v0   ;;  %vm5004_vm3 = vmor %vm5002_vm2, %vm5003_vm1 }
 0x6b8   : > { %v4998_v5 = vmul.f32 %v13114_v60, %v4997_v22  ;;  %v12875_v22 = vld [vmem:[%s16394_s7 + $0x8] sm:$0xff] }
 0x6ba   : > { %v4999_v50 = vmul.f32 0.5, %v4998_v5 }
 0x6bc   : > { %v5000_v54 = vsub.f32 1.5, %v4999_v50  ;;  %v12889_v50 = vld [vmem:[%s16394_s7 + $0x58] sm:$0xff] }
 0x6be   : > { %v5001_v23 = vmul.f32 %v13114_v60, %v5000_v54 }
 0x6c0   : > { %v5005_v35 = vsel %vm5004_vm3, %v13114_v60, %v5001_v23  ;;  %v12887_v60 = vld [vmem:[%s16394_s7 + $0x48] sm:$0xff] }
 0x6c1   : > { %v5013_v11 = vmul.f32 %v5005_v35, %v14791_v33  ;;  %v12909_v33 = vld [vmem:[%s16393_s6 + $0x78] sm:$0xff] }
 0x6c2   : > { %5693 = vmatpush.bf16.msrb.mxu3 %v12909_v33 }
 0x6c3   : > { %v5029_v41 = vmul.f32 0.2, %v5013_v11  ;;  %vm5021_vm8 = vcmp.ge.f32.partialorder %v5013_v11, 0.0 }
 0x6c5   : > { %v5037_v6 = vsel %vm5021_vm8, %v5013_v11, %v5029_v41  ;;  %v12879_v41 = vld [vmem:[%s16394_s7 + $0x28] sm:$0xff] }
 0x6ee   : > { %v4906_v14 = vpop.xlane.xlu0 %4905 }
 0x6ef   : > { %v4916_v20 = vmul.f32 %v4906_v14, %v14743_v40  ;;  %v12888_v14 = vld [vmem:[%s16394_s7 + $0x50] sm:$0xff] }
 0x6f1   : > { %v4924_v49 = vadd.f32 1e-05, %v4916_v20 }
 0x6f3   : > { %13115 = vrsqrt.f32 %v4924_v49  ;;  %vm4992_vm5 = vweird.f32 %v4924_v49 }
 0x6f9   : > { %v13116_v53 = vpop.eup %13115 }
 0x6fa   : > { %v4987_v46 = vmul.f32 %v13116_v53, %v4924_v49  ;;  %vm4993_vm4 = vweird.f32 %v13116_v53 }
 0x6fb   : > { %vm4994_vm7 = vmor %vm4992_vm5, %vm4993_vm4 }
 0x6fc   : > { %v4988_v40 = vmul.f32 %v13116_v53, %v4987_v46  ;;  %v12890_v46 = vld [vmem:[%s16394_s7 + $0x60] sm:$0xff] }
 0x6fe   : > { %v4989_v59 = vmul.f32 0.5, %v4988_v40 }
 0x700   : > { %v4990_v25 = vsub.f32 1.5, %v4989_v59  ;;  %v12878_v59 = vld [vmem:[%s16394_s7 + $0x20] sm:$0xff] }
 0x702   : > { %v4991_v28 = vmul.f32 %v13116_v53, %v4990_v25  ;;  %v12898_v25 = vld [vmem:[%s16394_s7 + $0x80] sm:$0xff] }
 0x704   : > { %v4995_v34 = vsel %vm4994_vm7, %v13116_v53, %v4991_v28 }
 0x705   : > { %v5012_v15 = vmul.f32 %v4995_v34, %v14854_v31  ;;  %v12908_v31 = vld [vmem:[%s16393_s6 + $0x70] sm:$0xff]  ;;  %v12891_v34 = vld [vmem:[%s16394_s7 + $0x68] sm:$0xff] }
 0x706   : > { %5694 = vmatpush.bf16.msrb.mxu3 %v12908_v31  ;;  %v12892_v31 = vld [vmem:[%s16394_s7 + $0x70] sm:$0xff] }
 0x707   : > { %vm5020_vm9 = vcmp.ge.f32.partialorder %v5012_v15, 0.0  ;;  %v5028_v18 = vmul.f32 0.2, %v5012_v15 }
 0x709   : > { %v5036_v52 = vsel %vm5020_vm9, %v5012_v15, %v5028_v18  ;;  %v12899_v15 = vld [vmem:[%s16394_s7 + $0x88] sm:$0xff] }
 0x70a   : > { %v14921_v9 = vpack.c.bf16 %v5037_v6, %v5036_v52  ;;  %5695 = vmatpush.bf16.msrb.mxu3 %v12907_v56  ;;  %v12921_v6 = vld [vmem:[%s16393_s6 + $0x98] sm:$0xff]  ;;  %v12920_v52 = vld [vmem:[%s16393_s6 + $0x90] sm:$0xff]  ;;  %v12919_v56 = vld [vmem:[%s16393_s6 + $0x88] sm:$0xff] }
 0x70c   : > { %11210 = vmatmul.msk.bf16.gmra.mxu3 %vm4830_vm6, %v14921_v9  ;;  %11238 = vmatmul.msk.bf16.gmra.mxu1 %vm4830_vm6, %v14921_v9 }
 0x70e   : > { %5696 = vmatpush.bf16.msrb.mxu3 %v12906_v51  ;;  %v5177_v16 = vpop.f32.mrf.mxu0  ;;  %v12918_v51 = vld [vmem:[%s16393_s6 + $0x80] sm:$0xff] }
 0x714   : > { %v5095_v19 = vpop.f32.mrf.mxu3 }
 0x716   : > { %v5179_v10 = vpop.f32.mrf.mxu0 }
 0x717   : > { %v5214_v24 = vpack.c.bf16 %v5179_v10, %v5177_v16  ;;  %v12902_v16 = vld [vmem:[%s16394_s7 + $0xa0] sm:$0xff]  ;;  %v12903_v10 = vld [vmem:[%s16394_s7 + $0xa8] sm:$0xff] }
 0x71c   : > { %11359 = vmatmul.msk.bf16.vlgmr.msra.gmra.mxu3 %vm4830_vm6, %v14867_v29  ;;  %v5097_v44 = vpop.f32.mrf.mxu3 }
 0x71d   : > { %v5131_v0 = vpack.c.bf16 %v5097_v44, %v5095_v19  ;;  %v12880_v19 = vld [vmem:[%s16394_s7 + $0x30] sm:$0xff] }
 0x71e   : > { %v5182_v48 = vpop.f32.mrf.mxu1  ;;  %v12900_v44 = vld [vmem:[%s16394_s7 + $0x90] sm:$0xff] }
 0x724   : > { %v5100_v26 = vpop.f32.mrf.mxu3 }
 0x726   : > { %v5184_v38 = vpop.f32.mrf.mxu1 }
 0x727   : > { %v5215_v1 = vpack.c.bf16 %v5184_v38, %v5182_v48  ;;  %v12893_v38 = vld [vmem:[%s16394_s7 + $0x78] sm:$0xff] }
 0x72c   : > { %11360 = vmatmul.msk.bf16.gmra.mxu3 %vm4830_vm6, %v14882_v36  ;;  %v5102_v13 = vpop.f32.mrf.mxu3 }
 0x72d   : > { %v5132_v47 = vpack.c.bf16 %v5102_v13, %v5100_v26  ;;  %v12881_v13 = vld [vmem:[%s16394_s7 + $0x38] sm:$0xff] }
 0x72e   : > { %v5187_v55 = vpop.f32.mrf.mxu1 }
 0x734   : > { %v5105_v57 = vpop.f32.mrf.mxu3 }
 0x736   : > { %v5189_v21 = vpop.f32.mrf.mxu1 }
 0x737   : > { %v5216_v61 = vpack.c.bf16 %v5189_v21, %v5187_v55  ;;  %v12901_v55 = vld [vmem:[%s16394_s7 + $0x98] sm:$0xff] }
 0x73c   : > { %11361 = vmatmul.msk.bf16.gmra.mxu3 %vm4830_vm6, %v14896_v39  ;;  %v5107_v27 = vpop.f32.mrf.mxu3 }
 0x73d   : > { %v5133_v37 = vpack.c.bf16 %v5107_v27, %v5105_v57 }
 0x74c   : > { %11362 = vmatmul.msk.bf16.gmra.mxu3 %vm4830_vm6, %v14921_v9 }
 0x75c   : > { %11443 = vmatmul.msk.bf16.vlgmr.msrb.gmra.mxu3 %vm4830_vm6, %v14867_v29 }
 0x76c   : > { %11444 = vmatmul.msk.bf16.gmra.mxu3 %vm4830_vm6, %v14882_v36 }
 0x77c   : > { %11445 = vmatmul.msk.bf16.gmra.mxu3 %vm4830_vm6, %v14896_v39 }
 0x789   : > { %v5192_v45 = vpop.f32.mrf.mxu1 }
 0x78c   : > { %11446 = vmatmul.msk.bf16.gmra.mxu3 %vm4830_vm6, %v14921_v9 }
 0x78f   : > { %v5110_v17 = vpop.f32.mrf.mxu3 }
 0x791   : > { %v5194_v62 = vpop.f32.mrf.mxu1 }
 0x792   : > { %v5217_v43 = vpack.c.bf16 %v5194_v62, %v5192_v45  ;;  %v12910_v62 = vld [vmem:[%s16394_s7 + $0xc0] sm:$0xff] }
 0x794   : > { %5286 = vmatpush.bf16.msra.mxu2 %v5217_v43 }
 0x797   : > { %v5112_v3 = vpop.f32.mrf.mxu3 }
 0x798   : > { %v5134_v42 = vpack.c.bf16 %v5112_v3, %v5110_v17  ;;  %5287 = vmatpush.bf16.msra.mxu2 %v5216_v61 }
 0x79a   : > { %5399 = vmatpush.bf16.msrb.mxu1 %v5134_v42 }
 0x79c   : > { %5288 = vmatpush.bf16.msra.mxu2 %v5215_v1 }
 0x79e   : > { %5400 = vmatpush.bf16.msrb.mxu1 %v5133_v37  ;;  %v12911_v37 = vld [vmem:[%s16394_s7 + $0xc8] sm:$0xff] }
 0x79f   : > { %v5486_v7 = vpop.f32.mrf.mxu3 }
 0x7a0   : > { %5289 = vmatpush.bf16.msra.mxu2 %v5214_v24 }
 0x7a2   : > { %5401 = vmatpush.bf16.msrb.mxu1 %v5132_v47  ;;  %v12933_v47 = vld [vmem:[%s16393_s6 + $0xb8] sm:$0xff] }
 0x7a3   : > { %11287 = vmatmul.msk.bf16.vlgmr.msra.gmra.mxu2 %vm4830_vm6, %v12886_v8 }
 0x7a6   : > { %5402 = vmatpush.bf16.msrb.mxu1 %v5131_v0  ;;  %v12932_v0 = vld [vmem:[%s16393_s6 + $0xb0] sm:$0xff] }
 0x7a7   : > { %v5488_v2 = vpop.f32.mrf.mxu3 }
 0x7a8   : > { %v5523_v35 = vpack.c.bf16 %v5488_v2, %v5486_v7 }
 0x7a9   : > { %11327 = vmatmul.msk.bf16.vlgmr.msrb.gmra.mxu1 %vm4830_vm6, %v12874_v12 }
 0x7aa   : > { %5905 = vmatpush.bf16.msra.mxu1 %v12921_v6 }
 0x7ae   : > { %5906 = vmatpush.bf16.msra.mxu1 %v12920_v52  ;;  %v12915_v52 = vld [vmem:[%s16394_s7 + $0xe8] sm:$0xff] }
 0x7af   : > { %v5491_v63 = vpop.f32.mrf.mxu3 }
 0x7b2   : > { %5907 = vmatpush.bf16.msra.mxu1 %v12919_v56 }
 0x7b3   : > { %11288 = vmatmul.msk.bf16.gmra.mxu2 %vm4830_vm6, %v12887_v60  ;;  %v12904_v60 = vld [vmem:[%s16394_s7 + $0xb0] sm:$0xff] }
 0x7b6   : > { %5908 = vmatpush.bf16.msra.mxu1 %v12918_v51 }
 0x7b7   : > { %v5493_v30 = vpop.f32.mrf.mxu3 }
 0x7b8   : > { %v5524_v40 = vpack.c.bf16 %v5493_v30, %v5491_v63  ;;  %v12931_v63 = vld [vmem:[%s16393_s6 + $0xa8] sm:$0xff]  ;;  %v12930_v30 = vld [vmem:[%s16393_s6 + $0xa0] sm:$0xff] }
 0x7b9   : > { %11328 = vmatmul.msk.bf16.gmra.mxu1 %vm4830_vm6, %v12875_v22  ;;  %v12912_v22 = vld [vmem:[%s16394_s7 + $0xd0] sm:$0xff] }
 0x7bf   : > { %v5496_v5 = vpop.f32.mrf.mxu3 }
 0x7c3   : > { %11289 = vmatmul.msk.bf16.gmra.mxu2 %vm4830_vm6, %v12888_v14 }
 0x7c7   : > { %v5498_v20 = vpop.f32.mrf.mxu3 }
 0x7c8   : > { %v5525_v53 = vpack.c.bf16 %v5498_v20, %v5496_v5 }
 0x7c9   : > { %11329 = vmatmul.msk.bf16.gmra.mxu1 %vm4830_vm6, %v12876_v58 }
 0x7cf   : > { %v5501_v49 = vpop.f32.mrf.mxu3 }
 0x7d3   : > { %11290 = vmatmul.msk.bf16.gmra.mxu2 %vm4830_vm6, %v12889_v50  ;;  %v12905_v50 = vld [vmem:[%s16394_s7 + $0xb8] sm:$0xff] }
 0x7d7   : > { %v5503_v54 = vpop.f32.mrf.mxu3 }
 0x7d8   : > { %v5526_v4 = vpack.c.bf16 %v5503_v54, %v5501_v49 }
 0x7d9   : > { %11330 = vmatmul.msk.bf16.gmra.mxu1 %vm4830_vm6, %v12877_v32  ;;  %v12913_v32 = vld [vmem:[%s16394_s7 + $0xd8] sm:$0xff] }
 0x7da   : > { %5595 = vmatpush.bf16.msrb.mxu0 %v5526_v4 }
 0x7de   : > { %5596 = vmatpush.bf16.msrb.mxu0 %v5525_v53 }
 0x7df   : > { %v5698_v23 = vpop.f32.mrf.mxu3 }
 0x7e2   : > { %5597 = vmatpush.bf16.msrb.mxu0 %v5524_v40  ;;  %v12914_v40 = vld [vmem:[%s16394_s7 + $0xe0] sm:$0xff] }
 0x7e3   : > { %11291 = vmatmul.msk.bf16.gmra.mxu2 %vm4830_vm6, %v12890_v46 }
 0x7e6   : > { %5598 = vmatpush.bf16.msrb.mxu0 %v5523_v35 }
 0x7e7   : > { %v5700_v11 = vpop.f32.mrf.mxu3 }
 0x7e8   : > { %v5735_v17 = vpack.c.bf16 %v5700_v11, %v5698_v23 }
 0x7e9   : > { %11331 = vmatmul.msk.bf16.gmra.mxu1 %vm4830_vm6, %v12878_v59  ;;  %11411 = vmatmul.msk.bf16.vlgmr.msrb.gmra.mxu0 %vm4830_vm6, %v12898_v25 }
 0x7ea   : > { %6117 = vmatpush.bf16.msra.mxu0 %v12933_v47 }
 0x7ee   : > { %6118 = vmatpush.bf16.msra.mxu0 %v12932_v0 }
 0x7ef   : > { %v5703_v28 = vpop.f32.mrf.mxu3 }
 0x7f2   : > { %6119 = vmatpush.bf16.msra.mxu0 %v12931_v63 }
 0x7f3   : > { %11292 = vmatmul.msk.bf16.gmra.mxu2 %vm4830_vm6, %v12891_v34 }
 0x7f6   : > { %6120 = vmatpush.bf16.msra.mxu0 %v12930_v30 }
 0x7f7   : > { %v5705_v18 = vpop.f32.mrf.mxu3 }
 0x7f8   : > { %v5736_v45 = vpack.c.bf16 %v5705_v18, %v5703_v28 }
 0x7f9   : > { %11332 = vmatmul.msk.bf16.gmra.mxu1 %vm4830_vm6, %v12879_v41  ;;  %11412 = vmatmul.msk.bf16.gmra.mxu0 %vm4830_vm6, %v12899_v15 }
 0x7ff   : > { %v5708_v33 = vpop.f32.mrf.mxu3 }
 0x803   : > { %11293 = vmatmul.msk.bf16.gmra.mxu2 %vm4830_vm6, %v12892_v31 }
 0x807   : > { %v5710_v48 = vpop.f32.mrf.mxu3 }
 0x808   : > { %v5737_v27 = vpack.c.bf16 %v5710_v48, %v5708_v33 }
 0x809   : > { %11333 = vmatmul.msk.bf16.gmra.mxu1 %vm4830_vm6, %v12880_v19  ;;  %11413 = vmatmul.msk.bf16.gmra.mxu0 %vm4830_vm6, %v12900_v44  ;;  %v12945_v44 = vld [vmem:[%s16393_s6 + $0xd8] sm:$0xff] }
 0x80a   : > { %6329 = vmatpush.bf16.msrb.mxu0 %v12945_v44 }
 0x80f   : > { %v5713_v26 = vpop.f32.mrf.mxu3 }
 0x813   : > { %11294 = vmatmul.msk.bf16.gmra.mxu2 %vm4830_vm6, %v12893_v38 }
 0x817   : > { %v5715_v57 = vpop.f32.mrf.mxu3 }
 0x818   : > { %v5738_v21 = vpack.c.bf16 %v5715_v57, %v5713_v26  ;;  %v12944_v26 = vld [vmem:[%s16393_s6 + $0xd0] sm:$0xff] }
 0x819   : > { %11334 = vmatmul.msk.bf16.gmra.mxu1 %vm4830_vm6, %v12881_v13  ;;  %11414 = vmatmul.msk.bf16.gmra.mxu0 %vm4830_vm6, %v12901_v55 }
 0x81a   : > { %5807 = vmatpush.bf16.msrb.mxu2 %v5738_v21  ;;  %6330 = vmatpush.bf16.msrb.mxu0 %v12944_v26  ;;  %v12943_v21 = vld [vmem:[%s16393_s6 + $0xc8] sm:$0xff] }
 0x81e   : > { %5808 = vmatpush.bf16.msrb.mxu2 %v5737_v27  ;;  %6331 = vmatpush.bf16.msrb.mxu0 %v12943_v21  ;;  %v12916_v27 = vld [vmem:[%s16394_s7 + $0xf0] sm:$0xff] }
 0x822   : > { %5809 = vmatpush.bf16.msrb.mxu2 %v5736_v45  ;;  %v12942_v45 = vld [vmem:[%s16393_s6 + $0xc0] sm:$0xff] }
 0x823   : > { %6332 = vmatpush.bf16.msrb.mxu0 %v12942_v45 }
 0x826   : > { %v5404_v43 = vpop.f32.mrf.mxu1  ;;  %5810 = vmatpush.bf16.msrb.mxu2 %v5735_v17  ;;  %v5291_v61 = vpop.f32.mrf.mxu2 }
 0x827   : > { %v5405_v3 = vadd.f32 %v5404_v43, %v5291_v61 }
 0x829   : > { %11415 = vmatmul.msk.bf16.gmra.mxu0 %vm4830_vm6, %v12902_v16  ;;  %11495 = vmatmul.msk.bf16.vlgmr.msrb.gmra.mxu2 %vm4830_vm6, %v12910_v62 }
 0x82a   : > { %11527 = vmatmul.msk.bf16.vlgmr.msra.gmra.mxu1 %vm4830_vm6, %v14867_v29 }
 0x82e   : > { %v5406_v42 = vpop.f32.mrf.mxu1  ;;  %v5293_v1 = vpop.f32.mrf.mxu2 }
 0x82f   : > { %v5407_v34 = vadd.f32 %v5406_v42, %v5293_v1 }
 0x836   : > { %v5409_v24 = vpop.f32.mrf.mxu1  ;;  %v5296_v7 = vpop.f32.mrf.mxu2 }
 0x837   : > { %v5410_v8 = vadd.f32 %v5409_v24, %v5296_v7  ;;  %v12917_v24 = vld [vmem:[%s16394_s7 + $0xf8] sm:$0xff] }
 0x839   : > { %11416 = vmatmul.msk.bf16.gmra.mxu0 %vm4830_vm6, %v12903_v10  ;;  %11496 = vmatmul.msk.bf16.gmra.mxu2 %vm4830_vm6, %v12911_v37 }
 0x83a   : > { %11528 = vmatmul.msk.bf16.gmra.mxu1 %vm4830_vm6, %v14882_v36 }
 0x83e   : > { %v5411_v12 = vpop.f32.mrf.mxu1  ;;  %v5298_v2 = vpop.f32.mrf.mxu2 }
 0x83f   : > { %v5412_v48 = vadd.f32 %v5411_v12, %v5298_v2 }
 0x846   : > { %v5414_v5 = vpop.f32.mrf.mxu1  ;;  %v5301_v14 = vpop.f32.mrf.mxu2 }
 0x847   : > { %v5415_v58 = vadd.f32 %v5414_v5, %v5301_v14 }
 0x849   : > { %11417 = vmatmul.msk.bf16.gmra.mxu0 %vm4830_vm6, %v12904_v60  ;;  %11497 = vmatmul.msk.bf16.gmra.mxu2 %vm4830_vm6, %v12912_v22 }
 0x84a   : > { %11529 = vmatmul.msk.bf16.gmra.mxu1 %vm4830_vm6, %v14896_v39 }
 0x84e   : > { %v5416_v20 = vpop.f32.mrf.mxu1  ;;  %v5303_v49 = vpop.f32.mrf.mxu2 }
 0x856   : > { %v5419_v54 = vpop.f32.mrf.mxu1  ;;  %v5306_v4 = vpop.f32.mrf.mxu2 }
 0x857   : > { %v5420_v53 = vadd.f32 %v5419_v54, %v5306_v4 }
 0x859   : > { %11418 = vmatmul.msk.bf16.gmra.mxu0 %vm4830_vm6, %v12905_v50  ;;  %11498 = vmatmul.msk.bf16.gmra.mxu2 %vm4830_vm6, %v12913_v32 }
 0x85a   : > { %11530 = vmatmul.msk.bf16.gmra.mxu1 %vm4830_vm6, %v14921_v9 }
 0x85e   : > { %v5421_v23 = vpop.f32.mrf.mxu1  ;;  %v5308_v46 = vpop.f32.mrf.mxu2 }
 0x85f   : > { %v5422_v2 = vadd.f32 %v5421_v23, %v5308_v46 }
 0x866   : > { %v5424_v35 = vpop.f32.mrf.mxu1  ;;  %v5600_v59 = vpop.f32.mrf.mxu0 }
 0x867   : > { %v5640_v25 = vadd.f32 %v5600_v59, %v5405_v3  ;;  %v5311_v11 = vpop.f32.mrf.mxu2  ;;  %v5417_v3 = vadd.f32 %v5416_v20, %v5303_v49 }
 0x868   : > { %v5425_v28 = vadd.f32 %v5424_v35, %v5311_v11 }
 0x869   : > { %11499 = vmatmul.msk.bf16.gmra.mxu2 %vm4830_vm6, %v12914_v40  ;;  %11611 = vmatmul.msk.bf16.vlgmr.msra.gmra.mxu0 %vm4830_vm6, %v14867_v29 }
 0x86e   : > { %v15105_v41 = vpop.f32.mrf.mxu1  ;;  %v5602_v15 = vpop.f32.mrf.mxu0 }
 0x86f   : > { %v15107_v18 = vadd.f32 %v5602_v15, %v5407_v34  ;;  %v15109_v6 = vpop.f32.mrf.mxu2 }
 0x876   : > { %v5429_v33 = vpop.f32.mrf.mxu1  ;;  %v5605_v31 = vpop.f32.mrf.mxu0 }
 0x877   : > { %v5642_v56 = vadd.f32 %v5605_v31, %v5410_v8  ;;  %v5316_v51 = vpop.f32.mrf.mxu2 }
 0x878   : > { %v5430_v19 = vadd.f32 %v5429_v33, %v5316_v51 }
 0x879   : > { %11500 = vmatmul.msk.bf16.gmra.mxu2 %vm4830_vm6, %v12915_v52  ;;  %11612 = vmatmul.msk.bf16.gmra.mxu0 %vm4830_vm6, %v14882_v36 }
 0x87e   : > { %v15123_v38 = vpop.f32.mrf.mxu1  ;;  %v5607_v13 = vpop.f32.mrf.mxu0 }
 0x87f   : > { %16399 = vst [vmem:[#allocation3_spill] sm:$0xff] %v15123_v38  ;;  %v15125_v55 = vadd.f32 %v5607_v13, %v5412_v48  ;;  %v15127_v57 = vpop.f32.mrf.mxu2 }
 0x880   : > { %16400 = vst [vmem:[#allocation4_spill] sm:$0xff] %v15127_v57 }
 0x886   : > { %v5434_v17 = vpop.f32.mrf.mxu1  ;;  %v5610_v16 = vpop.f32.mrf.mxu0 }
 0x887   : > { %v5644_v62 = vadd.f32 %v5610_v16, %v5415_v58  ;;  %v5321_v43 = vpop.f32.mrf.mxu2 }
 0x888   : > { %v5435_v61 = vadd.f32 %v5434_v17, %v5321_v43 }
 0x889   : > { %11501 = vmatmul.msk.bf16.gmra.mxu2 %vm4830_vm6, %v12916_v27  ;;  %11613 = vmatmul.msk.bf16.gmra.mxu0 %vm4830_vm6, %v14896_v39 }
 0x88e   : > { %v15141_v42 = vpop.f32.mrf.mxu1  ;;  %v5612_v1 = vpop.f32.mrf.mxu0 }
 0x88f   : > { %16401 = vst [vmem:[#allocation5_spill] sm:$0xff] %v15141_v42  ;;  %v15143_v10 = vadd.f32 %v5612_v1, %v5417_v3  ;;  %v15145_v37 = vpop.f32.mrf.mxu2  ;;  %v12922_v1 = vld [vmem:[%s16394_s7 + $0x100] sm:$0xff] }
 0x890   : > { %16402 = vst [vmem:[#allocation6_spill] sm:$0xff] %v15145_v37 }
 0x896   : > { %v5439_v7 = vpop.f32.mrf.mxu1  ;;  %v5615_v8 = vpop.f32.mrf.mxu0 }
 0x897   : > { %v5646_v47 = vadd.f32 %v5615_v8, %v5420_v53  ;;  %v5326_v0 = vpop.f32.mrf.mxu2 }
 0x898   : > { %v5440_v12 = vadd.f32 %v5439_v7, %v5326_v0 }
 0x899   : > { %11502 = vmatmul.msk.bf16.gmra.mxu2 %vm4830_vm6, %v12917_v24  ;;  %11614 = vmatmul.msk.bf16.gmra.mxu0 %vm4830_vm6, %v14921_v9 }
 0x89e   : > { %v15153_v63 = vpop.f32.mrf.mxu1  ;;  %v5617_v60 = vpop.f32.mrf.mxu0 }
 0x89f   : > { %16403 = vst [vmem:[#allocation7_spill] sm:$0xff] %v15153_v63  ;;  %v15155_v22 = vadd.f32 %v5617_v60, %v5422_v2  ;;  %v15157_v30 = vpop.f32.mrf.mxu2 }
 0x8a0   : > { %16404 = vst [vmem:[#allocation8_spill] sm:$0xff] %v15157_v30 }
 0x8a6   : > { %v5620_v5 = vpop.f32.mrf.mxu0 }
 0x8a7   : > { %v5648_v14 = vadd.f32 %v5620_v5, %v5425_v28  ;;  %v5910_v58 = vpop.f32.mrf.mxu1 }
 0x8a9   : > { %11695 = vmatmul.msk.bf16.vlgmr.msrb.gmra.mxu0 %vm4830_vm6, %v14867_v29 }
 0x8ac   : > { %v5812_v20 = vpop.f32.mrf.mxu2 }
 0x8ad   : > { %v15161_v49 = vadd.f32 %v5812_v20, %v5640_v25  ;;  %v12924_v20 = vld [vmem:[%s16394_s7 + $0x110] sm:$0xff] }
 0x8ae   : > { %v15163_v50 = vpop.f32.mrf.mxu0 }
 0x8af   : > { %16405 = vst [vmem:[#allocation9_spill] sm:$0xff] %v15163_v50  ;;  %v5912_v32 = vpop.f32.mrf.mxu1 }
 0x8b0   : > { %v5947_v43 = vpack.c.bf16 %v5912_v32, %v5910_v58 }
 0x8b4   : > { %v15165_v54 = vpop.f32.mrf.mxu2 }
 0x8b6   : > { %v5625_v4 = vpop.f32.mrf.mxu0 }
 0x8b7   : > { %v5650_v53 = vadd.f32 %v5625_v4, %v5430_v19  ;;  %v5915_v23 = vpop.f32.mrf.mxu1 }
 0x8b9   : > { %11696 = vmatmul.msk.bf16.gmra.mxu0 %vm4830_vm6, %v14882_v36 }
 0x8bc   : > { %v5817_v46 = vpop.f32.mrf.mxu2 }
 0x8bd   : > { %v15169_v40 = vadd.f32 %v5817_v46, %v5642_v56 }
 0x8be   : > { %v15171_v35 = vpop.f32.mrf.mxu0 }
 0x8bf   : > { %16406 = vst [vmem:[#allocation10_spill] sm:$0xff] %v15171_v35  ;;  %v5917_v59 = vpop.f32.mrf.mxu1 }
 0x8c4   : > { %v15173_v11 = vpop.f32.mrf.mxu2 }
 0x8c6   : > { %v5630_v25 = vpop.f32.mrf.mxu0 }
 0x8c7   : > { %v5652_v28 = vadd.f32 %v5630_v25, %v5435_v61  ;;  %v5920_v34 = vpop.f32.mrf.mxu1 }
 0x8c9   : > { %11697 = vmatmul.msk.bf16.gmra.mxu0 %vm4830_vm6, %v14896_v39 }
 0x8cc   : > { %v5822_v15 = vpop.f32.mrf.mxu2 }
 0x8cd   : > { %v15177_v52 = vadd.f32 %v5822_v15, %v5644_v62  ;;  %v5948_v62 = vpack.c.bf16 %v5917_v59, %v5915_v23  ;;  %v12925_v59 = vld [vmem:[%s16394_s7 + $0x118] sm:$0xff] }
 0x8ce   : > { %v15179_v33 = vpop.f32.mrf.mxu0 }
 0x8cf   : > { %16407 = vst [vmem:[#allocation11_spill] sm:$0xff] %v15179_v33  ;;  %v5922_v31 = vpop.f32.mrf.mxu1 }
 0x8d0   : > { %v5949_v45 = vpack.c.bf16 %v5922_v31, %v5920_v34 }
 0x8d4   : > { %v15181_v51 = vpop.f32.mrf.mxu2 }
 0x8d6   : > { %v5635_v56 = vpop.f32.mrf.mxu0 }
 0x8d7   : > { %v5654_v19 = vadd.f32 %v5635_v56, %v5440_v12  ;;  %v5925_v44 = vpop.f32.mrf.mxu1  ;;  %v12923_v12 = vld [vmem:[%s16394_s7 + $0x108] sm:$0xff] }
 0x8d9   : > { %11698 = vmatmul.msk.bf16.gmra.mxu0 %vm4830_vm6, %v14921_v9 }
 0x8dc   : > { %v5827_v48 = vpop.f32.mrf.mxu2 }
 0x8dd   : > { %v15185_v26 = vadd.f32 %v5827_v48, %v5646_v47 }
 0x8de   : > { %v15187_v13 = vpop.f32.mrf.mxu0 }
 0x8df   : > { %16408 = vst [vmem:[#allocation12_spill] sm:$0xff] %v15187_v13  ;;  %v5927_v21 = vpop.f32.mrf.mxu1 }
 0x8e0   : > { %v5950_v27 = vpack.c.bf16 %v5927_v21, %v5925_v44  ;;  %v12926_v44 = vld [vmem:[%s16394_s7 + $0x120] sm:$0xff] }
 0x8e2   : > { %6019 = vmatpush.bf16.msra.mxu3 %v5950_v27  ;;  %v12935_v27 = vld [vmem:[%s16394_s7 + $0x148] sm:$0xff] }
 0x8e4   : > { %v15189_v17 = vpop.f32.mrf.mxu2 }
 0x8e6   : > { %6020 = vmatpush.bf16.msra.mxu3 %v5949_v45  ;;  %v6122_v16 = vpop.f32.mrf.mxu0  ;;  %v12927_v45 = vld [vmem:[%s16394_s7 + $0x128] sm:$0xff] }
 0x8ea   : > { %6021 = vmatpush.bf16.msra.mxu3 %v5948_v62  ;;  %v12957_v62 = vld [vmem:[%s16393_s6 + $0xf8] sm:$0xff] }
 0x8ec   : > { %v5832_v61 = vpop.f32.mrf.mxu2 }
 0x8ed   : > { %v15191_v3 = vadd.f32 %v5832_v61, %v5648_v14 }
 0x8ee   : > { %6022 = vmatpush.bf16.msra.mxu3 %v5947_v43  ;;  %v6124_v24 = vpop.f32.mrf.mxu0  ;;  %v12956_v43 = vld [vmem:[%s16393_s6 + $0xf0] sm:$0xff] }
 0x8ef   : > { %v6159_v56 = vpack.c.bf16 %v6124_v24, %v6122_v16  ;;  %v12936_v24 = vld [vmem:[%s16394_s7 + $0x150] sm:$0xff] }
 0x8f1   : > { %11579 = vmatmul.msk.bf16.vlgmr.msra.gmra.mxu3 %vm4830_vm6, %v12922_v1  ;;  %v12955_v1 = vld [vmem:[%s16393_s6 + $0xe8] sm:$0xff] }
 0x8f2   : > { %6541 = vmatpush.bf16.msrb.mxu3 %v12957_v62  ;;  %v12948_v62 = vld [vmem:[%s16394_s7 + $0x190] sm:$0xff] }
 0x8f4   : > { %v15197_v7 = vpop.f32.mrf.mxu2 }
 0x8f5   : > { %16409 = vst [vmem:[#allocation13_spill] sm:$0xff] %v15197_v7 }
 0x8f6   : > { %v6127_v8 = vpop.f32.mrf.mxu0  ;;  %6542 = vmatpush.bf16.msrb.mxu3 %v12956_v43 }
 0x8fa   : > { %6543 = vmatpush.bf16.msrb.mxu3 %v12955_v1 }
 0x8fc   : > { %v5837_v47 = vpop.f32.mrf.mxu2 }
 0x8fd   : > { %v15199_v0 = vadd.f32 %v5837_v47, %v5650_v53  ;;  %v12928_v47 = vld [vmem:[%s16394_s7 + $0x130] sm:$0xff] }
 0x8fe   : > { %v6129_v2 = vpop.f32.mrf.mxu0 }
 0x8ff   : > { %v6160_v31 = vpack.c.bf16 %v6129_v2, %v6127_v8  ;;  %v12954_v8 = vld [vmem:[%s16393_s6 + $0xe0] sm:$0xff] }
 0x900   : > { %6544 = vmatpush.bf16.msrb.mxu3 %v12954_v8  ;;  %v12949_v8 = vld [vmem:[%s16394_s7 + $0x198] sm:$0xff] }
 0x901   : > { %11580 = vmatmul.msk.bf16.gmra.mxu3 %vm4830_vm6, %v12923_v12 }
 0x904   : > { %v15205_v60 = vpop.f32.mrf.mxu2 }
 0x905   : > { %16410 = vst [vmem:[#allocation14_spill] sm:$0xff] %v15205_v60 }
 0x906   : > { %v6132_v5 = vpop.f32.mrf.mxu0 }
 0x90c   : > { %v5842_v14 = vpop.f32.mrf.mxu2 }
 0x90d   : > { %v15207_v58 = vadd.f32 %v5842_v14, %v5652_v28  ;;  %v12929_v14 = vld [vmem:[%s16394_s7 + $0x138] sm:$0xff] }
 0x90e   : > { %v6134_v32 = vpop.f32.mrf.mxu0 }
 0x90f   : > { %v6161_v34 = vpack.c.bf16 %v6134_v32, %v6132_v5  ;;  %v12937_v5 = vld [vmem:[%s16394_s7 + $0x158] sm:$0xff] }
 0x911   : > { %11581 = vmatmul.msk.bf16.gmra.mxu3 %vm4830_vm6, %v12924_v20 }
 0x914   : > { %v15213_v4 = vpop.f32.mrf.mxu2 }
 0x915   : > { %16411 = vst [vmem:[#allocation15_spill] sm:$0xff] %v15213_v4 }
 0x916   : > { %v6137_v53 = vpop.f32.mrf.mxu0 }
 0x91c   : > { %v5847_v23 = vpop.f32.mrf.mxu2 }
 0x91d   : > { %v15215_v46 = vadd.f32 %v5847_v23, %v5654_v19  ;;  %v12934_v19 = vld [vmem:[%s16394_s7 + $0x140] sm:$0xff] }
 0x91e   : > { %v6139_v25 = vpop.f32.mrf.mxu0 }
 0x91f   : > { %v6162_v28 = vpack.c.bf16 %v6139_v25, %v6137_v53  ;;  %v12938_v25 = vld [vmem:[%s16394_s7 + $0x160] sm:$0xff] }
 0x921   : > { %11582 = vmatmul.msk.bf16.gmra.mxu3 %vm4830_vm6, %v12925_v59  ;;  %6231 = vmatpush.bf16.msrb.mxu1 %v6162_v28  ;;  %v12946_v28 = vld [vmem:[%s16394_s7 + $0x180] sm:$0xff] }
 0x925   : > { %6232 = vmatpush.bf16.msrb.mxu1 %v6161_v34 }
 0x926   : > { %v6334_v15 = vpop.f32.mrf.mxu0 }
 0x929   : > { %6233 = vmatpush.bf16.msrb.mxu1 %v6160_v31 }
 0x92d   : > { %6234 = vmatpush.bf16.msrb.mxu1 %v6159_v56  ;;  %v12939_v56 = vld [vmem:[%s16394_s7 + $0x168] sm:$0xff] }
 0x92e   : > { %v6336_v48 = vpop.f32.mrf.mxu0 }
 0x92f   : > { %v6371_v59 = vpack.c.bf16 %v6336_v48, %v6334_v15  ;;  %v12968_v48 = vld [vmem:[%s16393_s6 + $0x110] sm:$0xff] }
 0x930   : > { %11663 = vmatmul.msk.bf16.vlgmr.msrb.gmra.mxu1 %vm4830_vm6, %v12934_v19  ;;  %v12947_v19 = vld [vmem:[%s16394_s7 + $0x188] sm:$0xff] }
 0x931   : > { %11583 = vmatmul.msk.bf16.gmra.mxu3 %vm4830_vm6, %v12926_v44  ;;  %v12969_v44 = vld [vmem:[%s16393_s6 + $0x118] sm:$0xff] }
 0x932   : > { %6753 = vmatpush.bf16.msra.mxu1 %v12969_v44 }
 0x936   : > { %v6339_v21 = vpop.f32.mrf.mxu0  ;;  %6754 = vmatpush.bf16.msra.mxu1 %v12968_v48  ;;  %v12978_v48 = vld [vmem:[%s16393_s6 + $0x120] sm:$0xff] }
 0x93e   : > { %v6341_v16 = vpop.f32.mrf.mxu0 }
 0x93f   : > { %v6372_v23 = vpack.c.bf16 %v6341_v16, %v6339_v21  ;;  %v12940_v16 = vld [vmem:[%s16394_s7 + $0x170] sm:$0xff] }
 0x940   : > { %11664 = vmatmul.msk.bf16.gmra.mxu1 %vm4830_vm6, %v12935_v27  ;;  %v12967_v27 = vld [vmem:[%s16393_s6 + $0x108] sm:$0xff] }
 0x941   : > { %11584 = vmatmul.msk.bf16.gmra.mxu3 %vm4830_vm6, %v12927_v45  ;;  %6755 = vmatpush.bf16.msra.mxu1 %v12967_v27 }
 0x946   : > { %v6344_v61 = vpop.f32.mrf.mxu0 }
 0x94e   : > { %v6346_v12 = vpop.f32.mrf.mxu0 }
 0x94f   : > { %v6373_v53 = vpack.c.bf16 %v6346_v12, %v6344_v61 }
 0x950   : > { %11665 = vmatmul.msk.bf16.gmra.mxu1 %vm4830_vm6, %v12936_v24  ;;  %v12941_v24 = vld [vmem:[%s16394_s7 + $0x178] sm:$0xff] }
 0x951   : > { %11585 = vmatmul.msk.bf16.gmra.mxu3 %vm4830_vm6, %v12928_v47 }
 0x956   : > { %v6349_v2 = vpop.f32.mrf.mxu0 }
 0x95e   : > { %v6351_v20 = vpop.f32.mrf.mxu0 }
 0x95f   : > { %v6374_v32 = vpack.c.bf16 %v6351_v20, %v6349_v2  ;;  %v12950_v2 = vld [vmem:[%s16394_s7 + $0x1a0] sm:$0xff] }
 0x960   : > { %11666 = vmatmul.msk.bf16.gmra.mxu1 %vm4830_vm6, %v12937_v5 }
 0x961   : > { %11586 = vmatmul.msk.bf16.gmra.mxu3 %vm4830_vm6, %v12929_v14  ;;  %6443 = vmatpush.bf16.msra.mxu2 %v6374_v32 }
 0x965   : > { %6444 = vmatpush.bf16.msra.mxu2 %v6373_v53 }
 0x969   : > { %6445 = vmatpush.bf16.msra.mxu2 %v6372_v23 }
 0x96d   : > { %6446 = vmatpush.bf16.msra.mxu2 %v6371_v59 }
 0x970   : > { %11667 = vmatmul.msk.bf16.gmra.mxu1 %vm4830_vm6, %v12938_v25  ;;  %11747 = vmatmul.msk.bf16.vlgmr.msra.gmra.mxu2 %vm4830_vm6, %v12946_v28  ;;  %v12981_v28 = vld [vmem:[%s16393_s6 + $0x138] sm:$0xff] }
 0x971   : > { %11779 = vmatmul.msk.bf16.vlgmr.msrb.gmra.mxu3 %vm4830_vm6, %v14867_v29  ;;  %6965 = vmatpush.bf16.msrb.mxu2 %v12981_v28 }
 0x974   : > { %v6024_v34 = vpop.f32.mrf.mxu3 }
 0x975   : > { %v6064_v31 = vadd.f32 %v6024_v34, %v15161_v49  ;;  %v12980_v34 = vld [vmem:[%s16393_s6 + $0x130] sm:$0xff] }
 0x976   : > { %6966 = vmatpush.bf16.msrb.mxu2 %v12980_v34 }
 0x97c   : > { %v15276_v15 = vpop.f32.mrf.mxu3 }
 0x980   : > { %11668 = vmatmul.msk.bf16.gmra.mxu1 %vm4830_vm6, %v12939_v56  ;;  %11748 = vmatmul.msk.bf16.gmra.mxu2 %vm4830_vm6, %v12947_v19  ;;  %v12979_v19 = vld [vmem:[%s16393_s6 + $0x128] sm:$0xff] }
 0x981   : > { %11780 = vmatmul.msk.bf16.gmra.mxu3 %vm4830_vm6, %v14882_v36  ;;  %6967 = vmatpush.bf16.msrb.mxu2 %v12979_v19 }
 0x984   : > { %v6029_v49 = vpop.f32.mrf.mxu3 }
 0x985   : > { %v6066_v21 = vadd.f32 %v6029_v49, %v15169_v40  ;;  %v12966_v40 = vld [vmem:[%s16393_s6 + $0x100] sm:$0xff]  ;;  %v12952_v49 = vld [vmem:[%s16394_s7 + $0x1b0] sm:$0xff]  ;;  %6968 = vmatpush.bf16.msrb.mxu2 %v12978_v48 }
 0x986   : > { %6756 = vmatpush.bf16.msra.mxu1 %v12966_v40 }
 0x98c   : > { %v15298_v45 = vpop.f32.mrf.mxu3 }
 0x990   : > { %11669 = vmatmul.msk.bf16.gmra.mxu1 %vm4830_vm6, %v12940_v16  ;;  %11749 = vmatmul.msk.bf16.gmra.mxu2 %vm4830_vm6, %v12948_v62 }
 0x991   : > { %11781 = vmatmul.msk.bf16.gmra.mxu3 %vm4830_vm6, %v14896_v39 }
 0x994   : > { %v6034_v43 = vpop.f32.mrf.mxu3 }
 0x995   : > { %v6068_v61 = vadd.f32 %v6034_v43, %v15177_v52  ;;  %v12953_v43 = vld [vmem:[%s16394_s7 + $0x1b8] sm:$0xff] }
 0x99c   : > { %v15314_v1 = vpop.f32.mrf.mxu3 }
 0x9a0   : > { %11670 = vmatmul.msk.bf16.gmra.mxu1 %vm4830_vm6, %v12941_v24  ;;  %11750 = vmatmul.msk.bf16.gmra.mxu2 %vm4830_vm6, %v12949_v8 }
 0x9a1   : > { %11782 = vmatmul.msk.bf16.gmra.mxu3 %vm4830_vm6, %v14921_v9 }
 0x9a4   : > { %v6039_v47 = vpop.f32.mrf.mxu3 }
 0x9a5   : > { %v6070_v52 = vadd.f32 %v6039_v47, %v15185_v26  ;;  %v12951_v26 = vld [vmem:[%s16394_s7 + $0x1a8] sm:$0xff] }
 0x9ac   : > { %v15327_v12 = vpop.f32.mrf.mxu3 }
 0x9ad   : > { %v6236_v5 = vpop.f32.mrf.mxu1 }
 0x9ae   : > { %v6276_v14 = vadd.f32 %v6236_v5, %v6064_v31 }
 0x9b0   : > { %11751 = vmatmul.msk.bf16.gmra.mxu2 %vm4830_vm6, %v12950_v2  ;;  %11863 = vmatmul.msk.bf16.vlgmr.msra.gmra.mxu1 %vm4830_vm6, %v14867_v29 }
 0x9b4   : > { %v6044_v20 = vpop.f32.mrf.mxu3 }
 0x9b5   : > { %v6072_v32 = vadd.f32 %v6044_v20, %v15191_v3  ;;  %v15336_v53 = vpop.f32.mrf.mxu1 }
 0x9bc   : > { %v15338_v23 = vpop.f32.mrf.mxu3 }
 0x9bd   : > { %16412 = vst [vmem:[#allocation16_spill] sm:$0xff] %v15338_v23  ;;  %v6241_v59 = vpop.f32.mrf.mxu1 }
 0x9be   : > { %v6278_v25 = vadd.f32 %v6241_v59, %v6066_v21 }
 0x9c0   : > { %11752 = vmatmul.msk.bf16.gmra.mxu2 %vm4830_vm6, %v12951_v26  ;;  %11864 = vmatmul.msk.bf16.gmra.mxu1 %vm4830_vm6, %v14882_v36 }
 0x9c4   : > { %v6049_v3 = vpop.f32.mrf.mxu3 }
 0x9c5   : > { %v6074_v31 = vadd.f32 %v6049_v3, %v15199_v0  ;;  %v15353_v56 = vpop.f32.mrf.mxu1 }
 0x9cc   : > { %v15358_v44 = vpop.f32.mrf.mxu3 }
 0x9cd   : > { %16413 = vst [vmem:[#allocation17_spill] sm:$0xff] %v15358_v44  ;;  %v6246_v21 = vpop.f32.mrf.mxu1 }
 0x9ce   : > { %v6280_v0 = vadd.f32 %v6246_v21, %v6068_v61 }
 0x9d0   : > { %11753 = vmatmul.msk.bf16.gmra.mxu2 %vm4830_vm6, %v12952_v49  ;;  %11865 = vmatmul.msk.bf16.gmra.mxu1 %vm4830_vm6, %v14896_v39 }
 0x9d4   : > { %v6054_v27 = vpop.f32.mrf.mxu3 }
 0x9d5   : > { %v6076_v16 = vadd.f32 %v6054_v27, %v15207_v58  ;;  %v15370_v62 = vpop.f32.mrf.mxu1  ;;  %v15383_v58 = vpop.f32.mrf.mxu2 }
 0x9d6   : > { %16415 = vst [vmem:[#allocation19_spill] sm:$0xff] %v15383_v58 }
 0x9dc   : > { %v15372_v40 = vpop.f32.mrf.mxu3 }
 0x9dd   : > { %16414 = vst [vmem:[#allocation18_spill] sm:$0xff] %v15372_v40  ;;  %v6251_v24 = vpop.f32.mrf.mxu1 }
 0x9de   : > { %v6282_v8 = vadd.f32 %v6251_v24, %v6070_v52 }
 0x9e0   : > { %11754 = vmatmul.msk.bf16.gmra.mxu2 %vm4830_vm6, %v12953_v43  ;;  %11866 = vmatmul.msk.bf16.gmra.mxu1 %vm4830_vm6, %v14921_v9 }
 0x9e4   : > { %v6059_v61 = vpop.f32.mrf.mxu3 }
 0x9e5   : > { %v6078_v47 = vadd.f32 %v6059_v61, %v15215_v46  ;;  %v15381_v2 = vpop.f32.mrf.mxu1 }
 0x9ec   : > { %v15385_v5 = vpop.f32.mrf.mxu3 }
 0x9ed   : > { %16416 = vst [vmem:[#allocation20_spill] sm:$0xff] %v15385_v5  ;;  %v6256_v20 = vpop.f32.mrf.mxu1 }
 0x9ee   : > { %v6284_v26 = vadd.f32 %v6256_v20, %v6072_v32 }
 0x9f0   : > { %11947 = vmatmul.msk.bf16.vlgmr.msrb.gmra.mxu2 %vm4830_vm6, %v14867_v29 }
 0x9f3   : > { %v6448_v52 = vpop.f32.mrf.mxu2 }
 0x9f4   : > { %v15389_v59 = vadd.f32 %v6448_v52, %v6276_v14  ;;  %v6546_v28 = vpop.f32.mrf.mxu3 }
 0x9f5   : > { %v15391_v3 = vpop.f32.mrf.mxu1 }
 0x9f6   : > { %16417 = vst [vmem:[#allocation21_spill] sm:$0xff] %v15391_v3 }
 0x9fb   : > { %v15393_v34 = vpop.f32.mrf.mxu2 }
 0x9fc   : > { %v6548_v46 = vpop.f32.mrf.mxu3 }
 0x9fd   : > { %v6261_v19 = vpop.f32.mrf.mxu1  ;;  %v6583_v42 = vpack.c.bf16 %v6548_v46, %v6546_v28 }
 0x9fe   : > { %v6286_v49 = vadd.f32 %v6261_v19, %v6074_v31 }
 0xa00   : > { %11948 = vmatmul.msk.bf16.gmra.mxu2 %vm4830_vm6, %v14882_v36 }
 0xa03   : > { %v6453_v48 = vpop.f32.mrf.mxu2 }
 0xa04   : > { %v15397_v21 = vadd.f32 %v6453_v48, %v6278_v25  ;;  %v6551_v32 = vpop.f32.mrf.mxu3 }
 0xa05   : > { %v15399_v27 = vpop.f32.mrf.mxu1 }
 0xa06   : > { %16418 = vst [vmem:[#allocation22_spill] sm:$0xff] %v15399_v27 }
 0xa0b   : > { %v15401_v43 = vpop.f32.mrf.mxu2 }
 0xa0c   : > { %v6553_v14 = vpop.f32.mrf.mxu3 }
 0xa0d   : > { %v6266_v24 = vpop.f32.mrf.mxu1 }
 0xa0e   : > { %v6288_v61 = vadd.f32 %v6266_v24, %v6076_v16 }
 0xa10   : > { %11949 = vmatmul.msk.bf16.gmra.mxu2 %vm4830_vm6, %v14896_v39 }
 0xa13   : > { %v6458_v20 = vpop.f32.mrf.mxu2 }
 0xa14   : > { %v15405_v52 = vadd.f32 %v6458_v20, %v6280_v0  ;;  %v6556_v31 = vpop.f32.mrf.mxu3 }
 0xa15   : > { %v15407_v19 = vpop.f32.mrf.mxu1 }
 0xa16   : > { %16419 = vst [vmem:[#allocation23_spill] sm:$0xff] %v15407_v19 }
 0xa1b   : > { %v15409_v5 = vpop.f32.mrf.mxu2 }
 0xa1c   : > { %v6558_v25 = vpop.f32.mrf.mxu3 }
 0xa1d   : > { %v6271_v48 = vpop.f32.mrf.mxu1  ;;  %v6585_v19 = vpack.c.bf16 %v6558_v25, %v6556_v31 }
 0xa1e   : > { %v6290_v58 = vadd.f32 %v6271_v48, %v6078_v47  ;;  %v6584_v47 = vpack.c.bf16 %v6553_v14, %v6551_v32  ;;  %v12960_v14 = vld [vmem:[%s16394_s7 + $0x1d0] sm:$0xff] }
 0xa20   : > { %11950 = vmatmul.msk.bf16.gmra.mxu2 %vm4830_vm6, %v14921_v9 }
 0xa23   : > { %v6463_v13 = vpop.f32.mrf.mxu2 }
 0xa24   : > { %v15413_v63 = vadd.f32 %v6463_v13, %v6282_v8  ;;  %v6561_v16 = vpop.f32.mrf.mxu3  ;;  %v12958_v13 = vld [vmem:[%s16394_s7 + $0x1c0] sm:$0xff] }
 0xa25   : > { %v15415_v24 = vpop.f32.mrf.mxu1 }
 0xa26   : > { %16420 = vst [vmem:[#allocation24_spill] sm:$0xff] %v15415_v24 }
 0xa2b   : > { %v15417_v30 = vpop.f32.mrf.mxu2 }
 0xa2c   : > { %v6563_v0 = vpop.f32.mrf.mxu3 }
 0xa2d   : > { %v6586_v20 = vpack.c.bf16 %v6563_v0, %v6561_v16  ;;  %v6758_v40 = vpop.f32.mrf.mxu1 }
 0xa2f   : > { %6655 = vmatpush.bf16.msra.mxu0 %v6586_v20 }
 0xa33   : > { %6656 = vmatpush.bf16.msra.mxu0 %v6585_v19  ;;  %v6468_v4 = vpop.f32.mrf.mxu2 }
 0xa34   : > { %v15419_v33 = vadd.f32 %v6468_v4, %v6284_v26  ;;  %v12959_v4 = vld [vmem:[%s16394_s7 + $0x1c8] sm:$0xff] }
 0xa35   : > { %v6760_v48 = vpop.f32.mrf.mxu1 }
 0xa37   : > { %6657 = vmatpush.bf16.msra.mxu0 %v6584_v47 }
 0xa3b   : > { %6658 = vmatpush.bf16.msra.mxu0 %v6583_v42  ;;  %v15424_v8 = vpop.f32.mrf.mxu2 }
 0xa3c   : > { %16421 = vst [vmem:[#allocation25_spill] sm:$0xff] %v15424_v8 }
 0xa3d   : > { %v6763_v24 = vpop.f32.mrf.mxu1 }
 0xa3e   : > { %11831 = vmatmul.msk.bf16.vlgmr.msra.gmra.mxu0 %vm4830_vm6, %v12958_v13 }
 0xa43   : > { %v6473_v16 = vpop.f32.mrf.mxu2 }
 0xa44   : > { %v15427_v31 = vadd.f32 %v6473_v16, %v6286_v49 }
 0xa45   : > { %v6765_v19 = vpop.f32.mrf.mxu1 }
 0xa4b   : > { %v15432_v26 = vpop.f32.mrf.mxu2 }
 0xa4c   : > { %16422 = vst [vmem:[#allocation26_spill] sm:$0xff] %v15432_v26 }
 0xa4d   : > { %v6768_v28 = vpop.f32.mrf.mxu1 }
 0xa4e   : > { %11832 = vmatmul.msk.bf16.gmra.mxu0 %vm4830_vm6, %v12959_v4 }
 0xa53   : > { %v6478_v46 = vpop.f32.mrf.mxu2 }
 0xa54   : > { %v15435_v42 = vadd.f32 %v6478_v46, %v6288_v61  ;;  %v12961_v61 = vld [vmem:[%s16394_s7 + $0x1d8] sm:$0xff]  ;;  %v6796_v46 = vpack.c.bf16 %v6765_v19, %v6763_v24 }
 0xa55   : > { %v6770_v32 = vpop.f32.mrf.mxu1 }
 0xa56   : > { %v6797_v16 = vpack.c.bf16 %v6770_v32, %v6768_v28  ;;  %v12962_v28 = vld [vmem:[%s16394_s7 + $0x1e0] sm:$0xff] }
 0xa5b   : > { %v15440_v49 = vpop.f32.mrf.mxu2 }
 0xa5c   : > { %16423 = vst [vmem:[#allocation27_spill] sm:$0xff] %v15440_v49  ;;  %v6795_v49 = vpack.c.bf16 %v6760_v48, %v6758_v40  ;;  %v12971_v40 = vld [vmem:[%s16394_s7 + $0x208] sm:$0xff] }
 0xa5d   : > { %v6773_v25 = vpop.f32.mrf.mxu1  ;;  %v12963_v48 = vld [vmem:[%s16394_s7 + $0x1e8] sm:$0xff] }
 0xa5e   : > { %11833 = vmatmul.msk.bf16.gmra.mxu0 %vm4830_vm6, %v12960_v14 }
 0xa63   : > { %v6483_v0 = vpop.f32.mrf.mxu2 }
 0xa64   : > { %v15443_v20 = vadd.f32 %v6483_v0, %v6290_v58  ;;  %v12970_v58 = vld [vmem:[%s16394_s7 + $0x200] sm:$0xff] }
 0xa65   : > { %v6775_v47 = vpop.f32.mrf.mxu1 }
 0xa66   : > { %v6798_v13 = vpack.c.bf16 %v6775_v47, %v6773_v25  ;;  %v12992_v25 = vld [vmem:[%s16393_s6 + $0x150] sm:$0xff] }
 0xa67   : > { %v12972_v47 = vld [vmem:[%s16394_s7 + $0x210] sm:$0xff] }
 0xa68   : > { %6867 = vmatpush.bf16.msra.mxu3 %v6798_v13  ;;  %v12991_v13 = vld [vmem:[%s16393_s6 + $0x148] sm:$0xff] }
 0xa6b   : > { %v15448_v4 = vpop.f32.mrf.mxu2 }
 0xa6c   : > { %16424 = vst [vmem:[#allocation28_spill] sm:$0xff] %v15448_v4  ;;  %6868 = vmatpush.bf16.msra.mxu3 %v6797_v16  ;;  %v12990_v16 = vld [vmem:[%s16393_s6 + $0x140] sm:$0xff] }
 0xa6e   : > { %11834 = vmatmul.msk.bf16.gmra.mxu0 %vm4830_vm6, %v12961_v61  ;;  %v12964_v61 = vld [vmem:[%s16394_s7 + $0x1f0] sm:$0xff] }
 0xa70   : > { %6869 = vmatpush.bf16.msra.mxu3 %v6796_v46 }
 0xa73   : > { %v6970_v14 = vpop.f32.mrf.mxu2 }
 0xa74   : > { %6870 = vmatpush.bf16.msra.mxu3 %v6795_v49  ;;  %v12993_v49 = vld [vmem:[%s16393_s6 + $0x158] sm:$0xff] }
 0xa75   : > { %7177 = vmatpush.bf16.msrb.mxu0 %v12993_v49 }
 0xa77   : > { %11915 = vmatmul.msk.bf16.vlgmr.msra.gmra.mxu3 %vm4830_vm6, %v12970_v58 }
 0xa79   : > { %7178 = vmatpush.bf16.msrb.mxu0 %v12992_v25 }
 0xa7b   : > { %v6972_v32 = vpop.f32.mrf.mxu2 }
 0xa7d   : > { %7179 = vmatpush.bf16.msrb.mxu0 %v12991_v13 }
 0xa7e   : > { %11835 = vmatmul.msk.bf16.gmra.mxu0 %vm4830_vm6, %v12962_v28  ;;  %v12973_v28 = vld [vmem:[%s16394_s7 + $0x218] sm:$0xff] }
 0xa81   : > { %7180 = vmatpush.bf16.msrb.mxu0 %v12990_v16  ;;  %v7007_v16 = vpack.c.bf16 %v6972_v32, %v6970_v14  ;;  %v13005_v14 = vld [vmem:[%s16393_s6 + $0x178] sm:$0xff] }
 0xa82   : > { %7389 = vmatpush.bf16.msrb.mxu3 %v13005_v14 }
 0xa83   : > { %v6975_v24 = vpop.f32.mrf.mxu2 }
 0xa87   : > { %11916 = vmatmul.msk.bf16.gmra.mxu3 %vm4830_vm6, %v12971_v40  ;;  %v12965_v40 = vld [vmem:[%s16394_s7 + $0x1f8] sm:$0xff] }
 0xa8b   : > { %v6977_v19 = vpop.f32.mrf.mxu2 }
 0xa8c   : > { %v7008_v13 = vpack.c.bf16 %v6977_v19, %v6975_v24  ;;  %v12975_v24 = vld [vmem:[%s16394_s7 + $0x228] sm:$0xff]  ;;  %v13004_v19 = vld [vmem:[%s16393_s6 + $0x170] sm:$0xff] }
 0xa8d   : > { %7390 = vmatpush.bf16.msrb.mxu3 %v13004_v19 }
 0xa8e   : > { %11836 = vmatmul.msk.bf16.gmra.mxu0 %vm4830_vm6, %v12963_v48 }
 0xa93   : > { %v6980_v0 = vpop.f32.mrf.mxu2 }
 0xa97   : > { %11917 = vmatmul.msk.bf16.gmra.mxu3 %vm4830_vm6, %v12972_v47  ;;  %v12974_v47 = vld [vmem:[%s16394_s7 + $0x220] sm:$0xff] }
 0xa9b   : > { %v6982_v46 = vpop.f32.mrf.mxu2 }
 0xa9c   : > { %v7009_v25 = vpack.c.bf16 %v6982_v46, %v6980_v0 }
 0xa9e   : > { %11837 = vmatmul.msk.bf16.gmra.mxu0 %vm4830_vm6, %v12964_v61  ;;  %v12982_v61 = vld [vmem:[%s16394_s7 + $0x240] sm:$0xff] }
 0xaa3   : > { %v6985_v58 = vpop.f32.mrf.mxu2 }
 0xaa7   : > { %11918 = vmatmul.msk.bf16.gmra.mxu3 %vm4830_vm6, %v12973_v28 }
 0xaab   : > { %v6987_v48 = vpop.f32.mrf.mxu2 }
 0xaac   : > { %v7010_v49 = vpack.c.bf16 %v6987_v48, %v6985_v58 }
 0xaae   : > { %11838 = vmatmul.msk.bf16.gmra.mxu0 %vm4830_vm6, %v12965_v40  ;;  %7079 = vmatpush.bf16.msrb.mxu1 %v7010_v49  ;;  %v13003_v40 = vld [vmem:[%s16393_s6 + $0x168] sm:$0xff]  ;;  %v12976_v49 = vld [vmem:[%s16394_s7 + $0x230] sm:$0xff] }
 0xaaf   : > { %7391 = vmatpush.bf16.msrb.mxu3 %v13003_v40 }
 0xab2   : > { %7080 = vmatpush.bf16.msrb.mxu1 %v7009_v25  ;;  %v12984_v25 = vld [vmem:[%s16394_s7 + $0x250] sm:$0xff] }
 0xab6   : > { %7081 = vmatpush.bf16.msrb.mxu1 %v7008_v13 }
 0xab7   : > { %11919 = vmatmul.msk.bf16.gmra.mxu3 %vm4830_vm6, %v12974_v47 }
 0xaba   : > { %7082 = vmatpush.bf16.msrb.mxu1 %v7007_v16 }
 0xabb   : > { %v6660_v58 = vpop.f32.mrf.mxu0 }
 0xabc   : > { %v6700_v28 = vadd.f32 %v6660_v58, %v15389_v59  ;;  %v12983_v59 = vld [vmem:[%s16394_s7 + $0x248] sm:$0xff]  ;;  %v12985_v58 = vld [vmem:[%s16394_s7 + $0x258] sm:$0xff] }
 0xabd   : > { %11999 = vmatmul.msk.bf16.vlgmr.msrb.gmra.mxu1 %vm4830_vm6, %v12982_v61  ;;  %v12977_v61 = vld [vmem:[%s16394_s7 + $0x238] sm:$0xff] }
 0xabe   : > { %12031 = vmatmul.msk.bf16.vlgmr.msrb.gmra.mxu0 %vm4830_vm6, %v14867_v29 }
 0xac3   : > { %v15506_v0 = vpop.f32.mrf.mxu0 }
 0xac7   : > { %11920 = vmatmul.msk.bf16.gmra.mxu3 %vm4830_vm6, %v12975_v24 }
 0xacb   : > { %v6665_v32 = vpop.f32.mrf.mxu0 }
 0xacc   : > { %v6702_v46 = vadd.f32 %v6665_v32, %v15397_v21  ;;  %v13002_v21 = vld [vmem:[%s16393_s6 + $0x160] sm:$0xff] }
 0xacd   : > { %12000 = vmatmul.msk.bf16.gmra.mxu1 %vm4830_vm6, %v12983_v59  ;;  %7392 = vmatpush.bf16.msrb.mxu3 %v13002_v21  ;;  %v12986_v59 = vld [vmem:[%s16394_s7 + $0x260] sm:$0xff] }
 0xace   : > { %12032 = vmatmul.msk.bf16.gmra.mxu0 %vm4830_vm6, %v14882_v36 }
 0xad3   : > { %v15528_v48 = vpop.f32.mrf.mxu0 }
 0xad7   : > { %11921 = vmatmul.msk.bf16.gmra.mxu3 %vm4830_vm6, %v12976_v49 }
 0xadb   : > { %v6670_v47 = vpop.f32.mrf.mxu0 }
 0xadc   : > { %v6704_v13 = vadd.f32 %v6670_v47, %v15405_v52 }
 0xadd   : > { %12001 = vmatmul.msk.bf16.gmra.mxu1 %vm4830_vm6, %v12984_v25  ;;  %v12987_v25 = vld [vmem:[%s16394_s7 + $0x268] sm:$0xff] }
 0xade   : > { %12033 = vmatmul.msk.bf16.gmra.mxu0 %vm4830_vm6, %v14896_v39 }
 0xae3   : > { %v15544_v16 = vpop.f32.mrf.mxu0 }
 0xae7   : > { %11922 = vmatmul.msk.bf16.gmra.mxu3 %vm4830_vm6, %v12977_v61 }
 0xaeb   : > { %v6675_v24 = vpop.f32.mrf.mxu0 }
 0xaec   : > { %v6706_v52 = vadd.f32 %v6675_v24, %v15413_v63  ;;  %v13016_v24 = vld [vmem:[%s16393_s6 + $0x190] sm:$0xff] }
 0xaed   : > { %12002 = vmatmul.msk.bf16.gmra.mxu1 %vm4830_vm6, %v12985_v58 }
 0xaee   : > { %12034 = vmatmul.msk.bf16.gmra.mxu0 %vm4830_vm6, %v14921_v9 }
 0xaf3   : > { %v15557_v14 = vpop.f32.mrf.mxu0 }
 0xaf7   : > { %12115 = vmatmul.msk.bf16.vlgmr.msrb.gmra.mxu3 %vm4830_vm6, %v14867_v29 }
 0xafa   : > { %v6872_v32 = vpop.f32.mrf.mxu3 }
 0xafb   : > { %v6680_v19 = vpop.f32.mrf.mxu0  ;;  %v6912_v40 = vadd.f32 %v6872_v32, %v6700_v28 }
 0xafc   : > { %v6708_v49 = vadd.f32 %v6680_v19, %v15419_v33  ;;  %v13017_v33 = vld [vmem:[%s16393_s6 + $0x198] sm:$0xff]  ;;  %v13014_v19 = vld [vmem:[%s16393_s6 + $0x180] sm:$0xff] }
 0xafd   : > { %12003 = vmatmul.msk.bf16.gmra.mxu1 %vm4830_vm6, %v12986_v59 }
 0xafe   : > { %7601 = vmatpush.bf16.msra.mxu1 %v13017_v33 }
 0xb02   : > { %v15566_v63 = vpop.f32.mrf.mxu3  ;;  %7602 = vmatpush.bf16.msra.mxu1 %v13016_v24 }
 0xb03   : > { %v15568_v21 = vpop.f32.mrf.mxu0 }
 0xb04   : > { %16425 = vst [vmem:[#allocation29_spill] sm:$0xff] %v15568_v21 }
 0xb07   : > { %12116 = vmatmul.msk.bf16.gmra.mxu3 %vm4830_vm6, %v14882_v36 }
 0xb0a   : > { %v6877_v47 = vpop.f32.mrf.mxu3 }
 0xb0b   : > { %v6685_v61 = vpop.f32.mrf.mxu0  ;;  %v6914_v58 = vadd.f32 %v6877_v47, %v6702_v46  ;;  %v12988_v46 = vld [vmem:[%s16394_s7 + $0x270] sm:$0xff] }
 0xb0c   : > { %v6710_v28 = vadd.f32 %v6685_v61, %v15427_v31  ;;  %v13015_v31 = vld [vmem:[%s16393_s6 + $0x188] sm:$0xff] }
 0xb0d   : > { %12004 = vmatmul.msk.bf16.gmra.mxu1 %vm4830_vm6, %v12987_v25 }
 0xb0e   : > { %7603 = vmatpush.bf16.msra.mxu1 %v13015_v31  ;;  %v12989_v31 = vld [vmem:[%s16394_s7 + $0x278] sm:$0xff] }
 0xb12   : > { %v15583_v59 = vpop.f32.mrf.mxu3  ;;  %7604 = vmatpush.bf16.msra.mxu1 %v13014_v19 }
 0xb13   : > { %v15585_v32 = vpop.f32.mrf.mxu0 }
 0xb14   : > { %16426 = vst [vmem:[#allocation30_spill] sm:$0xff] %v15585_v32 }
 0xb17   : > { %12117 = vmatmul.msk.bf16.gmra.mxu3 %vm4830_vm6, %v14896_v39 }
 0xb1a   : > { %v6882_v25 = vpop.f32.mrf.mxu3 }
 0xb1b   : > { %v6690_v47 = vpop.f32.mrf.mxu0  ;;  %v6916_v61 = vadd.f32 %v6882_v25, %v6704_v13 }
 0xb1c   : > { %v6712_v33 = vadd.f32 %v6690_v47, %v15435_v42 }
 0xb1d   : > { %12005 = vmatmul.msk.bf16.gmra.mxu1 %vm4830_vm6, %v12988_v46 }
 0xb22   : > { %v15600_v24 = vpop.f32.mrf.mxu3 }
 0xb23   : > { %v15602_v4 = vpop.f32.mrf.mxu0 }
 0xb24   : > { %16427 = vst [vmem:[#allocation31_spill] sm:$0xff] %v15602_v4 }
 0xb27   : > { %12118 = vmatmul.msk.bf16.gmra.mxu3 %vm4830_vm6, %v14921_v9 }
 0xb2a   : > { %v6887_v37 = vpop.f32.mrf.mxu3 }
 0xb2b   : > { %v6695_v32 = vpop.f32.mrf.mxu0  ;;  %v6918_v26 = vadd.f32 %v6887_v37, %v6706_v52 }
 0xb2c   : > { %v6714_v13 = vadd.f32 %v6695_v32, %v15443_v20 }
 0xb2d   : > { %12006 = vmatmul.msk.bf16.gmra.mxu1 %vm4830_vm6, %v12989_v31 }
 0xb32   : > { %v15611_v42 = vpop.f32.mrf.mxu3 }
 0xb33   : > { %v15613_v46 = vpop.f32.mrf.mxu0 }
 0xb34   : > { %16428 = vst [vmem:[#allocation32_spill] sm:$0xff] %v15613_v46 }
 0xb3a   : > { %v6892_v19 = vpop.f32.mrf.mxu3  ;;  %v7084_v25 = vpop.f32.mrf.mxu1 }
 0xb3b   : > { %v6920_v47 = vadd.f32 %v6892_v19, %v6708_v49  ;;  %v15615_v4 = vadd.f32 %v7084_v25, %v6912_v40  ;;  %v7182_v27 = vpop.f32.mrf.mxu0 }
 0xb3d   : > { %12199 = vmatmul.msk.bf16.vlgmr.msra.gmra.mxu1 %vm4830_vm6, %v14867_v29 }
 0xb42   : > { %v15619_v44 = vpop.f32.mrf.mxu3  ;;  %v15621_v37 = vpop.f32.mrf.mxu1 }
 0xb43   : > { %16429 = vst [vmem:[#allocation33_spill] sm:$0xff] %v15619_v44  ;;  %v7184_v20 = vpop.f32.mrf.mxu0 }
 0xb4a   : > { %v6897_v52 = vpop.f32.mrf.mxu3  ;;  %v7089_v32 = vpop.f32.mrf.mxu1 }
 0xb4b   : > { %v6922_v31 = vadd.f32 %v6897_v52, %v6710_v28  ;;  %v15623_v60 = vadd.f32 %v7089_v32, %v6914_v58  ;;  %v7187_v46 = vpop.f32.mrf.mxu0 }
 0xb4d   : > { %12200 = vmatmul.msk.bf16.gmra.mxu1 %vm4830_vm6, %v14882_v36 }
 0xb52   : > { %v15627_v40 = vpop.f32.mrf.mxu3  ;;  %v15629_v49 = vpop.f32.mrf.mxu1 }
 0xb53   : > { %16430 = vst [vmem:[#allocation34_spill] sm:$0xff] %v15627_v40  ;;  %v7189_v19 = vpop.f32.mrf.mxu0 }
 0xb5a   : > { %v6902_v25 = vpop.f32.mrf.mxu3  ;;  %v7094_v35 = vpop.f32.mrf.mxu1 }
 0xb5b   : > { %v6924_v44 = vadd.f32 %v6902_v25, %v6712_v33  ;;  %v15631_v38 = vadd.f32 %v7094_v35, %v6916_v61  ;;  %v7192_v57 = vpop.f32.mrf.mxu0 }
 0xb5d   : > { %12201 = vmatmul.msk.bf16.gmra.mxu1 %vm4830_vm6, %v14896_v39 }
 0xb62   : > { %v15635_v58 = vpop.f32.mrf.mxu3  ;;  %v15637_v28 = vpop.f32.mrf.mxu1 }
 0xb63   : > { %16431 = vst [vmem:[#allocation35_spill] sm:$0xff] %v15635_v58  ;;  %v7194_v52 = vpop.f32.mrf.mxu0 }
 0xb64   : > { %v7221_v58 = vpack.c.bf16 %v7194_v52, %v7192_v57  ;;  %v12996_v52 = vld [vmem:[%s16394_s7 + $0x290] sm:$0xff] }
 0xb6a   : > { %v6907_v32 = vpop.f32.mrf.mxu3  ;;  %v7099_v21 = vpop.f32.mrf.mxu1 }
 0xb6b   : > { %v6926_v40 = vadd.f32 %v6907_v32, %v6714_v13  ;;  %v15639_v8 = vadd.f32 %v7099_v21, %v6918_v26  ;;  %v7197_v3 = vpop.f32.mrf.mxu0  ;;  %v7220_v13 = vpack.c.bf16 %v7189_v19, %v7187_v46  ;;  %v7219_v26 = vpack.c.bf16 %v7184_v20, %v7182_v27  ;;  %v12994_v21 = vld [vmem:[%s16394_s7 + $0x280] sm:$0xff] }
 0xb6d   : > { %12202 = vmatmul.msk.bf16.gmra.mxu1 %vm4830_vm6, %v14921_v9 }
 0xb72   : > { %v15643_v35 = vpop.f32.mrf.mxu3  ;;  %v15645_v61 = vpop.f32.mrf.mxu1 }
 0xb73   : > { %16432 = vst [vmem:[#allocation36_spill] sm:$0xff] %v15643_v35  ;;  %v7199_v33 = vpop.f32.mrf.mxu0 }
 0xb74   : > { %v7222_v25 = vpack.c.bf16 %v7199_v33, %v7197_v3 }
 0xb76   : > { %7291 = vmatpush.bf16.msra.mxu2 %v7222_v25 }
 0xb7a   : > { %7292 = vmatpush.bf16.msra.mxu2 %v7221_v58  ;;  %v7104_v23 = vpop.f32.mrf.mxu1  ;;  %v7394_v7 = vpop.f32.mrf.mxu3 }
 0xb7b   : > { %v15647_v50 = vadd.f32 %v7104_v23, %v6920_v47  ;;  %v12995_v23 = vld [vmem:[%s16394_s7 + $0x288] sm:$0xff] }
 0xb7e   : > { %7293 = vmatpush.bf16.msra.mxu2 %v7220_v13 }
 0xb82   : > { %7294 = vmatpush.bf16.msra.mxu2 %v7219_v26  ;;  %v15652_v32 = vpop.f32.mrf.mxu1  ;;  %v7396_v35 = vpop.f32.mrf.mxu3 }
 0xb83   : > { %16433 = vst [vmem:[#allocation37_spill] sm:$0xff] %v15652_v32 }
 0xb85   : > { %12083 = vmatmul.msk.bf16.vlgmr.msra.gmra.mxu2 %vm4830_vm6, %v12994_v21  ;;  %v12997_v21 = vld [vmem:[%s16394_s7 + $0x298] sm:$0xff] }
 0xb8a   : > { %v7109_v3 = vpop.f32.mrf.mxu1  ;;  %v7399_v57 = vpop.f32.mrf.mxu3 }
 0xb8b   : > { %v15655_v58 = vadd.f32 %v7109_v3, %v6922_v31 }
 0xb92   : > { %v15660_v46 = vpop.f32.mrf.mxu1  ;;  %v7401_v27 = vpop.f32.mrf.mxu3 }
 0xb93   : > { %16434 = vst [vmem:[#allocation38_spill] sm:$0xff] %v15660_v46  ;;  %v7432_v46 = vpack.c.bf16 %v7401_v27, %v7399_v57  ;;  %v13007_v57 = vld [vmem:[%s16394_s7 + $0x2c8] sm:$0xff]  ;;  %v13028_v27 = vld [vmem:[%s16393_s6 + $0x1b0] sm:$0xff] }
 0xb95   : > { %12084 = vmatmul.msk.bf16.gmra.mxu2 %vm4830_vm6, %v12995_v23 }
 0xb9a   : > { %v7114_v47 = vpop.f32.mrf.mxu1  ;;  %v7404_v20 = vpop.f32.mrf.mxu3 }
 0xb9b   : > { %v15663_v19 = vadd.f32 %v7114_v47, %v6924_v44 }
 0xba2   : > { %v15668_v33 = vpop.f32.mrf.mxu1  ;;  %v7406_v31 = vpop.f32.mrf.mxu3 }
 0xba3   : > { %16435 = vst [vmem:[#allocation39_spill] sm:$0xff] %v15668_v33  ;;  %v7433_v47 = vpack.c.bf16 %v7406_v31, %v7404_v20 }
 0xba5   : > { %12085 = vmatmul.msk.bf16.gmra.mxu2 %vm4830_vm6, %v12996_v52  ;;  %v7431_v52 = vpack.c.bf16 %v7396_v35, %v7394_v7  ;;  %v12999_v7 = vld [vmem:[%s16394_s7 + $0x2a8] sm:$0xff] }
 0xbaa   : > { %v7119_v25 = vpop.f32.mrf.mxu1  ;;  %v7409_v13 = vpop.f32.mrf.mxu3 }
 0xbab   : > { %v15671_v26 = vadd.f32 %v7119_v25, %v6926_v40  ;;  %v13006_v40 = vld [vmem:[%s16394_s7 + $0x2c0] sm:$0xff] }
 0xbac   : > { %v12998_v25 = vld [vmem:[%s16394_s7 + $0x2a0] sm:$0xff] }
 0xbb2   : > { %v15676_v3 = vpop.f32.mrf.mxu1  ;;  %v7411_v44 = vpop.f32.mrf.mxu3 }
 0xbb3   : > { %16436 = vst [vmem:[#allocation40_spill] sm:$0xff] %v15676_v3  ;;  %v7434_v23 = vpack.c.bf16 %v7411_v44, %v7409_v13  ;;  %v13027_v13 = vld [vmem:[%s16393_s6 + $0x1a8] sm:$0xff]  ;;  %v13026_v44 = vld [vmem:[%s16393_s6 + $0x1a0] sm:$0xff] }
 0xbb5   : > { %12086 = vmatmul.msk.bf16.gmra.mxu2 %vm4830_vm6, %v12997_v21  ;;  %7503 = vmatpush.bf16.msra.mxu0 %v7434_v23  ;;  %v13008_v21 = vld [vmem:[%s16394_s7 + $0x2d0] sm:$0xff] }
 0xbb6   : > { %v13000_v23 = vld [vmem:[%s16394_s7 + $0x2b0] sm:$0xff] }
 0xbb9   : > { %7504 = vmatpush.bf16.msra.mxu0 %v7433_v47 }
 0xbba   : > { %v7606_v33 = vpop.f32.mrf.mxu1 }
 0xbbd   : > { %7505 = vmatpush.bf16.msra.mxu0 %v7432_v46  ;;  %v13029_v46 = vld [vmem:[%s16393_s6 + $0x1b8] sm:$0xff] }
 0xbbe   : > { %7813 = vmatpush.bf16.msrb.mxu2 %v13029_v46 }
 0xbc1   : > { %7506 = vmatpush.bf16.msra.mxu0 %v7431_v52 }
 0xbc2   : > { %v7608_v3 = vpop.f32.mrf.mxu1  ;;  %7814 = vmatpush.bf16.msrb.mxu2 %v13028_v27 }
 0xbc4   : > { %12167 = vmatmul.msk.bf16.vlgmr.msra.gmra.mxu0 %vm4830_vm6, %v13006_v40  ;;  %v13009_v40 = vld [vmem:[%s16394_s7 + $0x2d8] sm:$0xff] }
 0xbc5   : > { %12087 = vmatmul.msk.bf16.gmra.mxu2 %vm4830_vm6, %v12998_v25  ;;  %v13001_v25 = vld [vmem:[%s16394_s7 + $0x2b8] sm:$0xff] }
 0xbc6   : > { %7815 = vmatpush.bf16.msrb.mxu2 %v13027_v13  ;;  %v7643_v13 = vpack.c.bf16 %v7608_v3, %v7606_v33  ;;  %v13011_v3 = vld [vmem:[%s16394_s7 + $0x2e8] sm:$0xff] }
 0xbca   : > { %v7611_v20 = vpop.f32.mrf.mxu1  ;;  %7816 = vmatpush.bf16.msrb.mxu2 %v13026_v44  ;;  %v13018_v44 = vld [vmem:[%s16394_s7 + $0x300] sm:$0xff] }
 0xbd2   : > { %v7613_v35 = vpop.f32.mrf.mxu1 }
 0xbd3   : > { %v7644_v27 = vpack.c.bf16 %v7613_v35, %v7611_v20  ;;  %v13019_v35 = vld [vmem:[%s16394_s7 + $0x308] sm:$0xff] }
 0xbd4   : > { %12168 = vmatmul.msk.bf16.gmra.mxu0 %vm4830_vm6, %v13007_v57 }
 0xbd5   : > { %12088 = vmatmul.msk.bf16.gmra.mxu2 %vm4830_vm6, %v12999_v7 }
 0xbda   : > { %v7616_v31 = vpop.f32.mrf.mxu1 }
 0xbe2   : > { %v7618_v47 = vpop.f32.mrf.mxu1 }
 0xbe3   : > { %v7645_v46 = vpack.c.bf16 %v7618_v47, %v7616_v31  ;;  %v13040_v47 = vld [vmem:[%s16393_s6 + $0x1d0] sm:$0xff] }
 0xbe4   : > { %12169 = vmatmul.msk.bf16.gmra.mxu0 %vm4830_vm6, %v13008_v21  ;;  %v13010_v21 = vld [vmem:[%s16394_s7 + $0x2e0] sm:$0xff] }
 0xbe5   : > { %12089 = vmatmul.msk.bf16.gmra.mxu2 %vm4830_vm6, %v13000_v23  ;;  %v13041_v23 = vld [vmem:[%s16393_s6 + $0x1d8] sm:$0xff] }
 0xbe6   : > { %8025 = vmatpush.bf16.msrb.mxu0 %v13041_v23 }
 0xbea   : > { %v7621_v52 = vpop.f32.mrf.mxu1  ;;  %8026 = vmatpush.bf16.msrb.mxu0 %v13040_v47 }
 0xbf2   : > { %v7623_v57 = vpop.f32.mrf.mxu1 }
 0xbf3   : > { %v7646_v7 = vpack.c.bf16 %v7623_v57, %v7621_v52  ;;  %v13012_v57 = vld [vmem:[%s16394_s7 + $0x2f0] sm:$0xff] }
 0xbf4   : > { %12170 = vmatmul.msk.bf16.gmra.mxu0 %vm4830_vm6, %v13009_v40  ;;  %v13039_v40 = vld [vmem:[%s16393_s6 + $0x1c8] sm:$0xff] }
 0xbf5   : > { %12090 = vmatmul.msk.bf16.gmra.mxu2 %vm4830_vm6, %v13001_v25  ;;  %7715 = vmatpush.bf16.msra.mxu3 %v7646_v7  ;;  %v13020_v7 = vld [vmem:[%s16394_s7 + $0x310] sm:$0xff] }
 0xbf6   : > { %8027 = vmatpush.bf16.msrb.mxu0 %v13039_v40 }
 0xbf9   : > { %7716 = vmatpush.bf16.msra.mxu3 %v7645_v46 }
 0xbfd   : > { %7717 = vmatpush.bf16.msra.mxu3 %v7644_v27 }
 0xc01   : > { %7718 = vmatpush.bf16.msra.mxu3 %v7643_v13 }
 0xc04   : > { %12171 = vmatmul.msk.bf16.gmra.mxu0 %vm4830_vm6, %v13010_v21  ;;  %12251 = vmatmul.msk.bf16.vlgmr.msra.gmra.mxu3 %vm4830_vm6, %v13018_v44  ;;  %v13013_v21 = vld [vmem:[%s16394_s7 + $0x2f8] sm:$0xff] }
 0xc05   : > { %12283 = vmatmul.msk.bf16.vlgmr.msrb.gmra.mxu2 %vm4830_vm6, %v14867_v29  ;;  %v13021_v44 = vld [vmem:[%s16394_s7 + $0x318] sm:$0xff] }
 0xc08   : > { %v7296_v31 = vpop.f32.mrf.mxu2 }
 0xc09   : > { %v7336_v20 = vadd.f32 %v7296_v31, %v15615_v4 }
 0xc10   : > { %v15734_v33 = vpop.f32.mrf.mxu2 }
 0xc14   : > { %12172 = vmatmul.msk.bf16.gmra.mxu0 %vm4830_vm6, %v13011_v3  ;;  %12252 = vmatmul.msk.bf16.gmra.mxu3 %vm4830_vm6, %v13019_v35  ;;  %v13022_v35 = vld [vmem:[%s16394_s7 + $0x320] sm:$0xff] }
 0xc15   : > { %12284 = vmatmul.msk.bf16.gmra.mxu2 %vm4830_vm6, %v14882_v36 }
 0xc18   : > { %v7301_v4 = vpop.f32.mrf.mxu2 }
 0xc19   : > { %v7338_v52 = vadd.f32 %v7301_v4, %v15623_v60  ;;  %v13038_v60 = vld [vmem:[%s16393_s6 + $0x1c0] sm:$0xff] }
 0xc1a   : > { %8028 = vmatpush.bf16.msrb.mxu0 %v13038_v60 }
 0xc20   : > { %v15756_v25 = vpop.f32.mrf.mxu2 }
 0xc24   : > { %12173 = vmatmul.msk.bf16.gmra.mxu0 %vm4830_vm6, %v13012_v57  ;;  %12253 = vmatmul.msk.bf16.gmra.mxu3 %vm4830_vm6, %v13020_v7 }
 0xc25   : > { %12285 = vmatmul.msk.bf16.gmra.mxu2 %vm4830_vm6, %v14896_v39 }
 0xc28   : > { %v7306_v46 = vpop.f32.mrf.mxu2 }
 0xc29   : > { %v7340_v27 = vadd.f32 %v7306_v46, %v15631_v38 }
 0xc30   : > { %v15772_v13 = vpop.f32.mrf.mxu2 }
 0xc34   : > { %12174 = vmatmul.msk.bf16.gmra.mxu0 %vm4830_vm6, %v13013_v21  ;;  %12254 = vmatmul.msk.bf16.gmra.mxu3 %vm4830_vm6, %v13021_v44  ;;  %v13052_v21 = vld [vmem:[%s16393_s6 + $0x1f0] sm:$0xff] }
 0xc35   : > { %12286 = vmatmul.msk.bf16.gmra.mxu2 %vm4830_vm6, %v14921_v9 }
 0xc38   : > { %v7311_v31 = vpop.f32.mrf.mxu2 }
 0xc39   : > { %v7342_v38 = vadd.f32 %v7311_v31, %v15639_v8  ;;  %v13023_v8 = vld [vmem:[%s16394_s7 + $0x328] sm:$0xff] }
 0xc40   : > { %v15785_v3 = vpop.f32.mrf.mxu2 }
 0xc41   : > { %v7508_v23 = vpop.f32.mrf.mxu0 }
 0xc42   : > { %v7548_v4 = vadd.f32 %v7508_v23, %v7336_v20  ;;  %v13053_v20 = vld [vmem:[%s16393_s6 + $0x1f8] sm:$0xff]  ;;  %v13024_v23 = vld [vmem:[%s16394_s7 + $0x330] sm:$0xff] }
 0xc43   : > { %8237 = vmatpush.bf16.msrb.mxu3 %v13053_v20 }
 0xc44   : > { %12255 = vmatmul.msk.bf16.gmra.mxu3 %vm4830_vm6, %v13022_v35  ;;  %12367 = vmatmul.msk.bf16.vlgmr.msrb.gmra.mxu0 %vm4830_vm6, %v14867_v29 }
 0xc47   : > { %8238 = vmatpush.bf16.msrb.mxu3 %v13052_v21 }
 0xc48   : > { %v7316_v47 = vpop.f32.mrf.mxu2 }
 0xc49   : > { %v7344_v40 = vadd.f32 %v7316_v47, %v15647_v50  ;;  %v7510_v57 = vpop.f32.mrf.mxu0  ;;  %v13050_v47 = vld [vmem:[%s16393_s6 + $0x1e0] sm:$0xff] }
 0xc50   : > { %v15794_v7 = vpop.f32.mrf.mxu2 }
 0xc51   : > { %16437 = vst [vmem:[#allocation41_spill] sm:$0xff] %v15794_v7  ;;  %v7513_v60 = vpop.f32.mrf.mxu0 }
 0xc52   : > { %v7550_v46 = vadd.f32 %v7513_v60, %v7338_v52  ;;  %v13051_v52 = vld [vmem:[%s16393_s6 + $0x1e8] sm:$0xff] }
 0xc53   : > { %8239 = vmatpush.bf16.msrb.mxu3 %v13051_v52  ;;  %v13025_v52 = vld [vmem:[%s16394_s7 + $0x338] sm:$0xff] }
 0xc54   : > { %12256 = vmatmul.msk.bf16.gmra.mxu3 %vm4830_vm6, %v13023_v8  ;;  %12368 = vmatmul.msk.bf16.gmra.mxu0 %vm4830_vm6, %v14882_v36 }
 0xc57   : > { %8240 = vmatpush.bf16.msrb.mxu3 %v13050_v47 }
 0xc58   : > { %v7321_v50 = vpop.f32.mrf.mxu2 }
 0xc59   : > { %v7346_v44 = vadd.f32 %v7321_v50, %v15655_v58  ;;  %v7515_v31 = vpop.f32.mrf.mxu0 }
 0xc60   : > { %v15812_v35 = vpop.f32.mrf.mxu2 }
 0xc61   : > { %16438 = vst [vmem:[#allocation42_spill] sm:$0xff] %v15812_v35  ;;  %v7518_v8 = vpop.f32.mrf.mxu0 }
 0xc62   : > { %v15820_v60 = vadd.f32 %v7518_v8, %v7340_v27  ;;  %v5853_v8 = vadd.f32 %v15165_v54, %v15107_v18 }
 0xc64   : > { %12257 = vmatmul.msk.bf16.gmra.mxu3 %vm4830_vm6, %v13024_v23  ;;  %12369 = vmatmul.msk.bf16.gmra.mxu0 %vm4830_vm6, %v14896_v39 }
 0xc68   : > { %v7326_v58 = vpop.f32.mrf.mxu2 }
 0xc69   : > { %v7348_v20 = vadd.f32 %v7326_v58, %v15663_v19  ;;  %v15826_v50 = vpop.f32.mrf.mxu0  ;;  %v6065_v58 = vadd.f32 %v15276_v15, %v5853_v8 }
 0xc70   : > { %v15828_v21 = vpop.f32.mrf.mxu2 }
 0xc71   : > { %16439 = vst [vmem:[#allocation43_spill] sm:$0xff] %v15828_v21  ;;  %v7523_v35 = vpop.f32.mrf.mxu0 }
 0xc72   : > { %v15833_v27 = vadd.f32 %v7523_v35, %v7342_v38  ;;  %v6277_v35 = vadd.f32 %v15336_v53, %v6065_v58 }
 0xc74   : > { %12258 = vmatmul.msk.bf16.gmra.mxu3 %vm4830_vm6, %v13025_v52  ;;  %12370 = vmatmul.msk.bf16.gmra.mxu0 %vm4830_vm6, %v14921_v9  ;;  %v6489_v7 = vadd.f32 %v15393_v34, %v6277_v35  ;;  %v5855_v34 = vadd.f32 %v15173_v11, %v15125_v55 }
 0xc78   : > { %v7331_v23 = vpop.f32.mrf.mxu2 }
 0xc79   : > { %v15839_v47 = vadd.f32 %v7331_v23, %v15671_v26  ;;  %v15841_v19 = vpop.f32.mrf.mxu0  ;;  %v6701_v26 = vadd.f32 %v15506_v0, %v6489_v7  ;;  %v6067_v0 = vadd.f32 %v15298_v45, %v5855_v34 }
 0xc7b   : > { %v6913_v32 = vadd.f32 %v15566_v63, %v6701_v26  ;;  %v6279_v58 = vadd.f32 %v15353_v56, %v6067_v0 }
 0xc7d   : > { %v7125_v53 = vadd.f32 %v15621_v37, %v6913_v32  ;;  %v6491_v37 = vadd.f32 %v15401_v43, %v6279_v58  ;;  %v5857_v43 = vadd.f32 %v15181_v51, %v15143_v10 }
 0xc7f   : > { %v6703_v55 = vadd.f32 %v15528_v48, %v6491_v37 }
 0xc80   : > { %v15846_v21 = vpop.f32.mrf.mxu2 }
 0xc81   : > { %v7528_v38 = vpop.f32.mrf.mxu0  ;;  %v6915_v32 = vadd.f32 %v15583_v59, %v6703_v55 }
 0xc82   : > { %v15849_v52 = vadd.f32 %v7528_v38, %v7344_v40  ;;  %v7337_v40 = vadd.f32 %v15734_v33, %v7125_v53 }
 0xc83   : > { %v7127_v35 = vadd.f32 %v15629_v49, %v6915_v32 }
 0xc84   : > { %12451 = vmatmul.msk.bf16.vlgmr.msrb.gmra.mxu3 %vm4830_vm6, %v14867_v29  ;;  %v7549_v8 = vadd.f32 %v7510_v57, %v7337_v40 }
 0xc85   : > { %v7339_v56 = vadd.f32 %v15756_v25, %v7127_v35 }
 0xc87   : > { %v7720_v23 = vpop.f32.mrf.mxu3 }
 0xc88   : > { %v15856_v18 = vadd.f32 %v7720_v23, %v7548_v4  ;;  %v15858_v54 = vpop.f32.mrf.mxu2 }
 0xc89   : > { %v15860_v15 = vpop.f32.mrf.mxu0 }
 0xc8f   : > { %v7722_v29 = vpop.f32.mrf.mxu3 }
 0xc90   : > { %v15867_v7 = vadd.f32 %v7722_v29, %v7549_v8  ;;  %v15869_v63 = vpop.f32.mrf.mxu2 }
 0xc91   : > { %v7533_v4 = vpop.f32.mrf.mxu0 }
 0xc92   : > { %v15872_v38 = vadd.f32 %v7533_v4, %v7346_v44  ;;  %v7551_v44 = vadd.f32 %v7515_v31, %v7339_v56 }
 0xc94   : > { %12452 = vmatmul.msk.bf16.gmra.mxu3 %vm4830_vm6, %v14882_v36  ;;  %v6069_v36 = vadd.f32 %v15314_v1, %v5857_v43 }
 0xc97   : > { %v7725_v11 = vpop.f32.mrf.mxu3 }
 0xc98   : > { %v15879_v45 = vadd.f32 %v7725_v11, %v7550_v46  ;;  %v7823_v33 = vpop.f32.mrf.mxu2  ;;  %v6281_v46 = vadd.f32 %v15370_v62, %v6069_v36 }
 0xc99   : > { %v15881_v57 = vpop.f32.mrf.mxu0 }
 0xc9a   : > { %v6493_v40 = vadd.f32 %v15409_v5, %v6281_v46  ;;  %v5859_v5 = vadd.f32 %v15189_v17, %v15155_v22 }
 0xc9c   : > { %v6705_v49 = vadd.f32 %v15544_v16, %v6493_v40  ;;  %v6071_v16 = vadd.f32 %v15327_v12, %v5859_v5 }
 0xc9e   : > { %v6917_v10 = vadd.f32 %v15600_v24, %v6705_v49  ;;  %v6283_v29 = vadd.f32 %v15381_v2, %v6071_v16  ;;  %v13034_v16 = vld [vmem:[%s16394_s7 + $0x360] sm:$0xff] }
 0xc9f   : > { %v7727_v26 = vpop.f32.mrf.mxu3 }
 0xca0   : > { %v15888_v48 = vadd.f32 %v7727_v26, %v7551_v44  ;;  %v7825_v23 = vpop.f32.mrf.mxu2  ;;  %v7129_v34 = vadd.f32 %v15637_v28, %v6917_v10  ;;  %v6495_v28 = vadd.f32 %v15417_v30, %v6283_v29  ;;  %v13031_v44 = vld [vmem:[%s16394_s7 + $0x348] sm:$0xff] }
 0xca1   : > { %v7538_v59 = vpop.f32.mrf.mxu0  ;;  %v7856_v32 = vpack.c.bf16 %v7825_v23, %v7823_v33  ;;  %v13043_v29 = vld [vmem:[%s16394_s7 + $0x388] sm:$0xff] }
 0xca2   : > { %v7560_v53 = vadd.f32 %v7538_v59, %v7348_v20  ;;  %v7341_v62 = vadd.f32 %v15772_v13, %v7129_v34  ;;  %v6707_v22 = vadd.f32 %v15557_v14, %v6495_v28  ;;  %v13032_v59 = vld [vmem:[%s16394_s7 + $0x350] sm:$0xff] }
 0xca4   : > { %12453 = vmatmul.msk.bf16.gmra.mxu3 %vm4830_vm6, %v14896_v39  ;;  %v7553_v39 = vadd.f32 %v15826_v50, %v7341_v62  ;;  %v6919_v13 = vadd.f32 %v15611_v42, %v6707_v22 }
 0xca6   : > { %v7131_v2 = vadd.f32 %v15645_v61, %v6919_v13  ;;  %v7855_v61 = vpack.c.bf16 %v15869_v63, %v15858_v54  ;;  %v13036_v13 = vld [vmem:[%s16394_s7 + $0x370] sm:$0xff] }
 0xca7   : > { %v7730_v25 = vpop.f32.mrf.mxu3 }
 0xca8   : > { %v15897_v51 = vadd.f32 %v7730_v25, %v15820_v60  ;;  %v7828_v1 = vpop.f32.mrf.mxu2 }
 0xca9   : > { %v15899_v31 = vpop.f32.mrf.mxu0 }
 0xcaf   : > { %v7732_v20 = vpop.f32.mrf.mxu3 }
 0xcb0   : > { %v15907_v8 = vadd.f32 %v7732_v20, %v7553_v39  ;;  %v7830_v24 = vpop.f32.mrf.mxu2  ;;  %v13042_v20 = vld [vmem:[%s16394_s7 + $0x380] sm:$0xff] }
 0xcb1   : > { %v7543_v60 = vpop.f32.mrf.mxu0  ;;  %v7857_v42 = vpack.c.bf16 %v7830_v24, %v7828_v1 }
 0xcb2   : > { %v7562_v0 = vadd.f32 %v7543_v60, %v15839_v47  ;;  %v7343_v47 = vadd.f32 %v15785_v3, %v7131_v2  ;;  %v13030_v3 = vld [vmem:[%s16394_s7 + $0x340] sm:$0xff] }
 0xcb4   : > { %12454 = vmatmul.msk.bf16.gmra.mxu3 %vm4830_vm6, %v14921_v9  ;;  %v7555_v30 = vadd.f32 %v15841_v19, %v7343_v47  ;;  %v13045_v47 = vld [vmem:[%s16394_s7 + $0x398] sm:$0xff] }
 0xcb7   : > { %v7735_v17 = vpop.f32.mrf.mxu3 }
 0xcb8   : > { %v15917_v12 = vadd.f32 %v7735_v17, %v15833_v27  ;;  %v7833_v50 = vpop.f32.mrf.mxu2  ;;  %v13044_v17 = vld [vmem:[%s16394_s7 + $0x390] sm:$0xff] }
 0xcb9   : > { %v15919_v4 = vpop.f32.mrf.mxu0 }
 0xcbf   : > { %v7737_v58 = vpop.f32.mrf.mxu3 }
 0xcc0   : > { %v15924_v37 = vadd.f32 %v7737_v58, %v7555_v30  ;;  %v7835_v9 = vpop.f32.mrf.mxu2  ;;  %v13037_v30 = vld [vmem:[%s16394_s7 + $0x378] sm:$0xff] }
 0xcc1   : > { %v7858_v14 = vpack.c.bf16 %v7835_v9, %v7833_v50  ;;  %v8030_v55 = vpop.f32.mrf.mxu0 }
 0xcc3   : > { %7927 = vmatpush.bf16.msrb.mxu1 %v7858_v14 }
 0xcc7   : > { %7928 = vmatpush.bf16.msrb.mxu1 %v7857_v42  ;;  %v7740_v27 = vpop.f32.mrf.mxu3 }
 0xcc8   : > { %v15927_v11 = vadd.f32 %v7740_v27, %v15849_v52 }
 0xcc9   : > { %v8032_v35 = vpop.f32.mrf.mxu0 }
 0xcca   : > { %v8067_v5 = vpack.c.bf16 %v8032_v35, %v8030_v55  ;;  %v13046_v55 = vld [vmem:[%s16394_s7 + $0x3a0] sm:$0xff]  ;;  %v13047_v35 = vld [vmem:[%s16394_s7 + $0x3a8] sm:$0xff] }
 0xccb   : > { %7929 = vmatpush.bf16.msrb.mxu1 %v7856_v32  ;;  %v13054_v32 = vld [vmem:[%s16394_s7 + $0x3c0] sm:$0xff] }
 0xccf   : > { %7930 = vmatpush.bf16.msrb.mxu1 %v7855_v61  ;;  %v15934_v19 = vpop.f32.mrf.mxu3  ;;  %v13055_v61 = vld [vmem:[%s16394_s7 + $0x3c8] sm:$0xff] }
 0xcd1   : > { %v8035_v56 = vpop.f32.mrf.mxu0 }
 0xcd2   : > { %12335 = vmatmul.msk.bf16.vlgmr.msrb.gmra.mxu1 %vm4830_vm6, %v13030_v3  ;;  %v13048_v3 = vld [vmem:[%s16394_s7 + $0x3b0] sm:$0xff] }
 0xcd7   : > { %v7745_v43 = vpop.f32.mrf.mxu3 }
 0xcd8   : > { %v15938_v52 = vadd.f32 %v7745_v43, %v15872_v38  ;;  %v13049_v43 = vld [vmem:[%s16394_s7 + $0x3b8] sm:$0xff] }
 0xcd9   : > { %v8037_v33 = vpop.f32.mrf.mxu0 }
 0xcda   : > { %v8068_v62 = vpack.c.bf16 %v8037_v33, %v8035_v56  ;;  %v13056_v56 = vld [vmem:[%s16394_s7 + $0x3d0] sm:$0xff]  ;;  %v13057_v33 = vld [vmem:[%s16394_s7 + $0x3d8] sm:$0xff] }
 0xcdf   : > { %v15943_v54 = vpop.f32.mrf.mxu3 }
 0xce1   : > { %v8040_v63 = vpop.f32.mrf.mxu0 }
 0xce2   : > { %12336 = vmatmul.msk.bf16.gmra.mxu1 %vm4830_vm6, %v13031_v44  ;;  %v13058_v44 = vld [vmem:[%s16394_s7 + $0x3e0] sm:$0xff] }
 0xce7   : > { %v7750_v26 = vpop.f32.mrf.mxu3 }
 0xce8   : > { %v15946_v36 = vadd.f32 %v7750_v26, %v7560_v53  ;;  %v13033_v53 = vld [vmem:[%s16394_s7 + $0x358] sm:$0xff] }
 0xce9   : > { %v8042_v23 = vpop.f32.mrf.mxu0 }
 0xcea   : > { %v8069_v1 = vpack.c.bf16 %v8042_v23, %v8040_v63  ;;  %v13059_v63 = vld [vmem:[%s16394_s7 + $0x3e8] sm:$0xff] }
 0xcef   : > { %v15951_v38 = vpop.f32.mrf.mxu3 }
 0xcf1   : > { %v8045_v46 = vpop.f32.mrf.mxu0 }
 0xcf2   : > { %12337 = vmatmul.msk.bf16.gmra.mxu1 %vm4830_vm6, %v13032_v59  ;;  %v13060_v59 = vld [vmem:[%s16394_s7 + $0x3f0] sm:$0xff] }
 0xcf7   : > { %v7755_v40 = vpop.f32.mrf.mxu3 }
 0xcf8   : > { %v15954_v49 = vadd.f32 %v7755_v40, %v7562_v0  ;;  %v13035_v0 = vld [vmem:[%s16394_s7 + $0x368] sm:$0xff] }
 0xcf9   : > { %v8047_v25 = vpop.f32.mrf.mxu0 }
 0xcfa   : > { %v8070_v10 = vpack.c.bf16 %v8047_v25, %v8045_v46  ;;  %v13061_v25 = vld [vmem:[%s16394_s7 + $0x3f8] sm:$0xff] }
 0xcfc   : > { %8139 = vmatpush.bf16.msra.mxu2 %v8070_v10 }
 0xcff   : > { %v15959_v34 = vpop.f32.mrf.mxu3 }
 0xd00   : > { %8140 = vmatpush.bf16.msra.mxu2 %v8069_v1 }
 0xd02   : > { %12338 = vmatmul.msk.bf16.gmra.mxu1 %vm4830_vm6, %v13033_v53 }
 0xd04   : > { %8141 = vmatpush.bf16.msra.mxu2 %v8068_v62 }
 0xd07   : > { %v8242_v39 = vpop.f32.mrf.mxu3 }
 0xd08   : > { %8142 = vmatpush.bf16.msra.mxu2 %v8067_v5 }
 0xd0b   : > { %12419 = vmatmul.msk.bf16.vlgmr.msra.gmra.mxu2 %vm4830_vm6, %v13042_v20 }
 0xd0f   : > { %v8244_v24 = vpop.f32.mrf.mxu3 }
 0xd10   : > { %v8279_v27 = vpack.c.bf16 %v8244_v24, %v8242_v39  ;;  %v8431_v24 = vpop.permute.xlu1 %8430 }
 0xd12   : > { %12339 = vmatmul.msk.bf16.gmra.mxu1 %vm4830_vm6, %v13034_v16 }
 0xd17   : > { %v8247_v60 = vpop.f32.mrf.mxu3 }
 0xd1b   : > { %12420 = vmatmul.msk.bf16.gmra.mxu2 %vm4830_vm6, %v13043_v29 }
 0xd1f   : > { %v8249_v28 = vpop.f32.mrf.mxu3 }
 0xd20   : > { %v8280_v42 = vpack.c.bf16 %v8249_v28, %v8247_v60 }
 0xd22   : > { %12340 = vmatmul.msk.bf16.gmra.mxu1 %vm4830_vm6, %v13035_v0 }
 0xd27   : > { %v8252_v22 = vpop.f32.mrf.mxu3 }
 0xd2b   : > { %12421 = vmatmul.msk.bf16.gmra.mxu2 %vm4830_vm6, %v13044_v17 }
 0xd2f   : > { %v8254_v50 = vpop.f32.mrf.mxu3 }
 0xd30   : > { %v8281_v14 = vpack.c.bf16 %v8254_v50, %v8252_v22 }
 0xd32   : > { %12341 = vmatmul.msk.bf16.gmra.mxu1 %vm4830_vm6, %v13036_v13 }
 0xd37   : > { %v8257_v2 = vpop.f32.mrf.mxu3 }
 0xd3b   : > { %12422 = vmatmul.msk.bf16.gmra.mxu2 %vm4830_vm6, %v13045_v47 }
 0xd3f   : > { %v8259_v58 = vpop.f32.mrf.mxu3 }
 0xd40   : > { %v8282_v9 = vpack.c.bf16 %v8259_v58, %v8257_v2  ;;  %v8436_v2 = vpop.permute.xlu0 %8435 }
 0xd42   : > { %12342 = vmatmul.msk.bf16.gmra.mxu1 %vm4830_vm6, %v13037_v30  ;;  %8351 = vmatpush.bf16.msra.mxu0 %v8282_v9 }
 0xd46   : > { %8352 = vmatpush.bf16.msra.mxu0 %v8281_v14 }
 0xd4a   : > { %8353 = vmatpush.bf16.msra.mxu0 %v8280_v42  ;;  %v8441_v42 = vpop.permute.xlu2 %8440 }
 0xd4b   : > { %12423 = vmatmul.msk.bf16.gmra.mxu2 %vm4830_vm6, %v13046_v55 }
 0xd4e   : > { %8354 = vmatpush.bf16.msra.mxu0 %v8279_v27 }
 0xd4f   : > { %v7932_v26 = vpop.f32.mrf.mxu1 }
 0xd50   : > { %v7972_v5 = vadd.f32 %v7932_v26, %v15856_v18 }
 0xd51   : > { %12503 = vmatmul.msk.bf16.vlgmr.msra.gmra.mxu0 %vm4830_vm6, %v13054_v32 }
 0xd57   : > { %v7934_v46 = vpop.f32.mrf.mxu1 }
 0xd58   : > { %v7973_v0 = vadd.f32 %v7934_v46, %v15867_v7  ;;  %v8451_v46 = vpop.permute.xlu1 %8450 }
 0xd5b   : > { %12424 = vmatmul.msk.bf16.gmra.mxu2 %vm4830_vm6, %v13047_v35 }
 0xd5f   : > { %v7937_v10 = vpop.f32.mrf.mxu1 }
 0xd60   : > { %v7974_v47 = vadd.f32 %v7937_v10, %v15879_v45 }
 0xd61   : > { %12504 = vmatmul.msk.bf16.gmra.mxu0 %vm4830_vm6, %v13055_v61 }
 0xd67   : > { %v7939_v53 = vpop.f32.mrf.mxu1 }
 0xd68   : > { %v7975_v32 = vadd.f32 %v7939_v53, %v15888_v48 }
 0xd6b   : > { %12425 = vmatmul.msk.bf16.gmra.mxu2 %vm4830_vm6, %v13048_v3 }
 0xd6f   : > { %v7942_v29 = vpop.f32.mrf.mxu1 }
 0xd71   : > { %12505 = vmatmul.msk.bf16.gmra.mxu0 %vm4830_vm6, %v13056_v56 }
 0xd77   : > { %v7944_v58 = vpop.f32.mrf.mxu1 }
 0xd7b   : > { %12426 = vmatmul.msk.bf16.gmra.mxu2 %vm4830_vm6, %v13049_v43  ;;  %v8446_v43 = vpop.permute.xlu0 %8445 }
 0xd7f   : > { %v7947_v45 = vpop.f32.mrf.mxu1 }
 0xd81   : > { %12506 = vmatmul.msk.bf16.gmra.mxu0 %vm4830_vm6, %v13057_v33 }
 0xd8e   : > { %v8144_v23 = vpop.f32.mrf.mxu2 }
 0xd8f   : > { %v8184_v39 = vadd.f32 %v8144_v23, %v7972_v5 }
 0xd91   : > { %12507 = vmatmul.msk.bf16.gmra.mxu0 %vm4830_vm6, %v13058_v44 }
 0xd96   : > { %v8146_v40 = vpop.f32.mrf.mxu2 }
 0xd97   : > { %v8185_v17 = vadd.f32 %v8146_v40, %v7973_v0  ;;  %v7949_v40 = vpop.f32.mrf.mxu1 }
 0xd9e   : > { %v8149_v1 = vpop.f32.mrf.mxu2 }
 0xd9f   : > { %v8186_v9 = vadd.f32 %v8149_v1, %v7974_v47  ;;  %v7977_v1 = vadd.f32 %v7944_v58, %v15907_v8  ;;  %v16442_v58 = vld [vmem:[#allocation16_spill] sm:$0xff] }
 0xda1   : > { %12508 = vmatmul.msk.bf16.gmra.mxu0 %vm4830_vm6, %v13059_v63  ;;  %v7976_v63 = vadd.f32 %v7942_v29, %v15897_v51  ;;  %v7978_v29 = vadd.f32 %v7947_v45, %v15917_v12  ;;  %v7979_v12 = vadd.f32 %v7949_v40, %v15924_v37 }
 0xda6   : > { %v8151_v62 = vpop.f32.mrf.mxu2 }
 0xda7   : > { %v8187_v61 = vadd.f32 %v8151_v62, %v7975_v32 }
 0xdae   : > { %v8154_v22 = vpop.f32.mrf.mxu2 }
 0xdaf   : > { %v8188_v23 = vadd.f32 %v8154_v22, %v7976_v63  ;;  %v16446_v63 = vld [vmem:[#allocation4_spill] sm:$0xff] }
 0xdb1   : > { %12509 = vmatmul.msk.bf16.gmra.mxu0 %vm4830_vm6, %v13060_v59 }
 0xdb6   : > { %v8156_v7 = vpop.f32.mrf.mxu2 }
 0xdb7   : > { %v8189_v62 = vadd.f32 %v8156_v7, %v7977_v1 }
 0xdbe   : > { %v8159_v33 = vpop.f32.mrf.mxu2 }
 0xdc1   : > { %12510 = vmatmul.msk.bf16.gmra.mxu0 %vm4830_vm6, %v13061_v25 }
 0xdc6   : > { %v8161_v10 = vpop.f32.mrf.mxu2 }
 0xdce   : > { %v8356_v20 = vpop.f32.mrf.mxu0  ;;  %v8164_v8 = vpop.f32.mrf.mxu2 }
 0xdcf   : > { %v8396_v16 = vadd.f32 %v8356_v20, %v8184_v39  ;;  %v8456_v39 = vpop.permute.xlu2 %8455  ;;  %v5427_v20 = vadd.f32 %v15105_v41, %v15109_v6 }
 0xdd1   : > { %v16043_v60 = vadd.f32 %v8431_v24, %v8396_v16  ;;  %v7952_v24 = vpop.f32.mrf.mxu1 }
 0xdd2   : > { %v7980_v1 = vadd.f32 %v7952_v24, %v15927_v11 }
 0xdd3   : > { %v8525_v28 = vsel %vm8524_vm10, %v16043_v60, 0.0 }
 0xdd4   : > { %8526 = vadd.xlane.f32.xlu1 %v8525_v28  ;;  %v16440_v28 = vld [vmem:[#allocation9_spill] sm:$0xff] }
 0xdd5   : > { %v5649_v22 = vadd.f32 %v16440_v28, %v5427_v20 }
 0xdd6   : > { %v8358_v13 = vpop.f32.mrf.mxu0 }
 0xdd7   : > { %v8397_v50 = vadd.f32 %v8358_v13, %v8185_v17  ;;  %v8190_v17 = vadd.f32 %v8159_v33, %v7978_v29  ;;  %v8466_v33 = vpop.permute.xlu1 %8465 }
 0xdd9   : > { %v16048_v18 = vadd.f32 %v8436_v2, %v8397_v50  ;;  %v16441_v50 = vld [vmem:[#allocation13_spill] sm:$0xff] }
 0xdda   : > { %v5861_v2 = vadd.f32 %v16441_v50, %v5649_v22 }
 0xddb   : > { %v8528_v30 = vsel %vm8524_vm10, %v16048_v18, 0.0 }
 0xddc   : > { %8529 = vadd.xlane.f32.xlu2 %v8528_v30  ;;  %v8461_v30 = vpop.permute.xlu0 %8460  ;;  %v6073_v41 = vadd.f32 %v16442_v58, %v5861_v2  ;;  %v16453_v2 = vld [vmem:[#allocation17_spill] sm:$0xff] }
 0xdde   : > { %v8361_v14 = vpop.f32.mrf.mxu0 }
 0xddf   : > { %v8398_v55 = vadd.f32 %v8361_v14, %v8186_v9  ;;  %v16443_v9 = vld [vmem:[#allocation21_spill] sm:$0xff] }
 0xde0   : > { %v6285_v7 = vadd.f32 %v16443_v9, %v6073_v41  ;;  %v16455_v9 = vld [vmem:[#allocation26_spill] sm:$0xff] }
 0xde1   : > { %v16053_v27 = vadd.f32 %v8441_v42, %v8398_v55  ;;  %v7954_v55 = vpop.f32.mrf.mxu1  ;;  %v16444_v42 = vld [vmem:[#allocation25_spill] sm:$0xff] }
 0xde2   : > { %v6497_v32 = vadd.f32 %v16444_v42, %v6285_v7 }
 0xde3   : > { %v8531_v35 = vsel %vm8524_vm10, %v16053_v27, 0.0 }
 0xde4   : > { %8532 = vadd.xlane.f32.xlu0 %v8531_v35  ;;  %v8191_v35 = vadd.f32 %v8161_v10, %v7979_v12 }
 0xde6   : > { %v8363_v3 = vpop.f32.mrf.mxu0 }
 0xde7   : > { %v8399_v56 = vadd.f32 %v8363_v3, %v8187_v61  ;;  %v8166_v61 = vpop.f32.mrf.mxu2  ;;  %v16445_v3 = vld [vmem:[#allocation29_spill] sm:$0xff] }
 0xde9   : > { %v16058_v44 = vadd.f32 %v8446_v43, %v8399_v56  ;;  %v6709_v56 = vadd.f32 %v16445_v3, %v6497_v32  ;;  %v7957_v20 = vpop.f32.mrf.mxu1  ;;  %v16457_v3 = vld [vmem:[#allocation6_spill] sm:$0xff] }
 0xdeb   : > { %v8534_v26 = vsel %vm8524_vm10, %v16058_v44, 0.0 }
 0xdec   : > { %8535 = vadd.xlane.f32.xlu1 %v8534_v26  ;;  %v16447_v26 = vld [vmem:[#allocation3_spill] sm:$0xff] }
 0xdee   : > { %v8366_v48 = vpop.f32.mrf.mxu0 }
 0xdef   : > { %v8400_v59 = vadd.f32 %v8366_v48, %v8188_v23  ;;  %v5432_v23 = vadd.f32 %v16447_v26, %v16446_v63  ;;  %v16448_v48 = vld [vmem:[#allocation33_spill] sm:$0xff]  ;;  %v8169_v50 = vpop.f32.mrf.mxu2  ;;  %v16460_v26 = vld [vmem:[#allocation38_spill] sm:$0xff] }
 0xdf1   : > { %v16063_v25 = vadd.f32 %v8451_v46, %v8400_v59  ;;  %v6921_v59 = vadd.f32 %v16448_v48, %v6709_v56  ;;  %v16449_v46 = vld [vmem:[#allocation37_spill] sm:$0xff]  ;;  %v7982_v48 = vadd.f32 %v7957_v20, %v15938_v52 }
 0xdf3   : > { %v8537_v53 = vsel %vm8524_vm10, %v16063_v25, 0.0  ;;  %v7133_v40 = vadd.f32 %v16449_v46, %v6921_v59  ;;  %v16461_v59 = vld [vmem:[#allocation11_spill] sm:$0xff] }
 0xdf4   : > { %8538 = vadd.xlane.f32.xlu2 %v8537_v53  ;;  %v16450_v53 = vld [vmem:[#allocation10_spill] sm:$0xff] }
 0xdf6   : > { %v8368_v51 = vpop.f32.mrf.mxu0 }
 0xdf7   : > { %v8401_v5 = vadd.f32 %v8368_v51, %v8189_v62  ;;  %v5651_v62 = vadd.f32 %v16450_v53, %v5432_v23  ;;  %v16451_v51 = vld [vmem:[#allocation41_spill] sm:$0xff] }
 0xdf9   : > { %v16070_v16 = vadd.f32 %v8456_v39, %v8401_v5  ;;  %v7345_v5 = vadd.f32 %v16451_v51, %v7133_v40  ;;  %v8192_v39 = vadd.f32 %v8164_v8, %v7980_v1  ;;  %v16462_v40 = vld [vmem:[#allocation42_spill] sm:$0xff] }
 0xdfb   : > { %v8540_v0 = vsel %vm8524_vm10, %v16070_v16, 0.0  ;;  %v7557_v22 = vadd.f32 %v15860_v15, %v7345_v5 }
 0xdfc   : > { %8541 = vadd.xlane.f32.xlu0 %v8540_v0  ;;  %v16452_v0 = vld [vmem:[#allocation14_spill] sm:$0xff] }
 0xdfd   : > { %v5863_v28 = vadd.f32 %v16452_v0, %v5651_v62  ;;  %v7769_v24 = vadd.f32 %v15934_v19, %v7557_v22  ;;  %v16458_v19 = vld [vmem:[#allocation5_spill] sm:$0xff]  ;;  %v16463_v62 = vld [vmem:[#allocation15_spill] sm:$0xff]  ;;  %v16464_v0 = vld [vmem:[#allocation18_spill] sm:$0xff] }
 0xdfe   : > { %v8371_v13 = vpop.f32.mrf.mxu0  ;;  %v5437_v56 = vadd.f32 %v16458_v19, %v16457_v3 }
 0xdff   : > { %v8402_v47 = vadd.f32 %v8371_v13, %v8190_v17  ;;  %v8471_v13 = vpop.permute.xlu2 %8470  ;;  %v6075_v11 = vadd.f32 %v16453_v2, %v5863_v28  ;;  %v7981_v41 = vadd.f32 %v7954_v55, %v7769_v24  ;;  %v8171_v55 = vpop.f32.mrf.mxu2  ;;  %v16466_v24 = vld [vmem:[#allocation27_spill] sm:$0xff] }
 0xe00   : > { %v5653_v46 = vadd.f32 %v16461_v59, %v5437_v56 }
 0xe01   : > { %v16078_v6 = vadd.f32 %v8461_v30, %v8402_v47  ;;  %v16454_v30 = vld [vmem:[#allocation22_spill] sm:$0xff]  ;;  %v8193_v12 = vadd.f32 %v8166_v61, %v7981_v41  ;;  %v16467_v41 = vld [vmem:[#allocation31_spill] sm:$0xff] }
 0xe02   : > { %v6287_v58 = vadd.f32 %v16454_v30, %v6075_v11  ;;  %v5865_v51 = vadd.f32 %v16463_v62, %v5653_v46  ;;  %v16474_v46 = vld [vmem:[#allocation19_spill] sm:$0xff] }
 0xe03   : > { %v8543_v14 = vsel %vm8524_vm10, %v16078_v6, 0.0 }
 0xe04   : > { %8544 = vadd.xlane.f32.xlu1 %v8543_v14  ;;  %v6499_v7 = vadd.f32 %v16455_v9, %v6287_v58  ;;  %v16456_v14 = vld [vmem:[#allocation30_spill] sm:$0xff]  ;;  %v6077_v28 = vadd.f32 %v16464_v0, %v5865_v51 }
 0xe06   : > { %v8373_v45 = vpop.f32.mrf.mxu0  ;;  %v6711_v42 = vadd.f32 %v16456_v14, %v6499_v7  ;;  %v16470_v14 = vld [vmem:[#allocation35_spill] sm:$0xff] }
 0xe07   : > { %v8403_v43 = vadd.f32 %v8373_v45, %v8191_v35  ;;  %v8476_v35 = vpop.permute.xlu0 %8475  ;;  %v7959_v45 = vpop.f32.mrf.mxu1 }
 0xe08   : > { %v8174_v11 = vpop.f32.mrf.mxu2  ;;  %v8486_v7 = vpop.permute.xlu2 %8485 }
 0xe09   : > { %v16089_v37 = vadd.f32 %v8466_v33, %v8403_v43  ;;  %v16459_v43 = vld [vmem:[#allocation34_spill] sm:$0xff] }
 0xe0a   : > { %v6923_v33 = vadd.f32 %v16459_v43, %v6711_v42  ;;  %v13162_v43 = vmov 16.0  }
 0xe0b   : > { %v8546_v10 = vsel %vm8524_vm10, %v16089_v37, 0.0  ;;  %13117 = vrcp.f32 %v13162_v43 }
 0xe0c   : > { %8547 = vadd.xlane.f32.xlu2 %v8546_v10  ;;  %v7135_v23 = vadd.f32 %v16460_v26, %v6923_v33  ;;  %v8194_v10 = vadd.f32 %v8169_v50, %v7982_v48  ;;  %v16472_v33 = vld [vmem:[#allocation12_spill] sm:$0xff]  ;;  %v16473_v26 = vld [vmem:[#allocation43_spill] sm:$0xff] }
 0xe0e   : > { %v8376_v29 = vpop.f32.mrf.mxu0  ;;  %v7347_v1 = vadd.f32 %v16462_v40, %v7135_v23 }
 0xe0f   : > { %v8404_v17 = vadd.f32 %v8376_v29, %v8192_v39  ;;  %v8481_v29 = vpop.permute.xlu1 %8480  ;;  %v7962_v22 = vpop.f32.mrf.mxu1 }
 0xe10   : > { %v7559_v5 = vadd.f32 %v15881_v57, %v7347_v1  ;;  %v7984_v3 = vadd.f32 %v7962_v22, %v15946_v36  ;;  %v8491_v36 = vpop.permute.xlu0 %8490  ;;  %v16477_v22 = vld [vmem:[#allocation28_spill] sm:$0xff] }
 0xe11   : > { %v16101_v47 = vadd.f32 %v8471_v13, %v8404_v17  ;;  %v16465_v17 = vld [vmem:[#allocation23_spill] sm:$0xff] }
 0xe12   : > { %v7771_v52 = vadd.f32 %v15943_v54, %v7559_v5  ;;  %v6289_v13 = vadd.f32 %v16465_v17, %v6077_v28  ;;  %v16468_v54 = vld [vmem:[#allocation8_spill] sm:$0xff]  ;;  %v8196_v48 = vadd.f32 %v8174_v11, %v7984_v3 }
 0xe13   : > { %v8549_v8 = vsel %vm8524_vm10, %v16101_v47, 0.0  ;;  %v16478_v11 = vld [vmem:[#allocation32_spill] sm:$0xff] }
 0xe14   : > { %8550 = vadd.xlane.f32.xlu0 %v8549_v8  ;;  %v7983_v2 = vadd.f32 %v7959_v45, %v7771_v52  ;;  %v6501_v30 = vadd.f32 %v16466_v24, %v6289_v13 }
 0xe16   : > { %v8378_v15 = vpop.f32.mrf.mxu0  ;;  %v8195_v57 = vadd.f32 %v8171_v55, %v7983_v2  ;;  %v6713_v8 = vadd.f32 %v16467_v41, %v6501_v30 }
 0xe17   : > { %v8405_v32 = vadd.f32 %v8378_v15, %v8193_v12  ;;  %v16469_v12 = vld [vmem:[#allocation7_spill] sm:$0xff]  ;;  %v7964_v56 = vpop.f32.mrf.mxu1 }
 0xe18   : > { %v5442_v15 = vadd.f32 %v16469_v12, %v16468_v54  ;;  %v6925_v42 = vadd.f32 %v16470_v14, %v6713_v8 }
 0xe19   : > { %v16111_v63 = vadd.f32 %v8476_v35, %v8405_v32  ;;  %v16471_v35 = vld [vmem:[#allocation39_spill] sm:$0xff] }
 0xe1a   : > { %v7137_v45 = vadd.f32 %v16471_v35, %v6925_v42  ;;  %v5655_v55 = vadd.f32 %v16472_v33, %v5442_v15 }
 0xe1b   : > { %v8552_v61 = vsel %vm8524_vm10, %v16111_v63, 0.0 }
 0xe1c   : > { %8553 = vadd.xlane.f32.xlu1 %v8552_v61  ;;  %v7349_v23 = vadd.f32 %v16473_v26, %v7137_v45  ;;  %v8176_v61 = vpop.f32.mrf.mxu2  ;;  %v5867_v40 = vadd.f32 %v16474_v46, %v5655_v55 }
 0xe1e   : > { %v8381_v53 = vpop.f32.mrf.mxu0  ;;  %v7561_v1 = vadd.f32 %v15899_v31, %v7349_v23 }
 0xe1f   : > { %v8406_v39 = vadd.f32 %v8381_v53, %v8194_v10  ;;  %v16475_v53 = vld [vmem:[#allocation20_spill] sm:$0xff]  ;;  %v7967_v2 = vpop.f32.mrf.mxu1 }
 0xe20   : > { %v6079_v62 = vadd.f32 %v16475_v53, %v5867_v40  ;;  %v7773_v51 = vadd.f32 %v15951_v38, %v7561_v1  ;;  %v8496_v38 = vpop.permute.xlu1 %8495  ;;  %v7986_v12 = vadd.f32 %v7967_v2, %v15954_v49  ;;  %v8506_v40 = vpop.permute.xlu0 %8505 }
 0xe21   : > { %v16123_v20 = vadd.f32 %v8481_v29, %v8406_v39  ;;  %v13118_v39 = vpop.eup %13117  ;;  %v16476_v29 = vld [vmem:[#allocation24_spill] sm:$0xff] }
 0xe22   : > { %v6291_v0 = vadd.f32 %v16476_v29, %v6079_v62  ;;  %v7985_v28 = vadd.f32 %v7964_v56, %v7773_v51  ;;  %v8574_v31 = vmul.f32 16.0, %v13118_v39  ;;  %v8501_v56 = vpop.permute.xlu2 %8500  ;;  %vm8578_vm6 = vweird.f32 %v13118_v39 }
 0xe23   : > { %v8555_v50 = vsel %vm8524_vm10, %v16123_v20, 0.0 }
 0xe24   : > { %8556 = vadd.xlane.f32.xlu2 %v8555_v50  ;;  %v6503_v17 = vadd.f32 %v16477_v22, %v6291_v0  ;;  %v8197_v13 = vadd.f32 %v8176_v61, %v7985_v28 }
 0xe26   : > { %v8383_v58 = vpop.f32.mrf.mxu0  ;;  %v6715_v24 = vadd.f32 %v16478_v11, %v6503_v17 }
 0xe27   : > { %v8407_v9 = vadd.f32 %v8383_v58, %v8195_v57  ;;  %v8179_v57 = vpop.f32.mrf.mxu2  ;;  %v16479_v58 = vld [vmem:[#allocation36_spill] sm:$0xff]  ;;  %v7969_v43 = vpop.f32.mrf.mxu1 }
 0xe28   : > { %v6927_v41 = vadd.f32 %v16479_v58, %v6715_v24  ;;  %v8198_v42 = vadd.f32 %v8179_v57, %v7986_v12 }
 0xe29   : > { %v16133_v32 = vadd.f32 %v8486_v7, %v8407_v9  ;;  %v8575_v9 = vsub.f32 1.0, %v8574_v31  ;;  %v16480_v7 = vld [vmem:[#allocation40_spill] sm:$0xff] }
 0xe2a   : > { %v7139_v54 = vadd.f32 %v16480_v7, %v6927_v41 }
 0xe2b   : > { %v8558_v19 = vsel %vm8524_vm10, %v16133_v32, 0.0  ;;  %v8576_v35 = vmul.f32 %v13118_v39, %v8575_v9 }
 0xe2c   : > { %8559 = vadd.xlane.f32.xlu0 %v8558_v19  ;;  %v7351_v14 = vadd.f32 %v15846_v21, %v7139_v54 }
 0xe2d   : > { %v8577_v26 = vadd.f32 %v13118_v39, %v8576_v35 }
 0xe2e   : > { %v8386_v59 = vpop.f32.mrf.mxu0  ;;  %v7563_v3 = vadd.f32 %v15919_v4, %v7351_v14 }
 0xe2f   : > { %v8408_v10 = vadd.f32 %v8386_v59, %v8196_v48  ;;  %v8181_v49 = vpop.f32.mrf.mxu2  ;;  %v16166_v61 = vsel %vm8578_vm6, %v13118_v39, %v8577_v26 }
 0xe30   : > { %v7775_v33 = vadd.f32 %v15959_v34, %v7563_v3 }
 0xe31   : > { %v16145_v5 = vadd.f32 %v8491_v36, %v8408_v10 }
 0xe32   : > { %v7987_v23 = vadd.f32 %v7969_v43, %v7775_v33 }
 0xe33   : > { %v8561_v52 = vsel %vm8524_vm10, %v16145_v5, 0.0 }
 0xe34   : > { %8562 = vadd.xlane.f32.xlu1 %v8561_v52  ;;  %v8199_v21 = vadd.f32 %v8181_v49, %v7987_v23 }
 0xe36   : > { %v8388_v50 = vpop.f32.mrf.mxu0 }
 0xe37   : > { %v8409_v30 = vadd.f32 %v8388_v50, %v8197_v13 }
 0xe39   : > { %v16153_v8 = vadd.f32 %v8496_v38, %v8409_v30 }
 0xe3b   : > { %v8564_v15 = vsel %vm8524_vm10, %v16153_v8, 0.0 }
 0xe3c   : > { %8565 = vadd.xlane.f32.xlu2 %v8564_v15 }
 0xe3e   : > { %v8391_v45 = vpop.f32.mrf.mxu0 }
 0xe3f   : > { %v8410_v19 = vadd.f32 %v8391_v45, %v8198_v42 }
 0xe41   : > { %v16162_v55 = vadd.f32 %v8501_v56, %v8410_v19 }
 0xe43   : > { %v8567_v48 = vsel %vm8524_vm10, %v16162_v55, 0.0 }
 0xe44   : > { %8568 = vadd.xlane.f32.xlu0 %v8567_v48 }
 0xe46   : > { %v8393_v59 = vpop.f32.mrf.mxu0 }
 0xe47   : > { %v8411_v4 = vadd.f32 %v8393_v59, %v8199_v21  ;;  %v8527_v46 = vpop.xlane.xlu1 %8526 }
 0xe48   : > { %v8580_v1 = vmul.f32 %v16166_v61, %v8527_v46 }
 0xe49   : > { %v16169_v34 = vadd.f32 %v8506_v40, %v8411_v4 }
 0xe4a   : > { %v16172_v10 = vsub.f32 %v16043_v60, %v8580_v1 }
 0xe4b   : > { %v8570_v36 = vsel %vm8524_vm10, %v16169_v34, 0.0 }
 0xe4c   : > { %8571 = vadd.xlane.f32.xlu1 %v8570_v36  ;;  %v8612_v53 = vmul.f32 %v16172_v10, %v16172_v10 }
 0xe4e   : > { %v8628_v62 = vsel %vm8524_vm10, %v8612_v53, 0.0 }
 0xe4f   : > { %8629 = vadd.xlane.f32.xlu2 %v8628_v62  ;;  %v8530_v51 = vpop.xlane.xlu2 %8529 }
 0xe50   : > { %v8581_v39 = vmul.f32 %v16166_v61, %v8530_v51 }
 0xe52   : > { %v16181_v29 = vsub.f32 %v16048_v18, %v8581_v39 }
 0xe54   : > { %v8613_v60 = vmul.f32 %v16181_v29, %v16181_v29 }
 0xe56   : > { %v8631_v0 = vsel %vm8524_vm10, %v8613_v60, 0.0 }
 0xe57   : > { %v8533_v28 = vpop.xlane.xlu0 %8532  ;;  %8632 = vadd.xlane.f32.xlu0 %v8631_v0 }
 0xe58   : > { %v8582_v52 = vmul.f32 %v16166_v61, %v8533_v28 }
 0xe5a   : > { %v16188_v22 = vsub.f32 %v16053_v27, %v8582_v52 }
 0xe5c   : > { %v8614_v17 = vmul.f32 %v16188_v22, %v16188_v22 }
 0xe5e   : > { %v8634_v13 = vsel %vm8524_vm10, %v8614_v17, 0.0 }
 0xe5f   : > { %v8536_v31 = vpop.xlane.xlu1 %8535  ;;  %8635 = vadd.xlane.f32.xlu1 %v8634_v13 }
 0xe60   : > { %v8583_v18 = vmul.f32 %v16166_v61, %v8536_v31 }
 0xe62   : > { %v16195_v2 = vsub.f32 %v16058_v44, %v8583_v18 }
 0xe64   : > { %v8615_v50 = vmul.f32 %v16195_v2, %v16195_v2 }
 0xe66   : > { %v8637_v11 = vsel %vm8524_vm10, %v8615_v50, 0.0 }
 0xe67   : > { %8638 = vadd.xlane.f32.xlu2 %v8637_v11  ;;  %v8539_v27 = vpop.xlane.xlu2 %8538 }
 0xe68   : > { %v8584_v24 = vmul.f32 %v16166_v61, %v8539_v27 }
 0xe6a   : > { %v16202_v30 = vsub.f32 %v16063_v25, %v8584_v24 }
 0xe6c   : > { %v8616_v38 = vmul.f32 %v16202_v30, %v16202_v30 }
 0xe6e   : > { %v8640_v57 = vsel %vm8524_vm10, %v8616_v38, 0.0 }
 0xe6f   : > { %v8542_v58 = vpop.xlane.xlu0 %8541  ;;  %8641 = vadd.xlane.f32.xlu0 %v8640_v57 }
 0xe70   : > { %v8585_v44 = vmul.f32 %v16166_v61, %v8542_v58 }
 0xe72   : > { %v16209_v41 = vsub.f32 %v16070_v16, %v8585_v44 }
 0xe74   : > { %v8617_v9 = vmul.f32 %v16209_v41, %v16209_v41 }
 0xe76   : > { %v8643_v7 = vsel %vm8524_vm10, %v8617_v9, 0.0 }
 0xe77   : > { %v8545_v54 = vpop.xlane.xlu1 %8544  ;;  %8644 = vadd.xlane.f32.xlu1 %v8643_v7 }
 0xe78   : > { %v8586_v25 = vmul.f32 %v16166_v61, %v8545_v54 }
 0xe7a   : > { %v16216_v12 = vsub.f32 %v16078_v6, %v8586_v25 }
 0xe7c   : > { %v8618_v15 = vmul.f32 %v16216_v12, %v16216_v12 }
 0xe7e   : > { %v8646_v14 = vsel %vm8524_vm10, %v8618_v15, 0.0 }
 0xe7f   : > { %8647 = vadd.xlane.f32.xlu2 %v8646_v14  ;;  %v8548_v16 = vpop.xlane.xlu2 %8547 }
 0xe80   : > { %v8587_v42 = vmul.f32 %v16166_v61, %v8548_v16 }
 0xe82   : > { %v16223_v35 = vsub.f32 %v16089_v37, %v8587_v42 }
 0xe84   : > { %v8619_v45 = vmul.f32 %v16223_v35, %v16223_v35 }
 0xe86   : > { %v8649_v3 = vsel %vm8524_vm10, %v8619_v45, 0.0 }
 0xe87   : > { %v8551_v19 = vpop.xlane.xlu0 %8550  ;;  %8650 = vadd.xlane.f32.xlu0 %v8649_v3 }
 0xe88   : > { %v8588_v6 = vmul.f32 %v16166_v61, %v8551_v19 }
 0xe8a   : > { %v16230_v56 = vsub.f32 %v16101_v47, %v8588_v6 }
 0xe8c   : > { %v8620_v43 = vmul.f32 %v16230_v56, %v16230_v56 }
 0xe8e   : > { %v8652_v33 = vsel %vm8524_vm10, %v8620_v43, 0.0 }
 0xe8f   : > { %v8554_v26 = vpop.xlane.xlu1 %8553  ;;  %8653 = vadd.xlane.f32.xlu1 %v8652_v33 }
 0xe90   : > { %v8589_v37 = vmul.f32 %v16166_v61, %v8554_v26 }
 0xe92   : > { %v16237_v49 = vsub.f32 %v16111_v63, %v8589_v37 }
 0xe94   : > { %v8621_v23 = vmul.f32 %v16237_v49, %v16237_v49 }
 0xe96   : > { %v8655_v48 = vsel %vm8524_vm10, %v8621_v23, 0.0 }
 0xe97   : > { %8656 = vadd.xlane.f32.xlu2 %v8655_v48  ;;  %v8557_v47 = vpop.xlane.xlu2 %8556 }
 0xe98   : > { %v8590_v21 = vmul.f32 %v16166_v61, %v8557_v47 }
 0xe9a   : > { %v16244_v59 = vsub.f32 %v16123_v20, %v8590_v21  ;;  %v8932_v21 = vld [vmem:[%s16396_s9] sm:$0xff] }
 0xe9c   : > { %v8622_v4 = vmul.f32 %v16244_v59, %v16244_v59 }
 0xe9e   : > { %v8658_v46 = vsel %vm8524_vm10, %v8622_v4, 0.0 }
 0xe9f   : > { %v8560_v40 = vpop.xlane.xlu0 %8559  ;;  %8659 = vadd.xlane.f32.xlu0 %v8658_v46 }
 0xea0   : > { %v8591_v63 = vmul.f32 %v16166_v61, %v8560_v40 }
 0xea2   : > { %v16251_v1 = vsub.f32 %v16133_v32, %v8591_v63 }
 0xea4   : > { %v8623_v36 = vmul.f32 %v16251_v1, %v16251_v1 }
 0xea6   : > { %v8661_v53 = vsel %vm8524_vm10, %v8623_v36, 0.0 }
 0xea7   : > { %v8563_v62 = vpop.xlane.xlu1 %8562  ;;  %8662 = vadd.xlane.f32.xlu1 %v8661_v53 }
 0xea8   : > { %v8592_v20 = vmul.f32 %v16166_v61, %v8563_v62 }
 0xeaa   : > { %v16258_v51 = vsub.f32 %v16145_v5, %v8592_v20 }
 0xeac   : > { %v8624_v39 = vmul.f32 %v16258_v51, %v16258_v51 }
 0xeae   : > { %v8664_v60 = vsel %vm8524_vm10, %v8624_v39, 0.0 }
 0xeaf   : > { %8665 = vadd.xlane.f32.xlu2 %v8664_v60  ;;  %v8566_v32 = vpop.xlane.xlu2 %8565 }
 0xeb0   : > { %v8593_v0 = vmul.f32 %v16166_v61, %v8566_v32 }
 0xeb2   : > { %v16265_v28 = vsub.f32 %v16153_v8, %v8593_v0 }
 0xeb4   : > { %v8625_v52 = vmul.f32 %v16265_v28, %v16265_v28 }
 0xeb6   : > { %v8667_v17 = vsel %vm8524_vm10, %v8625_v52, 0.0 }
 0xeb7   : > { %v8569_v13 = vpop.xlane.xlu0 %8568  ;;  %8668 = vadd.xlane.f32.xlu0 %v8667_v17 }
 0xeb8   : > { %v8594_v5 = vmul.f32 %v16166_v61, %v8569_v13  ;;  %v8933_v13 = vld [vmem:[%s16396_s9 + $0x8] sm:$0xff] }
 0xeba   : > { %v16272_v31 = vsub.f32 %v16162_v55, %v8594_v5 }
 0xebc   : > { %v8626_v18 = vmul.f32 %v16272_v31, %v16272_v31 }
 0xebe   : > { %v8670_v50 = vsel %vm8524_vm10, %v8626_v18, 0.0 }
 0xebf   : > { %v8572_v11 = vpop.xlane.xlu1 %8571  ;;  %8671 = vadd.xlane.f32.xlu1 %v8670_v50 }
 0xec0   : > { %v8595_v8 = vmul.f32 %v16166_v61, %v8572_v11 }
 0xec2   : > { %v16279_v27 = vsub.f32 %v16169_v34, %v8595_v8  ;;  %v8630_v24 = vpop.xlane.xlu2 %8629 }
 0xec3   : > { %v8676_v38 = vmul.f32 %v8630_v24, %v16166_v61 }
 0xec4   : > { %v8627_v57 = vmul.f32 %v16279_v27, %v16279_v27 }
 0xec5   : > { %v8692_v55 = vadd.f32 1e-05, %v8676_v38 }
 0xec6   : > { %v8673_v58 = vsel %vm8524_vm10, %v8627_v57, 0.0 }
 0xec7   : > { %13119 = vrsqrt.f32 %v8692_v55  ;;  %8674 = vadd.xlane.f32.xlu2 %v8673_v58  ;;  %vm8714_vm12 = vweird.f32 %v8692_v55 }
 0xeca   : > { %v8633_v44 = vpop.xlane.xlu0 %8632 }
 0xecb   : > { %v8677_v9 = vmul.f32 %v8633_v44, %v16166_v61 }
 0xecd   : > { %v13120_v7 = vpop.eup %13119  ;;  %v8693_v54 = vadd.f32 1e-05, %v8677_v9 }
 0xece   : > { %v8709_v25 = vmul.f32 %v13120_v7, %v8692_v55  ;;  %vm8715_vm11 = vweird.f32 %v13120_v7 }
 0xecf   : > { %13121 = vrsqrt.f32 %v8693_v54  ;;  %vm8716_vm13 = vmor %vm8714_vm12, %vm8715_vm11  ;;  %vm8724_vm0 = vweird.f32 %v8693_v54 }
 0xed0   : > { %v8710_v34 = vmul.f32 %v13120_v7, %v8709_v25  ;;  %v8934_v25 = vld [vmem:[%s16396_s9 + $0x10] sm:$0xff] }
 0xed2   : > { %v8711_v15 = vmul.f32 0.5, %v8710_v34  ;;  %v8636_v14 = vpop.xlane.xlu1 %8635 }
 0xed3   : > { %v8678_v16 = vmul.f32 %v8636_v14, %v16166_v61 }
 0xed4   : > { %v8712_v42 = vsub.f32 1.5, %v8711_v15 }
 0xed5   : > { %v13122_v45 = vpop.eup %13121  ;;  %v8694_v3 = vadd.f32 1e-05, %v8678_v16 }
 0xed6   : > { %v8713_v19 = vmul.f32 %v13120_v7, %v8712_v42  ;;  %v8719_v6 = vmul.f32 %v13122_v45, %v8693_v54  ;;  %vm8725_vm15 = vweird.f32 %v13122_v45 }
 0xed7   : > { %13123 = vrsqrt.f32 %v8694_v3  ;;  %vm8726_vm1 = vmor %vm8724_vm0, %vm8725_vm15  ;;  %vm8734_vm4 = vweird.f32 %v8694_v3 }
 0xed8   : > { %v8717_v43 = vsel %vm8716_vm13, %v13120_v7, %v8713_v19  ;;  %v8720_v33 = vmul.f32 %v13122_v45, %v8719_v6 }
 0xed9   : > { %v8868_v26 = vmul.f32 %v8717_v43, %v16172_v10 }
 0xeda   : > { %v8721_v37 = vmul.f32 0.5, %v8720_v33  ;;  %v8639_v23 = vpop.xlane.xlu2 %8638 }
 0xedb   : > { %v8679_v48 = vmul.f32 %v8639_v23, %v16166_v61  ;;  %vm8884_vm14 = vcmp.ge.f32.partialorder %v8868_v26, 0.0  ;;  %v8900_v47 = vmul.f32 0.2, %v8868_v26 }
 0xedc   : > { %v8722_v4 = vsub.f32 1.5, %v8721_v37 }
 0xedd   : > { %v13124_v46 = vpop.eup %13123  ;;  %v8695_v40 = vadd.f32 1e-05, %v8679_v48  ;;  %v8916_v63 = vsel %vm8884_vm14, %v8868_v26, %v8900_v47  ;;  %v8935_v48 = vld [vmem:[%s16396_s9 + $0x18] sm:$0xff] }
 0xede   : > { %v8723_v36 = vmul.f32 %v13122_v45, %v8722_v4  ;;  %v8729_v53 = vmul.f32 %v13124_v46, %v8694_v3  ;;  %v8948_v62 = vmul.f32 %v8932_v21, %v8916_v63  ;;  %vm8735_vm3 = vweird.f32 %v13124_v46 }
 0xedf   : > { %13125 = vrsqrt.f32 %v8695_v40  ;;  %vm8736_vm5 = vmor %vm8734_vm4, %vm8735_vm3  ;;  %vm8744_vm9 = vweird.f32 %v8695_v40 }
 0xee0   : > { %v8727_v10 = vsel %vm8726_vm1, %v13122_v45, %v8723_v36  ;;  %v8730_v20 = vmul.f32 %v13124_v46, %v8729_v53  ;;  %v8964_v39 = vsel %vm8524_vm10, %v8948_v62, 0.0 }
 0xee1   : > { %8965 = vadd.xlane.f32.xlu0 %v8964_v39  ;;  %v8869_v60 = vmul.f32 %v8727_v10, %v16181_v29 }
 0xee2   : > { %v8731_v32 = vmul.f32 0.5, %v8730_v20  ;;  %v8642_v0 = vpop.xlane.xlu0 %8641 }
 0xee3   : > { %v8680_v52 = vmul.f32 %v8642_v0, %v16166_v61  ;;  %vm8885_vm2 = vcmp.ge.f32.partialorder %v8869_v60, 0.0  ;;  %v8901_v17 = vmul.f32 0.2, %v8869_v60  ;;  %v8936_v0 = vld [vmem:[%s16396_s9 + $0x20] sm:$0xff] }
 0xee4   : > { %v8732_v5 = vsub.f32 1.5, %v8731_v32 }
 0xee5   : > { %v13126_v18 = vpop.eup %13125  ;;  %v8696_v50 = vadd.f32 1e-05, %v8680_v52  ;;  %v8917_v11 = vsel %vm8885_vm2, %v8869_v60, %v8901_v17 }
 0xee6   : > { %v8733_v8 = vmul.f32 %v13124_v46, %v8732_v5  ;;  %v8739_v24 = vmul.f32 %v13126_v18, %v8695_v40  ;;  %v8949_v38 = vmul.f32 %v8933_v13, %v8917_v11  ;;  %vm8745_vm8 = vweird.f32 %v13126_v18 }
 0xee7   : > { %13127 = vrsqrt.f32 %v8696_v50  ;;  %vm8746_vm6 = vmor %vm8744_vm9, %vm8745_vm8  ;;  %vm8754_vm13 = vweird.f32 %v8696_v50 }
 0xee8   : > { %v8737_v29 = vsel %vm8736_vm5, %v13124_v46, %v8733_v8  ;;  %v8740_v57 = vmul.f32 %v13126_v18, %v8739_v24  ;;  %v8967_v55 = vsel %vm8524_vm10, %v8949_v38, 0.0 }
 0xee9   : > { %8968 = vadd.xlane.f32.xlu1 %v8967_v55  ;;  %v8870_v58 = vmul.f32 %v8737_v29, %v16188_v22 }
 0xeea   : > { %v8741_v44 = vmul.f32 0.5, %v8740_v57  ;;  %v8645_v9 = vpop.xlane.xlu1 %8644 }
 0xeeb   : > { %v8681_v7 = vmul.f32 %v8645_v9, %v16166_v61  ;;  %vm8886_vm7 = vcmp.ge.f32.partialorder %v8870_v58, 0.0  ;;  %v8902_v54 = vmul.f32 0.2, %v8870_v58 }
 0xeec   : > { %v8742_v34 = vsub.f32 1.5, %v8741_v44  ;;  %v8937_v44 = vld [vmem:[%s16396_s9 + $0x28] sm:$0xff] }
 0xeed   : > { %v13128_v15 = vpop.eup %13127  ;;  %v8697_v14 = vadd.f32 1e-05, %v8681_v7  ;;  %v8918_v16 = vsel %vm8886_vm7, %v8870_v58, %v8902_v54 }
 0xeee   : > { %v8743_v42 = vmul.f32 %v13126_v18, %v8742_v34  ;;  %v8749_v45 = vmul.f32 %v13128_v15, %v8696_v50  ;;  %v8950_v3 = vmul.f32 %v8934_v25, %v8918_v16  ;;  %vm8755_vm12 = vweird.f32 %v13128_v15 }
 0xeef   : > { %13129 = vrsqrt.f32 %v8697_v14  ;;  %vm8756_vm14 = vmor %vm8754_vm13, %vm8755_vm12  ;;  %vm8764_vm1 = vweird.f32 %v8697_v14 }
 0xef0   : > { %v8747_v22 = vsel %vm8746_vm6, %v13126_v18, %v8743_v42  ;;  %v8750_v19 = vmul.f32 %v13128_v15, %v8749_v45  ;;  %v8970_v6 = vsel %vm8524_vm10, %v8950_v3, 0.0 }
 0xef1   : > { %8971 = vadd.xlane.f32.xlu2 %v8970_v6  ;;  %v8871_v43 = vmul.f32 %v8747_v22, %v16195_v2 }
 0xef2   : > { %v8751_v33 = vmul.f32 0.5, %v8750_v19  ;;  %v8648_v26 = vpop.xlane.xlu2 %8647 }
 0xef3   : > { %v8682_v37 = vmul.f32 %v8648_v26, %v16166_v61  ;;  %vm8887_vm11 = vcmp.ge.f32.partialorder %v8871_v43, 0.0  ;;  %v8903_v23 = vmul.f32 0.2, %v8871_v43 }
 0xef4   : > { %v8752_v47 = vsub.f32 1.5, %v8751_v33 }
 0xef5   : > { %v13130_v21 = vpop.eup %13129  ;;  %v8698_v4 = vadd.f32 1e-05, %v8682_v37  ;;  %v8919_v46 = vsel %vm8887_vm11, %v8871_v43, %v8903_v23  ;;  %v8938_v43 = vld [vmem:[%s16396_s9 + $0x30] sm:$0xff] }
 0xef6   : > { %v8753_v40 = vmul.f32 %v13128_v15, %v8752_v47  ;;  %v8759_v63 = vmul.f32 %v13130_v21, %v8697_v14  ;;  %v8951_v36 = vmul.f32 %v8935_v48, %v8919_v46  ;;  %vm8765_vm0 = vweird.f32 %v13130_v21 }
 0xef7   : > { %13131 = vrsqrt.f32 %v8698_v4  ;;  %vm8766_vm2 = vmor %vm8764_vm1, %vm8765_vm0  ;;  %vm8774_vm5 = vweird.f32 %v8698_v4 }
 0xef8   : > { %v8757_v2 = vsel %vm8756_vm14, %v13128_v15, %v8753_v40  ;;  %v8760_v53 = vmul.f32 %v13130_v21, %v8759_v63  ;;  %v8973_v62 = vsel %vm8524_vm10, %v8951_v36, 0.0 }
 0xef9   : > { %8974 = vadd.xlane.f32.xlu0 %v8973_v62  ;;  %v8872_v10 = vmul.f32 %v8757_v2, %v16202_v30  ;;  %v8939_v62 = vld [vmem:[%s16396_s9 + $0x38] sm:$0xff] }
 0xefa   : > { %v8761_v20 = vmul.f32 0.5, %v8760_v53  ;;  %v8651_v39 = vpop.xlane.xlu0 %8650 }
 0xefb   : > { %v8683_v60 = vmul.f32 %v8651_v39, %v16166_v61  ;;  %vm8888_vm15 = vcmp.ge.f32.partialorder %v8872_v10, 0.0  ;;  %v8904_v32 = vmul.f32 0.2, %v8872_v10 }
 0xefc   : > { %v8762_v52 = vsub.f32 1.5, %v8761_v20 }
 0xefd   : > { %v13132_v17 = vpop.eup %13131  ;;  %v8699_v13 = vadd.f32 1e-05, %v8683_v60  ;;  %v8920_v5 = vsel %vm8888_vm15, %v8872_v10, %v8904_v32 }
 0xefe   : > { %v8763_v18 = vmul.f32 %v13130_v21, %v8762_v52  ;;  %v8769_v50 = vmul.f32 %v13132_v17, %v8698_v4  ;;  %v8952_v11 = vmul.f32 %v8936_v0, %v8920_v5  ;;  %vm8775_vm4 = vweird.f32 %v13132_v17 }
 0xeff   : > { %13133 = vrsqrt.f32 %v8699_v13  ;;  %vm8776_vm7 = vmor %vm8774_vm5, %vm8775_vm4  ;;  %vm8784_vm6 = vweird.f32 %v8699_v13 }
 0xf00   : > { %v8767_v30 = vsel %vm8766_vm2, %v13130_v21, %v8763_v18  ;;  %v8770_v8 = vmul.f32 %v13132_v17, %v8769_v50  ;;  %v8976_v24 = vsel %vm8524_vm10, %v8952_v11, 0.0 }
 0xf01   : > { %8977 = vadd.xlane.f32.xlu1 %v8976_v24  ;;  %v8873_v38 = vmul.f32 %v8767_v30, %v16209_v41 }
 0xf02   : > { %v8771_v29 = vmul.f32 0.5, %v8770_v8  ;;  %v8654_v57 = vpop.xlane.xlu1 %8653  ;;  %v8940_v8 = vld [vmem:[%s16396_s9 + $0x40] sm:$0xff] }
 0xf03   : > { %v8684_v55 = vmul.f32 %v8654_v57, %v16166_v61  ;;  %vm8889_vm3 = vcmp.ge.f32.partialorder %v8873_v38, 0.0  ;;  %v8905_v58 = vmul.f32 0.2, %v8873_v38 }
 0xf04   : > { %v8772_v9 = vsub.f32 1.5, %v8771_v29 }
 0xf05   : > { %v13134_v7 = vpop.eup %13133  ;;  %v8700_v54 = vadd.f32 1e-05, %v8684_v55  ;;  %v8921_v25 = vsel %vm8889_vm3, %v8873_v38, %v8905_v58 }
 0xf06   : > { %v8773_v34 = vmul.f32 %v13132_v17, %v8772_v9  ;;  %v8779_v15 = vmul.f32 %v13134_v7, %v8699_v13  ;;  %v8953_v14 = vmul.f32 %v8937_v44, %v8921_v25  ;;  %vm8785_vm9 = vweird.f32 %v13134_v7 }
 0xf07   : > { %13135 = vrsqrt.f32 %v8700_v54  ;;  %vm8786_vm11 = vmor %vm8784_vm6, %vm8785_vm9  ;;  %vm8794_vm14 = vweird.f32 %v8700_v54 }
 0xf08   : > { %v8777_v41 = vsel %vm8776_vm7, %v13132_v17, %v8773_v34  ;;  %v8780_v16 = vmul.f32 %v13134_v7, %v8779_v15  ;;  %v8979_v42 = vsel %vm8524_vm10, %v8953_v14, 0.0 }
 0xf09   : > { %8980 = vadd.xlane.f32.xlu2 %v8979_v42  ;;  %v8874_v45 = vmul.f32 %v8777_v41, %v16216_v12  ;;  %v8941_v41 = vld [vmem:[%s16396_s9 + $0x48] sm:$0xff] }
 0xf0a   : > { %v8781_v3 = vmul.f32 0.5, %v8780_v16  ;;  %v8657_v22 = vpop.xlane.xlu2 %8656 }
 0xf0b   : > { %v8685_v19 = vmul.f32 %v8657_v22, %v16166_v61  ;;  %vm8890_vm8 = vcmp.ge.f32.partialorder %v8874_v45, 0.0  ;;  %v8906_v6 = vmul.f32 0.2, %v8874_v45 }
 0xf0c   : > { %v8782_v33 = vsub.f32 1.5, %v8781_v3 }
 0xf0d   : > { %v13136_v26 = vpop.eup %13135  ;;  %v8701_v37 = vadd.f32 1e-05, %v8685_v19  ;;  %v8922_v23 = vsel %vm8890_vm8, %v8874_v45, %v8906_v6 }
 0xf0e   : > { %v8783_v48 = vmul.f32 %v13134_v7, %v8782_v33  ;;  %v8789_v47 = vmul.f32 %v13136_v26, %v8700_v54  ;;  %v8954_v21 = vmul.f32 %v8938_v43, %v8922_v23  ;;  %vm8795_vm13 = vweird.f32 %v13136_v26 }
 0xf0f   : > { %13137 = vrsqrt.f32 %v8701_v37  ;;  %vm8796_vm15 = vmor %vm8794_vm14, %vm8795_vm13  ;;  %vm8804_vm2 = vweird.f32 %v8701_v37 }
 0xf10   : > { %v8787_v12 = vsel %vm8786_vm11, %v13134_v7, %v8783_v48  ;;  %v8790_v4 = vmul.f32 %v13136_v26, %v8789_v47  ;;  %v8982_v46 = vsel %vm8524_vm10, %v8954_v21, 0.0  ;;  %v8942_v21 = vld [vmem:[%s16396_s9 + $0x50] sm:$0xff] }
 0xf11   : > { %8983 = vadd.xlane.f32.xlu0 %v8982_v46  ;;  %v8875_v40 = vmul.f32 %v8787_v12, %v16223_v35 }
 0xf12   : > { %v8791_v63 = vmul.f32 0.5, %v8790_v4  ;;  %v8660_v36 = vpop.xlane.xlu0 %8659 }
 0xf13   : > { %v8686_v2 = vmul.f32 %v8660_v36, %v16166_v61  ;;  %vm8891_vm12 = vcmp.ge.f32.partialorder %v8875_v40, 0.0  ;;  %v8907_v53 = vmul.f32 0.2, %v8875_v40 }
 0xf14   : > { %v8792_v10 = vsub.f32 1.5, %v8791_v63 }
 0xf15   : > { %v13138_v20 = vpop.eup %13137  ;;  %v8702_v39 = vadd.f32 1e-05, %v8686_v2  ;;  %v8923_v60 = vsel %vm8891_vm12, %v8875_v40, %v8907_v53 }
 0xf16   : > { %v8793_v32 = vmul.f32 %v13136_v26, %v8792_v10  ;;  %v8799_v0 = vmul.f32 %v13138_v20, %v8701_v37  ;;  %v8955_v52 = vmul.f32 %v8939_v62, %v8923_v60  ;;  %vm8805_vm1 = vweird.f32 %v13138_v20 }
 0xf17   : > { %13139 = vrsqrt.f32 %v8702_v39  ;;  %vm8806_vm3 = vmor %vm8804_vm2, %vm8805_vm1  ;;  %vm8814_vm7 = vweird.f32 %v8702_v39 }
 0xf18   : > { %v8797_v35 = vsel %vm8796_vm15, %v13136_v26, %v8793_v32  ;;  %v8800_v17 = vmul.f32 %v13138_v20, %v8799_v0  ;;  %v8985_v13 = vsel %vm8524_vm10, %v8955_v52, 0.0  ;;  %v8943_v0 = vld [vmem:[%s16396_s9 + $0x58] sm:$0xff] }
 0xf19   : > { %8986 = vadd.xlane.f32.xlu1 %v8985_v13  ;;  %v8876_v5 = vmul.f32 %v8797_v35, %v16230_v56 }
 0xf1a   : > { %v8801_v18 = vmul.f32 0.5, %v8800_v17  ;;  %v8663_v50 = vpop.xlane.xlu1 %8662 }
 0xf1b   : > { %v8687_v11 = vmul.f32 %v8663_v50, %v16166_v61  ;;  %vm8892_vm0 = vcmp.ge.f32.partialorder %v8876_v5, 0.0  ;;  %v8908_v30 = vmul.f32 0.2, %v8876_v5 }
 0xf1c   : > { %v8802_v24 = vsub.f32 1.5, %v8801_v18 }
 0xf1d   : > { %v13140_v38 = vpop.eup %13139  ;;  %v8703_v29 = vadd.f32 1e-05, %v8687_v11  ;;  %v8924_v57 = vsel %vm8892_vm0, %v8876_v5, %v8908_v30 }
 0xf1e   : > { %v8803_v55 = vmul.f32 %v13138_v20, %v8802_v24  ;;  %v8809_v58 = vmul.f32 %v13140_v38, %v8702_v39  ;;  %v8956_v44 = vmul.f32 %v8940_v8, %v8924_v57  ;;  %vm8815_vm5 = vweird.f32 %v13140_v38 }
 0xf1f   : > { %13141 = vrsqrt.f32 %v8703_v29  ;;  %vm8816_vm8 = vmor %vm8814_vm7, %vm8815_vm5  ;;  %vm8824_vm11 = vweird.f32 %v8703_v29 }
 0xf20   : > { %v8807_v56 = vsel %vm8806_vm3, %v13138_v20, %v8803_v55  ;;  %v8810_v9 = vmul.f32 %v13140_v38, %v8809_v58  ;;  %v8988_v7 = vsel %vm8524_vm10, %v8956_v44, 0.0  ;;  %v8944_v55 = vld [vmem:[%s16396_s9 + $0x60] sm:$0xff] }
 0xf21   : > { %8989 = vadd.xlane.f32.xlu2 %v8988_v7  ;;  %v8877_v54 = vmul.f32 %v8807_v56, %v16237_v49 }
 0xf22   : > { %v8811_v25 = vmul.f32 0.5, %v8810_v9  ;;  %v8666_v34 = vpop.xlane.xlu2 %8665 }
 0xf23   : > { %v8688_v15 = vmul.f32 %v8666_v34, %v16166_v61  ;;  %vm8893_vm4 = vcmp.ge.f32.partialorder %v8877_v54, 0.0  ;;  %v8909_v14 = vmul.f32 0.2, %v8877_v54 }
 0xf24   : > { %v8812_v16 = vsub.f32 1.5, %v8811_v25 }
 0xf25   : > { %v13142_v42 = vpop.eup %13141  ;;  %v8704_v45 = vadd.f32 1e-05, %v8688_v15  ;;  %v8925_v3 = vsel %vm8893_vm4, %v8877_v54, %v8909_v14 }
 0xf26   : > { %v8813_v22 = vmul.f32 %v13140_v38, %v8812_v16  ;;  %v8819_v19 = vmul.f32 %v13142_v42, %v8703_v29  ;;  %v8957_v6 = vmul.f32 %v8941_v41, %v8925_v3  ;;  %vm8825_vm6 = vweird.f32 %v13142_v42  ;;  %v8945_v16 = vld [vmem:[%s16396_s9 + $0x68] sm:$0xff] }
 0xf27   : > { %13143 = vrsqrt.f32 %v8704_v45  ;;  %vm8826_vm12 = vmor %vm8824_vm11, %vm8825_vm6  ;;  %vm8834_vm15 = vweird.f32 %v8704_v45 }
 0xf28   : > { %v8817_v49 = vsel %vm8816_vm8, %v13140_v38, %v8813_v22  ;;  %v8820_v43 = vmul.f32 %v13142_v42, %v8819_v19  ;;  %v8991_v33 = vsel %vm8524_vm10, %v8957_v6, 0.0 }
 0xf29   : > { %8992 = vadd.xlane.f32.xlu0 %v8991_v33  ;;  %v8878_v26 = vmul.f32 %v8817_v49, %v16244_v59 }
 0xf2a   : > { %v8821_v37 = vmul.f32 0.5, %v8820_v43  ;;  %v8669_v23 = vpop.xlane.xlu0 %8668 }
 0xf2b   : > { %v8689_v48 = vmul.f32 %v8669_v23, %v16166_v61  ;;  %vm8894_vm9 = vcmp.ge.f32.partialorder %v8878_v26, 0.0  ;;  %v8910_v47 = vmul.f32 0.2, %v8878_v26  ;;  %v8946_v23 = vld [vmem:[%s16396_s9 + $0x70] sm:$0xff] }
 0xf2c   : > { %v8822_v12 = vsub.f32 1.5, %v8821_v37 }
 0xf2d   : > { %v13144_v4 = vpop.eup %13143  ;;  %v8705_v46 = vadd.f32 1e-05, %v8689_v48  ;;  %v8926_v40 = vsel %vm8894_vm9, %v8878_v26, %v8910_v47 }
 0xf2e   : > { %v8823_v63 = vmul.f32 %v13142_v42, %v8822_v12  ;;  %v8829_v36 = vmul.f32 %v13144_v4, %v8704_v45  ;;  %v8958_v2 = vmul.f32 %v8942_v21, %v8926_v40  ;;  %vm8835_vm14 = vweird.f32 %v13144_v4 }
 0xf2f   : > { %13145 = vrsqrt.f32 %v8705_v46  ;;  %vm8836_vm0 = vmor %vm8834_vm15, %vm8835_vm14  ;;  %vm8844_vm3 = vweird.f32 %v8705_v46 }
 0xf30   : > { %v8827_v59 = vsel %vm8826_vm12, %v13142_v42, %v8823_v63  ;;  %v8830_v53 = vmul.f32 %v13144_v4, %v8829_v36  ;;  %v8994_v62 = vsel %vm8524_vm10, %v8958_v2, 0.0  ;;  %v8947_v63 = vld [vmem:[%s16396_s9 + $0x78] sm:$0xff] }
 0xf31   : > { %8995 = vadd.xlane.f32.xlu1 %v8994_v62  ;;  %v8879_v10 = vmul.f32 %v8827_v59, %v16251_v1 }
 0xf32   : > { %v8831_v20 = vmul.f32 0.5, %v8830_v53  ;;  %v8672_v39 = vpop.xlane.xlu1 %8671 }
 0xf33   : > { %v8690_v60 = vmul.f32 %v8672_v39, %v16166_v61  ;;  %vm8895_vm13 = vcmp.ge.f32.partialorder %v8879_v10, 0.0  ;;  %v8911_v32 = vmul.f32 0.2, %v8879_v10 }
 0xf34   : > { %v8832_v52 = vsub.f32 1.5, %v8831_v20 }
 0xf35   : > { %v13146_v35 = vpop.eup %13145  ;;  %v8706_v17 = vadd.f32 1e-05, %v8690_v60  ;;  %v8927_v13 = vsel %vm8895_vm13, %v8879_v10, %v8911_v32 }
 0xf36   : > { %v8833_v5 = vmul.f32 %v13144_v4, %v8832_v52  ;;  %v8839_v18 = vmul.f32 %v13146_v35, %v8705_v46  ;;  %v8959_v50 = vmul.f32 %v8943_v0, %v8927_v13  ;;  %vm8845_vm2 = vweird.f32 %v13146_v35 }
 0xf37   : > { %13147 = vrsqrt.f32 %v8706_v17  ;;  %vm8846_vm4 = vmor %vm8844_vm3, %vm8845_vm2  ;;  %vm8854_vm8 = vweird.f32 %v8706_v17 }
 0xf38   : > { %v8837_v1 = vsel %vm8836_vm0, %v13144_v4, %v8833_v5  ;;  %v8840_v11 = vmul.f32 %v13146_v35, %v8839_v18  ;;  %v8997_v30 = vsel %vm8524_vm10, %v8959_v50, 0.0 }
 0xf39   : > { %8998 = vadd.xlane.f32.xlu2 %v8997_v30  ;;  %v8880_v8 = vmul.f32 %v8837_v1, %v16258_v51 }
 0xf3a   : > { %v8841_v24 = vmul.f32 0.5, %v8840_v11  ;;  %v8675_v38 = vpop.xlane.xlu2 %8674 }
 0xf3b   : > { %v8691_v29 = vmul.f32 %v8675_v38, %v16166_v61  ;;  %vm8896_vm1 = vcmp.ge.f32.partialorder %v8880_v8, 0.0  ;;  %v8912_v57 = vmul.f32 0.2, %v8880_v8 }
 0xf3c   : > { %v8842_v58 = vsub.f32 1.5, %v8841_v24 }
 0xf3d   : > { %v13148_v44 = vpop.eup %13147  ;;  %v8707_v56 = vadd.f32 1e-05, %v8691_v29  ;;  %v8928_v9 = vsel %vm8896_vm1, %v8880_v8, %v8912_v57 }
 0xf3e   : > { %v8843_v7 = vmul.f32 %v13146_v35, %v8842_v58  ;;  %v8849_v54 = vmul.f32 %v13148_v44, %v8706_v17  ;;  %v8960_v25 = vmul.f32 %v8944_v55, %v8928_v9  ;;  %vm8855_vm7 = vweird.f32 %v13148_v44 }
 0xf3f   : > { %13149 = vrsqrt.f32 %v8707_v56  ;;  %vm8856_vm9 = vmor %vm8854_vm8, %vm8855_vm7  ;;  %vm8864_vm12 = vweird.f32 %v8707_v56 }
 0xf40   : > { %v8847_v51 = vsel %vm8846_vm4, %v13146_v35, %v8843_v7  ;;  %v8850_v34 = vmul.f32 %v13148_v44, %v8849_v54  ;;  %v9000_v61 = vsel %vm8524_vm10, %v8960_v25, 0.0 }
 0xf41   : > { %9001 = vadd.xlane.f32.xlu0 %v9000_v61  ;;  %v8881_v15 = vmul.f32 %v8847_v51, %v16265_v28 }
 0xf42   : > { %v8851_v14 = vmul.f32 0.5, %v8850_v34 }
 0xf43   : > { %vm8897_vm5 = vcmp.ge.f32.partialorder %v8881_v15, 0.0  ;;  %v8913_v41 = vmul.f32 0.2, %v8881_v15 }
 0xf44   : > { %v8852_v42 = vsub.f32 1.5, %v8851_v14  ;;  %v9033_v14 = vld [vmem:[#allocation2] sm:$0x1] }
 0xf45   : > { %v13150_v45 = vpop.eup %13149  ;;  %v8929_v3 = vsel %vm8897_vm5, %v8881_v15, %v8913_v41 }
 0xf46   : > { %v8853_v22 = vmul.f32 %v13148_v44, %v8852_v42  ;;  %v8859_v19 = vmul.f32 %v13150_v45, %v8707_v56  ;;  %v8961_v6 = vmul.f32 %v8945_v16, %v8929_v3  ;;  %vm8865_vm11 = vweird.f32 %v13150_v45 }
 0xf47   : > { %vm8866_vm13 = vmor %vm8864_vm12, %vm8865_vm11 }
 0xf48   : > { %v8857_v49 = vsel %vm8856_vm9, %v13148_v44, %v8853_v22  ;;  %v8860_v43 = vmul.f32 %v13150_v45, %v8859_v19  ;;  %v9003_v28 = vsel %vm8524_vm10, %v8961_v6, 0.0 }
 0xf49   : > { %9004 = vadd.xlane.f32.xlu1 %v9003_v28  ;;  %v8882_v33 = vmul.f32 %v8857_v49, %v16272_v31 }
 0xf4a   : > { %v8861_v26 = vmul.f32 0.5, %v8860_v43 }
 0xf4b   : > { %vm8898_vm6 = vcmp.ge.f32.partialorder %v8882_v33, 0.0  ;;  %v8914_v37 = vmul.f32 0.2, %v8882_v33 }
 0xf4c   : > { %v8862_v48 = vsub.f32 1.5, %v8861_v26 }
 0xf4d   : > { %v8930_v47 = vsel %vm8898_vm6, %v8882_v33, %v8914_v37 }
 0xf4e   : > { %v8863_v21 = vmul.f32 %v13150_v45, %v8862_v48  ;;  %v8962_v12 = vmul.f32 %v8946_v23, %v8930_v47 }
 0xf50   : > { %v8867_v4 = vsel %vm8866_vm13, %v13150_v45, %v8863_v21  ;;  %v9006_v46 = vsel %vm8524_vm10, %v8962_v12, 0.0 }
 0xf51   : > { %9007 = vadd.xlane.f32.xlu2 %v9006_v46  ;;  %v8883_v31 = vmul.f32 %v8867_v4, %v16279_v27 }
 0xf53   : > { %vm8899_vm14 = vcmp.ge.f32.partialorder %v8883_v31, 0.0  ;;  %v8915_v40 = vmul.f32 0.2, %v8883_v31 }
 0xf54   : > { %v8966_v53 = vpop.xlane.xlu0 %8965 }
 0xf55   : > { %v8931_v36 = vsel %vm8899_vm14, %v8883_v31, %v8915_v40 }
 0xf56   : > { %v8963_v2 = vmul.f32 %v8947_v63, %v8931_v36 }
 0xf58   : > { %v9009_v59 = vsel %vm8524_vm10, %v8963_v2, 0.0 }
 0xf59   : > { %9010 = vadd.xlane.f32.xlu0 %v9009_v59 }
 0xf5c   : > { %v8969_v62 = vpop.xlane.xlu1 %8968 }
 0xf5d   : > { %v9012_v32 = vadd.f32 %v8969_v62, %v8966_v53 }
 0xf64   : > { %v8972_v10 = vpop.xlane.xlu2 %8971 }
 0xf65   : > { %v9013_v0 = vadd.f32 %v9012_v32, %v8972_v10 }
 0xf6c   : > { %v8975_v20 = vpop.xlane.xlu0 %8974 }
 0xf6d   : > { %v9014_v52 = vadd.f32 %v9013_v0, %v8975_v20 }
 0xf74   : > { %v8978_v39 = vpop.xlane.xlu1 %8977 }
 0xf75   : > { %v9015_v17 = vadd.f32 %v9014_v52, %v8978_v39 }
 0xf7c   : > { %v8981_v60 = vpop.xlane.xlu2 %8980 }
 0xf7d   : > { %v9016_v5 = vadd.f32 %v9015_v17, %v8981_v60 }
 0xf84   : > { %v8984_v27 = vpop.xlane.xlu0 %8983 }
 0xf85   : > { %v9017_v18 = vadd.f32 %v9016_v5, %v8984_v27 }
 0xf8c   : > { %v8987_v35 = vpop.xlane.xlu1 %8986 }
 0xf8d   : > { %v9018_v1 = vadd.f32 %v9017_v18, %v8987_v35 }
 0xf94   : > { %v8990_v13 = vpop.xlane.xlu2 %8989 }
 0xf95   : > { %v9019_v30 = vadd.f32 %v9018_v1, %v8990_v13 }
 0xf9c   : > { %v8993_v50 = vpop.xlane.xlu0 %8992 }
 0xf9d   : > { %v9020_v24 = vadd.f32 %v9019_v30, %v8993_v50 }
 0xfa4   : > { %v8996_v11 = vpop.xlane.xlu1 %8995 }
 0xfa5   : > { %v9021_v38 = vadd.f32 %v9020_v24, %v8996_v11 }
 0xfac   : > { %v8999_v8 = vpop.xlane.xlu2 %8998 }
 0xfad   : > { %v9022_v57 = vadd.f32 %v9021_v38, %v8999_v8 }
 0xfb4   : > { %v9002_v29 = vpop.xlane.xlu0 %9001 }
 0xfb5   : > { %v9023_v58 = vadd.f32 %v9022_v57, %v9002_v29 }
 0xfbc   : > { %v9005_v55 = vpop.xlane.xlu1 %9004 }
 0xfbd   : > { %v9024_v56 = vadd.f32 %v9023_v58, %v9005_v55 }
 0xfc4   : > { %v9008_v44 = vpop.xlane.xlu2 %9007 }
 0xfc5   : > { %v9025_v9 = vadd.f32 %v9024_v56, %v9008_v44 }
 0xfcc   : > { %v9011_v7 = vpop.xlane.xlu0 %9010 }
 0xfcd   : > { %v9026_v54 = vadd.f32 %v9025_v9, %v9011_v7 }
 0xfcf   : > { %v9027_v25 = vrot.slane %v9026_v54, 4 }
 0xfd1   : > { %v9028_v51 = vadd.f32 %v9027_v25, %v9026_v54 }
 0xfd3   : > { %v9029_v34 = vrot.slane %v9028_v51, 2 }
 0xfd5   : > { %v9030_v61 = vadd.f32 %v9029_v34, %v9028_v51 }
 0xfd7   : > { %v9031_v15 = vrot.slane %v9030_v61, 1 }
 0xfd9   : > { %v9032_v41 = vadd.f32 %v9031_v15, %v9030_v61 }
 0xfdb   : > { %v9034_v16 = vadd.f32 %v9033_v14, %v9032_v41 }
 0xfdd   : > { %v9036_v42 = vperm.slane %v9034_v16, 0 }
 0xfdf   : > { %9038 = vperm.xlu1 %13087, %v9036_v42  }
0x1051   : > { %v9039_v45 = vpop.permute.xlu1 %9038 }
0x1052   : > { %9041 = vst [vmem:[%s386_s21] sm:$0xff] %v9039_v45 }
0x1053 PF: > { %s23_s19 = sadd.s32 1, %s13157_s19  }
0x1054   : > { %p20_p4 = scmp.ge.s32.totalorder %s23_s19, 6  }
0x1056   :  { %22 = sbr.rel (!%p20_p4) target bundleno = 3 (0x3), region = 154 }

</bundles_post_ra>
